<compile_context>
chip_gen: v6e
topology: v6e:2x2x1
jax: 0.10.0
libtpu: 0.0.40
codegen_flags: <defaults>
</compile_context>

<pallas_src>
import math

import jax
import jax.numpy as jnp
from jax.experimental import pallas as pl
from jax.experimental.pallas import tpu as pltpu

LANE = 128  # padded per-head width -> every head slice is 128-lane aligned


def make_mha_kernel(tile_b, seq_len, embed_dim, num_heads, pad_head):
    rows = tile_b * seq_len

    def mha_kernel(x_ref, wqkv_ref, wproj_ref, bias_ref, o_ref):
        # (Bt, S, E) f32 -> (Bt*S, E) bf16.  Collapsing leading dims keeps E on
        # the lane axis (free); the f32->bf16 cast runs on the VPU here instead
        # of as a separate wrapper-side XLA pass over HBM.
        x2d = x_ref[...].reshape(rows, embed_dim).astype(jnp.bfloat16)

        # Fused qkv projection.  Column layout (see prepare_mha_params):
        #   [q_h0 | q_h1 | ... | k_h0 | ... | v_h0 | ...], each block pad_head
        # (=128) wide and zero-padded past head_dim, so every per-head slice
        # below starts on a 128-lane boundary.  Q columns already carry the
        # 1/sqrt(head_dim) attention scale.
        qkv = jnp.dot(x2d, wqkv_ref[...], preferred_element_type=jnp.float32)
        qkv = qkv.astype(jnp.bfloat16)                       # (rows, 3*H*Dp)

        acc = jnp.zeros((rows, embed_dim), jnp.float32)
        # num_heads is small (4); static unrolled loop.
        for h in range(num_heads):
            q = qkv[:, h * pad_head:(h + 1) * pad_head]
            k = qkv[:, (num_heads + h) * pad_head:(num_heads + h + 1) * pad_head]
            v = qkv[:, (2 * num_heads + h) * pad_head:
                       (2 * num_heads + h + 1) * pad_head]
            q = q.reshape(tile_b, seq_len, pad_head)          # (Bt, S, Dp)
            k = k.reshape(tile_b, seq_len, pad_head)
            v = v.reshape(tile_b, seq_len, pad_head)

            # scores are already scaled (scale folded into the Q weight)
            scores = jnp.einsum("bqd,bkd->bqk", q, k,
                                preferred_element_type=jnp.float32)  # (Bt,S,S)

            # numerically stable softmax; normalization deferred to the context
            m = jnp.max(scores, axis=-1, keepdims=True)
            e = jnp.exp(scores - m)
            denom = jnp.sum(e, axis=-1, keepdims=True)

            ctx = jnp.einsum("bqk,bkd->bqd", e.astype(jnp.bfloat16), v,
                             preferred_element_type=jnp.float32)     # (Bt,S,Dp)
            ctx = ctx * pl.reciprocal(denom, approx=True)
            ctx2d = ctx.reshape(rows, pad_head).astype(jnp.bfloat16)

            # Per-head output-projection accumulation (no lane concat).  The
            # wproj slice is on the leading (major) axis -> layout-free.
            acc = acc + jnp.dot(ctx2d, wproj_ref[h],
                                preferred_element_type=jnp.float32)

        out = acc + bias_ref[...]                                    # f32 bias
        o_ref[...] = out.reshape(tile_b, seq_len, embed_dim).astype(o_ref.dtype)

    return mha_kernel


def prepare_mha_params(w_qkv, w_proj, b_proj, num_heads, pad_head=LANE):
    """One-time parameter prep (hoisted out of the per-call path).

    w_qkv: (3E, E) PyTorch (out, in) layout; w_proj: (E, E); b_proj: (E,).
    Returns (w_qkv_padded (E, 3*H*Dp) bf16, w_proj_heads (H, Dp, E) bf16,
             bias (1, E) f32).
    """
    three_e, E = w_qkv.shape
    D = E // num_heads
    assert three_e == 3 * E and D * num_heads == E
    assert pad_head >= D
    scale = 1.0 / math.sqrt(D)

    # PyTorch nn.Linear computes y = x @ W.T: transpose to (E, 3E), then view
    # the output columns as (3, H, D) to match the module's reshape/permute.
    w4 = jnp.transpose(w_qkv).reshape(E, 3, num_heads, D)
    w4 = w4.at[:, 0].multiply(scale)          # fold 1/sqrt(D) into Q columns
    w4 = jnp.pad(w4, ((0, 0), (0, 0), (0, 0), (0, pad_head - D)))
    w_qkv_p = w4.reshape(E, 3 * num_heads * pad_head).astype(jnp.bfloat16)

    # Output projection: ctx (rows ordered by (H, D)) @ W_proj.T + b.
    # Per-head slab (H, Dp, E); padded rows are zero (ctx pad cols are zero
    # anyway, so this is exact).
    wpT = jnp.transpose(w_proj).reshape(num_heads, D, E)
    wpT = jnp.pad(wpT, ((0, 0), (0, pad_head - D), (0, 0)))
    w_proj_p = wpT.astype(jnp.bfloat16)

    b = b_proj.reshape(1, E).astype(jnp.float32)
    return w_qkv_p, w_proj_p, b


def mha_forward(x, params, num_heads, tile_b=16, pad_head=LANE):
    """x: (B, S, E) f32; params from prepare_mha_params."""
    w_qkv_p, w_proj_p, b_proj_2d = params
    B, S, E = x.shape
    assert E // num_heads * num_heads == E
    assert B % tile_b == 0, "batch must be divisible by the batch tile"

    kernel = make_mha_kernel(tile_b, S, E, num_heads, pad_head)

    # tile_b=16 -> rows=256 per step (fills the MXU M axis) and grid=B//16:
    # with B=32 that is 2 steps, i.e. one per TensorCore on v7x megacore and
    # only 2x the fixed step overhead on v5e/v6e.
    return pl.pallas_call(
        kernel,
        out_shape=jax.ShapeDtypeStruct((B, S, E), jnp.float32),
        grid_spec=pltpu.PrefetchScalarGridSpec(
            num_scalar_prefetch=0,
            grid=(B // tile_b,),
            in_specs=[
                pl.BlockSpec((tile_b, S, E), lambda b: (b, 0, 0)),        # x tile
                pl.BlockSpec((E, 3 * num_heads * pad_head),
                             lambda b: (0, 0)),                           # W_qkv (resident)
                pl.BlockSpec((num_heads, pad_head, E),
                             lambda b: (0, 0, 0)),                        # W_proj per head
                pl.BlockSpec((1, E), lambda b: (0, 0)),                   # proj bias
            ],
            out_specs=pl.BlockSpec((tile_b, S, E), lambda b: (b, 0, 0)),
        ),
        compiler_params=pltpu.CompilerParams(
            dimension_semantics=("parallel",)),
    )(x, w_qkv_p, w_proj_p, b_proj_2d)


def mha_reference(x, w_qkv, w_proj, b_proj, num_heads):
    """Pure-JAX f32 reference mirroring the PyTorch forward exactly."""
    B, S, E = x.shape
    D = E // num_heads
    qkv = jnp.einsum("bse,fe->bsf", x, w_qkv)                        # (B, S, 3E)
    qkv = qkv.reshape(B, S, 3, num_heads, D).transpose(2, 0, 3, 1, 4)
    q, k, v = qkv[0], qkv[1], qkv[2]                                 # (B, H, S, D)
    attn = jnp.einsum("bhqd,bhkd->bhqk", q, k) / math.sqrt(D)
    attn = jax.nn.softmax(attn, axis=-1)
    out = jnp.einsum("bhqk,bhkd->bhqd", attn, v)                     # (B, H, S, D)
    out = out.transpose(0, 2, 1, 3).reshape(B, S, E)
    return jnp.einsum("bse,fe->bsf", out, w_proj) + b_proj


if __name__ == "__main__":
    # Small shapes consistent with the module (embed_dim=192, num_heads=4).
    batch, seq_len, embed_dim, num_heads = 32, 16, 192, 4
    tile_b = 16   # rows=256 per step; grid=2 (one step per v7x TensorCore)

    key = jax.random.PRNGKey(0)
    kx, kqkv, kproj, kbias = jax.random.split(key, 4)

    x = jax.random.normal(kx, (batch, seq_len, embed_dim), dtype=jnp.float32)
    # PyTorch nn.Linear weight layout: (out_features, in_features).
    w_qkv = jax.random.normal(kqkv, (3 * embed_dim, embed_dim),
                              dtype=jnp.float32) * 0.05
    w_proj = jax.random.normal(kproj, (embed_dim, embed_dim),
                               dtype=jnp.float32) * 0.05
    b_proj = jax.random.normal(kbias, (embed_dim,), dtype=jnp.float32) * 0.05

    # One-time weight preparation (kept out of the per-call path).
    params = prepare_mha_params(w_qkv, w_proj, b_proj, num_heads)
    params = jax.block_until_ready(params)

    out = mha_forward(x, params, num_heads, tile_b=tile_b)
    out = jax.block_until_ready(out)

    ref = mha_reference(x, w_qkv, w_proj, b_proj, num_heads)
    assert out.shape == (batch, seq_len, embed_dim)
    # bf16 matmul inputs + approx reciprocal -> relaxed tolerance vs f32 ref.
    assert jnp.allclose(out, ref, atol=3e-2, rtol=3e-2), "mismatch vs reference"

    print("KERNEL_OK")
</pallas_src>

<mosaic_0001>
module attributes {stable_mosaic.version = 11 : i64} {
  func.func @mha_kernel(%arg0: i32, %arg1: memref<16x16x192xf32, #tpu.memory_space<vmem>>, %arg2: memref<192x1536xbf16, #tpu.memory_space<vmem>>, %arg3: memref<4x128x192xbf16, #tpu.memory_space<vmem>>, %arg4: memref<1x192xf32, #tpu.memory_space<vmem>>, %arg5: memref<16x16x192xf32, #tpu.memory_space<vmem>>) attributes {dimension_semantics = [#tpu.dimension_semantics<parallel>], iteration_bounds = array<i64: 2>, scalar_prefetch = 0 : i64, scratch_operands = 0 : i64, tpu.core_type = #tpu.core_type<tc>, window_params = [{transform_indices = @transform_0, window_bounds = array<i64: 16, 16, 192>}, {pipeline_mode = #tpu.pipeline_mode<synchronous>, transform_indices = @transform_1, window_bounds = array<i64: 192, 1536>}, {pipeline_mode = #tpu.pipeline_mode<synchronous>, transform_indices = @transform_2, window_bounds = array<i64: 4, 128, 192>}, {pipeline_mode = #tpu.pipeline_mode<synchronous>, transform_indices = @transform_3, window_bounds = array<i64: 1, 192>}, {transform_indices = @transform_4, window_bounds = array<i64: 16, 16, 192>}]} {
    %c0 = arith.constant 0 : index
    %c0_0 = arith.constant 0 : index
    %c0_1 = arith.constant 0 : index
    %0 = vector.load %arg1[%c0, %c0_0, %c0_1] : memref<16x16x192xf32, #tpu.memory_space<vmem>>, vector<16x16x192xf32>
    %1 = vector.shape_cast %0 : vector<16x16x192xf32> to vector<256x192xf32>
    %2 = arith.truncf %1 : vector<256x192xf32> to vector<256x192xbf16>
    %c0_2 = arith.constant 0 : index
    %c0_3 = arith.constant 0 : index
    %3 = vector.load %arg2[%c0_2, %c0_3] : memref<192x1536xbf16, #tpu.memory_space<vmem>>, vector<192x1536xbf16>
    %cst = arith.constant dense<0.000000e+00> : vector<256x1536xf32>
    %4 = tpu.matmul %2, %3, %cst {dimension_numbers = #tpu.dot_dimension_numbers<[1], [0], [0], [1], [0, 0, 1, 1], [], []>} : vector<256x192xbf16>, vector<192x1536xbf16>, vector<256x1536xf32> -> vector<256x1536xf32>
    %5 = arith.truncf %4 : vector<256x1536xf32> to vector<256x1536xbf16>
    %cst_4 = arith.constant 0.000000e+00 : f32
    %6 = vector.broadcast %cst_4 : f32 to vector<256x192xf32>
    %7 = vector.extract_strided_slice %5 {offsets = [0, 0], sizes = [256, 128], strides = [1, 1]} : vector<256x1536xbf16> to vector<256x128xbf16>
    %8 = vector.extract_strided_slice %5 {offsets = [0, 512], sizes = [256, 128], strides = [1, 1]} : vector<256x1536xbf16> to vector<256x128xbf16>
    %9 = vector.extract_strided_slice %5 {offsets = [0, 1024], sizes = [256, 128], strides = [1, 1]} : vector<256x1536xbf16> to vector<256x128xbf16>
    %10 = vector.shape_cast %7 : vector<256x128xbf16> to vector<16x16x128xbf16>
    %11 = vector.shape_cast %8 : vector<256x128xbf16> to vector<16x16x128xbf16>
    %12 = vector.shape_cast %9 : vector<256x128xbf16> to vector<16x16x128xbf16>
    "tpu.trace_start"() <{level = 10 : i32, message = "bqd,bkd->bqk"}> : () -> ()
    %cst_5 = arith.constant dense<0.000000e+00> : vector<16x16x16xf32>
    %13 = tpu.matmul %10, %11, %cst_5 {dimension_numbers = #tpu.dot_dimension_numbers<[2], [2], [1], [1], [0, 0, 0, 1, 1, 1], [0], [0]>} : vector<16x16x128xbf16>, vector<16x16x128xbf16>, vector<16x16x16xf32> -> vector<16x16x16xf32>
    "tpu.trace_stop"() : () -> ()
    %cst_6 = arith.constant dense<0xFF800000> : vector<16x16xf32>
    %14 = vector.multi_reduction <maximumf>, %13, %cst_6 [2] : vector<16x16x16xf32> to vector<16x16xf32>
    %15 = vector.shape_cast %14 : vector<16x16xf32> to vector<16x16x1xf32>
    %16 = vector.broadcast %15 : vector<16x16x1xf32> to vector<16x16x16xf32>
    %17 = arith.subf %13, %16 : vector<16x16x16xf32>
    %18 = math.exp %17 : vector<16x16x16xf32>
    %cst_7 = arith.constant dense<0.000000e+00> : vector<16x16xf32>
    %19 = vector.multi_reduction <add>, %18, %cst_7 [2] : vector<16x16x16xf32> to vector<16x16xf32>
    %20 = vector.shape_cast %19 : vector<16x16xf32> to vector<16x16x1xf32>
    %21 = arith.truncf %18 : vector<16x16x16xf32> to vector<16x16x16xbf16>
    "tpu.trace_start"() <{level = 10 : i32, message = "bqk,bkd->bqd"}> : () -> ()
    %cst_8 = arith.constant dense<0.000000e+00> : vector<16x16x128xf32>
    %22 = tpu.matmul %21, %12, %cst_8 {dimension_numbers = #tpu.dot_dimension_numbers<[2], [1], [1], [2], [0, 0, 0, 1, 1, 2], [0], [0]>} : vector<16x16x16xbf16>, vector<16x16x128xbf16>, vector<16x16x128xf32> -> vector<16x16x128xf32>
    "tpu.trace_stop"() : () -> ()
    %23 = tpu.reciprocal %20 {approx = true} : vector<16x16x1xf32> -> vector<16x16x1xf32>
    %24 = vector.broadcast %23 : vector<16x16x1xf32> to vector<16x16x128xf32>
    %25 = arith.mulf %22, %24 : vector<16x16x128xf32>
    %26 = vector.shape_cast %25 : vector<16x16x128xf32> to vector<256x128xf32>
    %27 = arith.truncf %26 : vector<256x128xf32> to vector<256x128xbf16>
    %c0_9 = arith.constant 0 : index
    %c0_10 = arith.constant 0 : index
    %c0_11 = arith.constant 0 : index
    %28 = vector.load %arg3[%c0_9, %c0_10, %c0_11] : memref<4x128x192xbf16, #tpu.memory_space<vmem>>, vector<1x128x192xbf16>
    %29 = vector.shape_cast %28 : vector<1x128x192xbf16> to vector<128x192xbf16>
    %cst_12 = arith.constant dense<0.000000e+00> : vector<256x192xf32>
    %30 = tpu.matmul %27, %29, %cst_12 {dimension_numbers = #tpu.dot_dimension_numbers<[1], [0], [0], [1], [0, 0, 1, 1], [], []>} : vector<256x128xbf16>, vector<128x192xbf16>, vector<256x192xf32> -> vector<256x192xf32>
    %31 = arith.addf %6, %30 : vector<256x192xf32>
    %32 = vector.extract_strided_slice %5 {offsets = [0, 128], sizes = [256, 128], strides = [1, 1]} : vector<256x1536xbf16> to vector<256x128xbf16>
    %33 = vector.extract_strided_slice %5 {offsets = [0, 640], sizes = [256, 128], strides = [1, 1]} : vector<256x1536xbf16> to vector<256x128xbf16>
    %34 = vector.extract_strided_slice %5 {offsets = [0, 1152], sizes = [256, 128], strides = [1, 1]} : vector<256x1536xbf16> to vector<256x128xbf16>
    %35 = vector.shape_cast %32 : vector<256x128xbf16> to vector<16x16x128xbf16>
    %36 = vector.shape_cast %33 : vector<256x128xbf16> to vector<16x16x128xbf16>
    %37 = vector.shape_cast %34 : vector<256x128xbf16> to vector<16x16x128xbf16>
    "tpu.trace_start"() <{level = 10 : i32, message = "bqd,bkd->bqk"}> : () -> ()
    %cst_13 = arith.constant dense<0.000000e+00> : vector<16x16x16xf32>
    %38 = tpu.matmul %35, %36, %cst_13 {dimension_numbers = #tpu.dot_dimension_numbers<[2], [2], [1], [1], [0, 0, 0, 1, 1, 1], [0], [0]>} : vector<16x16x128xbf16>, vector<16x16x128xbf16>, vector<16x16x16xf32> -> vector<16x16x16xf32>
    "tpu.trace_stop"() : () -> ()
    %cst_14 = arith.constant dense<0xFF800000> : vector<16x16xf32>
    %39 = vector.multi_reduction <maximumf>, %38, %cst_14 [2] : vector<16x16x16xf32> to vector<16x16xf32>
    %40 = vector.shape_cast %39 : vector<16x16xf32> to vector<16x16x1xf32>
    %41 = vector.broadcast %40 : vector<16x16x1xf32> to vector<16x16x16xf32>
    %42 = arith.subf %38, %41 : vector<16x16x16xf32>
    %43 = math.exp %42 : vector<16x16x16xf32>
    %cst_15 = arith.constant dense<0.000000e+00> : vector<16x16xf32>
    %44 = vector.multi_reduction <add>, %43, %cst_15 [2] : vector<16x16x16xf32> to vector<16x16xf32>
    %45 = vector.shape_cast %44 : vector<16x16xf32> to vector<16x16x1xf32>
    %46 = arith.truncf %43 : vector<16x16x16xf32> to vector<16x16x16xbf16>
    "tpu.trace_start"() <{level = 10 : i32, message = "bqk,bkd->bqd"}> : () -> ()
    %cst_16 = arith.constant dense<0.000000e+00> : vector<16x16x128xf32>
    %47 = tpu.matmul %46, %37, %cst_16 {dimension_numbers = #tpu.dot_dimension_numbers<[2], [1], [1], [2], [0, 0, 0, 1, 1, 2], [0], [0]>} : vector<16x16x16xbf16>, vector<16x16x128xbf16>, vector<16x16x128xf32> -> vector<16x16x128xf32>
    "tpu.trace_stop"() : () -> ()
    %48 = tpu.reciprocal %45 {approx = true} : vector<16x16x1xf32> -> vector<16x16x1xf32>
    %49 = vector.broadcast %48 : vector<16x16x1xf32> to vector<16x16x128xf32>
    %50 = arith.mulf %47, %49 : vector<16x16x128xf32>
    %51 = vector.shape_cast %50 : vector<16x16x128xf32> to vector<256x128xf32>
    %52 = arith.truncf %51 : vector<256x128xf32> to vector<256x128xbf16>
    %c1 = arith.constant 1 : index
    %c0_17 = arith.constant 0 : index
    %c0_18 = arith.constant 0 : index
    %53 = vector.load %arg3[%c1, %c0_17, %c0_18] : memref<4x128x192xbf16, #tpu.memory_space<vmem>>, vector<1x128x192xbf16>
    %54 = vector.shape_cast %53 : vector<1x128x192xbf16> to vector<128x192xbf16>
    %cst_19 = arith.constant dense<0.000000e+00> : vector<256x192xf32>
    %55 = tpu.matmul %52, %54, %cst_19 {dimension_numbers = #tpu.dot_dimension_numbers<[1], [0], [0], [1], [0, 0, 1, 1], [], []>} : vector<256x128xbf16>, vector<128x192xbf16>, vector<256x192xf32> -> vector<256x192xf32>
    %56 = arith.addf %31, %55 : vector<256x192xf32>
    %57 = vector.extract_strided_slice %5 {offsets = [0, 256], sizes = [256, 128], strides = [1, 1]} : vector<256x1536xbf16> to vector<256x128xbf16>
    %58 = vector.extract_strided_slice %5 {offsets = [0, 768], sizes = [256, 128], strides = [1, 1]} : vector<256x1536xbf16> to vector<256x128xbf16>
    %59 = vector.extract_strided_slice %5 {offsets = [0, 1280], sizes = [256, 128], strides = [1, 1]} : vector<256x1536xbf16> to vector<256x128xbf16>
    %60 = vector.shape_cast %57 : vector<256x128xbf16> to vector<16x16x128xbf16>
    %61 = vector.shape_cast %58 : vector<256x128xbf16> to vector<16x16x128xbf16>
    %62 = vector.shape_cast %59 : vector<256x128xbf16> to vector<16x16x128xbf16>
    "tpu.trace_start"() <{level = 10 : i32, message = "bqd,bkd->bqk"}> : () -> ()
    %cst_20 = arith.constant dense<0.000000e+00> : vector<16x16x16xf32>
    %63 = tpu.matmul %60, %61, %cst_20 {dimension_numbers = #tpu.dot_dimension_numbers<[2], [2], [1], [1], [0, 0, 0, 1, 1, 1], [0], [0]>} : vector<16x16x128xbf16>, vector<16x16x128xbf16>, vector<16x16x16xf32> -> vector<16x16x16xf32>
    "tpu.trace_stop"() : () -> ()
    %cst_21 = arith.constant dense<0xFF800000> : vector<16x16xf32>
    %64 = vector.multi_reduction <maximumf>, %63, %cst_21 [2] : vector<16x16x16xf32> to vector<16x16xf32>
    %65 = vector.shape_cast %64 : vector<16x16xf32> to vector<16x16x1xf32>
    %66 = vector.broadcast %65 : vector<16x16x1xf32> to vector<16x16x16xf32>
    %67 = arith.subf %63, %66 : vector<16x16x16xf32>
    %68 = math.exp %67 : vector<16x16x16xf32>
    %cst_22 = arith.constant dense<0.000000e+00> : vector<16x16xf32>
    %69 = vector.multi_reduction <add>, %68, %cst_22 [2] : vector<16x16x16xf32> to vector<16x16xf32>
    %70 = vector.shape_cast %69 : vector<16x16xf32> to vector<16x16x1xf32>
    %71 = arith.truncf %68 : vector<16x16x16xf32> to vector<16x16x16xbf16>
    "tpu.trace_start"() <{level = 10 : i32, message = "bqk,bkd->bqd"}> : () -> ()
    %cst_23 = arith.constant dense<0.000000e+00> : vector<16x16x128xf32>
    %72 = tpu.matmul %71, %62, %cst_23 {dimension_numbers = #tpu.dot_dimension_numbers<[2], [1], [1], [2], [0, 0, 0, 1, 1, 2], [0], [0]>} : vector<16x16x16xbf16>, vector<16x16x128xbf16>, vector<16x16x128xf32> -> vector<16x16x128xf32>
    "tpu.trace_stop"() : () -> ()
    %73 = tpu.reciprocal %70 {approx = true} : vector<16x16x1xf32> -> vector<16x16x1xf32>
    %74 = vector.broadcast %73 : vector<16x16x1xf32> to vector<16x16x128xf32>
    %75 = arith.mulf %72, %74 : vector<16x16x128xf32>
    %76 = vector.shape_cast %75 : vector<16x16x128xf32> to vector<256x128xf32>
    %77 = arith.truncf %76 : vector<256x128xf32> to vector<256x128xbf16>
    %c2 = arith.constant 2 : index
    %c0_24 = arith.constant 0 : index
    %c0_25 = arith.constant 0 : index
    %78 = vector.load %arg3[%c2, %c0_24, %c0_25] : memref<4x128x192xbf16, #tpu.memory_space<vmem>>, vector<1x128x192xbf16>
    %79 = vector.shape_cast %78 : vector<1x128x192xbf16> to vector<128x192xbf16>
    %cst_26 = arith.constant dense<0.000000e+00> : vector<256x192xf32>
    %80 = tpu.matmul %77, %79, %cst_26 {dimension_numbers = #tpu.dot_dimension_numbers<[1], [0], [0], [1], [0, 0, 1, 1], [], []>} : vector<256x128xbf16>, vector<128x192xbf16>, vector<256x192xf32> -> vector<256x192xf32>
    %81 = arith.addf %56, %80 : vector<256x192xf32>
    %82 = vector.extract_strided_slice %5 {offsets = [0, 384], sizes = [256, 128], strides = [1, 1]} : vector<256x1536xbf16> to vector<256x128xbf16>
    %83 = vector.extract_strided_slice %5 {offsets = [0, 896], sizes = [256, 128], strides = [1, 1]} : vector<256x1536xbf16> to vector<256x128xbf16>
    %84 = vector.extract_strided_slice %5 {offsets = [0, 1408], sizes = [256, 128], strides = [1, 1]} : vector<256x1536xbf16> to vector<256x128xbf16>
    %85 = vector.shape_cast %82 : vector<256x128xbf16> to vector<16x16x128xbf16>
    %86 = vector.shape_cast %83 : vector<256x128xbf16> to vector<16x16x128xbf16>
    %87 = vector.shape_cast %84 : vector<256x128xbf16> to vector<16x16x128xbf16>
    "tpu.trace_start"() <{level = 10 : i32, message = "bqd,bkd->bqk"}> : () -> ()
    %cst_27 = arith.constant dense<0.000000e+00> : vector<16x16x16xf32>
    %88 = tpu.matmul %85, %86, %cst_27 {dimension_numbers = #tpu.dot_dimension_numbers<[2], [2], [1], [1], [0, 0, 0, 1, 1, 1], [0], [0]>} : vector<16x16x128xbf16>, vector<16x16x128xbf16>, vector<16x16x16xf32> -> vector<16x16x16xf32>
    "tpu.trace_stop"() : () -> ()
    %cst_28 = arith.constant dense<0xFF800000> : vector<16x16xf32>
    %89 = vector.multi_reduction <maximumf>, %88, %cst_28 [2] : vector<16x16x16xf32> to vector<16x16xf32>
    %90 = vector.shape_cast %89 : vector<16x16xf32> to vector<16x16x1xf32>
    %91 = vector.broadcast %90 : vector<16x16x1xf32> to vector<16x16x16xf32>
    %92 = arith.subf %88, %91 : vector<16x16x16xf32>
    %93 = math.exp %92 : vector<16x16x16xf32>
    %cst_29 = arith.constant dense<0.000000e+00> : vector<16x16xf32>
    %94 = vector.multi_reduction <add>, %93, %cst_29 [2] : vector<16x16x16xf32> to vector<16x16xf32>
    %95 = vector.shape_cast %94 : vector<16x16xf32> to vector<16x16x1xf32>
    %96 = arith.truncf %93 : vector<16x16x16xf32> to vector<16x16x16xbf16>
    "tpu.trace_start"() <{level = 10 : i32, message = "bqk,bkd->bqd"}> : () -> ()
    %cst_30 = arith.constant dense<0.000000e+00> : vector<16x16x128xf32>
    %97 = tpu.matmul %96, %87, %cst_30 {dimension_numbers = #tpu.dot_dimension_numbers<[2], [1], [1], [2], [0, 0, 0, 1, 1, 2], [0], [0]>} : vector<16x16x16xbf16>, vector<16x16x128xbf16>, vector<16x16x128xf32> -> vector<16x16x128xf32>
    "tpu.trace_stop"() : () -> ()
    %98 = tpu.reciprocal %95 {approx = true} : vector<16x16x1xf32> -> vector<16x16x1xf32>
    %99 = vector.broadcast %98 : vector<16x16x1xf32> to vector<16x16x128xf32>
    %100 = arith.mulf %97, %99 : vector<16x16x128xf32>
    %101 = vector.shape_cast %100 : vector<16x16x128xf32> to vector<256x128xf32>
    %102 = arith.truncf %101 : vector<256x128xf32> to vector<256x128xbf16>
    %c3 = arith.constant 3 : index
    %c0_31 = arith.constant 0 : index
    %c0_32 = arith.constant 0 : index
    %103 = vector.load %arg3[%c3, %c0_31, %c0_32] : memref<4x128x192xbf16, #tpu.memory_space<vmem>>, vector<1x128x192xbf16>
    %104 = vector.shape_cast %103 : vector<1x128x192xbf16> to vector<128x192xbf16>
    %cst_33 = arith.constant dense<0.000000e+00> : vector<256x192xf32>
    %105 = tpu.matmul %102, %104, %cst_33 {dimension_numbers = #tpu.dot_dimension_numbers<[1], [0], [0], [1], [0, 0, 1, 1], [], []>} : vector<256x128xbf16>, vector<128x192xbf16>, vector<256x192xf32> -> vector<256x192xf32>
    %106 = arith.addf %81, %105 : vector<256x192xf32>
    %c0_34 = arith.constant 0 : index
    %c0_35 = arith.constant 0 : index
    %107 = vector.load %arg4[%c0_34, %c0_35] : memref<1x192xf32, #tpu.memory_space<vmem>>, vector<1x192xf32>
    %108 = vector.broadcast %107 : vector<1x192xf32> to vector<256x192xf32>
    %109 = arith.addf %106, %108 : vector<256x192xf32>
    %110 = vector.shape_cast %109 : vector<256x192xf32> to vector<16x16x192xf32>
    %c0_36 = arith.constant 0 : index
    %c0_37 = arith.constant 0 : index
    %c0_38 = arith.constant 0 : index
    %111 = vector.load %arg5[%c0_36, %c0_37, %c0_38] : memref<16x16x192xf32, #tpu.memory_space<vmem>>, vector<16x16x192xf32>
    tpu.vector_store %arg5[%c0_36, %c0_37, %c0_38], %110 {strides = array<i32>} : memref<16x16x192xf32, #tpu.memory_space<vmem>>, vector<16x16x192xf32>,
    return
  }
  func.func @transform_0(%arg0: i32) -> (i32, i32, i32) {
    %c0_i32 = arith.constant 0 : i32
    %c0_i32_0 = arith.constant 0 : i32
    %c0_i32_1 = arith.constant 0 : i32
    return %arg0, %c0_i32, %c0_i32_0 : i32, i32, i32
  }
  func.func @transform_1(%arg0: i32) -> (i32, i32) {
    %c0_i32 = arith.constant 0 : i32
    %c0_i32_0 = arith.constant 0 : i32
    %c0_i32_1 = arith.constant 0 : i32
    return %c0_i32, %c0_i32_0 : i32, i32
  }
  func.func @transform_2(%arg0: i32) -> (i32, i32, i32) {
    %c0_i32 = arith.constant 0 : i32
    %c0_i32_0 = arith.constant 0 : i32
    %c0_i32_1 = arith.constant 0 : i32
    %c0_i32_2 = arith.constant 0 : i32
    return %c0_i32, %c0_i32_0, %c0_i32_1 : i32, i32, i32
  }
  func.func @transform_3(%arg0: i32) -> (i32, i32) {
    %c0_i32 = arith.constant 0 : i32
    %c0_i32_0 = arith.constant 0 : i32
    %c0_i32_1 = arith.constant 0 : i32
    return %c0_i32, %c0_i32_0 : i32, i32
  }
  func.func @transform_4(%arg0: i32) -> (i32, i32, i32) {
    %c0_i32 = arith.constant 0 : i32
    %c0_i32_0 = arith.constant 0 : i32
    %c0_i32_1 = arith.constant 0 : i32
    return %arg0, %c0_i32, %c0_i32_0 : i32, i32, i32
  }
}

</mosaic_0001>

<bundles_post_ra>
// kernel: tpu_custom_call.1
= control target key start
LH: loop header
LB: loop body
LE: loop exit
PB: predicated region body
PF: predicated region fallthrough
CT: control target
= control target key end

     0   :  { %9 = vsyncpa [#allocation3], 0  ;;  %s18621_s0 = inlined_call_operand.hbm [shape: f32[32,16,192], index: 0, kind: input, shape index: {}]   ;;  %s18622_s1 = inlined_call_operand.hbm [shape: bf16[192,1536], index: 1, kind: input, shape index: {}]   ;;  %s18623_s2 = inlined_call_operand.vmem [shape: bf16[4,128,192], index: 2, kind: input, shape index: {}]   ;;  %s18624_s3 = inlined_call_operand.vmem [shape: f32[1,192], index: 3, kind: input, shape index: {}]   ;;  %s18625_s4 = inlined_call_operand.hbm [shape: f32[32,16,192], index: 4, kind: output, shape index: {}]  }
   0x1   :  { %11 = vsyncpa [#allocation3 + $0x1], 0 }
   0x2   :  { %12 = vsyncpa [#allocation6], 0 }
   0x3   :  { %13 = vsyncpa [#allocation4], 0 }
   0x4   :  { %15 = vsyncpa [#allocation4 + $0x1], 0  ;;  %s13633_s15 = smov 0   ;;  %s13635_s16 = smov 0  }
   0x5   :  { %s13637_s17 = smov 0   ;;  %s13639_s18 = smov 0  }
   0x6 LB: > { %s13654_s19 = sadd.s32 4294967295, %s13594_s18   ;;  %s11096_s20 = sadd.s32 4294967294, %s13594_s18   ;;  %s13594_s18 = sphi %s13639_s18, %s19984_s18   ;;  %s13590_s17 = sphi %s13637_s17, %s19983_s17   ;;  %s13586_s16 = sphi %s13635_s16, %s19982_s16   ;;  %s13582_s15 = sphi %s13633_s15, %s19981_s15  }
   0x7   : > { %p41_p0 = scmp.ne.s32.totalorder %s13586_s16, %s13582_s15  ;;  %p18626_p1 = scmp.eq.s32.totalorder %s13654_s19, 0 }
   0x8   : > { %p134_p3 = scmp.eq.s32.totalorder %s11096_s20, 1  ;;  %p11097_p5 = scmp.ge.s32.totalorder %s13594_s18, 1 }
   0x9   : > { %p13663_p4 = por %p18626_p1, %p41_p0  ;;  %p141_p7 = scmp.lt.s32.totalorder %s13594_s18, 3 }
   0xa   : > { %p13668_p6 = por %p134_p3, %p41_p0  ;;  %s13596_s24 = smov [#allocation5]  }
   0xb   : > { %s18860_s21 = scalar_select %p13663_p4, 1, 0 }
   0xc   : > { %s18861_s22 = scalar_select %p13668_p6, 1, 0 }
   0xd   : > { %p13673_p8 = pnand %p11097_p5, %p141_p7  ;;  %s153_s25 = sshll.u32 %s13596_s24, 4  ;;  %s154_s25 = int_to_ptr.vmem [resolvable:$true] %s153_s25 }
   0xe   : > { %s13687_s27 = sadd.s32 1, %s13594_s18   ;;  %s28_s28 = sadd.s32 1, %s13590_s17 }
   0xf   : > { %s18862_s23 = scalar_select %p13673_p8, 1, 0 }
  0x10   : > { %p12590_p9 = pneg %p13673_p8  ;;  %s25_s29 = ssub.s32 %s13594_s18, %s13687_s27 }
  0x11   : > { %s13483_s30 = scalar_lea.vmem %s154_s25, 18432  ;;  %p13491_p5 = scmp.lt.s32.totalorder %s154_s25, %s154_s25 }
  0x12   : > { %p13682_p11 = pnand %p12590_p9, %p18626_p1  ;;  %p13484_p13 = scmp.ne.s32.totalorder %s154_s25, %s13483_s30 }
  0x13   : > { %p13492_p7 = scmp.lt.s32.totalorder %s13483_s30, %s13483_s30 }
  0x14   : > { %p13474_p12 = pneg %p13682_p11 }
  0x15   : > { %p13493_p10 = por %p13492_p7, %p13491_p5 }
  0x16   : > { %p13486_p0 = pnand %p13484_p13, %p13474_p12 }
  0x18   : > { %p13487_p3 = pneg %p13486_p0 }
  0x1a   : > { %p13494_p2 = pnand %p13493_p10, %p13487_p3 }
  0x1c   : > { %13497 = shalt.err (!%p13494_p2)
}
  0x1d   : > { %s13597_s5 = smov 768   ;;  %s13598_s6 = smov 48  }
  0x1e   : > { %12593 = dma.hbm_to_vmem [thread:$0]  (!%p13682_p11), %s18622_s1, 18432, %s154_s25, [#allocation6], %s13597_s5, %s13597_s5, %s13598_s6  }
  0x1f   : > { %p26_p9 = scmp.eq.s32.totalorder %s25_s29, 0  ;;  %p35_p12 = scmp.ne.s32.totalorder %s13590_s17, %s13586_s16 }
  0x20   : > { %p36_p10 = scmp.eq.s32.totalorder %s13594_s18, 0  ;;  %p12603_p2 = scmp.lt.s32.totalorder %s13594_s18, 2 }
  0x21   : > { %s13704_s9 = scalar_select %p26_p9, %s13590_s17, %s28_s28  }
  0x22   : > { %p37_p13 = por %p36_p10, %p35_p12  ;;  %p18864_p0 = scmp.eq.s32.totalorder %s13654_s19, 1 }
  0x23   : > { %s173_s11 = sand.u32 1, %s13590_s17   ;;  %s11531_s12 = sshll.u32 %s13594_s18, 13 }
  0x24   : > { %p13708_p3 = por %p18864_p0, %p35_p12  ;;  %s11100_s13 = sshll.u32 %s173_s11, 9 }
  0x25   : > { %s13717_s24 = scalar_lea.hbm %s18621_s0, %s11531_s12  ;;  %s177_s25 = scalar_lea.vmem [#allocation2], %s11100_s13 }
  0x26   : > { %s18865_s10 = scalar_select %p13708_p3, 1, 0 }
  0x27   : > { %s185_s26 = sshll.u32 %s177_s25, 4  ;;  %p13719_p11 = pnand %p12603_p2, %p37_p13  ;;  %s13723_s26 = int_to_ptr.vmem [resolvable:$true] %s185_s26 }
  0x28   : > { %s13725_s29 = scalar_lea.sflag [#allocation3], %s173_s11  ;;  %s13498_s30 = scalar_lea.hbm %s13717_s24, 8192 }
  0x29   : > { %p13499_p5 = scmp.ne.s32.totalorder %s13717_s24, %s13498_s30  ;;  %p13500_p7 = pneg %p13719_p11 }
  0x2a   : > { %s13503_s7 = scalar_lea.hbm %s18621_s0, 16384  ;;  %p13504_p10 = scmp.lt.s32.totalorder %s13717_s24, %s18621_s0 }
  0x2b   : > { %p13501_p9 = pnand %p13500_p7, %p13499_p5  ;;  %p13505_p2 = scmp.lt.s32.totalorder %s13503_s7, %s13498_s30 }
  0x2d   : > { %p13502_p12 = pneg %p13501_p9  ;;  %p13506_p13 = por %p13505_p2, %p13504_p10 }
  0x2f   : > { %p13507_p0 = pnand %p13506_p13, %p13502_p12 }
  0x31   : > { %13510 = shalt.err (!%p13507_p0)
}
  0x32   : > { %s13511_s11 = scalar_lea.vmem %s13723_s26, 8192  ;;  %s13599_s13 = smov [#allocation2]  }
  0x33   : > { %p13512_p1 = scmp.ne.s32.totalorder %s13723_s26, %s13511_s11  ;;  %s13516_s14 = sshll.u32 %s13599_s13, 4  ;;  %s13517_s14 = int_to_ptr.vmem [resolvable:$false] %s13516_s14 }
  0x34   : > { %s13518_s20 = scalar_lea.vmem %s13517_s14, 16384  ;;  %p13519_p9 = scmp.lt.s32.totalorder %s13723_s26, %s13517_s14 }
  0x35   : > { %p13514_p6 = pnand %p13512_p1, %p13500_p7  ;;  %p13520_p3 = scmp.lt.s32.totalorder %s13518_s20, %s13511_s11 }
  0x37   : > { %p13515_p5 = pneg %p13514_p6  ;;  %p13521_p4 = por %p13520_p3, %p13519_p9 }
  0x39   : > { %p13522_p8 = pnand %p13521_p4, %p13515_p5 }
  0x3b   : > { %13525 = shalt.err (!%p13522_p8)
}
  0x3c   : > { %s13600_s25 = smov 256   ;;  %s13601_s30 = smov 16  }
  0x3d   : > { %12597 = dma.hbm_to_vmem [thread:$0]  (!%p13719_p11), %s13717_s24, 8192, %s13723_s26, %s13725_s29, %s13600_s25, %s13600_s25, %s13601_s30  }
  0x3e   : > { %p18867_p1 = scmp.ne.s32.totalorder %s18862_s23, 0 }
  0x40   : > { %197 = sbr.rel (%p18867_p1) target bundleno = 2966 (0xb96), region = 36 }
  0x45   : > { %s13749_s5 = sand.u32 1, %s13586_s16   ;;  %p18868_p4 = scmp.ne.s32.totalorder %s18860_s21, 0 }
  0x46   : > { %s11105_s6 = sshll.u32 %s13749_s5, 9  ;;  %s200_s7 = scalar_lea.sflag [#allocation3], %s13749_s5 }
  0x47   : > { %s13755_s8 = scalar_lea.vmem [#allocation2], %s11105_s6 }
  0x48   : > { %13569 = dma.done.wait (%p18868_p4), %s200_s7, 8192  }
  0x49   : > { %13571 = vsyncadd (%p18868_p4), %s200_s7, 4294959104  ;;  %p18869_p6 = scmp.eq.s32.totalorder %s13654_s19, 0 }
  0x4b   : > { %13573 = dma.done.wait (%p18869_p6), [#allocation6], 18432   ;;  %p18870_p8 = pmov %p18869_p6 }
  0x4c   : > { %v12648_v0 = vld [vmem:[#allocation5 + $0x2a4] ss:$48 sps:$4 sm:$0xff]   ;;  %v12650_v1 = vld [vmem:[#allocation5 + $0x2a0] ss:$48 sps:$4 sm:$0xff]   ;;  %v236_v11 = vld [vmem:[%s13755_s8 + $0x8] sm:$0xff]  ;;  %vm1195_vm0 = vcmask 523264  }
  0x4d   : > { %13575 = vsyncadd (%p18870_p8), [#allocation6], 4294948864  ;;  %1244 = vmatprep.subr.bf16.mxu0 %v12648_v0  ;;  %v12651_v2 = vld [vmem:[#allocation5 + $0x244] ss:$48 sps:$4 sm:$0xff]   ;;  %v12653_v3 = vld [vmem:[#allocation5 + $0x240] ss:$48 sps:$4 sm:$0xff]  }
  0x4e   : > { %1245 = vmatpush1.bf16.msra.mxu0 %v12650_v1  ;;  %v12654_v4 = vld [vmem:[#allocation5 + $0x1e4] ss:$48 sps:$4 sm:$0xff]   ;;  %v12656_v5 = vld [vmem:[#allocation5 + $0x1e0] ss:$48 sps:$4 sm:$0xff]   ;;  %v238_v12 = vld [vmem:[%s13755_s8 + $0x18] sm:$0xff]  ;;  %vm13603_vm1 = vmmov 0  }
  0x4f   : > { %1246 = vmatprep.subr.bf16.mxu0 %v12651_v2  ;;  %v12657_v6 = vld [vmem:[#allocation5 + $0x184] ss:$48 sps:$4 sm:$0xff]   ;;  %v12659_v7 = vld [vmem:[#allocation5 + $0x180] ss:$48 sps:$4 sm:$0xff]   ;;  %v13767_v13 = vpack.c.bf16 %v238_v12, %v236_v11  ;;  %v12684_v18 = vld [vmem:[#allocation5 + $0x2ac] ss:$48 sps:$4 sm:$0xff]  }
  0x50   : > { %v12660_v8 = vld [vmem:[#allocation5 + $0x124] ss:$48 sps:$4 sm:$0xff]   ;;  %v12662_v9 = vld [vmem:[#allocation5 + $0x120] ss:$48 sps:$4 sm:$0xff]   ;;  %v12686_v21 = vld [vmem:[#allocation5 + $0x2a8] ss:$48 sps:$4 sm:$0xff]   ;;  %12558 = vmatprep.subr.bf16.mxu1 %v12684_v18 }
  0x51   : > { %v12663_v10 = vld [vmem:[#allocation5 + $0xc4] ss:$48 sps:$4 sm:$0xff]   ;;  %v12665_v14 = vld [vmem:[#allocation5 + $0xc0] ss:$48 sps:$4 sm:$0xff]   ;;  %11252 = vmatprep.mubr.msk.bf16.mxu0 %vm1195_vm0, %v13767_v13  ;;  %v12687_v22 = vld [vmem:[#allocation5 + $0x24c] ss:$48 sps:$4 sm:$0xff]   ;;  %12570 = vmatpush1.bf16.msra.mxu1 %v12686_v21 }
  0x52   : > { %1247 = vmatpush1.bf16.msra.mxu0 %v12653_v3  ;;  %v12666_v15 = vld [vmem:[#allocation5 + $0x64] ss:$48 sps:$4 sm:$0xff]   ;;  %v12668_v16 = vld [vmem:[#allocation5 + $0x60] ss:$48 sps:$4 sm:$0xff]   ;;  %v13771_v23 = vld [vmem:[#allocation5 + $0x248] ss:$48 sps:$4 sm:$0xff]   ;;  %12559 = vmatprep.subr.bf16.mxu1 %v12687_v22 }
  0x53   : > { %1248 = vmatprep.subr.bf16.mxu0 %v12654_v4  ;;  %v12669_v17 = vld [vmem:[#allocation5 + $0x4] ss:$48 sps:$4 sm:$0xff]   ;;  %v12671_v19 = vld [vmem:[#allocation5] ss:$48 sps:$4 sm:$0xff]   ;;  %v12690_v24 = vld [vmem:[#allocation5 + $0x1ec] ss:$48 sps:$4 sm:$0xff]  }
  0x54   : > { %v12672_v20 = vld [vmem:[#allocation5 + $0x424] ss:$48 sps:$4 sm:$0xff]   ;;  %v12674_v25 = vld [vmem:[#allocation5 + $0x420] ss:$48 sps:$4 sm:$0xff]   ;;  %v13774_v27 = vld [vmem:[#allocation5 + $0x1e8] ss:$48 sps:$4 sm:$0xff]  }
  0x55   : > { %v12675_v26 = vld [vmem:[#allocation5 + $0x3c4] ss:$48 sps:$4 sm:$0xff]   ;;  %12571 = vmatpush1.bf16.msra.mxu1 %v13771_v23  ;;  %v13776_v28 = vld [vmem:[#allocation5 + $0x18c] ss:$48 sps:$4 sm:$0xff]   ;;  %v12677_v31 = vld [vmem:[#allocation5 + $0x3c0] ss:$48 sps:$4 sm:$0xff]  }
  0x56   : > { %1249 = vmatpush1.bf16.msra.mxu0 %v12656_v5  ;;  %12560 = vmatprep.subr.bf16.mxu1 %v12690_v24  ;;  %v272_v29 = vld [vmem:[%s13755_s8 + $0x128] sm:$0xff]  ;;  %v274_v30 = vld [vmem:[%s13755_s8 + $0x138] sm:$0xff]  ;;  %v12678_v33 = vld [vmem:[#allocation5 + $0x364] ss:$48 sps:$4 sm:$0xff]   ;;  %vm3250_vm2 = vcmask 130048   ;;  %s18319_s20 = scalar_lea.vmem [#allocation7], %s11105_s6 }
  0x57   : > { %1250 = vmatprep.subr.bf16.mxu0 %v12657_v6  ;;  %v13780_v32 = vpack.c.bf16 %v274_v30, %v272_v29  ;;  %v13783_v34 = vld [vmem:[#allocation5 + $0x188] ss:$48 sps:$4 sm:$0xff]   ;;  %v12696_v35 = vld [vmem:[#allocation5 + $0x12c] ss:$48 sps:$4 sm:$0xff]   ;;  %v12680_v36 = vld [vmem:[#allocation5 + $0x360] ss:$48 sps:$4 sm:$0xff]  }
  0x58   : > { %v12681_v37 = vld [vmem:[#allocation5 + $0x304] ss:$48 sps:$4 sm:$0xff]   ;;  %v13789_v38 = vld [vmem:[#allocation5 + $0x128] ss:$48 sps:$4 sm:$0xff]   ;;  %v12683_v39 = vld [vmem:[#allocation5 + $0x300] ss:$48 sps:$4 sm:$0xff]  }
  0x59   : > { %12572 = vmatpush1.bf16.msra.mxu1 %v13774_v27  ;;  %11277 = vmatprep.mubr.msk.bf16.mxu1 %vm1195_vm0, %v13780_v32  ;;  %v13791_v40 = vld [vmem:[#allocation5 + $0xcc] ss:$48 sps:$4 sm:$0xff]   ;;  %v235_v41 = vld [vmem:[%s13755_s8] sm:$0xff]  ;;  %v237_v42 = vld [vmem:[%s13755_s8 + $0x10] sm:$0xff]  ;;  %s11533_s6 = sshll.u32 %s13654_s19, 13  ;;  %s11013_s25 = sshll.u32 %s18319_s20, 4  ;;  %s18574_s25 = int_to_ptr.vmem [resolvable:$true] %s11013_s25 }
  0x5a   : > { %1251 = vmatpush1.bf16.msra.mxu0 %v12659_v7  ;;  %12561 = vmatprep.subr.bf16.mxu1 %v13776_v28  ;;  %v240_v43 = vld [vmem:[%s13755_s8 + $0x28] sm:$0xff]  ;;  %v242_v44 = vld [vmem:[%s13755_s8 + $0x38] sm:$0xff]  ;;  %v13800_v46 = vpack.c.bf16 %v237_v42, %v235_v41  ;;  %v239_v51 = vld [vmem:[%s13755_s8 + $0x20] sm:$0xff]  ;;  %s10999_s19 = scalar_lea.sflag [#allocation4], %s13749_s5  ;;  %s13526_s21 = scalar_lea.vmem %s18574_s25, 8192 }
  0x5b   : > { %1252 = vmatprep.subr.bf16.mxu0 %v12660_v8  ;;  %v13798_v45 = vld [vmem:[#allocation5 + $0xc8] ss:$48 sps:$4 sm:$0xff]   ;;  %v13803_v47 = vld [vmem:[#allocation5 + $0x6c] ss:$48 sps:$4 sm:$0xff]   ;;  %v13805_v48 = vpack.c.bf16 %v242_v44, %v240_v43  ;;  %v241_v52 = vld [vmem:[%s13755_s8 + $0x30] sm:$0xff]  ;;  %p13527_p3 = scmp.ne.s32.totalorder %s18574_s25, %s13526_s21  ;;  %p19978_p11 = scmp.ne.s32.totalorder %s18865_s10, 0 }
  0x5c   : > { %v13808_v49 = vld [vmem:[#allocation5 + $0x68] ss:$48 sps:$4 sm:$0xff]   ;;  %v13812_v50 = vld [vmem:[#allocation5 + $0xc] ss:$48 sps:$4 sm:$0xff]   ;;  %v13823_v56 = vpack.c.bf16 %v241_v52, %v239_v51  ;;  %v243_v60 = vld [vmem:[%s13755_s8 + $0x40] sm:$0xff]  ;;  %s13605_s23 = smov [#allocation7]  }
  0x5d   : > { %12573 = vmatpush1.bf16.msra.mxu1 %v13783_v34  ;;  %v244_v53 = vld [vmem:[%s13755_s8 + $0x48] sm:$0xff]  ;;  %v246_v54 = vld [vmem:[%s13755_s8 + $0x58] sm:$0xff]  ;;  %v245_v62 = vld [vmem:[%s13755_s8 + $0x50] sm:$0xff]  ;;  %p13528_p7 = pnand %p13527_p3, %p19978_p11  ;;  %s13530_s24 = sshll.u32 %s13605_s23, 4  ;;  %s13531_s24 = int_to_ptr.vmem [resolvable:$false] %s13530_s24 }
  0x5e   : > { %1253 = vmatpush1.bf16.msra.mxu0 %v12662_v9  ;;  %12562 = vmatprep.subr.bf16.mxu1 %v12696_v35  ;;  %v13821_v55 = vld [vmem:[#allocation5 + $0x8] ss:$48 sps:$4 sm:$0xff]   ;;  %v13826_v57 = vld [vmem:[#allocation5 + $0x42c] ss:$48 sps:$4 sm:$0xff]   ;;  %v13828_v58 = vpack.c.bf16 %v246_v54, %v244_v53  ;;  %v13849_v2 = vpack.c.bf16 %v245_v62, %v243_v60  ;;  %v247_v5 = vld [vmem:[%s13755_s8 + $0x60] sm:$0xff]  ;;  %s13532_s26 = scalar_lea.vmem %s13531_s24, 16384  ;;  %p13533_p10 = scmp.lt.s32.totalorder %s18574_s25, %s13531_s24 }
  0x5f   : > { %1254 = vmatprep.subr.bf16.mxu0 %v12663_v10  ;;  %v13832_v59 = vld [vmem:[#allocation5 + $0x428] ss:$48 sps:$4 sm:$0xff]   ;;  %v13837_v61 = vld [vmem:[#allocation5 + $0x3cc] ss:$48 sps:$4 sm:$0xff]   ;;  %v249_v6 = vld [vmem:[%s13755_s8 + $0x70] sm:$0xff]  ;;  %p13529_p12 = pneg %p13528_p7  ;;  %p13534_p2 = scmp.lt.s32.totalorder %s13532_s26, %s13526_s21 }
  0x60   : > { %v248_v63 = vld [vmem:[%s13755_s8 + $0x68] sm:$0xff]  ;;  %v250_v0 = vld [vmem:[%s13755_s8 + $0x78] sm:$0xff]  ;;  %v275_v30 = vld [vmem:[%s13755_s8 + $0x140] sm:$0xff] }
  0x61   : > { %12574 = vmatpush1.bf16.msra.mxu1 %v13789_v38  ;;  %v13847_v1 = vld [vmem:[#allocation5 + $0x3c8] ss:$48 sps:$4 sm:$0xff]   ;;  %v13852_v3 = vld [vmem:[#allocation5 + $0x36c] ss:$48 sps:$4 sm:$0xff]   ;;  %v13854_v4 = vpack.c.bf16 %v250_v0, %v248_v63  ;;  %v12755_v0 = vld [vmem:[#allocation5 + $0x2b4] ss:$48 sps:$4 sm:$0xff]   ;;  %p13535_p13 = por %p13534_p2, %p13533_p10 }
  0x62   : > { %1255 = vmatpush1.bf16.msra.mxu0 %v12665_v14  ;;  %12563 = vmatprep.subr.bf16.mxu1 %v13791_v40  ;;  %v13860_v7 = vld [vmem:[#allocation5 + $0x368] ss:$48 sps:$4 sm:$0xff]   ;;  %v13865_v9 = vld [vmem:[#allocation5 + $0x30c] ss:$48 sps:$4 sm:$0xff]   ;;  %v271_v14 = vld [vmem:[%s13755_s8 + $0x120] sm:$0xff] }
  0x63   : > { %1256 = vmatprep.subr.bf16.mxu0 %v12666_v15  ;;  %v252_v8 = vld [vmem:[%s13755_s8 + $0x88] sm:$0xff]  ;;  %v254_v10 = vld [vmem:[%s13755_s8 + $0x98] sm:$0xff]  ;;  %v273_v15 = vld [vmem:[%s13755_s8 + $0x130] sm:$0xff]  ;;  %p13536_p0 = pnand %p13535_p13, %p13529_p12 }
  0x64   : > { %v13871_v11 = vld [vmem:[#allocation5 + $0x308] ss:$48 sps:$4 sm:$0xff]   ;;  %v12722_v12 = vld [vmem:[#allocation5 + $0x2bc] ss:$48 sps:$4 sm:$0xff]  }
  0x65   : > { %12575 = vmatpush1.bf16.msra.mxu1 %v13798_v45  ;;  %v12728_v29 = vld [vmem:[#allocation5 + $0x1fc] ss:$48 sps:$4 sm:$0xff]  }
  0x66   : > { %1257 = vmatpush1.bf16.msra.mxu0 %v12668_v16  ;;  %12564 = vmatprep.subr.bf16.mxu1 %v13803_v47  ;;  %v13877_v16 = vpack.c.bf16 %v249_v6, %v247_v5  ;;  %v262_v41 = vld [vmem:[%s13755_s8 + $0xd8] sm:$0xff]  ;;  %v284_v52 = vld [vmem:[%s13755_s8 + $0x188] sm:$0xff]  ;;  %v283_v6 = vld [vmem:[%s13755_s8 + $0x180] sm:$0xff] }
  0x67   : > { %1258 = vmatprep.subr.bf16.mxu0 %v12669_v17  ;;  %v276_v17 = vld [vmem:[%s13755_s8 + $0x148] sm:$0xff]  ;;  %v286_v54 = vld [vmem:[%s13755_s8 + $0x198] sm:$0xff] }
  0x68   : > { %v12731_v43 = vld [vmem:[#allocation5 + $0x19c] ss:$48 sps:$4 sm:$0xff]  }
  0x69   : > { %12576 = vmatpush1.bf16.msra.mxu1 %v13808_v49  ;;  %v264_v60 = vld [vmem:[%s13755_s8 + $0xe8] sm:$0xff] }
  0x6a   : > { %1259 = vmatpush1.bf16.msra.mxu0 %v12671_v19  ;;  %12565 = vmatprep.subr.bf16.mxu1 %v13812_v50  ;;  %v278_v19 = vld [vmem:[%s13755_s8 + $0x158] sm:$0xff] }
  0x6b   : > { %1268 = vmatprep.subr.bf16.mxu0 %v12672_v20  ;;  %v251_v20 = vld [vmem:[%s13755_s8 + $0x80] sm:$0xff]  ;;  %v12737_v63 = vld [vmem:[#allocation5 + $0xdc] ss:$48 sps:$4 sm:$0xff]  }
  0x6c   : > { %v12740_v5 = vld [vmem:[#allocation5 + $0x7c] ss:$48 sps:$4 sm:$0xff]  }
  0x6d   : > { %12577 = vmatpush1.bf16.msra.mxu1 %v13821_v55 }
  0x6e   : > { %1269 = vmatpush2.bf16.msra.mxu0 %v12674_v25  ;;  %12566 = vmatprep.subr.bf16.mxu1 %v13826_v57  ;;  %v13892_v25 = vpack.c.bf16 %v273_v15, %v271_v14  ;;  %v290_v14 = vld [vmem:[%s13755_s8 + $0x1b8] sm:$0xff]  ;;  %v265_v15 = vld [vmem:[%s13755_s8 + $0xf0] sm:$0xff] }
  0x6f   : > { %1270 = vmatprep.subr.bf16.mxu0 %v12675_v26  ;;  %v12725_v26 = vld [vmem:[#allocation5 + $0x25c] ss:$48 sps:$4 sm:$0xff]  }
  0x71   : > { %12578 = vmatpush2.bf16.msra.mxu1 %v13832_v59 }
  0x72   : > { %1271 = vmatpush2.bf16.msra.mxu0 %v12677_v31  ;;  %12567 = vmatprep.subr.bf16.mxu1 %v13837_v61  ;;  %v277_v31 = vld [vmem:[%s13755_s8 + $0x150] sm:$0xff] }
  0x73   : > { %1272 = vmatprep.subr.bf16.mxu0 %v12678_v33  ;;  %v13918_v42 = vpack.c.bf16 %v277_v31, %v275_v30  ;;  %v292_v30 = vld [vmem:[%s13755_s8 + $0x1c8] sm:$0xff] }
  0x75   : > { %12579 = vmatpush2.bf16.msra.mxu1 %v13847_v1 }
  0x76   : > { %1273 = vmatpush2.bf16.msra.mxu0 %v12680_v36  ;;  %12568 = vmatprep.subr.bf16.mxu1 %v13852_v3  ;;  %v282_v36 = vld [vmem:[%s13755_s8 + $0x178] sm:$0xff] }
  0x77   : > { %1274 = vmatprep.subr.bf16.mxu0 %v12681_v37  ;;  %v255_v37 = vld [vmem:[%s13755_s8 + $0xa0] sm:$0xff] }
  0x79   : > { %12580 = vmatpush2.bf16.msra.mxu1 %v13860_v7 }
  0x7a   : > { %1275 = vmatpush2.bf16.msra.mxu0 %v12683_v39  ;;  %12569 = vmatprep.subr.bf16.mxu1 %v13865_v9  ;;  %v12726_v39 = vld [vmem:[#allocation5 + $0x1f8] ss:$48 sps:$4 sm:$0xff]  }
  0x7b   : > { %1437 = vmatprep.subr.bf16.mxu0 %v12684_v18  ;;  %v13881_v18 = vpack.c.bf16 %v254_v10, %v252_v8  ;;  %v285_v8 = vld [vmem:[%s13755_s8 + $0x190] sm:$0xff] }
  0x7d   : > { %1277 = vmatmul.mubr.bf16.vlgmr.msra.gmra.mxu0 %v13800_v46  ;;  %12581 = vmatpush2.bf16.msra.mxu1 %v13871_v11 }
  0x7e   : > { %11253 = vmatprep.mubr.msk.bf16.mxu0 %vm1195_vm0, %v13805_v48  ;;  %1438 = vmatpush1.bf16.msra.mxu0 %v12686_v21  ;;  %v253_v21 = vld [vmem:[%s13755_s8 + $0x90] sm:$0xff] }
  0x7f   : > { %1439 = vmatprep.subr.bf16.mxu0 %v12687_v22  ;;  %v12720_v22 = vld [vmem:[#allocation5 + $0x2b8] ss:$48 sps:$4 sm:$0xff]   ;;  %1823 = vmatprep.subr.bf16.mxu1 %v12722_v12  ;;  %v13905_v33 = vpack.c.bf16 %v253_v21, %v251_v20  ;;  %v13969_v21 = vpack.c.bf16 %v285_v8, %v283_v6  ;;  %v12797_v8 = vld [vmem:[#allocation5 + $0x26c] ss:$48 sps:$4 sm:$0xff]  }
  0x80   : > { %1560 = vmatmul.mubr.bf16.vlgmr.msra.gmra.mxu1 %v13892_v25  ;;  %v288_v12 = vld [vmem:[%s13755_s8 + $0x1a8] sm:$0xff]  ;;  %v270_v20 = vld [vmem:[%s13755_s8 + $0x118] sm:$0xff] }
  0x81   : > { %1824 = vmatpush1.bf16.msra.mxu1 %v12720_v22  ;;  %v12743_v22 = vld [vmem:[#allocation5 + $0x1c] ss:$48 sps:$4 sm:$0xff]   ;;  %v12792_v6 = vld [vmem:[#allocation5 + $0x2c8] ss:$48 sps:$4 sm:$0xff]  }
  0x82   : > { %1440 = vmatpush1.bf16.msra.mxu0 %v13771_v23  ;;  %v256_v23 = vld [vmem:[%s13755_s8 + $0xa8] sm:$0xff]  ;;  %1825 = vmatprep.subr.bf16.mxu1 %v12725_v26  ;;  %v287_v26 = vld [vmem:[%s13755_s8 + $0x1a0] sm:$0xff] }
  0x83   : > { %1441 = vmatprep.subr.bf16.mxu0 %v12690_v24  ;;  %v258_v24 = vld [vmem:[%s13755_s8 + $0xb8] sm:$0xff] }
  0x85   : > { %1287 = vmatmul.mubr.bf16.gmra.mxu0 %v13823_v56 }
  0x86   : > { %11254 = vmatprep.mubr.msk.bf16.mxu0 %vm1195_vm0, %v13828_v58  ;;  %1442 = vmatpush1.bf16.msra.mxu0 %v13774_v27  ;;  %v13896_v27 = vpack.c.bf16 %v278_v19, %v276_v17  ;;  %v12738_v17 = vld [vmem:[#allocation5 + $0x78] ss:$48 sps:$4 sm:$0xff]  }
  0x87   : > { %1443 = vmatprep.subr.bf16.mxu0 %v13776_v28  ;;  %v12723_v28 = vld [vmem:[#allocation5 + $0x258] ss:$48 sps:$4 sm:$0xff]  }
  0x88   : > { %11278 = vmatprep.mubr.msk.bf16.mxu1 %vm1195_vm0, %v13896_v27  ;;  %1826 = vmatpush1.bf16.msra.mxu1 %v12723_v28  ;;  %v268_v19 = vld [vmem:[%s13755_s8 + $0x108] sm:$0xff]  ;;  %v289_v28 = vld [vmem:[%s13755_s8 + $0x1b0] sm:$0xff] }
  0x89   : > { %1827 = vmatprep.subr.bf16.mxu1 %v12728_v29  ;;  %1570 = vmatmul.mubr.bf16.gmra.mxu1 %v13918_v42  ;;  %v13983_v31 = vpack.c.bf16 %v270_v20, %v268_v19  ;;  %v12806_v19 = vld [vmem:[#allocation5 + $0x14c] ss:$48 sps:$4 sm:$0xff]   ;;  %v12753_v20 = vld [vmem:[#allocation5 + $0x2b0] ss:$48 sps:$4 sm:$0xff]  }
  0x8a   : > { %1444 = vmatpush1.bf16.msra.mxu0 %v13783_v34  ;;  %v280_v34 = vld [vmem:[%s13755_s8 + $0x168] sm:$0xff] }
  0x8b   : > { %1445 = vmatprep.subr.bf16.mxu0 %v12696_v35  ;;  %v13908_v35 = vpack.c.bf16 %v258_v24, %v256_v23  ;;  %v13922_v44 = vpack.c.bf16 %v282_v36, %v280_v34  ;;  %v12741_v23 = vld [vmem:[#allocation5 + $0x18] ss:$48 sps:$4 sm:$0xff]   ;;  %v12746_v24 = vld [vmem:[#allocation5 + $0x43c] ss:$48 sps:$4 sm:$0xff]   ;;  %v267_v36 = vld [vmem:[%s13755_s8 + $0x100] sm:$0xff] }
  0x8c   : > { %1828 = vmatpush1.bf16.msra.mxu1 %v12726_v39  ;;  %v294_v34 = vld [vmem:[%s13755_s8 + $0x1d8] sm:$0xff]  ;;  %v13989_v39 = vpack.c.bf16 %v289_v28, %v287_v26  ;;  %v12759_v26 = vld [vmem:[#allocation5 + $0x250] ss:$48 sps:$4 sm:$0xff]  }
  0x8d   : > { %1297 = vmatmul.mubr.bf16.gmra.mxu0 %v13849_v2  ;;  %11279 = vmatprep.mubr.msk.bf16.mxu1 %vm1195_vm0, %v13922_v44  ;;  %v12807_v28 = vld [vmem:[#allocation5 + $0xe8] ss:$48 sps:$4 sm:$0xff]  }
  0x8e   : > { %11255 = vmatprep.mubr.msk.bf16.mxu0 %vm1195_vm0, %v13854_v4  ;;  %1446 = vmatpush1.bf16.msra.mxu0 %v13789_v38  ;;  %v257_v38 = vld [vmem:[%s13755_s8 + $0xb0] sm:$0xff] }
  0x8f   : > { %1447 = vmatprep.subr.bf16.mxu0 %v13791_v40  ;;  %v260_v40 = vld [vmem:[%s13755_s8 + $0xc8] sm:$0xff]  ;;  %v13931_v51 = vpack.c.bf16 %v257_v38, %v255_v37  ;;  %1829 = vmatprep.subr.bf16.mxu1 %v12731_v43  ;;  %v269_v38 = vld [vmem:[%s13755_s8 + $0x110] sm:$0xff] }
  0x90   : > { %v13934_v53 = vpack.c.bf16 %v262_v41, %v260_v40  ;;  %v12744_v37 = vld [vmem:[#allocation5 + $0x438] ss:$48 sps:$4 sm:$0xff]   ;;  %v12749_v40 = vld [vmem:[#allocation5 + $0x3dc] ss:$48 sps:$4 sm:$0xff]   ;;  %v13993_v41 = vpack.c.bf16 %v294_v34, %v292_v30  ;;  %v12764_v30 = vld [vmem:[#allocation5 + $0x1f4] ss:$48 sps:$4 sm:$0xff]  }
  0x91   : > { %v12747_v43 = vld [vmem:[#allocation5 + $0x3d8] ss:$48 sps:$4 sm:$0xff]   ;;  %v12812_v34 = vld [vmem:[#allocation5 + $0x8c] ss:$48 sps:$4 sm:$0xff]  }
  0x92   : > { %1448 = vmatpush1.bf16.msra.mxu0 %v13798_v45  ;;  %v12729_v45 = vld [vmem:[#allocation5 + $0x198] ss:$48 sps:$4 sm:$0xff]  }
  0x93   : > { %1449 = vmatprep.subr.bf16.mxu0 %v13803_v47  ;;  %v12734_v47 = vld [vmem:[#allocation5 + $0x13c] ss:$48 sps:$4 sm:$0xff]   ;;  %1830 = vmatpush1.bf16.msra.mxu1 %v12729_v45 }
  0x94   : > { %1831 = vmatprep.subr.bf16.mxu1 %v12734_v47  ;;  %v12752_v45 = vld [vmem:[#allocation5 + $0x37c] ss:$48 sps:$4 sm:$0xff]   ;;  %v291_v47 = vld [vmem:[%s13755_s8 + $0x1c0] sm:$0xff] }
  0x95   : > { %1307 = vmatmul.mubr.bf16.gmra.mxu0 %v13877_v16 }
  0x96   : > { %11256 = vmatprep.mubr.msk.bf16.mxu0 %vm1195_vm0, %v13881_v18  ;;  %1450 = vmatpush1.bf16.msra.mxu0 %v13808_v49  ;;  %v279_v49 = vld [vmem:[%s13755_s8 + $0x160] sm:$0xff] }
  0x97   : > { %1451 = vmatprep.subr.bf16.mxu0 %v13812_v50  ;;  %v281_v50 = vld [vmem:[%s13755_s8 + $0x170] sm:$0xff] }
  0x98   : > { %v13944_v62 = vpack.c.bf16 %v281_v50, %v279_v49  ;;  %v293_v49 = vld [vmem:[%s13755_s8 + $0x1d0] sm:$0xff]  ;;  %v14000_v50 = vpack.c.bf16 %v269_v38, %v267_v36 }
  0x99   : > { %v12762_v36 = vld [vmem:[#allocation5 + $0x1f0] ss:$48 sps:$4 sm:$0xff]   ;;  %v12767_v38 = vld [vmem:[#allocation5 + $0x194] ss:$48 sps:$4 sm:$0xff]  }
  0x9a   : > { %1452 = vmatpush1.bf16.msra.mxu0 %v13821_v55  ;;  %v259_v55 = vld [vmem:[%s13755_s8 + $0xc0] sm:$0xff]  ;;  %1580 = vmatmul.mubr.bf16.gmra.mxu1 %v13944_v62 }
  0x9b   : > { %1461 = vmatprep.subr.bf16.mxu0 %v13826_v57  ;;  %v261_v57 = vld [vmem:[%s13755_s8 + $0xd0] sm:$0xff] }
  0x9c   : > { %v13957_v10 = vpack.c.bf16 %v261_v57, %v259_v55  ;;  %v12750_v55 = vld [vmem:[#allocation5 + $0x378] ss:$48 sps:$4 sm:$0xff]   ;;  %v12758_v57 = vld [vmem:[#allocation5 + $0x31c] ss:$48 sps:$4 sm:$0xff]  }
  0x9d   : > { %1317 = vmatmul.mubr.bf16.gmra.mxu0 %v13905_v33 }
  0x9e   : > { %11257 = vmatprep.mubr.msk.bf16.mxu0 %vm1195_vm0, %v13908_v35  ;;  %1462 = vmatpush2.bf16.msra.mxu0 %v13832_v59  ;;  %v12732_v59 = vld [vmem:[#allocation5 + $0x138] ss:$48 sps:$4 sm:$0xff]  }
  0x9f   : > { %1463 = vmatprep.subr.bf16.mxu0 %v13837_v61  ;;  %v266_v61 = vld [vmem:[%s13755_s8 + $0xf8] sm:$0xff]  ;;  %1832 = vmatpush1.bf16.msra.mxu1 %v12732_v59  ;;  %v14005_v59 = vpack.c.bf16 %v293_v49, %v291_v47  ;;  %v12770_v47 = vld [vmem:[#allocation5 + $0x134] ss:$48 sps:$4 sm:$0xff]  }
  0xa0   : > { %1833 = vmatprep.subr.bf16.mxu1 %v12737_v63  ;;  %v297_v63 = vld [vmem:[%s13755_s8 + $0x1f0] sm:$0xff]  ;;  %v12818_v49 = vld [vmem:[#allocation5 + $0x44c] ss:$48 sps:$4 sm:$0xff]  }
  0xa2   : > { %1464 = vmatpush2.bf16.msra.mxu0 %v13847_v1  ;;  %v13948_v1 = vpack.c.bf16 %v286_v54, %v284_v52  ;;  %v296_v52 = vld [vmem:[%s13755_s8 + $0x1e8] sm:$0xff]  ;;  %v298_v54 = vld [vmem:[%s13755_s8 + $0x1f8] sm:$0xff] }
  0xa3   : > { %1465 = vmatprep.subr.bf16.mxu0 %v13852_v3  ;;  %v12735_v3 = vld [vmem:[#allocation5 + $0xd8] ss:$48 sps:$4 sm:$0xff]  }
  0xa4   : > { %11280 = vmatprep.mubr.msk.bf16.mxu1 %vm1195_vm0, %v13948_v1  ;;  %1834 = vmatpush1.bf16.msra.mxu1 %v12735_v3 }
  0xa5   : > { %1327 = vmatmul.mubr.bf16.gmra.mxu0 %v13931_v51  ;;  %1835 = vmatprep.subr.bf16.mxu1 %v12740_v5  ;;  %v12794_v5 = vld [vmem:[#allocation5 + $0x2cc] ss:$48 sps:$4 sm:$0xff]  }
  0xa6   : > { %11258 = vmatprep.mubr.msk.bf16.mxu0 %vm1195_vm0, %v13934_v53  ;;  %1466 = vmatpush2.bf16.msra.mxu0 %v13860_v7  ;;  %v13960_v7 = vpack.c.bf16 %v266_v61, %v264_v60  ;;  %v14009_v60 = vpack.c.bf16 %v298_v54, %v296_v52  ;;  %v295_v61 = vld [vmem:[%s13755_s8 + $0x1e0] sm:$0xff]  ;;  %v12816_v54 = vld [vmem:[#allocation5 + $0x448] ss:$48 sps:$4 sm:$0xff]  }
  0xa7   : > { %1467 = vmatprep.subr.bf16.mxu0 %v13865_v9  ;;  %v263_v9 = vld [vmem:[%s13755_s8 + $0xe0] sm:$0xff]  ;;  %1590 = vmatmul.mubr.bf16.gmra.mxu1 %v13969_v21  ;;  %v14017_v3 = vpack.c.bf16 %v297_v63, %v295_v61  ;;  %v12822_v63 = vld [vmem:[#allocation5 + $0x3e8] ss:$48 sps:$4 sm:$0xff]   ;;  %s18572_s8 = scalar_lea.hbm %s18625_s4, %s11533_s6 }
  0xa8   : > { %1836 = vmatpush1.bf16.msra.mxu1 %v12738_v17  ;;  %v13980_v29 = vpack.c.bf16 %v265_v15, %v263_v9  ;;  %v12798_v9 = vld [vmem:[#allocation5 + $0x208] ss:$48 sps:$4 sm:$0xff]   ;;  %v12803_v15 = vld [vmem:[#allocation5 + $0x1ac] ss:$48 sps:$4 sm:$0xff]   ;;  %v12768_v52 = vld [vmem:[#allocation5 + $0x130] ss:$48 sps:$4 sm:$0xff]  }
  0xa9   : > { %1837 = vmatprep.subr.bf16.mxu1 %v12743_v22  ;;  %v12801_v17 = vld [vmem:[#allocation5 + $0x1a8] ss:$48 sps:$4 sm:$0xff]   ;;  %v12771_v61 = vld [vmem:[#allocation5 + $0xd0] ss:$48 sps:$4 sm:$0xff]  }
  0xaa   : > { %1468 = vmatpush2.bf16.msra.mxu0 %v13871_v11  ;;  %v13973_v11 = vpack.c.bf16 %v290_v14, %v288_v12  ;;  %v12795_v12 = vld [vmem:[#allocation5 + $0x268] ss:$48 sps:$4 sm:$0xff]   ;;  %v12800_v14 = vld [vmem:[#allocation5 + $0x20c] ss:$48 sps:$4 sm:$0xff]  }
  0xab   : > { %1630 = vmatprep.subr.bf16.mxu0 %v12755_v0  ;;  %v12756_v0 = vld [vmem:[#allocation5 + $0x318] ss:$48 sps:$4 sm:$0xff]  }
  0xac   : > { %11281 = vmatprep.mubr.msk.bf16.mxu1 %vm1195_vm0, %v13973_v11  ;;  %1838 = vmatpush1.bf16.msra.mxu1 %v12741_v23  ;;  %v12804_v22 = vld [vmem:[#allocation5 + $0x148] ss:$48 sps:$4 sm:$0xff]   ;;  %v12761_v23 = vld [vmem:[#allocation5 + $0x254] ss:$48 sps:$4 sm:$0xff]  }
  0xad   : > { %1337 = vmatmul.mubr.bf16.gmra.mxu0 %v13957_v10  ;;  %1847 = vmatprep.subr.bf16.mxu1 %v12746_v24  ;;  %v12809_v24 = vld [vmem:[#allocation5 + $0xec] ss:$48 sps:$4 sm:$0xff]  }
  0xae   : > { %11259 = vmatprep.mubr.msk.bf16.mxu0 %vm1195_vm0, %v13960_v7 }
  0xaf   : > { %1600 = vmatmul.mubr.bf16.gmra.mxu1 %v13989_v39 }
  0xb0   : > { %11282 = vmatprep.mubr.msk.bf16.mxu1 %vm1195_vm0, %v13993_v41  ;;  %1848 = vmatpush2.bf16.msra.mxu1 %v12744_v37  ;;  %v12810_v37 = vld [vmem:[#allocation5 + $0x88] ss:$48 sps:$4 sm:$0xff]  }
  0xb1   : > { %1849 = vmatprep.subr.bf16.mxu1 %v12749_v40  ;;  %v12815_v40 = vld [vmem:[#allocation5 + $0x2c] ss:$48 sps:$4 sm:$0xff]  }
  0xb4   : > { %1850 = vmatpush2.bf16.msra.mxu1 %v12747_v43  ;;  %v12765_v43 = vld [vmem:[#allocation5 + $0x190] ss:$48 sps:$4 sm:$0xff]  }
  0xb5   : > { %1347 = vmatmul.mubr.bf16.gmra.mxu0 %v13980_v29  ;;  %1851 = vmatprep.subr.bf16.mxu1 %v12752_v45  ;;  %v12813_v45 = vld [vmem:[#allocation5 + $0x28] ss:$48 sps:$4 sm:$0xff]  }
  0xb6   : > { %11260 = vmatprep.mubr.msk.bf16.mxu0 %vm1195_vm0, %v13983_v31 }
  0xb7   : > { %1610 = vmatmul.mubr.bf16.gmra.mxu1 %v14005_v59 }
  0xb8   : > { %11283 = vmatprep.mubr.msk.bf16.mxu1 %vm1195_vm0, %v14009_v60  ;;  %1852 = vmatpush2.bf16.msra.mxu1 %v12750_v55  ;;  %v12773_v55 = vld [vmem:[#allocation5 + $0xd4] ss:$48 sps:$4 sm:$0xff]  }
  0xb9   : > { %1853 = vmatprep.subr.bf16.mxu1 %v12758_v57  ;;  %v12824_v57 = vld [vmem:[#allocation5 + $0x3ec] ss:$48 sps:$4 sm:$0xff]  }
  0xbc   : > { %1854 = vmatpush2.bf16.msra.mxu1 %v12756_v0  ;;  %v12776_v0 = vld [vmem:[#allocation5 + $0x74] ss:$48 sps:$4 sm:$0xff]  }
  0xbd   : > { %1357 = vmatmul.mubr.bf16.gmra.mxu0 %v14000_v50  ;;  %2209 = vmatprep.subr.bf16.mxu1 %v12794_v5  ;;  %v12827_v5 = vld [vmem:[#allocation5 + $0x38c] ss:$48 sps:$4 sm:$0xff]  }
  0xbe   : > { %11261 = vmatprep.mubr.msk.bf16.mxu0 %vm1195_vm0, %v13780_v32 }
  0xbf   : > { %1620 = vmatmul.mubr.bf16.gmra.mxu1 %v14017_v3 }
  0xc0   : > { %11300 = vmatprep.mubr.msk.bf16.mxu1 %vm1195_vm0, %v13767_v13 }
  0xc5   : > { %1367 = vmatmul.mubr.bf16.gmra.mxu0 %v13892_v25 }
  0xc6   : > { %11262 = vmatprep.mubr.msk.bf16.mxu0 %vm1195_vm0, %v13896_v27 }
  0xc7   : > { %1856 = vmatmul.mubr.bf16.vlgmr.msra.gmra.mxu1 %v13800_v46 }
  0xc8   : > { %11301 = vmatprep.mubr.msk.bf16.mxu1 %vm1195_vm0, %v13805_v48  ;;  %2210 = vmatpush1.bf16.msra.mxu1 %v12792_v6  ;;  %v12774_v6 = vld [vmem:[#allocation5 + $0x70] ss:$48 sps:$4 sm:$0xff]  }
  0xc9   : > { %2211 = vmatprep.subr.bf16.mxu1 %v12797_v8  ;;  %v12825_v8 = vld [vmem:[#allocation5 + $0x388] ss:$48 sps:$4 sm:$0xff]  }
  0xcc   : > { %2212 = vmatpush1.bf16.msra.mxu1 %v12795_v12  ;;  %v12779_v12 = vld [vmem:[#allocation5 + $0x14] ss:$48 sps:$4 sm:$0xff]  }
  0xcd   : > { %1377 = vmatmul.mubr.bf16.gmra.mxu0 %v13918_v42  ;;  %2213 = vmatprep.subr.bf16.mxu1 %v12800_v14  ;;  %v12830_v14 = vld [vmem:[#allocation5 + $0x32c] ss:$48 sps:$4 sm:$0xff]  }
  0xce   : > { %11263 = vmatprep.mubr.msk.bf16.mxu0 %vm1195_vm0, %v13922_v44 }
  0xcf   : > { %1866 = vmatmul.mubr.bf16.gmra.mxu1 %v13823_v56 }
  0xd0   : > { %11302 = vmatprep.mubr.msk.bf16.mxu1 %vm1195_vm0, %v13828_v58  ;;  %2214 = vmatpush1.bf16.msra.mxu1 %v12798_v9  ;;  %v12777_v9 = vld [vmem:[#allocation5 + $0x10] ss:$48 sps:$4 sm:$0xff]  }
  0xd1   : > { %2215 = vmatprep.subr.bf16.mxu1 %v12803_v15  ;;  %v12828_v15 = vld [vmem:[#allocation5 + $0x328] ss:$48 sps:$4 sm:$0xff]  }
  0xd4   : > { %2216 = vmatpush1.bf16.msra.mxu1 %v12801_v17  ;;  %v12782_v17 = vld [vmem:[#allocation5 + $0x434] ss:$48 sps:$4 sm:$0xff]  }
  0xd5   : > { %1387 = vmatmul.mubr.bf16.gmra.mxu0 %v13944_v62  ;;  %2217 = vmatprep.subr.bf16.mxu1 %v12806_v19  ;;  %v12780_v19 = vld [vmem:[#allocation5 + $0x430] ss:$48 sps:$4 sm:$0xff]  }
  0xd6   : > { %11264 = vmatprep.mubr.msk.bf16.mxu0 %vm1195_vm0, %v13948_v1 }
  0xd7   : > { %1876 = vmatmul.mubr.bf16.gmra.mxu1 %v13849_v2 }
  0xd8   : > { %11303 = vmatprep.mubr.msk.bf16.mxu1 %vm1195_vm0, %v13854_v4  ;;  %2218 = vmatpush1.bf16.msra.mxu1 %v12804_v22  ;;  %v12783_v22 = vld [vmem:[#allocation5 + $0x3d0] ss:$48 sps:$4 sm:$0xff]  }
  0xd9   : > { %2219 = vmatprep.subr.bf16.mxu1 %v12809_v24  ;;  %v12786_v24 = vld [vmem:[#allocation5 + $0x370] ss:$48 sps:$4 sm:$0xff]  }
  0xdc   : > { %2220 = vmatpush1.bf16.msra.mxu1 %v12807_v28  ;;  %v12789_v28 = vld [vmem:[#allocation5 + $0x310] ss:$48 sps:$4 sm:$0xff]  }
  0xdd   : > { %1397 = vmatmul.mubr.bf16.gmra.mxu0 %v13969_v21  ;;  %2221 = vmatprep.subr.bf16.mxu1 %v12812_v34 }
  0xde   : > { %11265 = vmatprep.mubr.msk.bf16.mxu0 %vm1195_vm0, %v13973_v11 }
  0xdf   : > { %1886 = vmatmul.mubr.bf16.gmra.mxu1 %v13877_v16 }
  0xe0   : > { %11304 = vmatprep.mubr.msk.bf16.mxu1 %vm1195_vm0, %v13881_v18  ;;  %2222 = vmatpush1.bf16.msra.mxu1 %v12810_v37 }
  0xe1   : > { %2223 = vmatprep.subr.bf16.mxu1 %v12815_v40  ;;  %v12819_v40 = vld [vmem:[#allocation5 + $0x2c0] ss:$48 sps:$4 sm:$0xff]  }
  0xe4   : > { %2224 = vmatpush1.bf16.msra.mxu1 %v12813_v45  ;;  %v12833_v45 = vld [vmem:[#allocation5 + $0x264] ss:$48 sps:$4 sm:$0xff]  }
  0xe5   : > { %1407 = vmatmul.mubr.bf16.gmra.mxu0 %v13989_v39  ;;  %2233 = vmatprep.subr.bf16.mxu1 %v12818_v49 }
  0xe6   : > { %11266 = vmatprep.mubr.msk.bf16.mxu0 %vm1195_vm0, %v13993_v41 }
  0xe7   : > { %1896 = vmatmul.mubr.bf16.gmra.mxu1 %v13905_v33 }
  0xe8   : > { %11305 = vmatprep.mubr.msk.bf16.mxu1 %vm1195_vm0, %v13908_v35  ;;  %2234 = vmatpush2.bf16.msra.mxu1 %v12816_v54 }
  0xe9   : > { %2235 = vmatprep.subr.bf16.mxu1 %v12824_v57 }
  0xec   : > { %2236 = vmatpush2.bf16.msra.mxu1 %v12822_v63  ;;  %v12834_v63 = vld [vmem:[#allocation5 + $0x200] ss:$48 sps:$4 sm:$0xff]  }
  0xed   : > { %1417 = vmatmul.mubr.bf16.gmra.mxu0 %v14005_v59  ;;  %2237 = vmatprep.subr.bf16.mxu1 %v12827_v5  ;;  %v12839_v5 = vld [vmem:[#allocation5 + $0x1a4] ss:$48 sps:$4 sm:$0xff]  }
  0xee   : > { %11267 = vmatprep.mubr.msk.bf16.mxu0 %vm1195_vm0, %v14009_v60 }
  0xef   : > { %1906 = vmatmul.mubr.bf16.gmra.mxu1 %v13931_v51 }
  0xf0   : > { %11306 = vmatprep.mubr.msk.bf16.mxu1 %vm1195_vm0, %v13934_v53  ;;  %2238 = vmatpush2.bf16.msra.mxu1 %v12825_v8 }
  0xf1   : > { %2239 = vmatprep.subr.bf16.mxu1 %v12830_v14 }
  0xf4   : > { %2240 = vmatpush2.bf16.msra.mxu1 %v12828_v15 }
  0xf5   : > { %1427 = vmatmul.mubr.bf16.gmra.mxu0 %v14017_v3 }
  0xf6   : > { %11268 = vmatprep.mubr.msk.bf16.mxu0 %vm1195_vm0, %v13767_v13 }
  0xf7   : > { %1916 = vmatmul.mubr.bf16.gmra.mxu1 %v13957_v10 }
  0xf8   : > { %11307 = vmatprep.mubr.msk.bf16.mxu1 %vm1195_vm0, %v13960_v7 }
  0xfd   : > { %1470 = vmatmul.mubr.bf16.vlgmr.msra.gmra.mxu0 %v13800_v46 }
  0xfe   : > { %11269 = vmatprep.mubr.msk.bf16.mxu0 %vm1195_vm0, %v13805_v48  ;;  %1631 = vmatpush1.bf16.msra.mxu0 %v12753_v20  ;;  %v12785_v20 = vld [vmem:[#allocation5 + $0x3d4] ss:$48 sps:$4 sm:$0xff]  }
  0xff   : > { %1632 = vmatprep.subr.bf16.mxu0 %v12761_v23  ;;  %1926 = vmatmul.mubr.bf16.gmra.mxu1 %v13980_v29  ;;  %v12788_v23 = vld [vmem:[#allocation5 + $0x374] ss:$48 sps:$4 sm:$0xff]  }
 0x100   : > { %11308 = vmatprep.mubr.msk.bf16.mxu1 %vm1195_vm0, %v13983_v31 }
 0x102   : > { %1633 = vmatpush1.bf16.msra.mxu0 %v12759_v26  ;;  %v12791_v26 = vld [vmem:[#allocation5 + $0x314] ss:$48 sps:$4 sm:$0xff]  }
 0x103   : > { %1634 = vmatprep.subr.bf16.mxu0 %v12764_v30  ;;  %v12821_v30 = vld [vmem:[#allocation5 + $0x2c4] ss:$48 sps:$4 sm:$0xff]  }
 0x105   : > { %1480 = vmatmul.mubr.bf16.gmra.mxu0 %v13823_v56 }
 0x106   : > { %11270 = vmatprep.mubr.msk.bf16.mxu0 %vm1195_vm0, %v13828_v58  ;;  %1635 = vmatpush1.bf16.msra.mxu0 %v12762_v36 }
 0x107   : > { %1636 = vmatprep.subr.bf16.mxu0 %v12767_v38  ;;  %1936 = vmatmul.mubr.bf16.gmra.mxu1 %v14000_v50 }
 0x108   : > { %11309 = vmatprep.mubr.msk.bf16.mxu1 %vm1195_vm0, %v13780_v32 }
 0x10a   : > { %1637 = vmatpush1.bf16.msra.mxu0 %v12765_v43 }
 0x10b   : > { %1638 = vmatprep.subr.bf16.mxu0 %v12770_v47 }
 0x10d   : > { %1490 = vmatmul.mubr.bf16.gmra.mxu0 %v13849_v2 }
 0x10e   : > { %11271 = vmatprep.mubr.msk.bf16.mxu0 %vm1195_vm0, %v13854_v4  ;;  %1639 = vmatpush1.bf16.msra.mxu0 %v12768_v52  ;;  %v12831_v52 = vld [vmem:[#allocation5 + $0x260] ss:$48 sps:$4 sm:$0xff]  }
 0x10f   : > { %1640 = vmatprep.subr.bf16.mxu0 %v12773_v55  ;;  %1946 = vmatmul.mubr.bf16.gmra.mxu1 %v13892_v25  ;;  %v12836_v55 = vld [vmem:[#allocation5 + $0x204] ss:$48 sps:$4 sm:$0xff]  }
 0x110   : > { %11310 = vmatprep.mubr.msk.bf16.mxu1 %vm1195_vm0, %v13896_v27 }
 0x112   : > { %1641 = vmatpush1.bf16.msra.mxu0 %v12771_v61 }
 0x113   : > { %1642 = vmatprep.subr.bf16.mxu0 %v12776_v0 }
 0x115   : > { %1500 = vmatmul.mubr.bf16.gmra.mxu0 %v13877_v16 }
 0x116   : > { %11272 = vmatprep.mubr.msk.bf16.mxu0 %vm1195_vm0, %v13881_v18  ;;  %1643 = vmatpush1.bf16.msra.mxu0 %v12774_v6 }
 0x117   : > { %1644 = vmatprep.subr.bf16.mxu0 %v12779_v12  ;;  %1956 = vmatmul.mubr.bf16.gmra.mxu1 %v13918_v42  ;;  %v12837_v12 = vld [vmem:[#allocation5 + $0x1a0] ss:$48 sps:$4 sm:$0xff]  }
 0x118   : > { %11311 = vmatprep.mubr.msk.bf16.mxu1 %vm1195_vm0, %v13922_v44 }
 0x11a   : > { %1645 = vmatpush1.bf16.msra.mxu0 %v12777_v9  ;;  %v12842_v9 = vld [vmem:[#allocation5 + $0x144] ss:$48 sps:$4 sm:$0xff]  }
 0x11b   : > { %1654 = vmatprep.subr.bf16.mxu0 %v12782_v17 }
 0x11d   : > { %1510 = vmatmul.mubr.bf16.gmra.mxu0 %v13905_v33 }
 0x11e   : > { %11273 = vmatprep.mubr.msk.bf16.mxu0 %vm1195_vm0, %v13908_v35  ;;  %1655 = vmatpush2.bf16.msra.mxu0 %v12780_v19  ;;  %v12840_v19 = vld [vmem:[#allocation5 + $0x140] ss:$48 sps:$4 sm:$0xff]  }
 0x11f   : > { %1656 = vmatprep.subr.bf16.mxu0 %v12785_v20  ;;  %1966 = vmatmul.mubr.bf16.gmra.mxu1 %v13944_v62 }
 0x120   : > { %11312 = vmatprep.mubr.msk.bf16.mxu1 %vm1195_vm0, %v13948_v1 }
 0x122   : > { %1657 = vmatpush2.bf16.msra.mxu0 %v12783_v22  ;;  %v12845_v22 = vld [vmem:[#allocation5 + $0xe4] ss:$48 sps:$4 sm:$0xff]  }
 0x123   : > { %1658 = vmatprep.subr.bf16.mxu0 %v12788_v23 }
 0x125   : > { %1520 = vmatmul.mubr.bf16.gmra.mxu0 %v13931_v51 }
 0x126   : > { %11274 = vmatprep.mubr.msk.bf16.mxu0 %vm1195_vm0, %v13934_v53  ;;  %1659 = vmatpush2.bf16.msra.mxu0 %v12786_v24 }
 0x127   : > { %1660 = vmatprep.subr.bf16.mxu0 %v12791_v26  ;;  %1976 = vmatmul.mubr.bf16.gmra.mxu1 %v13969_v21  ;;  %v12843_v26 = vld [vmem:[#allocation5 + $0xe0] ss:$48 sps:$4 sm:$0xff]  }
 0x128   : > { %11313 = vmatprep.mubr.msk.bf16.mxu1 %vm1195_vm0, %v13973_v11 }
 0x12a   : > { %1661 = vmatpush2.bf16.msra.mxu0 %v12789_v28 }
 0x12b   : > { %2016 = vmatprep.subr.bf16.mxu0 %v12821_v30 }
 0x12d   : > { %1530 = vmatmul.mubr.bf16.gmra.mxu0 %v13957_v10 }
 0x12e   : > { %11275 = vmatprep.mubr.msk.bf16.mxu0 %vm1195_vm0, %v13960_v7 }
 0x12f   : > { %1986 = vmatmul.mubr.bf16.gmra.mxu1 %v13989_v39 }
 0x130   : > { %11314 = vmatprep.mubr.msk.bf16.mxu1 %vm1195_vm0, %v13993_v41 }
 0x135   : > { %1540 = vmatmul.mubr.bf16.gmra.mxu0 %v13980_v29 }
 0x136   : > { %11276 = vmatprep.mubr.msk.bf16.mxu0 %vm1195_vm0, %v13983_v31 }
 0x137   : > { %1996 = vmatmul.mubr.bf16.gmra.mxu1 %v14005_v59 }
 0x138   : > { %11315 = vmatprep.mubr.msk.bf16.mxu1 %vm1195_vm0, %v14009_v60 }
 0x13d   : > { %v14108_v34 = vpop.f32.mrf.mxu0  ;;  %1550 = vmatmul.mubr.bf16.gmra.mxu0 %v14000_v50 }
 0x13e   : > { %11284 = vmatprep.mubr.msk.bf16.mxu0 %vm1195_vm0, %v13767_v13 }
 0x13f   : > { %v14113_v36 = vpop.f32.mrf.mxu0  ;;  %2006 = vmatmul.mubr.bf16.gmra.mxu1 %v14017_v3 }
 0x140   : > { %18871 = vst [vmem:[#allocation11_spill] sm:$0xff] %v14113_v36  ;;  %11332 = vmatprep.mubr.msk.bf16.mxu1 %vm1195_vm0, %v13767_v13  ;;  %v14169_v30 = vpop.f32.mrf.mxu1 }
 0x141   : > { %v14118_v37 = vpop.f32.mrf.mxu0  ;;  %18878 = vst [vmem:[#allocation18_spill] sm:$0xff] %v14169_v30 }
 0x143   : > { %v14122_v43 = vpop.f32.mrf.mxu0 }
 0x144   : > { %18872 = vst [vmem:[#allocation12_spill] sm:$0xff] %v14122_v43 }
 0x145   : > { %v14126_v49 = vpop.f32.mrf.mxu0  ;;  %1663 = vmatmul.mubr.bf16.vlgmr.msra.gmra.mxu0 %v13800_v46 }
 0x146   : > { %11285 = vmatprep.mubr.msk.bf16.mxu0 %vm1195_vm0, %v13805_v48  ;;  %2017 = vmatpush1.bf16.msra.mxu0 %v12819_v40  ;;  %v12848_v40 = vld [vmem:[#allocation5 + $0x84] ss:$48 sps:$4 sm:$0xff]  }
 0x147   : > { %v14131_v54 = vpop.f32.mrf.mxu0  ;;  %2018 = vmatprep.subr.bf16.mxu0 %v12833_v45  ;;  %2242 = vmatmul.mubr.bf16.vlgmr.msra.gmra.mxu1 %v13800_v46 }
 0x148   : > { %18873 = vst [vmem:[#allocation13_spill] sm:$0xff] %v14131_v54  ;;  %11333 = vmatprep.mubr.msk.bf16.mxu1 %vm1195_vm0, %v13805_v48 }
 0x149   : > { %v14136_v57 = vpop.f32.mrf.mxu0 }
 0x14a   : > { %2019 = vmatpush1.bf16.msra.mxu0 %v12831_v52  ;;  %v14176_v52 = vpop.f32.mrf.mxu1 }
 0x14b   : > { %v14140_v0 = vpop.f32.mrf.mxu0  ;;  %2020 = vmatprep.subr.bf16.mxu0 %v12836_v55  ;;  %18879 = vst [vmem:[#allocation19_spill] sm:$0xff] %v14176_v52  ;;  %v12857_v52 = vld [vmem:[#allocation5 + $0x3e4] ss:$48 sps:$4 sm:$0xff]  }
 0x14c   : > { %18874 = vst [vmem:[#allocation14_spill] sm:$0xff] %v14140_v0 }
 0x14d   : > { %v14144_v8 = vpop.f32.mrf.mxu0  ;;  %1673 = vmatmul.mubr.bf16.gmra.mxu0 %v13823_v56 }
 0x14e   : > { %11286 = vmatprep.mubr.msk.bf16.mxu0 %vm1195_vm0, %v13828_v58  ;;  %2021 = vmatpush1.bf16.msra.mxu0 %v12834_v63  ;;  %v12846_v63 = vld [vmem:[#allocation5 + $0x80] ss:$48 sps:$4 sm:$0xff]  }
 0x14f   : > { %v14149_v14 = vpop.f32.mrf.mxu0  ;;  %2022 = vmatprep.subr.bf16.mxu0 %v12839_v5  ;;  %2252 = vmatmul.mubr.bf16.gmra.mxu1 %v13823_v56 }
 0x150   : > { %18875 = vst [vmem:[#allocation15_spill] sm:$0xff] %v14149_v14  ;;  %11334 = vmatprep.mubr.msk.bf16.mxu1 %vm1195_vm0, %v13828_v58 }
 0x151   : > { %v14154_v15 = vpop.f32.mrf.mxu0 }
 0x152   : > { %2023 = vmatpush1.bf16.msra.mxu0 %v12837_v12  ;;  %v14182_v12 = vpop.f32.mrf.mxu1 }
 0x153   : > { %v14158_v20 = vpop.f32.mrf.mxu0  ;;  %2024 = vmatprep.subr.bf16.mxu0 %v12842_v9  ;;  %18881 = vst [vmem:[#allocation21_spill] sm:$0xff] %v14182_v12  ;;  %v12851_v9 = vld [vmem:[#allocation5 + $0x24] ss:$48 sps:$4 sm:$0xff]  }
 0x154   : > { %18876 = vst [vmem:[#allocation16_spill] sm:$0xff] %v14158_v20  ;;  %v14191_v6 = vpop.f32.mrf.mxu1 }
 0x155   : > { %v14162_v24 = vpop.f32.mrf.mxu0  ;;  %1683 = vmatmul.mubr.bf16.gmra.mxu0 %v13849_v2  ;;  %18882 = vst [vmem:[#allocation22_spill] sm:$0xff] %v14191_v6  ;;  %v12860_v6 = vld [vmem:[#allocation5 + $0x384] ss:$48 sps:$4 sm:$0xff]  }
 0x156   : > { %11287 = vmatprep.mubr.msk.bf16.mxu0 %vm1195_vm0, %v13854_v4  ;;  %2025 = vmatpush1.bf16.msra.mxu0 %v12840_v19  ;;  %v14199_v19 = vpop.f32.mrf.mxu1 }
 0x157   : > { %v14167_v28 = vpop.f32.mrf.mxu0  ;;  %2026 = vmatprep.subr.bf16.mxu0 %v12845_v22  ;;  %18884 = vst [vmem:[#allocation24_spill] sm:$0xff] %v14199_v19  ;;  %2262 = vmatmul.mubr.bf16.gmra.mxu1 %v13849_v2  ;;  %v12854_v22 = vld [vmem:[#allocation5 + $0x444] ss:$48 sps:$4 sm:$0xff]  }
 0x158   : > { %18877 = vst [vmem:[#allocation17_spill] sm:$0xff] %v14167_v28  ;;  %11335 = vmatprep.mubr.msk.bf16.mxu1 %vm1195_vm0, %v13854_v4  ;;  %v14206_v38 = vpop.f32.mrf.mxu1 }
 0x159   : > { %v14174_v45 = vpop.f32.mrf.mxu0  ;;  %18885 = vst [vmem:[#allocation25_spill] sm:$0xff] %v14206_v38 }
 0x15a   : > { %2027 = vmatpush1.bf16.msra.mxu0 %v12843_v26  ;;  %v14212_v61 = vpop.f32.mrf.mxu1 }
 0x15b   : > { %v14180_v5 = vpop.f32.mrf.mxu0  ;;  %2028 = vmatprep.subr.bf16.mxu0 %v12848_v40  ;;  %v12849_v40 = vld [vmem:[#allocation5 + $0x20] ss:$48 sps:$4 sm:$0xff]   ;;  %18887 = vst [vmem:[#allocation27_spill] sm:$0xff] %v14212_v61 }
 0x15c   : > { %18880 = vst [vmem:[#allocation20_spill] sm:$0xff] %v14180_v5  ;;  %v14221_v12 = vpop.f32.mrf.mxu1 }
 0x15d   : > { %v14188_v23 = vpop.f32.mrf.mxu0  ;;  %1693 = vmatmul.mubr.bf16.gmra.mxu0 %v13877_v16  ;;  %18888 = vst [vmem:[#allocation28_spill] sm:$0xff] %v14221_v12 }
 0x15e   : > { %11288 = vmatprep.mubr.msk.bf16.mxu0 %vm1195_vm0, %v13881_v18  ;;  %2029 = vmatpush1.bf16.msra.mxu0 %v12846_v63  ;;  %v12852_v63 = vld [vmem:[#allocation5 + $0x440] ss:$48 sps:$4 sm:$0xff]  }
 0x15f   : > { %v14197_v47 = vpop.f32.mrf.mxu0  ;;  %2030 = vmatprep.subr.bf16.mxu0 %v12851_v9  ;;  %v14229_v9 = vpop.f32.mrf.mxu1  ;;  %2272 = vmatmul.mubr.bf16.gmra.mxu1 %v13877_v16 }
 0x160   : > { %18883 = vst [vmem:[#allocation23_spill] sm:$0xff] %v14197_v47  ;;  %18890 = vst [vmem:[#allocation30_spill] sm:$0xff] %v14229_v9  ;;  %11336 = vmatprep.mubr.msk.bf16.mxu1 %vm1195_vm0, %v13881_v18  ;;  %v12863_v47 = vld [vmem:[#allocation5 + $0x324] ss:$48 sps:$4 sm:$0xff]  }
 0x161   : > { %v14204_v17 = vpop.f32.mrf.mxu0  ;;  %v14236_v61 = vpop.f32.mrf.mxu1 }
 0x162   : > { %2031 = vmatpush1.bf16.msra.mxu0 %v12849_v40  ;;  %18891 = vst [vmem:[#allocation31_spill] sm:$0xff] %v14236_v61 }
 0x163   : > { %v14210_v55 = vpop.f32.mrf.mxu0  ;;  %2040 = vmatprep.subr.bf16.mxu0 %v12854_v22  ;;  %v12855_v22 = vld [vmem:[#allocation5 + $0x3e0] ss:$48 sps:$4 sm:$0xff]   ;;  %v14242_v12 = vpop.f32.mrf.mxu1 }
 0x164   : > { %18886 = vst [vmem:[#allocation26_spill] sm:$0xff] %v14210_v55  ;;  %18893 = vst [vmem:[#allocation33_spill] sm:$0xff] %v14242_v12 }
 0x165   : > { %v14218_v30 = vpop.f32.mrf.mxu0  ;;  %1703 = vmatmul.mubr.bf16.gmra.mxu0 %v13905_v33  ;;  %v14251_v5 = vpop.f32.mrf.mxu1 }
 0x166   : > { %11289 = vmatprep.mubr.msk.bf16.mxu0 %vm1195_vm0, %v13908_v35  ;;  %2041 = vmatpush2.bf16.msra.mxu0 %v12852_v63  ;;  %v12858_v63 = vld [vmem:[#allocation5 + $0x380] ss:$48 sps:$4 sm:$0xff]   ;;  %18894 = vst [vmem:[#allocation34_spill] sm:$0xff] %v14251_v5 }
 0x167   : > { %v14227_v26 = vpop.f32.mrf.mxu0  ;;  %2042 = vmatprep.subr.bf16.mxu0 %v12857_v52  ;;  %v14259_v52 = vpop.f32.mrf.mxu1  ;;  %2282 = vmatmul.mubr.bf16.gmra.mxu1 %v13905_v33 }
 0x168   : > { %18889 = vst [vmem:[#allocation29_spill] sm:$0xff] %v14227_v26  ;;  %18896 = vst [vmem:[#allocation36_spill] sm:$0xff] %v14259_v52  ;;  %11337 = vmatprep.mubr.msk.bf16.mxu1 %vm1195_vm0, %v13908_v35 }
 0x169   : > { %v14234_v19 = vpop.f32.mrf.mxu0  ;;  %v14266_v9 = vpop.f32.mrf.mxu1 }
 0x16a   : > { %2043 = vmatpush2.bf16.msra.mxu0 %v12855_v22  ;;  %18897 = vst [vmem:[#allocation37_spill] sm:$0xff] %v14266_v9 }
 0x16b   : > { %v14240_v38 = vpop.f32.mrf.mxu0  ;;  %2044 = vmatprep.subr.bf16.mxu0 %v12860_v6  ;;  %v12861_v6 = vld [vmem:[#allocation5 + $0x320] ss:$48 sps:$4 sm:$0xff]   ;;  %v14272_v22 = vpop.f32.mrf.mxu1 }
 0x16c   : > { %18892 = vst [vmem:[#allocation32_spill] sm:$0xff] %v14240_v38  ;;  %18899 = vst [vmem:[#allocation39_spill] sm:$0xff] %v14272_v22 }
 0x16d   : > { %v14248_v28 = vpop.f32.mrf.mxu0  ;;  %1713 = vmatmul.mubr.bf16.gmra.mxu0 %v13931_v51  ;;  %v14281_v26 = vpop.f32.mrf.mxu1 }
 0x16e   : > { %11290 = vmatprep.mubr.msk.bf16.mxu0 %vm1195_vm0, %v13934_v53  ;;  %2045 = vmatpush2.bf16.msra.mxu0 %v12858_v63  ;;  %18900 = vst [vmem:[#allocation40_spill] sm:$0xff] %v14281_v26 }
 0x16f   : > { %v14257_v40 = vpop.f32.mrf.mxu0  ;;  %2046 = vmatprep.subr.bf16.mxu0 %v12863_v47  ;;  %v14289_v38 = vpop.f32.mrf.mxu1  ;;  %2292 = vmatmul.mubr.bf16.gmra.mxu1 %v13931_v51 }
 0x170   : > { %18895 = vst [vmem:[#allocation35_spill] sm:$0xff] %v14257_v40  ;;  %18902 = vst [vmem:[#allocation42_spill] sm:$0xff] %v14289_v38  ;;  %11338 = vmatprep.mubr.msk.bf16.mxu1 %vm1195_vm0, %v13934_v53  ;;  %v18672_v38 = vmov 0.0  }
 0x171   : > { %v14264_v55 = vpop.f32.mrf.mxu0  ;;  %v14296_v61 = vpop.f32.mrf.mxu1  ;;  %11796 = vmatprep.subr.bf16.mxu1 %v18672_v38 }
 0x172   : > { %2047 = vmatpush2.bf16.msra.mxu0 %v12861_v6  ;;  %18903 = vst [vmem:[#allocation43_spill] sm:$0xff] %v14296_v61 }
 0x173   : > { %v14270_v63 = vpop.f32.mrf.mxu0  ;;  %v14302_v40 = vpop.f32.mrf.mxu1  ;;  %11790 = vmatprep.subr.bf16.mxu0 %v18672_v38 }
 0x174   : > { %18898 = vst [vmem:[#allocation38_spill] sm:$0xff] %v14270_v63  ;;  %18905 = vst [vmem:[#allocation45_spill] sm:$0xff] %v14302_v40 }
 0x175   : > { %v14278_v5 = vpop.f32.mrf.mxu0  ;;  %1723 = vmatmul.mubr.bf16.gmra.mxu0 %v13957_v10  ;;  %v14311_v63 = vpop.f32.mrf.mxu1 }
 0x176   : > { %11291 = vmatprep.mubr.msk.bf16.mxu0 %vm1195_vm0, %v13960_v7  ;;  %18906 = vst [vmem:[#allocation46_spill] sm:$0xff] %v14311_v63 }
 0x177   : > { %v14287_v12 = vpop.f32.mrf.mxu0  ;;  %v14319_v20 = vpop.f32.mrf.mxu1  ;;  %2302 = vmatmul.mubr.bf16.gmra.mxu1 %v13957_v10 }
 0x178   : > { %18901 = vst [vmem:[#allocation41_spill] sm:$0xff] %v14287_v12  ;;  %18908 = vst [vmem:[#allocation48_spill] sm:$0xff] %v14319_v20  ;;  %11339 = vmatprep.mubr.msk.bf16.mxu1 %vm1195_vm0, %v13960_v7 }
 0x179   : > { %v14294_v47 = vpop.f32.mrf.mxu0  ;;  %v14326_v6 = vpop.f32.mrf.mxu1 }
 0x17a   : > { %18909 = vst [vmem:[#allocation49_spill] sm:$0xff] %v14326_v6 }
 0x17b   : > { %v14300_v22 = vpop.f32.mrf.mxu0  ;;  %v14332_v12 = vpop.f32.mrf.mxu1 }
 0x17c   : > { %18904 = vst [vmem:[#allocation44_spill] sm:$0xff] %v14300_v22  ;;  %18911 = vst [vmem:[#allocation51_spill] sm:$0xff] %v14332_v12 }
 0x17d   : > { %v14308_v26 = vpop.f32.mrf.mxu0  ;;  %1733 = vmatmul.mubr.bf16.gmra.mxu0 %v13980_v29  ;;  %v14341_v22 = vpop.f32.mrf.mxu1 }
 0x17e   : > { %11292 = vmatprep.mubr.msk.bf16.mxu0 %vm1195_vm0, %v13983_v31  ;;  %18912 = vst [vmem:[#allocation52_spill] sm:$0xff] %v14341_v22 }
 0x17f   : > { %v14317_v14 = vpop.f32.mrf.mxu0  ;;  %v14349_v0 = vpop.f32.mrf.mxu1  ;;  %2312 = vmatmul.mubr.bf16.gmra.mxu1 %v13980_v29 }
 0x180   : > { %18907 = vst [vmem:[#allocation47_spill] sm:$0xff] %v14317_v14  ;;  %18914 = vst [vmem:[#allocation54_spill] sm:$0xff] %v14349_v0  ;;  %11340 = vmatprep.mubr.msk.bf16.mxu1 %vm1195_vm0, %v13983_v31 }
 0x181   : > { %v14324_v9 = vpop.f32.mrf.mxu0  ;;  %v14356_v52 = vpop.f32.mrf.mxu1 }
 0x182   : > { %18915 = vst [vmem:[#allocation55_spill] sm:$0xff] %v14356_v52 }
 0x183   : > { %v14330_v40 = vpop.f32.mrf.mxu0  ;;  %v14362_v14 = vpop.f32.mrf.mxu1 }
 0x184   : > { %18910 = vst [vmem:[#allocation50_spill] sm:$0xff] %v14330_v40  ;;  %18917 = vst [vmem:[#allocation57_spill] sm:$0xff] %v14362_v14 }
 0x185   : > { %v14338_v63 = vpop.f32.mrf.mxu0  ;;  %1743 = vmatmul.mubr.bf16.gmra.mxu0 %v14000_v50  ;;  %v14373_v20 = vpop.f32.mrf.mxu1 }
 0x186   : > { %11293 = vmatprep.mubr.msk.bf16.mxu0 %vm1195_vm0, %v13780_v32  ;;  %18919 = vst [vmem:[#allocation59_spill] sm:$0xff] %v14373_v20 }
 0x187   : > { %v14347_v54 = vpop.f32.mrf.mxu0  ;;  %v14381_v38 = vpop.f32.mrf.mxu1  ;;  %2322 = vmatmul.mubr.bf16.gmra.mxu1 %v14000_v50 }
 0x188   : > { %18913 = vst [vmem:[#allocation53_spill] sm:$0xff] %v14347_v54  ;;  %18921 = vst [vmem:[#allocation61_spill] sm:$0xff] %v14381_v38  ;;  %11341 = vmatprep.mubr.msk.bf16.mxu1 %vm1195_vm0, %v13780_v32 }
 0x189   : > { %v14354_v61 = vpop.f32.mrf.mxu0  ;;  %v14388_v6 = vpop.f32.mrf.mxu1 }
 0x18a   : > { %18923 = vst [vmem:[#allocation63_spill] sm:$0xff] %v14388_v6 }
 0x18b   : > { %v14360_v12 = vpop.f32.mrf.mxu0  ;;  %v14394_v54 = vpop.f32.mrf.mxu1 }
 0x18c   : > { %18916 = vst [vmem:[#allocation56_spill] sm:$0xff] %v14360_v12  ;;  %18925 = vst [vmem:[#allocation65_spill] sm:$0xff] %v14394_v54 }
 0x18d   : > { %v14370_v40 = vpop.f32.mrf.mxu0  ;;  %1753 = vmatmul.mubr.bf16.gmra.mxu0 %v13892_v25  ;;  %v14403_v12 = vpop.f32.mrf.mxu1 }
 0x18e   : > { %18918 = vst [vmem:[#allocation58_spill] sm:$0xff] %v14370_v40  ;;  %11294 = vmatprep.mubr.msk.bf16.mxu0 %vm1195_vm0, %v13896_v27  ;;  %18927 = vst [vmem:[#allocation67_spill] sm:$0xff] %v14403_v12 }
 0x18f   : > { %v14379_v43 = vpop.f32.mrf.mxu0  ;;  %2332 = vmatmul.mubr.bf16.gmra.mxu1 %v13892_v25 }
 0x190   : > { %18920 = vst [vmem:[#allocation60_spill] sm:$0xff] %v14379_v43  ;;  %11342 = vmatprep.mubr.msk.bf16.mxu1 %vm1195_vm0, %v13896_v27 }
 0x191   : > { %v14386_v22 = vpop.f32.mrf.mxu0 }
 0x192   : > { %18922 = vst [vmem:[#allocation62_spill] sm:$0xff] %v14386_v22  ;;  %v14411_v22 = vpop.f32.mrf.mxu1 }
 0x193   : > { %v14392_v14 = vpop.f32.mrf.mxu0  ;;  %18929 = vst [vmem:[#allocation69_spill] sm:$0xff] %v14411_v22 }
 0x194   : > { %18924 = vst [vmem:[#allocation64_spill] sm:$0xff] %v14392_v14  ;;  %v14418_v36 = vpop.f32.mrf.mxu1 }
 0x195   : > { %v14400_v20 = vpop.f32.mrf.mxu0  ;;  %1763 = vmatmul.mubr.bf16.gmra.mxu0 %v13918_v42  ;;  %18931 = vst [vmem:[#allocation71_spill] sm:$0xff] %v14418_v36 }
 0x196   : > { %18926 = vst [vmem:[#allocation66_spill] sm:$0xff] %v14400_v20  ;;  %11295 = vmatprep.mubr.msk.bf16.mxu0 %vm1195_vm0, %v13922_v44  ;;  %v14424_v43 = vpop.f32.mrf.mxu1 }
 0x197   : > { %v14409_v40 = vpop.f32.mrf.mxu0  ;;  %18933 = vst [vmem:[#allocation73_spill] sm:$0xff] %v14424_v43  ;;  %2342 = vmatmul.mubr.bf16.gmra.mxu1 %v13918_v42 }
 0x198   : > { %18928 = vst [vmem:[#allocation68_spill] sm:$0xff] %v14409_v40  ;;  %v14433_v14 = vpop.f32.mrf.mxu1  ;;  %11343 = vmatprep.mubr.msk.bf16.mxu1 %vm1195_vm0, %v13922_v44 }
 0x199   : > { %v14416_v52 = vpop.f32.mrf.mxu0  ;;  %18935 = vst [vmem:[#allocation75_spill] sm:$0xff] %v14433_v14 }
 0x19a   : > { %18930 = vst [vmem:[#allocation70_spill] sm:$0xff] %v14416_v52  ;;  %v14441_v52 = vpop.f32.mrf.mxu1 }
 0x19b   : > { %v14422_v54 = vpop.f32.mrf.mxu0  ;;  %18937 = vst [vmem:[#allocation77_spill] sm:$0xff] %v14441_v52 }
 0x19c   : > { %18932 = vst [vmem:[#allocation72_spill] sm:$0xff] %v14422_v54  ;;  %v14448_v0 = vpop.f32.mrf.mxu1 }
 0x19d   : > { %v14430_v12 = vpop.f32.mrf.mxu0  ;;  %1773 = vmatmul.mubr.bf16.gmra.mxu0 %v13944_v62  ;;  %18939 = vst [vmem:[#allocation79_spill] sm:$0xff] %v14448_v0 }
 0x19e   : > { %18934 = vst [vmem:[#allocation74_spill] sm:$0xff] %v14430_v12  ;;  %11296 = vmatprep.mubr.msk.bf16.mxu0 %vm1195_vm0, %v13948_v1  ;;  %v14454_v40 = vpop.f32.mrf.mxu1 }
 0x19f   : > { %v14439_v20 = vpop.f32.mrf.mxu0  ;;  %18941 = vst [vmem:[#allocation81_spill] sm:$0xff] %v14454_v40  ;;  %2352 = vmatmul.mubr.bf16.gmra.mxu1 %v13944_v62 }
 0x1a0   : > { %18936 = vst [vmem:[#allocation76_spill] sm:$0xff] %v14439_v20  ;;  %v14463_v54 = vpop.f32.mrf.mxu1  ;;  %11344 = vmatprep.mubr.msk.bf16.mxu1 %vm1195_vm0, %v13948_v1 }
 0x1a1   : > { %v14446_v6 = vpop.f32.mrf.mxu0  ;;  %18943 = vst [vmem:[#allocation83_spill] sm:$0xff] %v14463_v54 }
 0x1a2   : > { %18938 = vst [vmem:[#allocation78_spill] sm:$0xff] %v14446_v6  ;;  %v14471_v6 = vpop.f32.mrf.mxu1 }
 0x1a3   : > { %v14452_v43 = vpop.f32.mrf.mxu0  ;;  %18945 = vst [vmem:[#allocation85_spill] sm:$0xff] %v14471_v6 }
 0x1a4   : > { %18940 = vst [vmem:[#allocation80_spill] sm:$0xff] %v14452_v43  ;;  %v14478_v38 = vpop.f32.mrf.mxu1 }
 0x1a5   : > { %v14460_v14 = vpop.f32.mrf.mxu0  ;;  %1783 = vmatmul.mubr.bf16.gmra.mxu0 %v13969_v21  ;;  %18947 = vst [vmem:[#allocation87_spill] sm:$0xff] %v14478_v38 }
 0x1a6   : > { %18942 = vst [vmem:[#allocation82_spill] sm:$0xff] %v14460_v14  ;;  %11297 = vmatprep.mubr.msk.bf16.mxu0 %vm1195_vm0, %v13973_v11  ;;  %v14484_v20 = vpop.f32.mrf.mxu1 }
 0x1a7   : > { %v14469_v12 = vpop.f32.mrf.mxu0  ;;  %18949 = vst [vmem:[#allocation89_spill] sm:$0xff] %v14484_v20  ;;  %2362 = vmatmul.mubr.bf16.gmra.mxu1 %v13969_v21 }
 0x1a8   : > { %18944 = vst [vmem:[#allocation84_spill] sm:$0xff] %v14469_v12  ;;  %v14493_v43 = vpop.f32.mrf.mxu1  ;;  %11345 = vmatprep.mubr.msk.bf16.mxu1 %vm1195_vm0, %v13973_v11 }
 0x1a9   : > { %v14476_v36 = vpop.f32.mrf.mxu0  ;;  %18951 = vst [vmem:[#allocation91_spill] sm:$0xff] %v14493_v43 }
 0x1aa   : > { %18946 = vst [vmem:[#allocation86_spill] sm:$0xff] %v14476_v36  ;;  %v14501_v36 = vpop.f32.mrf.mxu1 }
 0x1ab   : > { %v14482_v40 = vpop.f32.mrf.mxu0  ;;  %18953 = vst [vmem:[#allocation93_spill] sm:$0xff] %v14501_v36 }
 0x1ac   : > { %18948 = vst [vmem:[#allocation88_spill] sm:$0xff] %v14482_v40  ;;  %v14508_v22 = vpop.f32.mrf.mxu1 }
 0x1ad   : > { %v14490_v54 = vpop.f32.mrf.mxu0  ;;  %1793 = vmatmul.mubr.bf16.gmra.mxu0 %v13989_v39  ;;  %18955 = vst [vmem:[#allocation95_spill] sm:$0xff] %v14508_v22 }
 0x1ae   : > { %18950 = vst [vmem:[#allocation90_spill] sm:$0xff] %v14490_v54  ;;  %11298 = vmatprep.mubr.msk.bf16.mxu0 %vm1195_vm0, %v13993_v41  ;;  %v14514_v12 = vpop.f32.mrf.mxu1 }
 0x1af   : > { %v14499_v14 = vpop.f32.mrf.mxu0  ;;  %18957 = vst [vmem:[#allocation97_spill] sm:$0xff] %v14514_v12  ;;  %2372 = vmatmul.mubr.bf16.gmra.mxu1 %v13989_v39 }
 0x1b0   : > { %18952 = vst [vmem:[#allocation92_spill] sm:$0xff] %v14499_v14  ;;  %v14523_v40 = vpop.f32.mrf.mxu1  ;;  %11346 = vmatprep.mubr.msk.bf16.mxu1 %vm1195_vm0, %v13993_v41 }
 0x1b1   : > { %v14506_v0 = vpop.f32.mrf.mxu0  ;;  %18959 = vst [vmem:[#allocation99_spill] sm:$0xff] %v14523_v40 }
 0x1b2   : > { %18954 = vst [vmem:[#allocation94_spill] sm:$0xff] %v14506_v0  ;;  %v14529_v22 = vpop.f32.mrf.mxu1 }
 0x1b3   : > { %v14512_v20 = vpop.f32.mrf.mxu0  ;;  %18961 = vst [vmem:[#allocation101_spill] sm:$0xff] %v14529_v22 }
 0x1b4   : > { %18956 = vst [vmem:[#allocation96_spill] sm:$0xff] %v14512_v20  ;;  %v14536_v38 = vpop.f32.mrf.mxu1 }
 0x1b5   : > { %v14520_v43 = vpop.f32.mrf.mxu0  ;;  %1803 = vmatmul.mubr.bf16.gmra.mxu0 %v14005_v59  ;;  %18962 = vst [vmem:[#allocation102_spill] sm:$0xff] %v14536_v38 }
 0x1b6   : > { %18958 = vst [vmem:[#allocation98_spill] sm:$0xff] %v14520_v43  ;;  %11299 = vmatprep.mubr.msk.bf16.mxu0 %vm1195_vm0, %v14009_v60  ;;  %v14542_v12 = vpop.f32.mrf.mxu1 }
 0x1b7   : > { %v14527_v6 = vpop.f32.mrf.mxu0  ;;  %18964 = vst [vmem:[#allocation104_spill] sm:$0xff] %v14542_v12  ;;  %2382 = vmatmul.mubr.bf16.gmra.mxu1 %v14005_v59 }
 0x1b8   : > { %18960 = vst [vmem:[#allocation100_spill] sm:$0xff] %v14527_v6  ;;  %v14551_v0 = vpop.f32.mrf.mxu1  ;;  %11347 = vmatprep.mubr.msk.bf16.mxu1 %vm1195_vm0, %v14009_v60 }
 0x1b9   : > { %v14534_v52 = vpop.f32.mrf.mxu0  ;;  %18966 = vst [vmem:[#allocation106_spill] sm:$0xff] %v14551_v0 }
 0x1ba   : > { %v14557_v38 = vpop.f32.mrf.mxu1 }
 0x1bb   : > { %v14540_v40 = vpop.f32.mrf.mxu0  ;;  %18968 = vst [vmem:[#allocation108_spill] sm:$0xff] %v14557_v38 }
 0x1bc   : > { %18963 = vst [vmem:[#allocation103_spill] sm:$0xff] %v14540_v40  ;;  %v14564_v20 = vpop.f32.mrf.mxu1 }
 0x1bd   : > { %v14548_v54 = vpop.f32.mrf.mxu0  ;;  %1813 = vmatmul.mubr.bf16.gmra.mxu0 %v14017_v3  ;;  %18970 = vst [vmem:[#allocation110_spill] sm:$0xff] %v14564_v20 }
 0x1be   : > { %18965 = vst [vmem:[#allocation105_spill] sm:$0xff] %v14548_v54  ;;  %11316 = vmatprep.mubr.msk.bf16.mxu0 %vm1195_vm0, %v13767_v13  ;;  %v14570_v12 = vpop.f32.mrf.mxu1  ;;  %v18977_v13 = vmov 0.0  }
 0x1bf   : > { %v14555_v36 = vpop.f32.mrf.mxu0  ;;  %18972 = vst [vmem:[#allocation112_spill] sm:$0xff] %v14570_v12  ;;  %2392 = vmatmul.mubr.bf16.gmra.mxu1 %v14017_v3 }
 0x1c0   : > { %18967 = vst [vmem:[#allocation107_spill] sm:$0xff] %v14555_v36  ;;  %v14579_v43 = vpop.f32.mrf.mxu1  ;;  %11798 = vmatprep.mubr.msk.bf16.mxu1 %vm13603_vm1, %v18977_v13 }
 0x1c1   : > { %v14562_v14 = vpop.f32.mrf.mxu0  ;;  %18974 = vst [vmem:[#allocation114_spill] sm:$0xff] %v14579_v43 }
 0x1c2   : > { %18969 = vst [vmem:[#allocation109_spill] sm:$0xff] %v14562_v14  ;;  %v14585_v20 = vpop.f32.mrf.mxu1 }
 0x1c3   : > { %v14568_v0 = vpop.f32.mrf.mxu0  ;;  %18976 = vst [vmem:[#allocation116_spill] sm:$0xff] %v14585_v20 }
 0x1c4   : > { %18971 = vst [vmem:[#allocation111_spill] sm:$0xff] %v14568_v0  ;;  %v14592_v36 = vpop.f32.mrf.mxu1 }
 0x1c5   : > { %v14576_v40 = vpop.f32.mrf.mxu0  ;;  %2049 = vmatmul.mubr.bf16.vlgmr.msra.gmra.mxu0 %v13800_v46  ;;  %18979 = vst [vmem:[#allocation118_spill] sm:$0xff] %v14592_v36 }
 0x1c6   : > { %18973 = vst [vmem:[#allocation113_spill] sm:$0xff] %v14576_v40  ;;  %11317 = vmatprep.mubr.msk.bf16.mxu0 %vm1195_vm0, %v13805_v48  ;;  %v14598_v48 = vpop.f32.mrf.mxu1 }
 0x1c7   : > { %v14583_v22 = vpop.f32.mrf.mxu0  ;;  %18981 = vst [vmem:[#allocation120_spill] sm:$0xff] %v14598_v48 }
 0x1c8   : > { %18975 = vst [vmem:[#allocation115_spill] sm:$0xff] %v14583_v22  ;;  %v14607_v54 = vpop.f32.mrf.mxu1 }
 0x1c9   : > { %v14590_v6 = vpop.f32.mrf.mxu0  ;;  %18983 = vst [vmem:[#allocation122_spill] sm:$0xff] %v14607_v54 }
 0x1ca   : > { %18978 = vst [vmem:[#allocation117_spill] sm:$0xff] %v14590_v6  ;;  %v14613_v36 = vpop.f32.mrf.mxu1 }
 0x1cb   : > { %v14596_v43 = vpop.f32.mrf.mxu0  ;;  %18985 = vst [vmem:[#allocation124_spill] sm:$0xff] %v14613_v36 }
 0x1cc   : > { %18980 = vst [vmem:[#allocation119_spill] sm:$0xff] %v14596_v43  ;;  %v14617_v40 = vpop.f32.mrf.mxu1 }
 0x1cd   : > { %v14604_v12 = vpop.f32.mrf.mxu0  ;;  %2059 = vmatmul.mubr.bf16.gmra.mxu0 %v13823_v56  ;;  %18987 = vst [vmem:[#allocation126_spill] sm:$0xff] %v14617_v40 }
 0x1ce   : > { %18982 = vst [vmem:[#allocation121_spill] sm:$0xff] %v14604_v12  ;;  %11318 = vmatprep.mubr.msk.bf16.mxu0 %vm1195_vm0, %v13828_v58  ;;  %v14623_v22 = vpop.f32.mrf.mxu1 }
 0x1cf   : > { %v14611_v46 = vpop.f32.mrf.mxu0  ;;  %18989 = vst [vmem:[#allocation128_spill] sm:$0xff] %v14623_v22 }
 0x1d0   : > { %18984 = vst [vmem:[#allocation123_spill] sm:$0xff] %v14611_v46  ;;  %v14632_v43 = vpop.f32.mrf.mxu1 }
 0x1d1   : > { %v14615_v14 = vpop.f32.mrf.mxu0  ;;  %18991 = vst [vmem:[#allocation130_spill] sm:$0xff] %v14632_v43 }
 0x1d2   : > { %18986 = vst [vmem:[#allocation125_spill] sm:$0xff] %v14615_v14  ;;  %v14638_v40 = vpop.f32.mrf.mxu1 }
 0x1d3   : > { %v14621_v38 = vpop.f32.mrf.mxu0  ;;  %18993 = vst [vmem:[#allocation132_spill] sm:$0xff] %v14638_v40 }
 0x1d4   : > { %18988 = vst [vmem:[#allocation127_spill] sm:$0xff] %v14621_v38  ;;  %v14642_v14 = vpop.f32.mrf.mxu1 }
 0x1d5   : > { %v14629_v54 = vpop.f32.mrf.mxu0  ;;  %2069 = vmatmul.mubr.bf16.gmra.mxu0 %v13849_v2  ;;  %18995 = vst [vmem:[#allocation134_spill] sm:$0xff] %v14642_v14 }
 0x1d6   : > { %18990 = vst [vmem:[#allocation129_spill] sm:$0xff] %v14629_v54  ;;  %11319 = vmatprep.mubr.msk.bf16.mxu0 %vm1195_vm0, %v13854_v4  ;;  %v14648_v46 = vpop.f32.mrf.mxu1 }
 0x1d7   : > { %v14636_v0 = vpop.f32.mrf.mxu0  ;;  %18997 = vst [vmem:[#allocation136_spill] sm:$0xff] %v14648_v46 }
 0x1d8   : > { %18992 = vst [vmem:[#allocation131_spill] sm:$0xff] %v14636_v0  ;;  %v14657_v38 = vpop.f32.mrf.mxu1 }
 0x1d9   : > { %v14640_v12 = vpop.f32.mrf.mxu0  ;;  %18999 = vst [vmem:[#allocation138_spill] sm:$0xff] %v14657_v38 }
 0x1da   : > { %18994 = vst [vmem:[#allocation133_spill] sm:$0xff] %v14640_v12  ;;  %v14663_v14 = vpop.f32.mrf.mxu1 }
 0x1db   : > { %v14646_v58 = vpop.f32.mrf.mxu0  ;;  %19001 = vst [vmem:[#allocation140_spill] sm:$0xff] %v14663_v14 }
 0x1dc   : > { %18996 = vst [vmem:[#allocation135_spill] sm:$0xff] %v14646_v58  ;;  %v14667_v22 = vpop.f32.mrf.mxu1 }
 0x1dd   : > { %v14654_v43 = vpop.f32.mrf.mxu0  ;;  %2079 = vmatmul.mubr.bf16.gmra.mxu0 %v13877_v16  ;;  %19003 = vst [vmem:[#allocation142_spill] sm:$0xff] %v14667_v22 }
 0x1de   : > { %18998 = vst [vmem:[#allocation137_spill] sm:$0xff] %v14654_v43  ;;  %11320 = vmatprep.mubr.msk.bf16.mxu0 %vm1195_vm0, %v13881_v18  ;;  %v14673_v0 = vpop.f32.mrf.mxu1 }
 0x1df   : > { %v14661_v56 = vpop.f32.mrf.mxu0  ;;  %19005 = vst [vmem:[#allocation144_spill] sm:$0xff] %v14673_v0 }
 0x1e0   : > { %19000 = vst [vmem:[#allocation139_spill] sm:$0xff] %v14661_v56  ;;  %v14682_v58 = vpop.f32.mrf.mxu1 }
 0x1e1   : > { %v14665_v36 = vpop.f32.mrf.mxu0  ;;  %19007 = vst [vmem:[#allocation146_spill] sm:$0xff] %v14682_v58 }
 0x1e2   : > { %19002 = vst [vmem:[#allocation141_spill] sm:$0xff] %v14665_v36  ;;  %v14688_v22 = vpop.f32.mrf.mxu1 }
 0x1e3   : > { %v14671_v4 = vpop.f32.mrf.mxu0  ;;  %19009 = vst [vmem:[#allocation148_spill] sm:$0xff] %v14688_v22 }
 0x1e4   : > { %19004 = vst [vmem:[#allocation143_spill] sm:$0xff] %v14671_v4  ;;  %v14692_v36 = vpop.f32.mrf.mxu1 }
 0x1e5   : > { %v14679_v38 = vpop.f32.mrf.mxu0  ;;  %2089 = vmatmul.mubr.bf16.gmra.mxu0 %v13905_v33  ;;  %19011 = vst [vmem:[#allocation150_spill] sm:$0xff] %v14692_v36 }
 0x1e6   : > { %19006 = vst [vmem:[#allocation145_spill] sm:$0xff] %v14679_v38  ;;  %11321 = vmatprep.mubr.msk.bf16.mxu0 %vm1195_vm0, %v13908_v35  ;;  %v14698_v56 = vpop.f32.mrf.mxu1 }
 0x1e7   : > { %v14686_v2 = vpop.f32.mrf.mxu0  ;;  %19013 = vst [vmem:[#allocation152_spill] sm:$0xff] %v14698_v56 }
 0x1e8   : > { %19008 = vst [vmem:[#allocation147_spill] sm:$0xff] %v14686_v2  ;;  %v14707_v4 = vpop.f32.mrf.mxu1 }
 0x1e9   : > { %v14690_v43 = vpop.f32.mrf.mxu0  ;;  %19015 = vst [vmem:[#allocation154_spill] sm:$0xff] %v14707_v4 }
 0x1ea   : > { %19010 = vst [vmem:[#allocation149_spill] sm:$0xff] %v14690_v43  ;;  %v14713_v36 = vpop.f32.mrf.mxu1 }
 0x1eb   : > { %v14696_v18 = vpop.f32.mrf.mxu0  ;;  %19017 = vst [vmem:[#allocation156_spill] sm:$0xff] %v14713_v36 }
 0x1ec   : > { %19012 = vst [vmem:[#allocation151_spill] sm:$0xff] %v14696_v18  ;;  %v14717_v0 = vpop.f32.mrf.mxu1 }
 0x1ed   : > { %v14704_v58 = vpop.f32.mrf.mxu0  ;;  %2099 = vmatmul.mubr.bf16.gmra.mxu0 %v13931_v51  ;;  %19019 = vst [vmem:[#allocation158_spill] sm:$0xff] %v14717_v0 }
 0x1ee   : > { %19014 = vst [vmem:[#allocation153_spill] sm:$0xff] %v14704_v58  ;;  %11322 = vmatprep.mubr.msk.bf16.mxu0 %vm1195_vm0, %v13934_v53  ;;  %v14723_v2 = vpop.f32.mrf.mxu1 }
 0x1ef   : > { %v14711_v16 = vpop.f32.mrf.mxu0  ;;  %19021 = vst [vmem:[#allocation160_spill] sm:$0xff] %v14723_v2 }
 0x1f0   : > { %19016 = vst [vmem:[#allocation155_spill] sm:$0xff] %v14711_v16  ;;  %v14732_v18 = vpop.f32.mrf.mxu1 }
 0x1f1   : > { %v14715_v14 = vpop.f32.mrf.mxu0  ;;  %19023 = vst [vmem:[#allocation162_spill] sm:$0xff] %v14732_v18 }
 0x1f2   : > { %19018 = vst [vmem:[#allocation157_spill] sm:$0xff] %v14715_v14  ;;  %v14738_v0 = vpop.f32.mrf.mxu1 }
 0x1f3   : > { %v14721_v35 = vpop.f32.mrf.mxu0  ;;  %19025 = vst [vmem:[#allocation164_spill] sm:$0xff] %v14738_v0 }
 0x1f4   : > { %19020 = vst [vmem:[#allocation159_spill] sm:$0xff] %v14721_v35  ;;  %v14742_v14 = vpop.f32.mrf.mxu1 }
 0x1f5   : > { %v14729_v4 = vpop.f32.mrf.mxu0  ;;  %2109 = vmatmul.mubr.bf16.gmra.mxu0 %v13957_v10  ;;  %19027 = vst [vmem:[#allocation166_spill] sm:$0xff] %v14742_v14 }
 0x1f6   : > { %19022 = vst [vmem:[#allocation161_spill] sm:$0xff] %v14729_v4  ;;  %11323 = vmatprep.mubr.msk.bf16.mxu0 %vm1195_vm0, %v13960_v7  ;;  %v14748_v16 = vpop.f32.mrf.mxu1 }
 0x1f7   : > { %v14736_v33 = vpop.f32.mrf.mxu0  ;;  %19029 = vst [vmem:[#allocation168_spill] sm:$0xff] %v14748_v16 }
 0x1f8   : > { %19024 = vst [vmem:[#allocation163_spill] sm:$0xff] %v14736_v33  ;;  %v14757_v35 = vpop.f32.mrf.mxu1 }
 0x1f9   : > { %v14740_v58 = vpop.f32.mrf.mxu0  ;;  %19031 = vst [vmem:[#allocation170_spill] sm:$0xff] %v14757_v35 }
 0x1fa   : > { %19026 = vst [vmem:[#allocation165_spill] sm:$0xff] %v14740_v58  ;;  %v14763_v14 = vpop.f32.mrf.mxu1 }
 0x1fb   : > { %v14746_v53 = vpop.f32.mrf.mxu0  ;;  %19033 = vst [vmem:[#allocation172_spill] sm:$0xff] %v14763_v14 }
 0x1fc   : > { %19028 = vst [vmem:[#allocation167_spill] sm:$0xff] %v14746_v53  ;;  %v14767_v2 = vpop.f32.mrf.mxu1 }
 0x1fd   : > { %v14754_v18 = vpop.f32.mrf.mxu0  ;;  %2119 = vmatmul.mubr.bf16.gmra.mxu0 %v13980_v29  ;;  %19035 = vst [vmem:[#allocation174_spill] sm:$0xff] %v14767_v2 }
 0x1fe   : > { %19030 = vst [vmem:[#allocation169_spill] sm:$0xff] %v14754_v18  ;;  %11324 = vmatprep.mubr.msk.bf16.mxu0 %vm1195_vm0, %v13983_v31  ;;  %v14773_v33 = vpop.f32.mrf.mxu1 }
 0x1ff   : > { %v14761_v51 = vpop.f32.mrf.mxu0  ;;  %19037 = vst [vmem:[#allocation176_spill] sm:$0xff] %v14773_v33 }
 0x200   : > { %19032 = vst [vmem:[#allocation171_spill] sm:$0xff] %v14761_v51  ;;  %v14780_v53 = vpop.f32.mrf.mxu1 }
 0x201   : > { %v14765_v36 = vpop.f32.mrf.mxu0  ;;  %19038 = vst [vmem:[#allocation177_spill] sm:$0xff] %v14780_v53 }
 0x202   : > { %19034 = vst [vmem:[#allocation173_spill] sm:$0xff] %v14765_v36  ;;  %v14786_v10 = vpop.f32.mrf.mxu1 }
 0x203   : > { %v14771_v7 = vpop.f32.mrf.mxu0  ;;  %19040 = vst [vmem:[#allocation179_spill] sm:$0xff] %v14786_v10 }
 0x204   : > { %19036 = vst [vmem:[#allocation175_spill] sm:$0xff] %v14771_v7  ;;  %v14788_v36 = vpop.f32.mrf.mxu1 }
 0x205   : > { %v1664_v35 = vpop.f32.mrf.mxu0  ;;  %2129 = vmatmul.mubr.bf16.gmra.mxu0 %v14000_v50  ;;  %19041 = vst [vmem:[#allocation180_spill] sm:$0xff] %v14788_v36 }
 0x206   : > { %11325 = vmatprep.mubr.msk.bf16.mxu0 %vm1195_vm0, %v13780_v32  ;;  %v14792_v51 = vpop.f32.mrf.mxu1 }
 0x207   : > { %v14784_v2 = vpop.f32.mrf.mxu0  ;;  %19043 = vst [vmem:[#allocation182_spill] sm:$0xff] %v14792_v51 }
 0x208   : > { %19039 = vst [vmem:[#allocation178_spill] sm:$0xff] %v14784_v2  ;;  %v14800_v53 = vpop.f32.mrf.mxu1 }
 0x209   : > { %v1668_v18 = vpop.f32.mrf.mxu0  ;;  %19044 = vst [vmem:[#allocation183_spill] sm:$0xff] %v14800_v53 }
 0x20a   : > { %v2406_v0 = vpack.c.bf16 %v1668_v18, %v1664_v35  ;;  %v14806_v35 = vpop.f32.mrf.mxu1 }
 0x20b   : > { %v14790_v29 = vpop.f32.mrf.mxu0  ;;  %19046 = vst [vmem:[#allocation185_spill] sm:$0xff] %v14806_v35 }
 0x20c   : > { %19042 = vst [vmem:[#allocation181_spill] sm:$0xff] %v14790_v29  ;;  %11791 = vmatpush3.bf16.xpose.msra.mxu0 %v2406_v0  ;;  %v14808_v50 = vpop.f32.mrf.mxu1 }
 0x20d   : > { %v1674_v32 = vpop.f32.mrf.mxu0  ;;  %2139 = vmatmul.mubr.bf16.gmra.mxu0 %v13892_v25  ;;  %11802 = vmatprep.subr.bf16.mxu0 %v18977_v13  ;;  %19047 = vst [vmem:[#allocation186_spill] sm:$0xff] %v14808_v50 }
 0x20e   : > { %11326 = vmatprep.mubr.msk.bf16.mxu0 %vm1195_vm0, %v13896_v27  ;;  %v14812_v31 = vpop.f32.mrf.mxu1 }
 0x20f   : > { %v14804_v18 = vpop.f32.mrf.mxu0  ;;  %19049 = vst [vmem:[#allocation188_spill] sm:$0xff] %v14812_v31 }
 0x210   : > { %19045 = vst [vmem:[#allocation184_spill] sm:$0xff] %v14804_v18  ;;  %v14822_v14 = vpop.f32.mrf.mxu1 }
 0x211   : > { %v1678_v36 = vpop.f32.mrf.mxu0  ;;  %19050 = vst [vmem:[#allocation189_spill] sm:$0xff] %v14822_v14 }
 0x212   : > { %v2418_v0 = vpack.c.bf16 %v1678_v36, %v1674_v32  ;;  %v14828_v32 = vpop.f32.mrf.mxu1 }
 0x213   : > { %v14810_v7 = vpop.f32.mrf.mxu0  ;;  %19052 = vst [vmem:[#allocation191_spill] sm:$0xff] %v14828_v32 }
 0x214   : > { %19048 = vst [vmem:[#allocation187_spill] sm:$0xff] %v14810_v7  ;;  %11797 = vmatpush3.bf16.xpose.msra.mxu1 %v2418_v0  ;;  %v14832_v0 = vpop.f32.mrf.mxu1 }
 0x215   : > { %v14818_v27 = vpop.f32.mrf.mxu0  ;;  %2149 = vmatmul.mubr.bf16.gmra.mxu0 %v13918_v42  ;;  %11808 = vmatprep.subr.bf16.mxu1 %v18977_v13  ;;  %19053 = vst [vmem:[#allocation192_spill] sm:$0xff] %v14832_v0  ;;  %v19055_v42 = vpack.c.bf16 %v14136_v57, %v14126_v49 }
 0x216   : > { %11327 = vmatprep.mubr.msk.bf16.mxu0 %vm1195_vm0, %v13922_v44  ;;  %v14839_v50 = vpop.f32.mrf.mxu1 }
 0x217   : > { %v14826_v36 = vpop.f32.mrf.mxu0  ;;  %19056 = vst [vmem:[#allocation194_spill] sm:$0xff] %v14839_v50 }
 0x218   : > { %19051 = vst [vmem:[#allocation190_spill] sm:$0xff] %v14826_v36  ;;  %v14848_v0 = vpop.f32.mrf.mxu1 }
 0x219   : > { %v14830_v25 = vpop.f32.mrf.mxu0  ;;  %19057 = vst [vmem:[#allocation195_spill] sm:$0xff] %v14848_v0 }
 0x21a   : > { %v14854_v57 = vpop.f32.mrf.mxu1 }
 0x21b   : > { %v14834_v53 = vpop.f32.mrf.mxu0  ;;  %11799 = vmatmul.mubr.bf16.vlgmr.msra.gmra.mxu1 %v19055_v42  ;;  %19059 = vst [vmem:[#allocation197_spill] sm:$0xff] %v14854_v57 }
 0x21c   : > { %19054 = vst [vmem:[#allocation193_spill] sm:$0xff] %v14834_v53  ;;  %11810 = vmatprep.mubr.msk.bf16.mxu1 %vm13603_vm1, %v18977_v13  ;;  %v14856_v14 = vpop.f32.mrf.mxu1 }
 0x21d   : > { %v1694_v35 = vpop.f32.mrf.mxu0  ;;  %2159 = vmatmul.mubr.bf16.gmra.mxu0 %v13944_v62  ;;  %19060 = vst [vmem:[#allocation198_spill] sm:$0xff] %v14856_v14 }
 0x21e   : > { %11328 = vmatprep.mubr.msk.bf16.mxu0 %vm1195_vm0, %v13948_v1  ;;  %v14860_v10 = vpop.f32.mrf.mxu1 }
 0x21f   : > { %v14852_v49 = vpop.f32.mrf.mxu0  ;;  %19062 = vst [vmem:[#allocation200_spill] sm:$0xff] %v14860_v10 }
 0x220   : > { %19058 = vst [vmem:[#allocation196_spill] sm:$0xff] %v14852_v49  ;;  %v14870_v0 = vpop.f32.mrf.mxu1 }
 0x221   : > { %v1698_v42 = vpop.f32.mrf.mxu0  ;;  %19063 = vst [vmem:[#allocation201_spill] sm:$0xff] %v14870_v0 }
 0x222   : > { %v2442_v31 = vpack.c.bf16 %v1698_v42, %v1694_v35  ;;  %v14876_v42 = vpop.f32.mrf.mxu1 }
 0x223   : > { %v14858_v33 = vpop.f32.mrf.mxu0  ;;  %19065 = vst [vmem:[#allocation203_spill] sm:$0xff] %v14876_v42 }
 0x224   : > { %19061 = vst [vmem:[#allocation199_spill] sm:$0xff] %v14858_v33  ;;  %11809 = vmatpush3.bf16.xpose.msra.mxu1 %v2442_v31  ;;  %v14880_v31 = vpop.f32.mrf.mxu1 }
 0x225   : > { %v14866_v1 = vpop.f32.mrf.mxu0  ;;  %2169 = vmatmul.mubr.bf16.gmra.mxu0 %v13969_v21  ;;  %11820 = vmatprep.subr.bf16.mxu1 %v18977_v13  ;;  %19066 = vst [vmem:[#allocation204_spill] sm:$0xff] %v14880_v31  ;;  %v19068_v21 = vpack.c.bf16 %v14174_v45, %v14162_v24 }
 0x226   : > { %11329 = vmatprep.mubr.msk.bf16.mxu0 %vm1195_vm0, %v13973_v11  ;;  %v14887_v14 = vpop.f32.mrf.mxu1  ;;  %v19081_v11 = vpack.c.bf16 %v14234_v19, %v14218_v30 }
 0x227   : > { %v14874_v35 = vpop.f32.mrf.mxu0  ;;  %19069 = vst [vmem:[#allocation206_spill] sm:$0xff] %v14887_v14 }
 0x228   : > { %19064 = vst [vmem:[#allocation202_spill] sm:$0xff] %v14874_v35  ;;  %v14896_v31 = vpop.f32.mrf.mxu1 }
 0x229   : > { %v14878_v62 = vpop.f32.mrf.mxu0  ;;  %19070 = vst [vmem:[#allocation207_spill] sm:$0xff] %v14896_v31 }
 0x22a   : > { %v14902_v45 = vpop.f32.mrf.mxu1 }
 0x22b   : > { %v14882_v44 = vpop.f32.mrf.mxu0  ;;  %11811 = vmatmul.mubr.bf16.vlgmr.msra.gmra.mxu1 %v19068_v21  ;;  %19072 = vst [vmem:[#allocation209_spill] sm:$0xff] %v14902_v45 }
 0x22c   : > { %19067 = vst [vmem:[#allocation205_spill] sm:$0xff] %v14882_v44  ;;  %11822 = vmatprep.mubr.msk.bf16.mxu1 %vm13603_vm1, %v18977_v13  ;;  %v14904_v0 = vpop.f32.mrf.mxu1 }
 0x22d   : > { %v1714_v57 = vpop.f32.mrf.mxu0  ;;  %2179 = vmatmul.mubr.bf16.gmra.mxu0 %v13989_v39  ;;  %19073 = vst [vmem:[#allocation210_spill] sm:$0xff] %v14904_v0 }
 0x22e   : > { %11330 = vmatprep.mubr.msk.bf16.mxu0 %vm1195_vm0, %v13993_v41  ;;  %v14908_v50 = vpop.f32.mrf.mxu1 }
 0x22f   : > { %v14900_v24 = vpop.f32.mrf.mxu0  ;;  %19075 = vst [vmem:[#allocation212_spill] sm:$0xff] %v14908_v50 }
 0x230   : > { %19071 = vst [vmem:[#allocation208_spill] sm:$0xff] %v14900_v24  ;;  %v14918_v31 = vpop.f32.mrf.mxu1 }
 0x231   : > { %v1718_v21 = vpop.f32.mrf.mxu0  ;;  %19076 = vst [vmem:[#allocation213_spill] sm:$0xff] %v14918_v31 }
 0x232   : > { %v2466_v10 = vpack.c.bf16 %v1718_v21, %v1714_v57  ;;  %v14924_v21 = vpop.f32.mrf.mxu1 }
 0x233   : > { %v14906_v32 = vpop.f32.mrf.mxu0  ;;  %19078 = vst [vmem:[#allocation215_spill] sm:$0xff] %v14924_v21 }
 0x234   : > { %19074 = vst [vmem:[#allocation211_spill] sm:$0xff] %v14906_v32  ;;  %11821 = vmatpush3.bf16.xpose.msra.mxu1 %v2466_v10  ;;  %v14926_v10 = vpop.f32.mrf.mxu1 }
 0x235   : > { %v14914_v41 = vpop.f32.mrf.mxu0  ;;  %2189 = vmatmul.mubr.bf16.gmra.mxu0 %v14005_v59  ;;  %11832 = vmatprep.subr.bf16.mxu1 %v18977_v13  ;;  %19079 = vst [vmem:[#allocation216_spill] sm:$0xff] %v14926_v10 }
 0x236   : > { %11331 = vmatprep.mubr.msk.bf16.mxu0 %vm1195_vm0, %v14009_v60  ;;  %v14933_v59 = vpop.f32.mrf.mxu1 }
 0x237   : > { %v14922_v57 = vpop.f32.mrf.mxu0  ;;  %19082 = vst [vmem:[#allocation218_spill] sm:$0xff] %v14933_v59  ;;  %v19089_v59 = vpack.c.bf16 %v14118_v37, %v14108_v34  ;;  %v19095_v34 = vpack.c.bf16 %v14294_v47, %v14278_v5 }
 0x238   : > { %19077 = vst [vmem:[#allocation214_spill] sm:$0xff] %v14922_v57  ;;  %v14942_v10 = vpop.f32.mrf.mxu1 }
 0x239   : > { %v1728_v39 = vpop.f32.mrf.mxu0  ;;  %19083 = vst [vmem:[#allocation219_spill] sm:$0xff] %v14942_v10 }
 0x23a   : > { %v14948_v19 = vpop.f32.mrf.mxu1 }
 0x23b   : > { %v14928_v0 = vpop.f32.mrf.mxu0  ;;  %11823 = vmatmul.mubr.bf16.vlgmr.msra.gmra.mxu1 %v19081_v11  ;;  %19085 = vst [vmem:[#allocation221_spill] sm:$0xff] %v14948_v19 }
 0x23c   : > { %19080 = vst [vmem:[#allocation217_spill] sm:$0xff] %v14928_v0  ;;  %11834 = vmatprep.mubr.msk.bf16.mxu1 %vm13603_vm1, %v18977_v13  ;;  %v14950_v31 = vpop.f32.mrf.mxu1 }
 0x23d   : > { %v1734_v45 = vpop.f32.mrf.mxu0  ;;  %2199 = vmatmul.mubr.bf16.gmra.mxu0 %v14017_v3  ;;  %19086 = vst [vmem:[#allocation222_spill] sm:$0xff] %v14950_v31  ;;  %v2430_v3 = vpack.c.bf16 %v14830_v25, %v14818_v27  ;;  %v19104_v31 = vpack.c.bf16 %v14204_v17, %v14188_v23  ;;  %v19110_v17 = vpack.c.bf16 %v14354_v61, %v14338_v63 }
 0x23e   : > { %11792 = vmatprep.mubr.msk.bf16.mxu0 %vm13603_vm1, %v18977_v13  ;;  %v14954_v14 = vpop.f32.mrf.mxu1 }
 0x23f   : > { %v14946_v30 = vpop.f32.mrf.mxu0  ;;  %19088 = vst [vmem:[#allocation224_spill] sm:$0xff] %v14954_v14 }
 0x240   : > { %19084 = vst [vmem:[#allocation220_spill] sm:$0xff] %v14946_v30 }
 0x241   : > { %v1738_v11 = vpop.f32.mrf.mxu0 }
 0x242   : > { %v2490_v50 = vpack.c.bf16 %v1738_v11, %v1734_v45  ;;  %v14966_v45 = vpop.f32.mrf.mxu1 }
 0x243   : > { %v14952_v42 = vpop.f32.mrf.mxu0  ;;  %19090 = vst [vmem:[#allocation225_spill] sm:$0xff] %v14966_v45  ;;  %v19097_v45 = vpack.c.bf16 %v14154_v15, %v14144_v8  ;;  %v2478_v15 = vpack.c.bf16 %v1728_v39, %v14914_v41 }
 0x244   : > { %19087 = vst [vmem:[#allocation223_spill] sm:$0xff] %v14952_v42  ;;  %11833 = vmatpush3.bf16.xpose.msra.mxu1 %v2490_v50  ;;  %v14973_v50 = vpop.f32.mrf.mxu1 }
 0x245   : > { %v1744_v21 = vpop.f32.mrf.mxu0  ;;  %11793 = vmatmul.mubr.bf16.vlgmr.msra.gmra.mxu0 %v19089_v59  ;;  %11844 = vmatprep.subr.bf16.mxu1 %v18977_v13  ;;  %19092 = vst [vmem:[#allocation227_spill] sm:$0xff] %v14973_v50  ;;  %v2454_v59 = vpack.c.bf16 %v14878_v62, %v14866_v1 }
 0x246   : > { %11803 = vmatpush3.bf16.xpose.msra.mxu0 %v2430_v3  ;;  %11804 = vmatprep.mubr.msk.bf16.mxu0 %vm13603_vm1, %v18977_v13  ;;  %v14975_v11 = vpop.f32.mrf.mxu1 }
 0x247   : > { %v14970_v25 = vpop.f32.mrf.mxu0  ;;  %11814 = vmatprep.subr.bf16.mxu0 %v18977_v13  ;;  %19093 = vst [vmem:[#allocation228_spill] sm:$0xff] %v14975_v11 }
 0x248   : > { %19091 = vst [vmem:[#allocation226_spill] sm:$0xff] %v14970_v25  ;;  %v14982_v37 = vpop.f32.mrf.mxu1 }
 0x249   : > { %v1748_v27 = vpop.f32.mrf.mxu0  ;;  %19096 = vst [vmem:[#allocation230_spill] sm:$0xff] %v14982_v37 }
 0x24a   : > { %v14995_v5 = vpop.f32.mrf.mxu1 }
 0x24b   : > { %v14977_v10 = vpop.f32.mrf.mxu0  ;;  %11835 = vmatmul.mubr.bf16.vlgmr.msra.gmra.mxu1 %v19095_v34  ;;  %19098 = vst [vmem:[#allocation231_spill] sm:$0xff] %v14995_v5 }
 0x24c   : > { %19094 = vst [vmem:[#allocation229_spill] sm:$0xff] %v14977_v10  ;;  %11846 = vmatprep.mubr.msk.bf16.mxu1 %vm13603_vm1, %v18977_v13  ;;  %v15002_v62 = vpop.f32.mrf.mxu1 }
 0x24d   : > { %v1754_v11 = vpop.f32.mrf.mxu0  ;;  %11805 = vmatmul.mubr.bf16.vlgmr.msra.gmra.mxu0 %v19097_v45  ;;  %19100 = vst [vmem:[#allocation233_spill] sm:$0xff] %v15002_v62 }
 0x24e   : > { %11815 = vmatpush3.bf16.xpose.msra.mxu0 %v2454_v59  ;;  %11816 = vmatprep.mubr.msk.bf16.mxu0 %vm13603_vm1, %v18977_v13  ;;  %v15004_v34 = vpop.f32.mrf.mxu1 }
 0x24f   : > { %v14999_v47 = vpop.f32.mrf.mxu0  ;;  %11826 = vmatprep.subr.bf16.mxu0 %v18977_v13  ;;  %19101 = vst [vmem:[#allocation234_spill] sm:$0xff] %v15004_v34 }
 0x250   : > { %19099 = vst [vmem:[#allocation232_spill] sm:$0xff] %v14999_v47  ;;  %v15008_v8 = vpop.f32.mrf.mxu1 }
 0x251   : > { %v1758_v1 = vpop.f32.mrf.mxu0  ;;  %19103 = vst [vmem:[#allocation236_spill] sm:$0xff] %v15008_v8 }
 0x252   : > { %v2514_v60 = vpack.c.bf16 %v1758_v1, %v1754_v11  ;;  %v15019_v11 = vpop.f32.mrf.mxu1 }
 0x253   : > { %v15006_v3 = vpop.f32.mrf.mxu0  ;;  %19105 = vst [vmem:[#allocation237_spill] sm:$0xff] %v15019_v11 }
 0x254   : > { %19102 = vst [vmem:[#allocation235_spill] sm:$0xff] %v15006_v3  ;;  %11845 = vmatpush3.bf16.xpose.msra.mxu1 %v2514_v60  ;;  %v15026_v41 = vpop.f32.mrf.mxu1 }
 0x255   : > { %v1764_v5 = vpop.f32.mrf.mxu0  ;;  %11817 = vmatmul.mubr.bf16.vlgmr.msra.gmra.mxu0 %v19104_v31  ;;  %11856 = vmatprep.subr.bf16.mxu1 %v18977_v13  ;;  %19107 = vst [vmem:[#allocation239_spill] sm:$0xff] %v15026_v41  ;;  %v2502_v31 = vpack.c.bf16 %v1748_v27, %v1744_v21 }
 0x256   : > { %11827 = vmatpush3.bf16.xpose.msra.mxu0 %v2478_v15  ;;  %11828 = vmatprep.mubr.msk.bf16.mxu0 %vm13603_vm1, %v18977_v13  ;;  %v15028_v1 = vpop.f32.mrf.mxu1 }
 0x257   : > { %v15023_v39 = vpop.f32.mrf.mxu0  ;;  %11838 = vmatprep.subr.bf16.mxu0 %v18977_v13  ;;  %19108 = vst [vmem:[#allocation240_spill] sm:$0xff] %v15028_v1  ;;  %v19112_v1 = vpack.c.bf16 %v14264_v55, %v14248_v28 }
 0x258   : > { %19106 = vst [vmem:[#allocation238_spill] sm:$0xff] %v15023_v39  ;;  %v15035_v23 = vpop.f32.mrf.mxu1 }
 0x259   : > { %v1768_v60 = vpop.f32.mrf.mxu0  ;;  %19111 = vst [vmem:[#allocation242_spill] sm:$0xff] %v15035_v23 }
 0x25a   : > { %v15046_v34 = vpop.f32.mrf.mxu1  ;;  %v2526_v55 = vpack.c.bf16 %v1768_v60, %v1764_v5 }
 0x25b   : > { %v15030_v59 = vpop.f32.mrf.mxu0  ;;  %11847 = vmatmul.mubr.bf16.vlgmr.msra.gmra.mxu1 %v19110_v17  ;;  %19113 = vst [vmem:[#allocation243_spill] sm:$0xff] %v15046_v34  ;;  %v19119_v34 = vpack.c.bf16 %v14324_v9, %v14308_v26  ;;  %v19125_v9 = vld [vmem:[#allocation70_spill] sm:$0xff] }
 0x25c   : > { %19109 = vst [vmem:[#allocation241_spill] sm:$0xff] %v15030_v59  ;;  %11858 = vmatprep.mubr.msk.bf16.mxu1 %vm13603_vm1, %v18977_v13  ;;  %v15053_v63 = vpop.f32.mrf.mxu1 }
 0x25d   : > { %v1774_v11 = vpop.f32.mrf.mxu0  ;;  %11829 = vmatmul.mubr.bf16.vlgmr.msra.gmra.mxu0 %v19112_v1  ;;  %19115 = vst [vmem:[#allocation245_spill] sm:$0xff] %v15053_v63  ;;  %v19129_v63 = vld [vmem:[#allocation62_spill] sm:$0xff] }
 0x25e   : > { %11839 = vmatpush3.bf16.xpose.msra.mxu0 %v2502_v31  ;;  %11840 = vmatprep.mubr.msk.bf16.mxu0 %vm13603_vm1, %v18977_v13  ;;  %v15055_v27 = vpop.f32.mrf.mxu1 }
 0x25f   : > { %v15050_v61 = vpop.f32.mrf.mxu0  ;;  %11850 = vmatprep.subr.bf16.mxu0 %v18977_v13  ;;  %19116 = vst [vmem:[#allocation246_spill] sm:$0xff] %v15055_v27 }
 0x260   : > { %19114 = vst [vmem:[#allocation244_spill] sm:$0xff] %v15050_v61  ;;  %v15059_v28 = vpop.f32.mrf.mxu1 }
 0x261   : > { %v1778_v21 = vpop.f32.mrf.mxu0  ;;  %19118 = vst [vmem:[#allocation248_spill] sm:$0xff] %v15059_v28  ;;  %v19130_v28 = vld [vmem:[#allocation58_spill] sm:$0xff] }
 0x262   : > { %v2538_v17 = vpack.c.bf16 %v1778_v21, %v1774_v11  ;;  %v15069_v11 = vpop.f32.mrf.mxu1  ;;  %v19131_v62 = vpack.c.bf16 %v19129_v63, %v19130_v28 }
 0x263   : > { %v15057_v45 = vpop.f32.mrf.mxu0  ;;  %19120 = vst [vmem:[#allocation249_spill] sm:$0xff] %v15069_v11 }
 0x264   : > { %19117 = vst [vmem:[#allocation247_spill] sm:$0xff] %v15057_v45  ;;  %11857 = vmatpush3.bf16.xpose.msra.mxu1 %v2538_v17  ;;  %v15076_v60 = vpop.f32.mrf.mxu1 }
 0x265   : > { %v1784_v15 = vpop.f32.mrf.mxu0  ;;  %11841 = vmatmul.mubr.bf16.vlgmr.msra.gmra.mxu0 %v19119_v34  ;;  %11868 = vmatprep.subr.bf16.mxu1 %v18977_v13  ;;  %19122 = vst [vmem:[#allocation251_spill] sm:$0xff] %v15076_v60  ;;  %v19126_v34 = vld [vmem:[#allocation66_spill] sm:$0xff] }
 0x266   : > { %11851 = vmatpush3.bf16.xpose.msra.mxu0 %v2526_v55  ;;  %11852 = vmatprep.mubr.msk.bf16.mxu0 %vm13603_vm1, %v18977_v13  ;;  %v15078_v17 = vpop.f32.mrf.mxu1  ;;  %v19127_v1 = vpack.c.bf16 %v19125_v9, %v19126_v34 }
 0x267   : > { %v15073_v5 = vpop.f32.mrf.mxu0  ;;  %11862 = vmatprep.subr.bf16.mxu0 %v18977_v13  ;;  %19123 = vst [vmem:[#allocation252_spill] sm:$0xff] %v15078_v17 }
 0x268   : > { %19121 = vst [vmem:[#allocation250_spill] sm:$0xff] %v15073_v5  ;;  %v15085_v55 = vpop.f32.mrf.mxu1 }
 0x269   : > { %v1788_v21 = vpop.f32.mrf.mxu0  ;;  %19128 = vst [vmem:[#allocation70_spill] sm:$0xff] %v15085_v55  ;;  %v19156_v55 = vld [vmem:[#allocation90_spill] sm:$0xff] }
 0x26a   : > { %v2550_v31 = vpack.c.bf16 %v1788_v21, %v1784_v15  ;;  %v15094_v15 = vpop.f32.mrf.mxu1 }
 0x26b   : > { %v15080_v26 = vpop.f32.mrf.mxu0  ;;  %11859 = vmatmul.mubr.bf16.vlgmr.msra.gmra.mxu1 %v19127_v1  ;;  %19132 = vst [vmem:[#allocation66_spill] sm:$0xff] %v15094_v15  ;;  %v19139_v15 = vld [vmem:[#allocation74_spill] sm:$0xff] }
 0x26c   : > { %19124 = vst [vmem:[#allocation253_spill] sm:$0xff] %v15080_v26  ;;  %11870 = vmatprep.mubr.msk.bf16.mxu1 %vm13603_vm1, %v18977_v13  ;;  %v15101_v21 = vpop.f32.mrf.mxu1 }
 0x26d   : > { %v1794_v27 = vpop.f32.mrf.mxu0  ;;  %11853 = vmatmul.mubr.bf16.vlgmr.msra.gmra.mxu0 %v19131_v62  ;;  %19134 = vst [vmem:[#allocation58_spill] sm:$0xff] %v15101_v21 }
 0x26e   : > { %11863 = vmatpush3.bf16.xpose.msra.mxu0 %v2550_v31  ;;  %11864 = vmatprep.mubr.msk.bf16.mxu0 %vm13603_vm1, %v18977_v13  ;;  %v15103_v34 = vpop.f32.mrf.mxu1  ;;  %v19138_v31 = vld [vmem:[#allocation78_spill] sm:$0xff] }
 0x26f   : > { %v15098_v1 = vpop.f32.mrf.mxu0  ;;  %11874 = vmatprep.subr.bf16.mxu0 %v18977_v13  ;;  %19135 = vst [vmem:[#allocation254_spill] sm:$0xff] %v15103_v34  ;;  %v19140_v8 = vpack.c.bf16 %v19138_v31, %v19139_v15  ;;  %v19147_v15 = vld [vmem:[#allocation82_spill] sm:$0xff] }
 0x270   : > { %19133 = vst [vmem:[#allocation62_spill] sm:$0xff] %v15098_v1  ;;  %v15107_v63 = vpop.f32.mrf.mxu1 }
 0x271   : > { %v1798_v9 = vpop.f32.mrf.mxu0  ;;  %19137 = vst [vmem:[#allocation256_spill] sm:$0xff] %v15107_v63  ;;  %v19146_v63 = vld [vmem:[#allocation86_spill] sm:$0xff] }
 0x272   : > { %v2562_v11 = vpack.c.bf16 %v1798_v9, %v1794_v27  ;;  %v15115_v19 = vpop.f32.mrf.mxu1 }
 0x273   : > { %v15105_v17 = vpop.f32.mrf.mxu0  ;;  %19141 = vst [vmem:[#allocation78_spill] sm:$0xff] %v15115_v19 }
 0x274   : > { %19136 = vst [vmem:[#allocation255_spill] sm:$0xff] %v15105_v17  ;;  %11869 = vmatpush3.bf16.xpose.msra.mxu1 %v2562_v11  ;;  %v15121_v9 = vpop.f32.mrf.mxu1 }
 0x275   : > { %v1804_v28 = vpop.f32.mrf.mxu0  ;;  %11865 = vmatmul.mubr.bf16.vlgmr.msra.gmra.mxu0 %v19140_v8  ;;  %11880 = vmatprep.subr.bf16.mxu1 %v18977_v13  ;;  %19143 = vst [vmem:[#allocation257_spill] sm:$0xff] %v15121_v9  ;;  %v19148_v8 = vpack.c.bf16 %v19146_v63, %v19147_v15 }
 0x276   : > { %11876 = vmatprep.mubr.msk.bf16.mxu0 %vm13603_vm1, %v18977_v13  ;;  %v15123_v34 = vpop.f32.mrf.mxu1 }
 0x277   : > { %v15119_v27 = vpop.f32.mrf.mxu0  ;;  %19144 = vst [vmem:[#allocation258_spill] sm:$0xff] %v15123_v34  ;;  %v19155_v34 = vld [vmem:[#allocation94_spill] sm:$0xff] }
 0x278   : > { %19142 = vst [vmem:[#allocation74_spill] sm:$0xff] %v15119_v27  ;;  %v15130_v31 = vpop.f32.mrf.mxu1  ;;  %v19157_v41 = vpack.c.bf16 %v19155_v34, %v19156_v55 }
 0x279   : > { %v1808_v11 = vpop.f32.mrf.mxu0  ;;  %19149 = vst [vmem:[#allocation86_spill] sm:$0xff] %v15130_v31 }
 0x27a   : > { %v2574_v62 = vpack.c.bf16 %v1808_v11, %v1804_v28  ;;  %v15136_v60 = vpop.f32.mrf.mxu1 }
 0x27b   : > { %v15125_v21 = vpop.f32.mrf.mxu0  ;;  %11871 = vmatmul.mubr.bf16.vlgmr.msra.gmra.mxu1 %v19148_v8  ;;  %19150 = vst [vmem:[#allocation82_spill] sm:$0xff] %v15136_v60  ;;  %v19164_v60 = vld [vmem:[#allocation98_spill] sm:$0xff] }
 0x27c   : > { %19145 = vst [vmem:[#allocation259_spill] sm:$0xff] %v15125_v21  ;;  %11875 = vmatpush3.bf16.xpose.msra.mxu0 %v2574_v62  ;;  %11882 = vmatprep.mubr.msk.bf16.mxu1 %vm13603_vm1, %v18977_v13  ;;  %v15141_v11 = vpop.f32.mrf.mxu1 }
 0x27d   : > { %v1814_v14 = vpop.f32.mrf.mxu0  ;;  %11886 = vmatprep.subr.bf16.mxu0 %v18977_v13  ;;  %19152 = vst [vmem:[#allocation261_spill] sm:$0xff] %v15141_v11 }
 0x27e   : > { %v15143_v15 = vpop.f32.mrf.mxu1 }
 0x27f   : > { %v15139_v28 = vpop.f32.mrf.mxu0  ;;  %19153 = vst [vmem:[#allocation262_spill] sm:$0xff] %v15143_v15  ;;  %v19165_v15 = vpack.c.bf16 %v14534_v52, %v19164_v60 }
 0x280   : > { %19151 = vst [vmem:[#allocation260_spill] sm:$0xff] %v15139_v28  ;;  %v15150_v19 = vpop.f32.mrf.mxu1 }
 0x281   : > { %v1818_v63 = vpop.f32.mrf.mxu0  ;;  %19158 = vst [vmem:[#allocation94_spill] sm:$0xff] %v15150_v19 }
 0x282   : > { %v2586_v8 = vpack.c.bf16 %v1818_v63, %v1814_v14  ;;  %v15156_v31 = vpop.f32.mrf.mxu1 }
 0x283   : > { %v15145_v62 = vpop.f32.mrf.mxu0  ;;  %11877 = vmatmul.mubr.bf16.vlgmr.msra.gmra.mxu0 %v19157_v41  ;;  %19159 = vst [vmem:[#allocation90_spill] sm:$0xff] %v15156_v31 }
 0x284   : > { %19154 = vst [vmem:[#allocation263_spill] sm:$0xff] %v15145_v62  ;;  %11881 = vmatpush3.bf16.xpose.msra.mxu1 %v2586_v8  ;;  %11888 = vmatprep.mubr.msk.bf16.mxu0 %vm13603_vm1, %v18977_v13  ;;  %v15161_v63 = vpop.f32.mrf.mxu1 }
 0x285   : > { %v2050_v9 = vpop.f32.mrf.mxu0  ;;  %11892 = vmatprep.subr.bf16.mxu1 %v18977_v13  ;;  %19161 = vst [vmem:[#allocation265_spill] sm:$0xff] %v15161_v63 }
 0x286   : > { %v15163_v41 = vpop.f32.mrf.mxu1 }
 0x287   : > { %v15159_v14 = vpop.f32.mrf.mxu0  ;;  %19162 = vst [vmem:[#allocation266_spill] sm:$0xff] %v15163_v41 }
 0x288   : > { %19160 = vst [vmem:[#allocation264_spill] sm:$0xff] %v15159_v14  ;;  %v15170_v11 = vpop.f32.mrf.mxu1 }
 0x289   : > { %v2054_v55 = vpop.f32.mrf.mxu0  ;;  %19166 = vst [vmem:[#allocation98_spill] sm:$0xff] %v15170_v11 }
 0x28a   : > { %v2410_v34 = vpack.c.bf16 %v2054_v55, %v2050_v9 }
 0x28b   : > { %v15165_v8 = vpop.f32.mrf.mxu0  ;;  %11883 = vmatmul.mubr.bf16.vlgmr.msra.gmra.mxu1 %v19165_v15 }
 0x28c   : > { %19163 = vst [vmem:[#allocation267_spill] sm:$0xff] %v15165_v8  ;;  %11887 = vmatpush3.bf16.msra.mxu0 %v2410_v34  ;;  %11894 = vmatprep.mubr.msk.bf16.mxu1 %vm13603_vm1, %v18977_v13 }
 0x28d   : > { %v2060_v19 = vpop.f32.mrf.mxu0  ;;  %11898 = vmatprep.subr.bf16.mxu0 %v18977_v13 }
 0x28f   : > { %v15177_v41 = vpop.f32.mrf.mxu0 }
 0x290   : > { %19167 = vst [vmem:[#allocation268_spill] sm:$0xff] %v15177_v41 }
 0x291   : > { %v2064_v9 = vpop.f32.mrf.mxu0 }
 0x292   : > { %v2422_v55 = vpack.c.bf16 %v2064_v9, %v2060_v19 }
 0x293   : > { %v15179_v23 = vpop.f32.mrf.mxu0 }
 0x294   : > { %19168 = vst [vmem:[#allocation269_spill] sm:$0xff] %v15179_v23  ;;  %11893 = vmatpush3.bf16.msra.mxu1 %v2422_v55 }
 0x295   : > { %v15181_v52 = vpop.f32.mrf.mxu0  ;;  %11904 = vmatprep.subr.bf16.mxu1 %v18977_v13 }
 0x297   : > { %v15184_v60 = vpop.f32.mrf.mxu0 }
 0x298   : > { %19169 = vst [vmem:[#allocation270_spill] sm:$0xff] %v15184_v60 }
 0x299   : > { %v15186_v15 = vpop.f32.mrf.mxu0 }
 0x29b   : > { %v15190_v31 = vpop.f32.mrf.mxu0 }
 0x29c   : > { %19170 = vst [vmem:[#allocation271_spill] sm:$0xff] %v15190_v31 }
 0x29d   : > { %v15192_v63 = vpop.f32.mrf.mxu0 }
 0x29f   : > { %v15194_v11 = vpop.f32.mrf.mxu0 }
 0x2a0   : > { %19171 = vst [vmem:[#allocation272_spill] sm:$0xff] %v15194_v11 }
 0x2a1   : > { %v15196_v19 = vpop.f32.mrf.mxu0 }
 0x2a3   : > { %v15200_v55 = vpop.f32.mrf.mxu0 }
 0x2a4   : > { %19172 = vst [vmem:[#allocation273_spill] sm:$0xff] %v15200_v55  ;;  %v15266_v55 = vpop.f32.mrf.mxu1 }
 0x2a5   : > { %v15202_v50 = vpop.f32.mrf.mxu0  ;;  %19186 = vst [vmem:[#allocation287_spill] sm:$0xff] %v15266_v55 }
 0x2a7   : > { %v15204_v37 = vpop.f32.mrf.mxu0 }
 0x2a8   : > { %19173 = vst [vmem:[#allocation274_spill] sm:$0xff] %v15204_v37 }
 0x2a9   : > { %v15206_v51 = vpop.f32.mrf.mxu0 }
 0x2ab   : > { %v15210_v16 = vpop.f32.mrf.mxu0 }
 0x2ac   : > { %19174 = vst [vmem:[#allocation275_spill] sm:$0xff] %v15210_v16 }
 0x2ad   : > { %v15212_v22 = vpop.f32.mrf.mxu0 }
 0x2af   : > { %v15214_v56 = vpop.f32.mrf.mxu0 }
 0x2b0   : > { %19175 = vst [vmem:[#allocation276_spill] sm:$0xff] %v15214_v56 }
 0x2b1   : > { %v15216_v40 = vpop.f32.mrf.mxu0 }
 0x2b3   : > { %v15220_v46 = vpop.f32.mrf.mxu0 }
 0x2b4   : > { %19176 = vst [vmem:[#allocation277_spill] sm:$0xff] %v15220_v46 }
 0x2b5   : > { %v15222_v4 = vpop.f32.mrf.mxu0 }
 0x2b7   : > { %v15224_v58 = vpop.f32.mrf.mxu0 }
 0x2b8   : > { %19177 = vst [vmem:[#allocation278_spill] sm:$0xff] %v15224_v58 }
 0x2b9   : > { %v15226_v20 = vpop.f32.mrf.mxu0 }
 0x2bb   : > { %v15230_v48 = vpop.f32.mrf.mxu0 }
 0x2bc   : > { %19178 = vst [vmem:[#allocation279_spill] sm:$0xff] %v15230_v48 }
 0x2bd   : > { %v15232_v38 = vpop.f32.mrf.mxu0 }
 0x2bf   : > { %v15234_v43 = vpop.f32.mrf.mxu0 }
 0x2c0   : > { %19179 = vst [vmem:[#allocation280_spill] sm:$0xff] %v15234_v43 }
 0x2c1   : > { %v15236_v54 = vpop.f32.mrf.mxu0 }
 0x2c3   : > { %v15240_v12 = vpop.f32.mrf.mxu0 }
 0x2c4   : > { %19180 = vst [vmem:[#allocation281_spill] sm:$0xff] %v15240_v12 }
 0x2c5   : > { %v15242_v6 = vpop.f32.mrf.mxu0 }
 0x2c7   : > { %v15244_v58 = vpop.f32.mrf.mxu0 }
 0x2c8   : > { %19181 = vst [vmem:[#allocation282_spill] sm:$0xff] %v15244_v58 }
 0x2c9   : > { %v15246_v46 = vpop.f32.mrf.mxu0 }
 0x2cb   : > { %v15250_v48 = vpop.f32.mrf.mxu0 }
 0x2cc   : > { %19182 = vst [vmem:[#allocation283_spill] sm:$0xff] %v15250_v48 }
 0x2cd   : > { %v15252_v56 = vpop.f32.mrf.mxu0 }
 0x2cf   : > { %v15254_v43 = vpop.f32.mrf.mxu0 }
 0x2d0   : > { %19183 = vst [vmem:[#allocation284_spill] sm:$0xff] %v15254_v43 }
 0x2d1   : > { %v15256_v16 = vpop.f32.mrf.mxu0 }
 0x2d3   : > { %v15260_v12 = vpop.f32.mrf.mxu0 }
 0x2d4   : > { %19184 = vst [vmem:[#allocation285_spill] sm:$0xff] %v15260_v12 }
 0x2d5   : > { %v15262_v37 = vpop.f32.mrf.mxu0 }
 0x2d7   : > { %v15264_v58 = vpop.f32.mrf.mxu0 }
 0x2d8   : > { %19185 = vst [vmem:[#allocation286_spill] sm:$0xff] %v15264_v58 }
 0x2d9   : > { %v15268_v34 = vpop.f32.mrf.mxu0 }
 0x2db   : > { %v15272_v43 = vpop.f32.mrf.mxu0  ;;  %v15274_v11 = vpop.f32.mrf.mxu1 }
 0x2dc   : > { %19187 = vst [vmem:[#allocation288_spill] sm:$0xff] %v15272_v43  ;;  %v3257_v9 = vsel %vm3250_vm2, %v15274_v11, -inf }
 0x2dd   : > { %3258 = vmax.xlane.f32.xlu1 %v3257_v9  ;;  %v15278_v12 = vpop.f32.mrf.mxu0  ;;  %v11800_v31 = vpop.f32.mrf.mxu1 }
 0x2df   : > { %v15280_v58 = vpop.f32.mrf.mxu0  ;;  %v15282_v55 = vpop.f32.mrf.mxu1 }
 0x2e0   : > { %19188 = vst [vmem:[#allocation289_spill] sm:$0xff] %v15280_v58  ;;  %v3260_v60 = vsel %vm3250_vm2, %v15282_v55, -inf }
 0x2e1   : > { %3261 = vmax.xlane.f32.xlu1 %v3260_v60  ;;  %v15286_v48 = vpop.f32.mrf.mxu0  ;;  %v11801_v43 = vpop.f32.mrf.mxu1 }
 0x2e3   : > { %v15290_v41 = vpop.f32.mrf.mxu0 }
 0x2e4   : > { %19189 = vst [vmem:[#allocation290_spill] sm:$0xff] %v15290_v41 }
 0x2e5   : > { %v15292_v9 = vpop.f32.mrf.mxu0 }
 0x2e7   : > { %v15294_v8 = vpop.f32.mrf.mxu0 }
 0x2e8   : > { %19190 = vst [vmem:[#allocation291_spill] sm:$0xff] %v15294_v8 }
 0x2e9   : > { %v15296_v31 = vpop.f32.mrf.mxu0 }
 0x2eb   : > { %v15300_v14 = vpop.f32.mrf.mxu0  ;;  %v15302_v60 = vpop.f32.mrf.mxu1 }
 0x2ec   : > { %19191 = vst [vmem:[#allocation292_spill] sm:$0xff] %v15300_v14  ;;  %v3269_v10 = vsel %vm3250_vm2, %v15302_v60, -inf }
 0x2ed   : > { %v15304_v62 = vpop.f32.mrf.mxu0  ;;  %v11812_v43 = vpop.f32.mrf.mxu1 }
 0x2ee   : > { %19192 = vst [vmem:[#allocation293_spill] sm:$0xff] %v15304_v62 }
 0x2ef   : > { %v15306_v28 = vpop.f32.mrf.mxu0  ;;  %v15308_v23 = vpop.f32.mrf.mxu1 }
 0x2f0   : > { %19193 = vst [vmem:[#allocation294_spill] sm:$0xff] %v15306_v28  ;;  %v3272_v30 = vsel %vm3250_vm2, %v15308_v23, -inf }
 0x2f1   : > { %v15310_v41 = vpop.f32.mrf.mxu0  ;;  %v11813_v21 = vpop.f32.mrf.mxu1 }
 0x2f2   : > { %19194 = vst [vmem:[#allocation295_spill] sm:$0xff] %v15310_v41 }
 0x2f3   : > { %v15314_v27 = vpop.f32.mrf.mxu0 }
 0x2f4   : > { %19195 = vst [vmem:[#allocation296_spill] sm:$0xff] %v15314_v27 }
 0x2f5   : > { %v15316_v58 = vpop.f32.mrf.mxu0 }
 0x2f6   : > { %19196 = vst [vmem:[#allocation297_spill] sm:$0xff] %v15316_v58 }
 0x2f7   : > { %v15318_v14 = vpop.f32.mrf.mxu0 }
 0x2f8   : > { %19197 = vst [vmem:[#allocation298_spill] sm:$0xff] %v15318_v14 }
 0x2f9   : > { %v15320_v17 = vpop.f32.mrf.mxu0 }
 0x2fa   : > { %19198 = vst [vmem:[#allocation299_spill] sm:$0xff] %v15320_v17 }
 0x2fb   : > { %v15324_v28 = vpop.f32.mrf.mxu0  ;;  %v15326_v1 = vpop.f32.mrf.mxu1 }
 0x2fc   : > { %19199 = vst [vmem:[#allocation300_spill] sm:$0xff] %v15324_v28  ;;  %v3281_v42 = vsel %vm3250_vm2, %v15326_v1, -inf }
 0x2fd   : > { %v15328_v61 = vpop.f32.mrf.mxu0  ;;  %v11824_v21 = vpop.f32.mrf.mxu1 }
 0x2fe   : > { %19200 = vst [vmem:[#allocation301_spill] sm:$0xff] %v15328_v61 }
 0x2ff   : > { %v15330_v45 = vpop.f32.mrf.mxu0  ;;  %v15332_v8 = vpop.f32.mrf.mxu1 }
 0x300   : > { %19201 = vst [vmem:[#allocation302_spill] sm:$0xff] %v15330_v45 }
 0x301   : > { %v15334_v27 = vpop.f32.mrf.mxu0  ;;  %v11825_v26 = vpop.f32.mrf.mxu1 }
 0x302   : > { %19202 = vst [vmem:[#allocation303_spill] sm:$0xff] %v15334_v27 }
 0x303   : > { %v15338_v5 = vpop.f32.mrf.mxu0 }
 0x304   : > { %19203 = vst [vmem:[#allocation304_spill] sm:$0xff] %v15338_v5 }
 0x305   : > { %v15340_v43 = vpop.f32.mrf.mxu0 }
 0x306   : > { %v3251_v28 = vsel %vm3250_vm2, %v15340_v43, -inf }
 0x307   : > { %3252 = vmax.xlane.f32.xlu0 %v3251_v28  ;;  %v11794_v39 = vpop.f32.mrf.mxu0 }
 0x309   : > { %v15344_v21 = vpop.f32.mrf.mxu0 }
 0x30a   : > { %v3254_v45 = vsel %vm3250_vm2, %v15344_v21, -inf }
 0x30b   : > { %v15348_v59 = vpop.f32.mrf.mxu1  ;;  %3255 = vmax.xlane.f32.xlu0 %v3254_v45  ;;  %v11795_v26 = vpop.f32.mrf.mxu0 }
 0x30d   : > { %v15350_v47 = vpop.f32.mrf.mxu0  ;;  %v11836_v14 = vpop.f32.mrf.mxu1 }
 0x30e   : > { %v3263_v5 = vsel %vm3250_vm2, %v15350_v47, -inf }
 0x30f   : > { %v15354_v3 = vpop.f32.mrf.mxu1  ;;  %3264 = vmax.xlane.f32.xlu0 %v3263_v5  ;;  %v11806_v28 = vpop.f32.mrf.mxu0 }
 0x310   : > { %v3296_v44 = vsel %vm3250_vm2, %v15354_v3, -inf }
 0x311   : > { %v15356_v39 = vpop.f32.mrf.mxu0  ;;  %v11837_v25 = vpop.f32.mrf.mxu1 }
 0x312   : > { %v3266_v45 = vsel %vm3250_vm2, %v15356_v39, -inf }
 0x313   : > { %3270 = vmax.xlane.f32.xlu0 %v3269_v10  ;;  %3267 = vmax.xlane.f32.xlu1 %v3266_v45  ;;  %v11807_v26 = vpop.f32.mrf.mxu0 }
 0x315   : > { %v15362_v14 = vpop.f32.mrf.mxu0 }
 0x316   : > { %v3275_v5 = vsel %vm3250_vm2, %v15362_v14, -inf }
 0x317   : > { %3273 = vmax.xlane.f32.xlu1 %v3272_v30  ;;  %3276 = vmax.xlane.f32.xlu0 %v3275_v5  ;;  %v11818_v25 = vpop.f32.mrf.mxu0  ;;  %v3284_v30 = vsel %vm3250_vm2, %v15332_v8, -inf }
 0x319   : > { %v15368_v28 = vpop.f32.mrf.mxu0 }
 0x31a   : > { %v3278_v10 = vsel %vm3250_vm2, %v15368_v28, -inf }
 0x31b   : > { %v15374_v45 = vpop.f32.mrf.mxu1  ;;  %3282 = vmax.xlane.f32.xlu0 %v3281_v42  ;;  %3279 = vmax.xlane.f32.xlu1 %v3278_v10  ;;  %v11819_v26 = vpop.f32.mrf.mxu0  ;;  %v3293_v42 = vsel %vm3250_vm2, %v15348_v59, -inf }
 0x31d   : > { %v15376_v57 = vpop.f32.mrf.mxu0  ;;  %v11848_v0 = vpop.f32.mrf.mxu1 }
 0x31e   : > { %v3287_v5 = vsel %vm3250_vm2, %v15376_v57, -inf }
 0x31f   : > { %v15382_v25 = vpop.f32.mrf.mxu1  ;;  %3285 = vmax.xlane.f32.xlu1 %v3284_v30  ;;  %3288 = vmax.xlane.f32.xlu0 %v3287_v5  ;;  %v11830_v24 = vpop.f32.mrf.mxu0  ;;  %v3305_v5 = vsel %vm3250_vm2, %v15374_v45, -inf }
 0x321   : > { %v15384_v32 = vpop.f32.mrf.mxu0  ;;  %v11849_v35 = vpop.f32.mrf.mxu1 }
 0x322   : > { %v3290_v0 = vsel %vm3250_vm2, %v15384_v32, -inf }
 0x323   : > { %3294 = vmax.xlane.f32.xlu0 %v3293_v42  ;;  %3291 = vmax.xlane.f32.xlu1 %v3290_v0  ;;  %v11831_v10 = vpop.f32.mrf.mxu0 }
 0x325   : > { %v15390_v26 = vpop.f32.mrf.mxu0 }
 0x326   : > { %v3299_v24 = vsel %vm3250_vm2, %v15390_v26, -inf }
 0x327   : > { %3297 = vmax.xlane.f32.xlu1 %v3296_v44  ;;  %3300 = vmax.xlane.f32.xlu0 %v3299_v24  ;;  %v11842_v35 = vpop.f32.mrf.mxu0  ;;  %v3308_v44 = vsel %vm3250_vm2, %v15382_v25, -inf }
 0x329   : > { %v15396_v30 = vpop.f32.mrf.mxu0 }
 0x32a   : > { %v3302_v42 = vsel %vm3250_vm2, %v15396_v30, -inf }
 0x32b   : > { %v15402_v0 = vpop.f32.mrf.mxu1  ;;  %3306 = vmax.xlane.f32.xlu0 %v3305_v5  ;;  %3303 = vmax.xlane.f32.xlu1 %v3302_v42  ;;  %v11843_v10 = vpop.f32.mrf.mxu0 }
 0x32c   : > { %v3317_v5 = vsel %vm3250_vm2, %v15402_v0, -inf }
 0x32d   : > { %v15404_v49 = vpop.f32.mrf.mxu0  ;;  %v11860_v33 = vpop.f32.mrf.mxu1 }
 0x32e   : > { %v3311_v24 = vsel %vm3250_vm2, %v15404_v49, -inf }
 0x32f   : > { %v15410_v35 = vpop.f32.mrf.mxu1  ;;  %3309 = vmax.xlane.f32.xlu1 %v3308_v44  ;;  %3312 = vmax.xlane.f32.xlu0 %v3311_v24  ;;  %v11854_v36 = vpop.f32.mrf.mxu0 }
 0x330   : > { %v3320_v7 = vsel %vm3250_vm2, %v15410_v35, -inf }
 0x331   : > { %v15412_v53 = vpop.f32.mrf.mxu0  ;;  %v11861_v18 = vpop.f32.mrf.mxu1 }
 0x332   : > { %v3314_v33 = vsel %vm3250_vm2, %v15412_v53, -inf }
 0x333   : > { %3318 = vmax.xlane.f32.xlu0 %v3317_v5  ;;  %3315 = vmax.xlane.f32.xlu1 %v3314_v33  ;;  %v11855_v42 = vpop.f32.mrf.mxu0 }
 0x335   : > { %v15418_v10 = vpop.f32.mrf.mxu0 }
 0x336   : > { %v3323_v36 = vsel %vm3250_vm2, %v15418_v10, -inf }
 0x337   : > { %3321 = vmax.xlane.f32.xlu1 %v3320_v7  ;;  %3324 = vmax.xlane.f32.xlu0 %v3323_v36  ;;  %v11866_v18 = vpop.f32.mrf.mxu0 }
 0x339   : > { %v15424_v44 = vpop.f32.mrf.mxu0 }
 0x33a   : > { %v3326_v24 = vsel %vm3250_vm2, %v15424_v44, -inf }
 0x33b   : > { %v15428_v2 = vpop.f32.mrf.mxu1  ;;  %3327 = vmax.xlane.f32.xlu1 %v3326_v24  ;;  %v11867_v5 = vpop.f32.mrf.mxu0 }
 0x33c   : > { %v3329_v33 = vsel %vm3250_vm2, %v15428_v2, -inf }
 0x33d   : > { %v11872_v42 = vpop.f32.mrf.mxu1  ;;  %3330 = vmax.xlane.f32.xlu0 %v3329_v33 }
 0x33f   : > { %v15432_v29 = vpop.f32.mrf.mxu1 }
 0x340   : > { %v3332_v7 = vsel %vm3250_vm2, %v15432_v29, -inf }
 0x341   : > { %v11873_v36 = vpop.f32.mrf.mxu1  ;;  %3333 = vmax.xlane.f32.xlu1 %v3332_v7 }
 0x343   : > { %v15436_v18 = vpop.f32.mrf.mxu0 }
 0x344   : > { %v3335_v61 = vsel %vm3250_vm2, %v15436_v18, -inf }
 0x345   : > { %3336 = vmax.xlane.f32.xlu0 %v3335_v61  ;;  %v11878_v24 = vpop.f32.mrf.mxu0 }
 0x347   : > { %v15440_v5 = vpop.f32.mrf.mxu0 }
 0x348   : > { %19204 = vst [vmem:[#allocation305_spill] sm:$0xff] %v15440_v5  ;;  %v3338_v42 = vsel %vm3250_vm2, %v15440_v5, -inf }
 0x349   : > { %3339 = vmax.xlane.f32.xlu1 %v3338_v42  ;;  %v11879_v33 = vpop.f32.mrf.mxu0 }
 0x34b   : > { %v15444_v27 = vpop.f32.mrf.mxu1 }
 0x34c   : > { %19205 = vst [vmem:[#allocation306_spill] sm:$0xff] %v15444_v27  ;;  %v3341_v36 = vsel %vm3250_vm2, %v15444_v27, -inf }
 0x34d   : > { %v11884_v7 = vpop.f32.mrf.mxu1  ;;  %3342 = vmax.xlane.f32.xlu0 %v3341_v36 }
 0x34f   : > { %v15448_v58 = vpop.f32.mrf.mxu1 }
 0x350   : > { %v3344_v61 = vsel %vm3250_vm2, %v15448_v58, -inf }
 0x351   : > { %v11885_v24 = vpop.f32.mrf.mxu1  ;;  %3345 = vmax.xlane.f32.xlu1 %v3344_v61  ;;  %v19208_v61 = vpack.c.bf16 %v15196_v19, %v15192_v63 }
 0x366   : > { %v3259_v17 = vpop.xlane.xlu1 %3258 }
 0x367   : > { %v3349_v62 = vsub.f32 %v15274_v11, %v3259_v17 }
 0x369   : > { %v3383_v41 = vmul.f32 1.442695, %v3349_v62 }
 0x36a   : > { %v3262_v42 = vpop.xlane.xlu1 %3261 }
 0x36b   : > { %v3350_v33 = vsub.f32 %v15282_v55, %v3262_v42  ;;  %12960 = vpow2.f32 %v3383_v41 }
 0x36d   : > { %v3385_v5 = vmul.f32 1.442695, %v3350_v33 }
 0x36f   : > { %12962 = vpow2.f32 %v3385_v5 }
 0x378   : > { %v15454_v27 = vpop.eup %12960 }
 0x379   : > { %19206 = vst [vmem:[#allocation307_spill] sm:$0xff] %v15454_v27 }
 0x37c   : > { %v15456_v36 = vpop.eup %12962 }
 0x37d   : > { %19207 = vst [vmem:[#allocation308_spill] sm:$0xff] %v15456_v36  ;;  %v3540_v7 = vpack.c.bf16 %v15456_v36, %v15454_v27 }
 0x37f   : > { %11895 = vmatmul.mubr.msk.bf16.vlgmr.msra.gmra.mxu1 %vm3250_vm2, %v3540_v7 }
 0x380   : > { %11905 = vmatpush3.bf16.msra.mxu1 %v19208_v61  ;;  %11906 = vmatprep.mubr.msk.bf16.mxu1 %vm13603_vm1, %v18977_v13 }
 0x381   : > { %11916 = vmatprep.subr.bf16.mxu1 %v18977_v13 }
 0x390   : > { %v3253_v17 = vpop.xlane.xlu0 %3252 }
 0x391   : > { %v3347_v11 = vsub.f32 %v15340_v43, %v3253_v17 }
 0x393   : > { %v3379_v62 = vmul.f32 1.442695, %v3347_v11 }
 0x394   : > { %v3256_v41 = vpop.xlane.xlu0 %3255 }
 0x395   : > { %v3348_v55 = vsub.f32 %v15344_v21, %v3256_v41  ;;  %12964 = vpow2.f32 %v3379_v62 }
 0x397   : > { %v3381_v5 = vmul.f32 1.442695, %v3348_v55 }
 0x398   : > { %v3265_v24 = vpop.xlane.xlu0 %3264 }
 0x399   : > { %12966 = vpow2.f32 %v3381_v5  ;;  %v3351_v42 = vsub.f32 %v15350_v47, %v3265_v24 }
 0x39b   : > { %v3387_v33 = vmul.f32 1.442695, %v3351_v42 }
 0x39c   : > { %v3271_v63 = vpop.xlane.xlu0 %3270  ;;  %v3268_v19 = vpop.xlane.xlu1 %3267 }
 0x39d   : > { %v3353_v7 = vsub.f32 %v15302_v60, %v3271_v63  ;;  %v3352_v61 = vsub.f32 %v15356_v39, %v3268_v19  ;;  %12968 = vpow2.f32 %v3387_v33 }
 0x39f   : > { %v3389_v36 = vmul.f32 1.442695, %v3352_v61  ;;  %v3391_v27 = vmul.f32 1.442695, %v3353_v7 }
 0x3a0   : > { %v3274_v43 = vpop.xlane.xlu1 %3273  ;;  %v3277_v17 = vpop.xlane.xlu0 %3276 }
 0x3a1   : > { %v3354_v21 = vsub.f32 %v15308_v23, %v3274_v43  ;;  %v3355_v11 = vsub.f32 %v15362_v14, %v3277_v17  ;;  %12970 = vpow2.f32 %v3389_v36 }
 0x3a2   : > { %12972 = vpow2.f32 %v3391_v27  ;;  %v15474_v55 = vpop.eup %12964 }
 0x3a3   : > { %v3393_v62 = vmul.f32 1.442695, %v3354_v21  ;;  %v3395_v60 = vmul.f32 1.442695, %v3355_v11 }
 0x3a4   : > { %v3283_v47 = vpop.xlane.xlu0 %3282  ;;  %v3280_v41 = vpop.xlane.xlu1 %3279 }
 0x3a5   : > { %12974 = vpow2.f32 %v3393_v62  ;;  %v3357_v39 = vsub.f32 %v15326_v1, %v3283_v47  ;;  %v3356_v5 = vsub.f32 %v15368_v28, %v3280_v41  ;;  %v19209_v1 = vpack.c.bf16 %v15186_v15, %v15181_v52 }
 0x3a6   : > { %v15478_v24 = vpop.eup %12966  ;;  %12976 = vpow2.f32 %v3395_v60 }
 0x3a7   : > { %v3539_v23 = vpack.c.bf16 %v15478_v24, %v15474_v55  ;;  %v3397_v42 = vmul.f32 1.442695, %v3356_v5  ;;  %v3399_v14 = vmul.f32 1.442695, %v3357_v39  ;;  %v19210_v5 = vpack.c.bf16 %v15206_v51, %v15202_v50 }
 0x3a8   : > { %v3286_v36 = vpop.xlane.xlu1 %3285  ;;  %v3289_v63 = vpop.xlane.xlu0 %3288  ;;  %v19211_v51 = vpack.c.bf16 %v15216_v40, %v15212_v22 }
 0x3a9   : > { %v3358_v27 = vsub.f32 %v15332_v8, %v3286_v36  ;;  %v3359_v19 = vsub.f32 %v15376_v57, %v3289_v63  ;;  %11889 = vmatmul.mubr.msk.bf16.vlgmr.msra.gmra.mxu0 %vm3250_vm2, %v3539_v23  ;;  %12978 = vpow2.f32 %v3397_v42 }
 0x3aa   : > { %11899 = vmatpush3.bf16.msra.mxu0 %v19209_v1  ;;  %11900 = vmatprep.mubr.msk.bf16.mxu0 %vm13603_vm1, %v18977_v13  ;;  %12980 = vpow2.f32 %v3399_v14  ;;  %v15493_v43 = vpop.eup %12968 }
 0x3ab   : > { %v3401_v28 = vmul.f32 1.442695, %v3358_v27  ;;  %11910 = vmatprep.subr.bf16.mxu0 %v18977_v13  ;;  %v3403_v8 = vmul.f32 1.442695, %v3359_v19 }
 0x3ac   : > { %v3295_v33 = vpop.xlane.xlu0 %3294  ;;  %v3292_v7 = vpop.xlane.xlu1 %3291 }
 0x3ad   : > { %12982 = vpow2.f32 %v3401_v28  ;;  %v3361_v57 = vsub.f32 %v15348_v59, %v3295_v33  ;;  %v3360_v61 = vsub.f32 %v15384_v32, %v3292_v7 }
 0x3ae   : > { %v15495_v17 = vpop.eup %12970  ;;  %12984 = vpow2.f32 %v3403_v8  ;;  %v19212_v8 = vpack.c.bf16 %v15226_v20, %v15222_v4  ;;  %v19213_v20 = vpack.c.bf16 %v15236_v54, %v15232_v38 }
 0x3af   : > { %v3405_v52 = vmul.f32 1.442695, %v3360_v61  ;;  %v3541_v15 = vpack.c.bf16 %v15495_v17, %v15493_v43  ;;  %v3407_v21 = vmul.f32 1.442695, %v3361_v57  ;;  %v15499_v47 = vpop.eup %12972 }
 0x3b0   : > { %v3298_v11 = vpop.xlane.xlu1 %3297  ;;  %v3301_v62 = vpop.xlane.xlu0 %3300 }
 0x3b1   : > { %v3362_v41 = vsub.f32 %v15354_v3, %v3298_v11  ;;  %v3363_v59 = vsub.f32 %v15390_v26, %v3301_v62  ;;  %12986 = vpow2.f32 %v3405_v52  ;;  %11901 = vmatmul.mubr.msk.bf16.vlgmr.msra.gmra.mxu0 %vm3250_vm2, %v3541_v15 }
 0x3b2   : > { %v15503_v60 = vpop.eup %12974  ;;  %11911 = vmatpush3.bf16.msra.mxu0 %v19210_v5  ;;  %11912 = vmatprep.mubr.msk.bf16.mxu0 %vm13603_vm1, %v18977_v13  ;;  %12988 = vpow2.f32 %v3407_v21  ;;  %v19214_v5 = vpack.c.bf16 %v15246_v46, %v15242_v6 }
 0x3b3   : > { %v3542_v32 = vpack.c.bf16 %v15503_v60, %v15499_v47  ;;  %v3409_v39 = vmul.f32 1.442695, %v3362_v41  ;;  %11922 = vmatprep.subr.bf16.mxu0 %v18977_v13  ;;  %v3411_v26 = vmul.f32 1.442695, %v3363_v59  ;;  %v15517_v36 = vpop.eup %12976 }
 0x3b4   : > { %v3307_v3 = vpop.xlane.xlu0 %3306  ;;  %v3304_v23 = vpop.xlane.xlu1 %3303 }
 0x3b5   : > { %12990 = vpow2.f32 %v3409_v39  ;;  %v3365_v42 = vsub.f32 %v15374_v45, %v3307_v3  ;;  %v3364_v14 = vsub.f32 %v15396_v30, %v3304_v23  ;;  %11907 = vmatmul.mubr.msk.bf16.vlgmr.msra.gmra.mxu1 %vm3250_vm2, %v3542_v32 }
 0x3b6   : > { %11917 = vmatpush3.bf16.msra.mxu1 %v19211_v51  ;;  %11918 = vmatprep.mubr.msk.bf16.mxu1 %vm13603_vm1, %v18977_v13  ;;  %v15524_v50 = vpop.eup %12978  ;;  %12992 = vpow2.f32 %v3411_v26  ;;  %v19215_v26 = vpack.c.bf16 %v15256_v16, %v15252_v56 }
 0x3b7   : > { %v3413_v63 = vmul.f32 1.442695, %v3364_v14  ;;  %11928 = vmatprep.subr.bf16.mxu1 %v18977_v13  ;;  %v3543_v45 = vpack.c.bf16 %v15524_v50, %v15517_v36  ;;  %v3415_v30 = vmul.f32 1.442695, %v3365_v42  ;;  %v15529_v1 = vpop.eup %12980 }
 0x3b8   : > { %v3310_v27 = vpop.xlane.xlu1 %3309  ;;  %v3313_v19 = vpop.xlane.xlu0 %3312 }
 0x3b9   : > { %v3366_v40 = vsub.f32 %v15382_v25, %v3310_v27  ;;  %v3367_v22 = vsub.f32 %v15404_v49, %v3313_v19  ;;  %12994 = vpow2.f32 %v3413_v63  ;;  %11913 = vmatmul.mubr.msk.bf16.vlgmr.msra.gmra.mxu0 %vm3250_vm2, %v3543_v45 }
 0x3ba   : > { %v15533_v28 = vpop.eup %12982  ;;  %11923 = vmatpush3.bf16.msra.mxu0 %v19212_v8  ;;  %11924 = vmatprep.mubr.msk.bf16.mxu0 %vm13603_vm1, %v18977_v13  ;;  %12996 = vpow2.f32 %v3415_v30 }
 0x3bb   : > { %v3544_v33 = vpack.c.bf16 %v15533_v28, %v15529_v1  ;;  %v3417_v7 = vmul.f32 1.442695, %v3366_v40  ;;  %11934 = vmatprep.subr.bf16.mxu0 %v18977_v13  ;;  %v3419_v49 = vmul.f32 1.442695, %v3367_v22  ;;  %v15547_v15 = vpop.eup %12984  ;;  %v19217_v40 = vpack.c.bf16 %v15286_v48, %v15278_v12 }
 0x3bc   : > { %v3319_v25 = vpop.xlane.xlu0 %3318  ;;  %v3316_v57 = vpop.xlane.xlu1 %3315 }
 0x3bd   : > { %12998 = vpow2.f32 %v3417_v7  ;;  %v3369_v61 = vsub.f32 %v15402_v0, %v3319_v25  ;;  %v3368_v52 = vsub.f32 %v15412_v53, %v3316_v57  ;;  %11919 = vmatmul.mubr.msk.bf16.vlgmr.msra.gmra.mxu1 %vm3250_vm2, %v3544_v33  ;;  %v19218_v25 = vpack.c.bf16 %v15296_v31, %v15292_v9 }
 0x3be   : > { %11929 = vmatpush3.bf16.msra.mxu1 %v19213_v20  ;;  %11930 = vmatprep.mubr.msk.bf16.mxu1 %vm13603_vm1, %v18977_v13  ;;  %v15554_v4 = vpop.eup %12986  ;;  %13000 = vpow2.f32 %v3419_v49  ;;  %v19222_v20 = vld [vmem:[#allocation295_spill] sm:$0xff] }
 0x3bf   : > { %v3421_v21 = vmul.f32 1.442695, %v3368_v52  ;;  %11940 = vmatprep.subr.bf16.mxu1 %v18977_v13  ;;  %v3545_v0 = vpack.c.bf16 %v15554_v4, %v15547_v15  ;;  %v3423_v53 = vmul.f32 1.442695, %v3369_v61  ;;  %v15559_v41 = vpop.eup %12988 }
 0x3c0   : > { %v3322_v11 = vpop.xlane.xlu1 %3321  ;;  %v3325_v62 = vpop.xlane.xlu0 %3324 }
 0x3c1   : > { %v3370_v38 = vsub.f32 %v15410_v35, %v3322_v11  ;;  %v3371_v54 = vsub.f32 %v15418_v10, %v3325_v62  ;;  %13002 = vpow2.f32 %v3421_v21  ;;  %11925 = vmatmul.mubr.msk.bf16.vlgmr.msra.gmra.mxu0 %vm3250_vm2, %v3545_v0  ;;  %v19223_v21 = vld [vmem:[#allocation293_spill] sm:$0xff] }
 0x3c2   : > { %v15563_v59 = vpop.eup %12990  ;;  %11935 = vmatpush3.bf16.msra.mxu0 %v19214_v5  ;;  %11936 = vmatprep.mubr.msk.bf16.mxu0 %vm13603_vm1, %v18977_v13  ;;  %13004 = vpow2.f32 %v3423_v53  ;;  %v19224_v0 = vpack.c.bf16 %v19222_v20, %v19223_v21  ;;  %v19225_v53 = vld [vmem:[#allocation306_spill] sm:$0xff]  ;;  %v19251_v20 = vld [vmem:[#allocation13_spill] sm:$0xff] }
 0x3c3   : > { %v3546_v32 = vpack.c.bf16 %v15563_v59, %v15559_v41  ;;  %v3425_v39 = vmul.f32 1.442695, %v3370_v38  ;;  %v3427_v35 = vmul.f32 1.442695, %v3371_v54  ;;  %11946 = vmatprep.subr.bf16.mxu0 %v18977_v13  ;;  %v15576_v23 = vpop.eup %12992 }
 0x3c4   : > { %v3328_v3 = vpop.xlane.xlu1 %3327 }
 0x3c5   : > { %13006 = vpow2.f32 %v3425_v39  ;;  %v3372_v10 = vsub.f32 %v15424_v44, %v3328_v3  ;;  %11931 = vmatmul.mubr.msk.bf16.vlgmr.msra.gmra.mxu1 %vm3250_vm2, %v3546_v32  ;;  %v19227_v32 = vld [vmem:[#allocation299_spill] sm:$0xff]  ;;  %v19228_v39 = vld [vmem:[#allocation297_spill] sm:$0xff] }
 0x3c6   : > { %11941 = vmatpush3.bf16.msra.mxu1 %v19215_v26  ;;  %v3331_v6 = vpop.xlane.xlu0 %3330  ;;  %11942 = vmatprep.mubr.msk.bf16.mxu1 %vm13603_vm1, %v18977_v13  ;;  %v15583_v46 = vpop.eup %12994  ;;  %13008 = vpow2.f32 %v3427_v35  ;;  %v19229_v5 = vpack.c.bf16 %v19227_v32, %v19228_v39  ;;  %v19260_v32 = vld [vmem:[#allocation202_spill] sm:$0xff] }
 0x3c7   : > { %v3429_v42 = vmul.f32 1.442695, %v3372_v10  ;;  %v3373_v14 = vsub.f32 %v15428_v2, %v3331_v6  ;;  %11952 = vmatprep.subr.bf16.mxu1 %v18977_v13  ;;  %v3547_v44 = vpack.c.bf16 %v15583_v46, %v15576_v23  ;;  %v15589_v51 = vpop.eup %12996  ;;  %v19216_v2 = vpack.c.bf16 %v15268_v34, %v15262_v37  ;;  %v19231_v6 = vld [vmem:[#allocation303_spill] sm:$0xff] }
 0x3c9   : > { %13010 = vpow2.f32 %v3429_v42  ;;  %v3431_v16 = vmul.f32 1.442695, %v3373_v14  ;;  %11937 = vmatmul.mubr.msk.bf16.vlgmr.msra.gmra.mxu0 %vm3250_vm2, %v3547_v44  ;;  %v19232_v42 = vld [vmem:[#allocation301_spill] sm:$0xff] }
 0x3ca   : > { %v15591_v56 = vpop.eup %12998  ;;  %v3334_v63 = vpop.xlane.xlu1 %3333  ;;  %11947 = vmatpush3.bf16.msra.mxu0 %v19216_v2  ;;  %11948 = vmatprep.mubr.msk.bf16.mxu0 %vm13603_vm1, %v18977_v13  ;;  %v19233_v14 = vpack.c.bf16 %v19231_v6, %v19232_v42  ;;  %v19266_v6 = vld [vmem:[#allocation23_spill] sm:$0xff] }
 0x3cb   : > { %v3548_v45 = vpack.c.bf16 %v15591_v56, %v15589_v51  ;;  %v3374_v30 = vsub.f32 %v15432_v29, %v3334_v63  ;;  %11958 = vmatprep.subr.bf16.mxu0 %v18977_v13  ;;  %v15604_v19 = vpop.eup %13000  ;;  %13012 = vpow2.f32 %v3431_v16  ;;  %v19236_v63 = vld [vmem:[#allocation181_spill] sm:$0xff] }
 0x3cd   : > { %v3433_v27 = vmul.f32 1.442695, %v3374_v30  ;;  %11943 = vmatmul.mubr.msk.bf16.vlgmr.msra.gmra.mxu1 %vm3250_vm2, %v3548_v45  ;;  %v19237_v45 = vld [vmem:[#allocation178_spill] sm:$0xff] }
 0x3ce   : > { %11953 = vmatpush3.bf16.msra.mxu1 %v19217_v40  ;;  %v3337_v22 = vpop.xlane.xlu0 %3336  ;;  %11954 = vmatprep.mubr.msk.bf16.mxu1 %vm13603_vm1, %v18977_v13  ;;  %v15611_v29 = vpop.eup %13002  ;;  %v19238_v2 = vpack.c.bf16 %v19236_v63, %v19237_v45  ;;  %v19271_v45 = vld [vmem:[#allocation217_spill] sm:$0xff] }
 0x3cf   : > { %13014 = vpow2.f32 %v3433_v27  ;;  %v3375_v37 = vsub.f32 %v15436_v18, %v3337_v22  ;;  %11964 = vmatprep.subr.bf16.mxu1 %v18977_v13  ;;  %v3549_v34 = vpack.c.bf16 %v15611_v29, %v15604_v19  ;;  %v15617_v33 = vpop.eup %13004  ;;  %v19219_v18 = vld [vmem:[#allocation305_spill] sm:$0xff]  ;;  %v19241_v22 = vld [vmem:[#allocation12_spill] sm:$0xff] }
 0x3d1   : > { %v3435_v12 = vmul.f32 1.442695, %v3375_v37  ;;  %11949 = vmatmul.mubr.msk.bf16.vlgmr.msra.gmra.mxu0 %vm3250_vm2, %v3549_v34  ;;  %v19242_v37 = vld [vmem:[#allocation11_spill] sm:$0xff] }
 0x3d2   : > { %v15619_v7 = vpop.eup %13006  ;;  %v3340_v48 = vpop.xlane.xlu1 %3339  ;;  %11959 = vmatpush3.bf16.msra.mxu0 %v19218_v25  ;;  %11960 = vmatprep.mubr.msk.bf16.mxu0 %vm13603_vm1, %v18977_v13  ;;  %v19243_v34 = vpack.c.bf16 %v19241_v22, %v19242_v37  ;;  %v19247_v25 = vld [vmem:[#allocation193_spill] sm:$0xff]  ;;  %v19274_v22 = vld [vmem:[#allocation32_spill] sm:$0xff] }
 0x3d3   : > { %v3550_v8 = vpack.c.bf16 %v15619_v7, %v15617_v33  ;;  %v3376_v57 = vsub.f32 %v19219_v18, %v3340_v48  ;;  %11970 = vmatprep.subr.bf16.mxu0 %v18977_v13  ;;  %v15631_v49 = vpop.eup %13008  ;;  %13016 = vpow2.f32 %v3435_v12  ;;  %v19244_v12 = vld [vmem:[#allocation187_spill] sm:$0xff]  ;;  %v19245_v48 = vld [vmem:[#allocation184_spill] sm:$0xff]  ;;  %v19248_v18 = vld [vmem:[#allocation190_spill] sm:$0xff] }
 0x3d4   : > { %19220 = vst [vmem:[#allocation305_spill] sm:$0xff] %v15631_v49  ;;  %v19275_v37 = vld [vmem:[#allocation29_spill] sm:$0xff] }
 0x3d5   : > { %v3437_v61 = vmul.f32 1.442695, %v3376_v57  ;;  %11955 = vmatmul.mubr.msk.bf16.vlgmr.msra.gmra.mxu1 %vm3250_vm2, %v3550_v8  ;;  %v19246_v8 = vpack.c.bf16 %v19244_v12, %v19245_v48  ;;  %v19249_v57 = vpack.c.bf16 %v19247_v25, %v19248_v18  ;;  %v19277_v12 = vld [vmem:[#allocation38_spill] sm:$0xff]  ;;  %v19278_v48 = vld [vmem:[#allocation35_spill] sm:$0xff]  ;;  %v19281_v18 = vld [vmem:[#allocation220_spill] sm:$0xff] }
 0x3d6   : > { %v15634_v52 = vpop.eup %13010  ;;  %11965 = vmatpush3.bf16.msra.mxu1 %v19224_v0  ;;  %v3343_v9 = vpop.xlane.xlu0 %3342  ;;  %11966 = vmatprep.mubr.msk.bf16.mxu1 %vm13603_vm1, %v18977_v13  ;;  %v19253_v0 = vld [vmem:[#allocation16_spill] sm:$0xff]  ;;  %v19280_v25 = vld [vmem:[#allocation223_spill] sm:$0xff] }
 0x3d7   : > { %19221 = vst [vmem:[#allocation309_spill] sm:$0xff] %v15634_v52  ;;  %v3551_v31 = vpack.c.bf16 %v15634_v52, %v15631_v49  ;;  %13018 = vpow2.f32 %v3437_v61  ;;  %v3377_v11 = vsub.f32 %v19225_v53, %v3343_v9  ;;  %11976 = vmatprep.subr.bf16.mxu1 %v18977_v13  ;;  %v19250_v61 = vld [vmem:[#allocation14_spill] sm:$0xff]  ;;  %v19254_v9 = vld [vmem:[#allocation15_spill] sm:$0xff]  ;;  %v3443_v52 = vsel %vm3250_vm2, %v15474_v55, 0.0 }
 0x3d8   : > { %v15646_v54 = vpop.eup %13012  ;;  %v19252_v21 = vpack.c.bf16 %v19250_v61, %v19251_v20  ;;  %v19256_v53 = vld [vmem:[#allocation199_spill] sm:$0xff]  ;;  %v19283_v61 = vld [vmem:[#allocation229_spill] sm:$0xff]  ;;  %v19284_v20 = vld [vmem:[#allocation226_spill] sm:$0xff]  ;;  %v3446_v49 = vsel %vm3250_vm2, %v15478_v24, 0.0  ;;  %v3467_v24 = vsel %vm3250_vm2, %v15517_v36, 0.0 }
 0x3d9   : > { %v3439_v62 = vmul.f32 1.442695, %v3377_v11  ;;  %11961 = vmatmul.mubr.msk.bf16.vlgmr.msra.gmra.mxu0 %vm3250_vm2, %v3551_v31  ;;  %19226 = vst [vmem:[#allocation295_spill] sm:$0xff] %v15646_v54  ;;  %v19255_v31 = vpack.c.bf16 %v19253_v0, %v19254_v9  ;;  %v19257_v11 = vld [vmem:[#allocation196_spill] sm:$0xff]  ;;  %v19287_v9 = vld [vmem:[#allocation41_spill] sm:$0xff] }
 0x3da   : > { %v3346_v38 = vpop.xlane.xlu1 %3345  ;;  %11971 = vmatpush3.bf16.msra.mxu0 %v19229_v5  ;;  %11972 = vmatprep.mubr.msk.bf16.mxu0 %vm13603_vm1, %v18977_v13  ;;  %v19262_v5 = vld [vmem:[#allocation20_spill] sm:$0xff] }
 0x3db   : > { %v3378_v35 = vsub.f32 %v15448_v58, %v3346_v38  ;;  %11982 = vmatprep.subr.bf16.mxu0 %v18977_v13  ;;  %13020 = vpow2.f32 %v3439_v62  ;;  %v19258_v62 = vpack.c.bf16 %v19256_v53, %v19257_v11  ;;  %v19259_v38 = vld [vmem:[#allocation205_spill] sm:$0xff]  ;;  %v19286_v0 = vld [vmem:[#allocation44_spill] sm:$0xff]  ;;  %v19289_v53 = vld [vmem:[#allocation50_spill] sm:$0xff] }
 0x3dc   : > { %v15654_v3 = vpop.eup %13014  ;;  %v19261_v39 = vpack.c.bf16 %v19259_v38, %v19260_v32  ;;  %v19290_v11 = vld [vmem:[#allocation47_spill] sm:$0xff]  ;;  %v19293_v32 = vld [vmem:[#allocation232_spill] sm:$0xff] }
 0x3dd   : > { %19230 = vst [vmem:[#allocation293_spill] sm:$0xff] %v15654_v3  ;;  %v3552_v10 = vpack.c.bf16 %v15654_v3, %v15646_v54  ;;  %v3441_v26 = vmul.f32 1.442695, %v3378_v35  ;;  %v19263_v35 = vld [vmem:[#allocation17_spill] sm:$0xff]  ;;  %v19292_v38 = vld [vmem:[#allocation235_spill] sm:$0xff] }
 0x3df   : > { %13022 = vpow2.f32 %v3441_v26  ;;  %11967 = vmatmul.mubr.msk.bf16.vlgmr.msra.gmra.mxu1 %vm3250_vm2, %v3552_v10  ;;  %v19264_v10 = vpack.c.bf16 %v19262_v5, %v19263_v35  ;;  %v19265_v26 = vld [vmem:[#allocation26_spill] sm:$0xff]  ;;  %v19295_v5 = vld [vmem:[#allocation241_spill] sm:$0xff] }
 0x3e0   : > { %11977 = vmatpush3.bf16.msra.mxu1 %v19233_v14  ;;  %11978 = vmatprep.mubr.msk.bf16.mxu1 %vm13603_vm1, %v18977_v13  ;;  %v15666_v58 = vpop.eup %13016  ;;  %v19267_v42 = vpack.c.bf16 %v19265_v26, %v19266_v6  ;;  %v19268_v14 = vld [vmem:[#allocation211_spill] sm:$0xff]  ;;  %v19296_v35 = vld [vmem:[#allocation238_spill] sm:$0xff]  ;;  %v19299_v6 = vld [vmem:[#allocation253_spill] sm:$0xff] }
 0x3e1   : > { %11988 = vmatprep.subr.bf16.mxu1 %v18977_v13  ;;  %19234 = vst [vmem:[#allocation306_spill] sm:$0xff] %v15666_v58  ;;  %v19298_v26 = vld [vmem:[#allocation250_spill] sm:$0xff] }
 0x3e4   : > { %v15668_v44 = vpop.eup %13018 }
 0x3e5   : > { %19235 = vst [vmem:[#allocation299_spill] sm:$0xff] %v15668_v44  ;;  %v3553_v16 = vpack.c.bf16 %v15668_v44, %v15666_v58 }
 0x3e7   : > { %11973 = vmatmul.mubr.msk.bf16.vlgmr.msra.gmra.mxu0 %vm3250_vm2, %v3553_v16  ;;  %v19269_v16 = vld [vmem:[#allocation208_spill] sm:$0xff] }
 0x3e8   : > { %11983 = vmatpush3.bf16.xpose.msra.mxu0 %v19238_v2  ;;  %11984 = vmatprep.mubr.msk.bf16.mxu0 %vm13603_vm1, %v18977_v13  ;;  %v15679_v30 = vpop.eup %13020  ;;  %v19270_v63 = vpack.c.bf16 %v19268_v14, %v19269_v16  ;;  %v19272_v2 = vld [vmem:[#allocation214_spill] sm:$0xff]  ;;  %v19300_v14 = vld [vmem:[#allocation56_spill] sm:$0xff]  ;;  %v19301_v16 = vld [vmem:[#allocation53_spill] sm:$0xff] }
 0x3e9   : > { %11994 = vmatprep.subr.bf16.mxu0 %v18977_v13  ;;  %19239 = vst [vmem:[#allocation297_spill] sm:$0xff] %v15679_v30 }
 0x3ec   : > { %v15681_v27 = vpop.eup %13022 }
 0x3ed   : > { %19240 = vst [vmem:[#allocation303_spill] sm:$0xff] %v15681_v27  ;;  %v3554_v40 = vpack.c.bf16 %v15681_v27, %v15679_v30 }
 0x3ef   : > { %11979 = vmatmul.mubr.msk.bf16.vlgmr.msra.gmra.mxu1 %vm3250_vm2, %v3554_v40  ;;  %11985 = vmatmul.mubr.bf16.vlgmr.msra.gmra.mxu0 %v19243_v34  ;;  %v19273_v40 = vpack.c.bf16 %v19271_v45, %v19272_v2  ;;  %v19276_v34 = vpack.c.bf16 %v19274_v22, %v19275_v37  ;;  %v19303_v45 = vld [vmem:[#allocation64_spill] sm:$0xff]  ;;  %v19306_v22 = vld [vmem:[#allocation247_spill] sm:$0xff] }
 0x3f0   : > { %11989 = vmatpush3.bf16.xpose.msra.mxu1 %v19246_v8  ;;  %11995 = vmatpush3.bf16.xpose.msra.mxu0 %v19249_v57  ;;  %v19279_v8 = vpack.c.bf16 %v19277_v12, %v19278_v48  ;;  %v19282_v57 = vpack.c.bf16 %v19280_v25, %v19281_v18  ;;  %v19304_v2 = vld [vmem:[#allocation60_spill] sm:$0xff]  ;;  %v19309_v12 = vld [vmem:[#allocation62_spill] sm:$0xff]  ;;  %v19310_v48 = vld [vmem:[#allocation255_spill] sm:$0xff] }
 0x3f1   : > { %11990 = vmatprep.mubr.msk.bf16.mxu1 %vm13603_vm1, %v18977_v13  ;;  %11996 = vmatprep.mubr.msk.bf16.mxu0 %vm13603_vm1, %v18977_v13  ;;  %v19307_v37 = vld [vmem:[#allocation244_spill] sm:$0xff]  ;;  %v19311_v25 = vld [vmem:[#allocation74_spill] sm:$0xff]  ;;  %v19312_v18 = vld [vmem:[#allocation259_spill] sm:$0xff] }
 0x3f2   : > { %12000 = vmatprep.subr.bf16.mxu1 %v18977_v13  ;;  %12006 = vmatprep.subr.bf16.mxu0 %v18977_v13 }
 0x3f7   : > { %11991 = vmatmul.mubr.bf16.vlgmr.msra.gmra.mxu1 %v19252_v21  ;;  %11997 = vmatmul.mubr.bf16.vlgmr.msra.gmra.mxu0 %v19255_v31  ;;  %v19285_v21 = vpack.c.bf16 %v19283_v61, %v19284_v20  ;;  %v19288_v31 = vpack.c.bf16 %v19286_v0, %v19287_v9  ;;  %v19313_v61 = vld [vmem:[#allocation72_spill] sm:$0xff] }
 0x3f8   : > { %12001 = vmatpush3.bf16.xpose.msra.mxu1 %v19258_v62  ;;  %12007 = vmatpush3.bf16.xpose.msra.mxu0 %v19261_v39  ;;  %v19291_v62 = vpack.c.bf16 %v19289_v53, %v19290_v11  ;;  %v19294_v39 = vpack.c.bf16 %v19292_v38, %v19293_v32  ;;  %v19314_v20 = vld [vmem:[#allocation68_spill] sm:$0xff]  ;;  %v19320_v11 = vld [vmem:[#allocation263_spill] sm:$0xff] }
 0x3f9   : > { %12002 = vmatprep.mubr.msk.bf16.mxu1 %vm13603_vm1, %v18977_v13  ;;  %12008 = vmatprep.mubr.msk.bf16.mxu0 %vm13603_vm1, %v18977_v13  ;;  %v19316_v0 = vld [vmem:[#allocation80_spill] sm:$0xff]  ;;  %v19322_v32 = vld [vmem:[#allocation267_spill] sm:$0xff] }
 0x3fa   : > { %12012 = vmatprep.subr.bf16.mxu1 %v18977_v13  ;;  %12018 = vmatprep.subr.bf16.mxu0 %v18977_v13  ;;  %v19317_v9 = vld [vmem:[#allocation76_spill] sm:$0xff] }
 0x3fb   : > { %v19319_v53 = vld [vmem:[#allocation260_spill] sm:$0xff] }
 0x3fc   : > { %v19321_v38 = vld [vmem:[#allocation264_spill] sm:$0xff] }
 0x3ff   : > { %12003 = vmatmul.mubr.bf16.vlgmr.msra.gmra.mxu1 %v19264_v10  ;;  %12009 = vmatmul.mubr.bf16.vlgmr.msra.gmra.mxu0 %v19267_v42  ;;  %v19297_v10 = vpack.c.bf16 %v19295_v5, %v19296_v35  ;;  %v2551_v42 = vpack.c.bf16 %v19299_v6, %v19298_v26  ;;  %v19323_v5 = vld [vmem:[#allocation88_spill] sm:$0xff] }
 0x400   : > { %12013 = vmatpush3.bf16.xpose.msra.mxu1 %v19270_v63  ;;  %12019 = vmatpush3.bf16.xpose.msra.mxu0 %v19273_v40  ;;  %v19302_v63 = vpack.c.bf16 %v19300_v14, %v19301_v16  ;;  %v19305_v40 = vpack.c.bf16 %v19303_v45, %v19304_v2  ;;  %v19324_v35 = vld [vmem:[#allocation84_spill] sm:$0xff]  ;;  %v19330_v16 = vld [vmem:[#allocation269_spill] sm:$0xff]  ;;  %v19331_v45 = vld [vmem:[#allocation103_spill] sm:$0xff] }
 0x401   : > { %12014 = vmatprep.mubr.msk.bf16.mxu1 %vm13603_vm1, %v18977_v13  ;;  %12020 = vmatprep.mubr.msk.bf16.mxu0 %vm13603_vm1, %v18977_v13  ;;  %v19326_v26 = vld [vmem:[#allocation96_spill] sm:$0xff] }
 0x402   : > { %12024 = vmatprep.subr.bf16.mxu1 %v18977_v13  ;;  %12030 = vmatprep.subr.bf16.mxu0 %v18977_v13  ;;  %v19327_v6 = vld [vmem:[#allocation92_spill] sm:$0xff] }
 0x403   : > { %v19329_v14 = vld [vmem:[#allocation268_spill] sm:$0xff] }
 0x404   : > { %v19332_v2 = vld [vmem:[#allocation100_spill] sm:$0xff] }
 0x407   : > { %12015 = vmatmul.mubr.bf16.vlgmr.msra.gmra.mxu1 %v19276_v34  ;;  %12021 = vmatmul.mubr.bf16.vlgmr.msra.gmra.mxu0 %v19279_v8  ;;  %v19308_v34 = vpack.c.bf16 %v19306_v22, %v19307_v37  ;;  %v2563_v8 = vpack.c.bf16 %v19310_v48, %v19309_v12 }
 0x408   : > { %12025 = vmatpush3.bf16.xpose.msra.mxu1 %v19282_v57  ;;  %12031 = vmatpush3.bf16.xpose.msra.mxu0 %v19285_v21  ;;  %v2575_v57 = vpack.c.bf16 %v19312_v18, %v19311_v25  ;;  %v19315_v21 = vpack.c.bf16 %v19313_v61, %v19314_v20 }
 0x409   : > { %12026 = vmatprep.mubr.msk.bf16.mxu1 %vm13603_vm1, %v18977_v13  ;;  %12032 = vmatprep.mubr.msk.bf16.mxu0 %vm13603_vm1, %v18977_v13 }
 0x40a   : > { %12036 = vmatprep.subr.bf16.mxu1 %v18977_v13  ;;  %12042 = vmatprep.subr.bf16.mxu0 %v18977_v13 }
 0x40f   : > { %12027 = vmatmul.mubr.bf16.vlgmr.msra.gmra.mxu1 %v19288_v31  ;;  %12033 = vmatmul.mubr.bf16.vlgmr.msra.gmra.mxu0 %v19291_v62  ;;  %v19318_v31 = vpack.c.bf16 %v19316_v0, %v19317_v9  ;;  %v2587_v62 = vpack.c.bf16 %v19320_v11, %v19319_v53 }
 0x410   : > { %12037 = vmatpush3.bf16.xpose.msra.mxu1 %v19294_v39  ;;  %12043 = vmatpush3.bf16.xpose.msra.mxu0 %v19297_v10  ;;  %v2411_v39 = vpack.c.bf16 %v19322_v32, %v19321_v38  ;;  %v19325_v10 = vpack.c.bf16 %v19323_v5, %v19324_v35 }
 0x411   : > { %12038 = vmatprep.mubr.msk.bf16.mxu1 %vm13603_vm1, %v18977_v13  ;;  %12044 = vmatprep.mubr.msk.bf16.mxu0 %vm13603_vm1, %v18977_v13 }
 0x412   : > { %12048 = vmatprep.subr.bf16.mxu1 %v18977_v13  ;;  %12054 = vmatprep.subr.bf16.mxu0 %v18977_v13 }
 0x417   : > { %12039 = vmatmul.mubr.bf16.vlgmr.msra.gmra.mxu1 %v19302_v63  ;;  %12045 = vmatmul.mubr.bf16.vlgmr.msra.gmra.mxu0 %v19305_v40  ;;  %v2423_v63 = vpack.c.bf16 %v19330_v16, %v19329_v14  ;;  %v19333_v40 = vpack.c.bf16 %v19331_v45, %v19332_v2 }
 0x418   : > { %12049 = vmatpush3.bf16.xpose.msra.mxu1 %v19308_v34  ;;  %12055 = vmatpush3.bf16.xpose.msra.mxu0 %v2551_v42  ;;  %v19328_v42 = vpack.c.bf16 %v19326_v26, %v19327_v6 }
 0x419   : > { %12050 = vmatprep.mubr.msk.bf16.mxu1 %vm13603_vm1, %v18977_v13  ;;  %12056 = vmatprep.mubr.msk.bf16.mxu0 %vm13603_vm1, %v18977_v13 }
 0x41a   : > { %12060 = vmatprep.subr.bf16.mxu1 %v18977_v13  ;;  %12066 = vmatprep.subr.bf16.mxu0 %v18977_v13 }
 0x41f   : > { %12051 = vmatmul.mubr.bf16.vlgmr.msra.gmra.mxu1 %v19315_v21  ;;  %12057 = vmatmul.mubr.bf16.vlgmr.msra.gmra.mxu0 %v19318_v31 }
 0x420   : > { %12061 = vmatpush3.bf16.xpose.msra.mxu1 %v2563_v8  ;;  %12067 = vmatpush3.bf16.xpose.msra.mxu0 %v2575_v57 }
 0x421   : > { %12062 = vmatprep.mubr.msk.bf16.mxu1 %vm13603_vm1, %v18977_v13  ;;  %12068 = vmatprep.mubr.msk.bf16.mxu0 %vm13603_vm1, %v18977_v13 }
 0x422   : > { %12072 = vmatprep.subr.bf16.mxu1 %v18977_v13  ;;  %12078 = vmatprep.subr.bf16.mxu0 %v18977_v13 }
 0x427   : > { %12063 = vmatmul.mubr.bf16.vlgmr.msra.gmra.mxu1 %v19325_v10  ;;  %12069 = vmatmul.mubr.bf16.vlgmr.msra.gmra.mxu0 %v19328_v42 }
 0x428   : > { %12073 = vmatpush3.bf16.xpose.msra.mxu1 %v2587_v62  ;;  %12079 = vmatpush3.bf16.msra.mxu0 %v2411_v39 }
 0x429   : > { %12074 = vmatprep.mubr.msk.bf16.mxu1 %vm13603_vm1, %v18977_v13  ;;  %12084 = vmatprep.subr.bf16.mxu1 %v18977_v13 }
 0x42a   : > { %12080 = vmatprep.mubr.msk.bf16.mxu0 %vm13603_vm1, %v18977_v13  ;;  %12090 = vmatprep.subr.bf16.mxu0 %v18977_v13 }
 0x42f   : > { %12075 = vmatmul.mubr.bf16.vlgmr.msra.gmra.mxu1 %v19333_v40 }
 0x430   : > { %12085 = vmatpush3.bf16.msra.mxu1 %v2423_v63  ;;  %12086 = vmatprep.mubr.msk.bf16.mxu1 %vm13603_vm1, %v18977_v13 }
 0x431   : > { %12096 = vmatprep.subr.bf16.mxu1 %v18977_v13 }
 0x43f   : > { %v15830_v22 = vpop.f32.mrf.mxu1 }
 0x440   : > { %19334 = vst [vmem:[#allocation301_spill] sm:$0xff] %v15830_v22 }
 0x441   : > { %v11896_v37 = vpop.f32.mrf.mxu1 }
 0x443   : > { %v15832_v34 = vpop.f32.mrf.mxu1 }
 0x444   : > { %19335 = vst [vmem:[#allocation181_spill] sm:$0xff] %v15832_v34 }
 0x445   : > { %v11897_v12 = vpop.f32.mrf.mxu1 }
 0x469   : > { %v15834_v48 = vpop.f32.mrf.mxu0 }
 0x46a   : > { %19336 = vst [vmem:[#allocation178_spill] sm:$0xff] %v15834_v48 }
 0x46b   : > { %v11890_v8 = vpop.f32.mrf.mxu0 }
 0x46d   : > { %v15836_v25 = vpop.f32.mrf.mxu0 }
 0x46e   : > { %19337 = vst [vmem:[#allocation12_spill] sm:$0xff] %v15836_v25 }
 0x46f   : > { %v11891_v18 = vpop.f32.mrf.mxu0 }
 0x471   : > { %v15838_v57 = vpop.f32.mrf.mxu0 }
 0x472   : > { %19338 = vst [vmem:[#allocation11_spill] sm:$0xff] %v15838_v57 }
 0x473   : > { %v11902_v61 = vpop.f32.mrf.mxu0 }
 0x475   : > { %v15840_v20 = vpop.f32.mrf.mxu1  ;;  %v15842_v21 = vpop.f32.mrf.mxu0 }
 0x476   : > { %19339 = vst [vmem:[#allocation187_spill] sm:$0xff] %v15840_v20  ;;  %19340 = vst [vmem:[#allocation184_spill] sm:$0xff] %v15842_v21 }
 0x477   : > { %v11908_v0 = vpop.f32.mrf.mxu1  ;;  %v11903_v9 = vpop.f32.mrf.mxu0 }
 0x479   : > { %v15844_v31 = vpop.f32.mrf.mxu1  ;;  %v15846_v53 = vpop.f32.mrf.mxu0 }
 0x47a   : > { %19341 = vst [vmem:[#allocation193_spill] sm:$0xff] %v15844_v31  ;;  %19342 = vst [vmem:[#allocation190_spill] sm:$0xff] %v15846_v53 }
 0x47b   : > { %v11909_v11 = vpop.f32.mrf.mxu1  ;;  %v11914_v62 = vpop.f32.mrf.mxu0 }
 0x47d   : > { %v15848_v38 = vpop.f32.mrf.mxu1  ;;  %v15850_v32 = vpop.f32.mrf.mxu0 }
 0x47e   : > { %19343 = vst [vmem:[#allocation14_spill] sm:$0xff] %v15848_v38  ;;  %19344 = vst [vmem:[#allocation13_spill] sm:$0xff] %v15850_v32 }
 0x47f   : > { %v11920_v39 = vpop.f32.mrf.mxu1  ;;  %v11915_v5 = vpop.f32.mrf.mxu0 }
 0x481   : > { %v15852_v35 = vpop.f32.mrf.mxu1  ;;  %v15854_v10 = vpop.f32.mrf.mxu0 }
 0x482   : > { %19345 = vst [vmem:[#allocation16_spill] sm:$0xff] %v15852_v35  ;;  %19346 = vst [vmem:[#allocation15_spill] sm:$0xff] %v15854_v10 }
 0x483   : > { %v11921_v26 = vpop.f32.mrf.mxu1  ;;  %v11926_v6 = vpop.f32.mrf.mxu0 }
 0x485   : > { %v15856_v42 = vpop.f32.mrf.mxu1  ;;  %v15858_v14 = vpop.f32.mrf.mxu0 }
 0x486   : > { %19347 = vst [vmem:[#allocation199_spill] sm:$0xff] %v15856_v42  ;;  %19348 = vst [vmem:[#allocation196_spill] sm:$0xff] %v15858_v14 }
 0x487   : > { %v11932_v16 = vpop.f32.mrf.mxu1  ;;  %v11927_v63 = vpop.f32.mrf.mxu0 }
 0x489   : > { %v15860_v45 = vpop.f32.mrf.mxu1  ;;  %v15862_v2 = vpop.f32.mrf.mxu0 }
 0x48a   : > { %19349 = vst [vmem:[#allocation205_spill] sm:$0xff] %v15860_v45  ;;  %19350 = vst [vmem:[#allocation202_spill] sm:$0xff] %v15862_v2 }
 0x48b   : > { %v11933_v40 = vpop.f32.mrf.mxu1  ;;  %v11938_v37 = vpop.f32.mrf.mxu0 }
 0x48d   : > { %v15864_v12 = vpop.f32.mrf.mxu1  ;;  %v15866_v8 = vpop.f32.mrf.mxu0 }
 0x48e   : > { %19351 = vst [vmem:[#allocation20_spill] sm:$0xff] %v15864_v12  ;;  %19352 = vst [vmem:[#allocation17_spill] sm:$0xff] %v15866_v8 }
 0x48f   : > { %v11944_v18 = vpop.f32.mrf.mxu1  ;;  %v11939_v61 = vpop.f32.mrf.mxu0 }
 0x491   : > { %v15868_v0 = vpop.f32.mrf.mxu1  ;;  %v15870_v9 = vpop.f32.mrf.mxu0 }
 0x492   : > { %19353 = vst [vmem:[#allocation26_spill] sm:$0xff] %v15868_v0  ;;  %19354 = vst [vmem:[#allocation23_spill] sm:$0xff] %v15870_v9 }
 0x493   : > { %v11945_v11 = vpop.f32.mrf.mxu1  ;;  %v11950_v62 = vpop.f32.mrf.mxu0 }
 0x495   : > { %v15872_v39 = vpop.f32.mrf.mxu1  ;;  %v15874_v5 = vpop.f32.mrf.mxu0 }
 0x496   : > { %19355 = vst [vmem:[#allocation211_spill] sm:$0xff] %v15872_v39  ;;  %19356 = vst [vmem:[#allocation208_spill] sm:$0xff] %v15874_v5 }
 0x497   : > { %v11956_v26 = vpop.f32.mrf.mxu1  ;;  %v11951_v6 = vpop.f32.mrf.mxu0 }
 0x499   : > { %v15876_v16 = vpop.f32.mrf.mxu1  ;;  %v15878_v63 = vpop.f32.mrf.mxu0 }
 0x49a   : > { %19357 = vst [vmem:[#allocation217_spill] sm:$0xff] %v15876_v16  ;;  %19358 = vst [vmem:[#allocation214_spill] sm:$0xff] %v15878_v63 }
 0x49b   : > { %v11957_v40 = vpop.f32.mrf.mxu1  ;;  %v11962_v37 = vpop.f32.mrf.mxu0 }
 0x49d   : > { %v15880_v18 = vpop.f32.mrf.mxu0 }
 0x49e   : > { %19359 = vst [vmem:[#allocation32_spill] sm:$0xff] %v15880_v18 }
 0x49f   : > { %v15882_v61 = vpop.f32.mrf.mxu1  ;;  %v11963_v0 = vpop.f32.mrf.mxu0 }
 0x4a0   : > { %19360 = vst [vmem:[#allocation29_spill] sm:$0xff] %v15882_v61 }
 0x4a1   : > { %v11968_v9 = vpop.f32.mrf.mxu1 }
 0x4a3   : > { %v15884_v11 = vpop.f32.mrf.mxu1 }
 0x4a4   : > { %19361 = vst [vmem:[#allocation38_spill] sm:$0xff] %v15884_v11 }
 0x4a5   : > { %v11969_v62 = vpop.f32.mrf.mxu1 }
 0x4a7   : > { %v15886_v39 = vpop.f32.mrf.mxu0 }
 0x4a8   : > { %19362 = vst [vmem:[#allocation35_spill] sm:$0xff] %v15886_v39 }
 0x4a9   : > { %v11974_v5 = vpop.f32.mrf.mxu0 }
 0x4ab   : > { %v15888_v26 = vpop.f32.mrf.mxu0 }
 0x4ac   : > { %19363 = vst [vmem:[#allocation223_spill] sm:$0xff] %v15888_v26 }
 0x4ad   : > { %v11975_v6 = vpop.f32.mrf.mxu0 }
 0x4af   : > { %v15890_v16 = vpop.f32.mrf.mxu1  ;;  %v15892_v63 = vpop.f32.mrf.mxu0 }
 0x4b0   : > { %19364 = vst [vmem:[#allocation220_spill] sm:$0xff] %v15890_v16  ;;  %v5011_v40 = vsel %vm3250_vm2, %v15892_v63, -inf }
 0x4b1   : > { %v11980_v37 = vpop.f32.mrf.mxu1  ;;  %5012 = vmax.xlane.f32.xlu0 %v5011_v40  ;;  %v11986_v0 = vpop.f32.mrf.mxu0 }
 0x4b3   : > { %v15896_v9 = vpop.f32.mrf.mxu1  ;;  %v15898_v11 = vpop.f32.mrf.mxu0 }
 0x4b4   : > { %19365 = vst [vmem:[#allocation229_spill] sm:$0xff] %v15896_v9  ;;  %v5014_v5 = vsel %vm3250_vm2, %v15898_v11, -inf }
 0x4b5   : > { %v11981_v62 = vpop.f32.mrf.mxu1  ;;  %5015 = vmax.xlane.f32.xlu1 %v5014_v5  ;;  %v11987_v6 = vpop.f32.mrf.mxu0 }
 0x4b7   : > { %v15902_v26 = vpop.f32.mrf.mxu1  ;;  %v15904_v16 = vpop.f32.mrf.mxu0 }
 0x4b8   : > { %v5017_v39 = vsel %vm3250_vm2, %v15902_v26, -inf  ;;  %v5023_v5 = vsel %vm3250_vm2, %v15904_v16, -inf }
 0x4b9   : > { %v11992_v37 = vpop.f32.mrf.mxu1  ;;  %5018 = vmax.xlane.f32.xlu0 %v5017_v39  ;;  %v11998_v40 = vpop.f32.mrf.mxu0 }
 0x4bb   : > { %v15908_v0 = vpop.f32.mrf.mxu1  ;;  %v15910_v9 = vpop.f32.mrf.mxu0 }
 0x4bc   : > { %v5020_v61 = vsel %vm3250_vm2, %v15908_v0, -inf  ;;  %v5026_v37 = vsel %vm3250_vm2, %v15910_v9, -inf }
 0x4bd   : > { %v11993_v62 = vpop.f32.mrf.mxu1  ;;  %5021 = vmax.xlane.f32.xlu1 %v5020_v61  ;;  %5024 = vmax.xlane.f32.xlu0 %v5023_v5  ;;  %v11999_v6 = vpop.f32.mrf.mxu0 }
 0x4bf   : > { %v15916_v18 = vpop.f32.mrf.mxu1  ;;  %v15918_v12 = vpop.f32.mrf.mxu0 }
 0x4c0   : > { %v5029_v39 = vsel %vm3250_vm2, %v15916_v18, -inf  ;;  %v5035_v5 = vsel %vm3250_vm2, %v15918_v12, -inf }
 0x4c1   : > { %v12004_v40 = vpop.f32.mrf.mxu1  ;;  %5030 = vmax.xlane.f32.xlu0 %v5029_v39  ;;  %5027 = vmax.xlane.f32.xlu1 %v5026_v37  ;;  %v12010_v8 = vpop.f32.mrf.mxu0 }
 0x4c3   : > { %v15924_v2 = vpop.f32.mrf.mxu1  ;;  %v15926_v62 = vpop.f32.mrf.mxu0 }
 0x4c4   : > { %v5032_v61 = vsel %vm3250_vm2, %v15924_v2, -inf  ;;  %v5038_v39 = vsel %vm3250_vm2, %v15926_v62, -inf }
 0x4c5   : > { %v12005_v6 = vpop.f32.mrf.mxu1  ;;  %5033 = vmax.xlane.f32.xlu1 %v5032_v61  ;;  %5036 = vmax.xlane.f32.xlu0 %v5035_v5  ;;  %v12011_v45 = vpop.f32.mrf.mxu0 }
 0x4c7   : > { %v15932_v42 = vpop.f32.mrf.mxu1  ;;  %v15934_v40 = vpop.f32.mrf.mxu0 }
 0x4c8   : > { %v5041_v8 = vsel %vm3250_vm2, %v15932_v42, -inf  ;;  %v5047_v61 = vsel %vm3250_vm2, %v15934_v40, -inf }
 0x4c9   : > { %v12016_v37 = vpop.f32.mrf.mxu1  ;;  %5042 = vmax.xlane.f32.xlu0 %v5041_v8  ;;  %5039 = vmax.xlane.f32.xlu1 %v5038_v39  ;;  %v12022_v14 = vpop.f32.mrf.mxu0 }
 0x4cb   : > { %v15940_v10 = vpop.f32.mrf.mxu1  ;;  %v15942_v6 = vpop.f32.mrf.mxu0 }
 0x4cc   : > { %v5044_v45 = vsel %vm3250_vm2, %v15940_v10, -inf  ;;  %v5050_v8 = vsel %vm3250_vm2, %v15942_v6, -inf }
 0x4cd   : > { %v12017_v5 = vpop.f32.mrf.mxu1  ;;  %5045 = vmax.xlane.f32.xlu1 %v5044_v45  ;;  %5048 = vmax.xlane.f32.xlu0 %v5047_v61  ;;  %v12023_v38 = vpop.f32.mrf.mxu0 }
 0x4cf   : > { %v15948_v35 = vpop.f32.mrf.mxu1  ;;  %v15950_v37 = vpop.f32.mrf.mxu0 }
 0x4d0   : > { %v5053_v14 = vsel %vm3250_vm2, %v15948_v35, -inf  ;;  %v5059_v45 = vsel %vm3250_vm2, %v15950_v37, -inf }
 0x4d1   : > { %v12028_v39 = vpop.f32.mrf.mxu1  ;;  %5054 = vmax.xlane.f32.xlu0 %v5053_v14  ;;  %5051 = vmax.xlane.f32.xlu1 %v5050_v8  ;;  %v12034_v53 = vpop.f32.mrf.mxu0 }
 0x4d3   : > { %v15956_v32 = vpop.f32.mrf.mxu1  ;;  %v15958_v5 = vpop.f32.mrf.mxu0 }
 0x4d4   : > { %v5056_v38 = vsel %vm3250_vm2, %v15956_v32, -inf  ;;  %v5062_v14 = vsel %vm3250_vm2, %v15958_v5, -inf }
 0x4d5   : > { %v12029_v61 = vpop.f32.mrf.mxu1  ;;  %5057 = vmax.xlane.f32.xlu1 %v5056_v38  ;;  %5060 = vmax.xlane.f32.xlu0 %v5059_v45  ;;  %v12035_v20 = vpop.f32.mrf.mxu0 }
 0x4d7   : > { %v15964_v31 = vpop.f32.mrf.mxu1  ;;  %v15966_v39 = vpop.f32.mrf.mxu0 }
 0x4d8   : > { %v5065_v53 = vsel %vm3250_vm2, %v15964_v31, -inf  ;;  %v5071_v38 = vsel %vm3250_vm2, %v15966_v39, -inf }
 0x4d9   : > { %v12040_v8 = vpop.f32.mrf.mxu1  ;;  %5066 = vmax.xlane.f32.xlu0 %v5065_v53  ;;  %5063 = vmax.xlane.f32.xlu1 %v5062_v14  ;;  %v12046_v57 = vpop.f32.mrf.mxu0 }
 0x4db   : > { %v15972_v21 = vpop.f32.mrf.mxu1  ;;  %v15974_v61 = vpop.f32.mrf.mxu0 }
 0x4dc   : > { %v5068_v20 = vsel %vm3250_vm2, %v15972_v21, -inf  ;;  %v5074_v53 = vsel %vm3250_vm2, %v15974_v61, -inf }
 0x4dd   : > { %v12041_v45 = vpop.f32.mrf.mxu1  ;;  %5069 = vmax.xlane.f32.xlu1 %v5068_v20  ;;  %5072 = vmax.xlane.f32.xlu0 %v5071_v38  ;;  %v12047_v22 = vpop.f32.mrf.mxu0 }
 0x4df   : > { %v15980_v34 = vpop.f32.mrf.mxu1  ;;  %v15982_v8 = vpop.f32.mrf.mxu0 }
 0x4e0   : > { %v5077_v57 = vsel %vm3250_vm2, %v15980_v34, -inf  ;;  %v5083_v20 = vsel %vm3250_vm2, %v15982_v8, -inf }
 0x4e1   : > { %v12052_v14 = vpop.f32.mrf.mxu1  ;;  %5078 = vmax.xlane.f32.xlu0 %v5077_v57  ;;  %5075 = vmax.xlane.f32.xlu1 %v5074_v53  ;;  %v12058_v48 = vpop.f32.mrf.mxu0 }
 0x4e3   : > { %v15988_v25 = vpop.f32.mrf.mxu1  ;;  %v15990_v45 = vpop.f32.mrf.mxu0 }
 0x4e4   : > { %v5080_v22 = vsel %vm3250_vm2, %v15988_v25, -inf  ;;  %v5086_v57 = vsel %vm3250_vm2, %v15990_v45, -inf }
 0x4e5   : > { %v12053_v38 = vpop.f32.mrf.mxu1  ;;  %5081 = vmax.xlane.f32.xlu1 %v5080_v22  ;;  %5084 = vmax.xlane.f32.xlu0 %v5083_v20  ;;  %v12059_v27 = vpop.f32.mrf.mxu0 }
 0x4e7   : > { %v15996_v30 = vpop.f32.mrf.mxu1  ;;  %v15998_v14 = vpop.f32.mrf.mxu0 }
 0x4e8   : > { %v5089_v48 = vsel %vm3250_vm2, %v15996_v30, -inf  ;;  %v5095_v22 = vsel %vm3250_vm2, %v15998_v14, -inf }
 0x4e9   : > { %v12064_v53 = vpop.f32.mrf.mxu1  ;;  %5090 = vmax.xlane.f32.xlu0 %v5089_v48  ;;  %5087 = vmax.xlane.f32.xlu1 %v5086_v57  ;;  %v12070_v44 = vpop.f32.mrf.mxu0 }
 0x4eb   : > { %v16004_v58 = vpop.f32.mrf.mxu1  ;;  %v16006_v38 = vpop.f32.mrf.mxu0 }
 0x4ec   : > { %v5092_v27 = vsel %vm3250_vm2, %v16004_v58, -inf  ;;  %v5098_v44 = vsel %vm3250_vm2, %v16006_v38, -inf }
 0x4ed   : > { %v12065_v20 = vpop.f32.mrf.mxu1  ;;  %5093 = vmax.xlane.f32.xlu1 %v5092_v27  ;;  %5096 = vmax.xlane.f32.xlu0 %v5095_v22  ;;  %v12071_v3 = vpop.f32.mrf.mxu0  ;;  %v19366_v22 = vld [vmem:[#allocation307_spill] sm:$0xff] }
 0x4ee   : > { %v3449_v20 = vsel %vm3250_vm2, %v19366_v22, 0.0 }
 0x4ef   : > { %v16012_v54 = vpop.f32.mrf.mxu1 }
 0x4f0   : > { %v5101_v48 = vsel %vm3250_vm2, %v16012_v54, -inf }
 0x4f1   : > { %v12076_v57 = vpop.f32.mrf.mxu1  ;;  %5102 = vmax.xlane.f32.xlu0 %v5101_v48  ;;  %5099 = vmax.xlane.f32.xlu1 %v5098_v44  ;;  %v3455_v48 = vsel %vm3250_vm2, %v15493_v43, 0.0  ;;  %v19367_v44 = vld [vmem:[#allocation308_spill] sm:$0xff]  ;;  %v3473_v43 = vsel %vm3250_vm2, %v15529_v1, 0.0 }
 0x4f2   : > { %v3452_v55 = vsel %vm3250_vm2, %v19367_v44, 0.0  ;;  %v3458_v57 = vsel %vm3250_vm2, %v15495_v17, 0.0  ;;  %v3476_v17 = vsel %vm3250_vm2, %v15533_v28, 0.0 }
 0x4f3   : > { %v16018_v53 = vpop.f32.mrf.mxu1 }
 0x4f4   : > { %v5104_v27 = vsel %vm3250_vm2, %v16018_v53, -inf }
 0x4f5   : > { %v12077_v3 = vpop.f32.mrf.mxu1  ;;  %3444 = vadd.xlane.f32.xlu0 %v3443_v52  ;;  %5105 = vmax.xlane.f32.xlu1 %v5104_v27  ;;  %v3461_v52 = vsel %vm3250_vm2, %v15499_v47, 0.0  ;;  %v3470_v27 = vsel %vm3250_vm2, %v15524_v50, 0.0 }
 0x4f9   : > { %3450 = vadd.xlane.f32.xlu0 %v3449_v20  ;;  %3447 = vadd.xlane.f32.xlu1 %v3446_v49  ;;  %v3464_v49 = vsel %vm3250_vm2, %v15503_v60, 0.0 }
 0x4fd   : > { %3456 = vadd.xlane.f32.xlu0 %v3455_v48  ;;  %3453 = vadd.xlane.f32.xlu1 %v3452_v55 }
 0x501   : > { %3462 = vadd.xlane.f32.xlu0 %v3461_v52  ;;  %3459 = vadd.xlane.f32.xlu1 %v3458_v57 }
 0x505   : > { %3468 = vadd.xlane.f32.xlu0 %v3467_v24  ;;  %3465 = vadd.xlane.f32.xlu1 %v3464_v49 }
 0x509   : > { %3474 = vadd.xlane.f32.xlu0 %v3473_v43  ;;  %3471 = vadd.xlane.f32.xlu1 %v3470_v27 }
 0x50d   : > { %3477 = vadd.xlane.f32.xlu1 %v3476_v17 }
 0x53a   : > { %v5013_v47 = vpop.xlane.xlu0 %5012 }
 0x53b   : > { %v5107_v36 = vsub.f32 %v15892_v63, %v5013_v47 }
 0x53d   : > { %v5139_v3 = vmul.f32 1.442695, %v5107_v36 }
 0x53e   : > { %v5016_v22 = vpop.xlane.xlu1 %5015 }
 0x53f   : > { %13024 = vpow2.f32 %v5139_v3  ;;  %v5108_v60 = vsub.f32 %v15898_v11, %v5016_v22 }
 0x541   : > { %v5141_v20 = vmul.f32 1.442695, %v5108_v60 }
 0x542   : > { %v5019_v48 = vpop.xlane.xlu0 %5018 }
 0x543   : > { %13026 = vpow2.f32 %v5141_v20  ;;  %v5109_v1 = vsub.f32 %v15902_v26, %v5019_v48  ;;  %v19368_v48 = vld [vmem:[#allocation270_spill] sm:$0xff] }
 0x545   : > { %v5143_v50 = vmul.f32 1.442695, %v5109_v1  ;;  %v19369_v1 = vld [vmem:[#allocation271_spill] sm:$0xff] }
 0x546   : > { %v5022_v44 = vpop.xlane.xlu1 %5021  ;;  %v5025_v55 = vpop.xlane.xlu0 %5024 }
 0x547   : > { %13028 = vpow2.f32 %v5143_v50  ;;  %v5110_v28 = vsub.f32 %v15908_v0, %v5022_v44  ;;  %v5111_v52 = vsub.f32 %v15904_v16, %v5025_v55  ;;  %v2435_v50 = vpack.c.bf16 %v19369_v1, %v19368_v48 }
 0x549   : > { %v5145_v57 = vmul.f32 1.442695, %v5110_v28  ;;  %v5147_v63 = vmul.f32 1.442695, %v5111_v52 }
 0x54a   : > { %v5031_v24 = vpop.xlane.xlu0 %5030  ;;  %v5028_v49 = vpop.xlane.xlu1 %5027 }
 0x54b   : > { %13030 = vpow2.f32 %v5145_v57  ;;  %v5113_v11 = vsub.f32 %v15916_v18, %v5031_v24  ;;  %v5112_v43 = vsub.f32 %v15910_v9, %v5028_v49  ;;  %v3479_v18 = vsel %vm3250_vm2, %v15547_v15, 0.0 }
 0x54c   : > { %v13025_v27 = vpop.eup %13024  ;;  %13032 = vpow2.f32 %v5147_v63  ;;  %v3482_v63 = vsel %vm3250_vm2, %v15554_v4, 0.0 }
 0x54d   : > { %v5149_v26 = vmul.f32 1.442695, %v5112_v43  ;;  %v5203_v17 = vsel %vm3250_vm2, %v13025_v27, 0.0  ;;  %v5151_v47 = vmul.f32 1.442695, %v5113_v11 }
 0x54e   : > { %v5034_v36 = vpop.xlane.xlu1 %5033  ;;  %v5037_v3 = vpop.xlane.xlu0 %5036  ;;  %5204 = vadd.xlane.f32.xlu0 %v5203_v17  ;;  %v3485_v17 = vsel %vm3250_vm2, %v15559_v41, 0.0 }
 0x54f   : > { %v5114_v16 = vsub.f32 %v15924_v2, %v5034_v36  ;;  %v5115_v0 = vsub.f32 %v15918_v12, %v5037_v3  ;;  %13034 = vpow2.f32 %v5149_v26  ;;  %v19370_v36 = vld [vmem:[#allocation272_spill] sm:$0xff]  ;;  %v19371_v3 = vld [vmem:[#allocation273_spill] sm:$0xff] }
 0x550   : > { %v13027_v22 = vpop.eup %13026  ;;  %13036 = vpow2.f32 %v5151_v47 }
 0x551   : > { %v5299_v60 = vpack.c.bf16 %v13027_v22, %v13025_v27  ;;  %v5153_v20 = vmul.f32 1.442695, %v5114_v16  ;;  %v5206_v9 = vsel %vm3250_vm2, %v13027_v22, 0.0  ;;  %v5155_v2 = vmul.f32 1.442695, %v5115_v0 }
 0x552   : > { %v5043_v44 = vpop.xlane.xlu0 %5042  ;;  %v5040_v55 = vpop.xlane.xlu1 %5039  ;;  %3480 = vadd.xlane.f32.xlu0 %v3479_v18  ;;  %5207 = vadd.xlane.f32.xlu1 %v5206_v9  ;;  %v2447_v16 = vpack.c.bf16 %v19371_v3, %v19370_v36  ;;  %v3488_v9 = vsel %vm3250_vm2, %v15563_v59, 0.0 }
 0x553   : > { %13038 = vpow2.f32 %v5153_v20  ;;  %v5117_v12 = vsub.f32 %v15932_v42, %v5043_v44  ;;  %v5116_v28 = vsub.f32 %v15926_v62, %v5040_v55  ;;  %12081 = vmatmul.mubr.msk.bf16.vlgmr.msra.gmra.mxu0 %vm3250_vm2, %v5299_v60  ;;  %v19372_v44 = vld [vmem:[#allocation274_spill] sm:$0xff]  ;;  %v19373_v55 = vld [vmem:[#allocation275_spill] sm:$0xff] }
 0x554   : > { %v13029_v52 = vpop.eup %13028  ;;  %12091 = vmatpush3.bf16.msra.mxu0 %v2435_v50  ;;  %12092 = vmatprep.mubr.msk.bf16.mxu0 %vm13603_vm1, %v18977_v13  ;;  %13040 = vpow2.f32 %v5155_v2  ;;  %v2459_v2 = vpack.c.bf16 %v19373_v55, %v19372_v44 }
 0x555   : > { %v5157_v15 = vmul.f32 1.442695, %v5116_v28  ;;  %v5209_v57 = vsel %vm3250_vm2, %v13029_v52, 0.0  ;;  %12102 = vmatprep.subr.bf16.mxu0 %v18977_v13  ;;  %v5159_v24 = vmul.f32 1.442695, %v5117_v12 }
 0x556   : > { %v5046_v49 = vpop.xlane.xlu1 %5045  ;;  %v5049_v42 = vpop.xlane.xlu0 %5048  ;;  %5210 = vadd.xlane.f32.xlu0 %v5209_v57  ;;  %3483 = vadd.xlane.f32.xlu1 %v3482_v63  ;;  %v3491_v57 = vsel %vm3250_vm2, %v15576_v23, 0.0 }
 0x557   : > { %v5118_v62 = vsub.f32 %v15940_v10, %v5046_v49  ;;  %v5119_v11 = vsub.f32 %v15934_v40, %v5049_v42  ;;  %13042 = vpow2.f32 %v5157_v15  ;;  %v19375_v49 = vld [vmem:[#allocation277_spill] sm:$0xff] }
 0x558   : > { %v13031_v43 = vpop.eup %13030  ;;  %13044 = vpow2.f32 %v5159_v24  ;;  %v19374_v24 = vld [vmem:[#allocation276_spill] sm:$0xff] }
 0x559   : > { %v5300_v27 = vpack.c.bf16 %v13031_v43, %v13029_v52  ;;  %v5161_v26 = vmul.f32 1.442695, %v5118_v62  ;;  %v5212_v4 = vsel %vm3250_vm2, %v13031_v43, 0.0  ;;  %v13033_v47 = vpop.eup %13032  ;;  %v5163_v10 = vmul.f32 1.442695, %v5119_v11 }
 0x55a   : > { %v5055_v0 = vpop.xlane.xlu0 %5054  ;;  %v5052_v22 = vpop.xlane.xlu1 %5051  ;;  %3486 = vadd.xlane.f32.xlu0 %v3485_v17  ;;  %5213 = vadd.xlane.f32.xlu1 %v5212_v4  ;;  %v5215_v18 = vsel %vm3250_vm2, %v13033_v47, 0.0  ;;  %v3494_v4 = vsel %vm3250_vm2, %v15583_v46, 0.0 }
 0x55b   : > { %13046 = vpow2.f32 %v5161_v26  ;;  %v5121_v40 = vsub.f32 %v15948_v35, %v5055_v0  ;;  %v5120_v60 = vsub.f32 %v15942_v6, %v5052_v22  ;;  %12087 = vmatmul.mubr.msk.bf16.vlgmr.msra.gmra.mxu1 %vm3250_vm2, %v5300_v27  ;;  %v19377_v0 = vld [vmem:[#allocation279_spill] sm:$0xff] }
 0x55c   : > { %12097 = vmatpush3.bf16.msra.mxu1 %v2447_v16  ;;  %12098 = vmatprep.mubr.msk.bf16.mxu1 %vm13603_vm1, %v18977_v13  ;;  %v13035_v41 = vpop.eup %13034  ;;  %13048 = vpow2.f32 %v5163_v10  ;;  %v19376_v16 = vld [vmem:[#allocation278_spill] sm:$0xff] }
 0x55d   : > { %v5165_v20 = vmul.f32 1.442695, %v5120_v60  ;;  %12108 = vmatprep.subr.bf16.mxu1 %v18977_v13  ;;  %v5301_v48 = vpack.c.bf16 %v13035_v41, %v13033_v47  ;;  %v5167_v1 = vmul.f32 1.442695, %v5121_v40  ;;  %v13037_v6 = vpop.eup %13036  ;;  %v5218_v63 = vsel %vm3250_vm2, %v13035_v41, 0.0 }
 0x55e   : > { %v5058_v35 = vpop.xlane.xlu1 %5057  ;;  %v5061_v50 = vpop.xlane.xlu0 %5060  ;;  %5216 = vadd.xlane.f32.xlu0 %v5215_v18  ;;  %3489 = vadd.xlane.f32.xlu1 %v3488_v9  ;;  %v5221_v17 = vsel %vm3250_vm2, %v13037_v6, 0.0  ;;  %v2483_v22 = vpack.c.bf16 %v19377_v0, %v19376_v16 }
 0x55f   : > { %v5122_v12 = vsub.f32 %v15956_v32, %v5058_v35  ;;  %v5123_v28 = vsub.f32 %v15950_v37, %v5061_v50  ;;  %13050 = vpow2.f32 %v5165_v20  ;;  %12093 = vmatmul.mubr.msk.bf16.vlgmr.msra.gmra.mxu0 %vm3250_vm2, %v5301_v48  ;;  %v2471_v32 = vpack.c.bf16 %v19375_v49, %v19374_v24 }
 0x560   : > { %v13039_v52 = vpop.eup %13038  ;;  %12103 = vmatpush3.bf16.msra.mxu0 %v2459_v2  ;;  %12104 = vmatprep.mubr.msk.bf16.mxu0 %vm13603_vm1, %v18977_v13  ;;  %13052 = vpow2.f32 %v5167_v1  ;;  %v3497_v20 = vsel %vm3250_vm2, %v15589_v51, 0.0 }
 0x561   : > { %v5302_v59 = vpack.c.bf16 %v13039_v52, %v13037_v6  ;;  %v5169_v15 = vmul.f32 1.442695, %v5122_v12  ;;  %v5171_v62 = vmul.f32 1.442695, %v5123_v28  ;;  %12114 = vmatprep.subr.bf16.mxu0 %v18977_v13  ;;  %v13041_v23 = vpop.eup %13040  ;;  %v5224_v18 = vsel %vm3250_vm2, %v13039_v52, 0.0 }
 0x562   : > { %v5067_v37 = vpop.xlane.xlu0 %5066  ;;  %v5064_v42 = vpop.xlane.xlu1 %5063  ;;  %3492 = vadd.xlane.f32.xlu0 %v3491_v57  ;;  %5219 = vadd.xlane.f32.xlu1 %v5218_v63  ;;  %v5227_v2 = vsel %vm3250_vm2, %v13041_v23, 0.0  ;;  %v19381_v57 = vld [vmem:[#allocation283_spill] sm:$0xff] }
 0x563   : > { %13054 = vpow2.f32 %v5169_v15  ;;  %v5125_v11 = vsub.f32 %v15964_v31, %v5067_v37  ;;  %v5124_v43 = vsub.f32 %v15958_v5, %v5064_v42  ;;  %12099 = vmatmul.mubr.msk.bf16.vlgmr.msra.gmra.mxu1 %vm3250_vm2, %v5302_v59  ;;  %v19380_v15 = vld [vmem:[#allocation282_spill] sm:$0xff]  ;;  %v3503_v42 = vsel %vm3250_vm2, %v15604_v19, 0.0 }
 0x564   : > { %12109 = vmatpush3.bf16.msra.mxu1 %v2471_v32  ;;  %12110 = vmatprep.mubr.msk.bf16.mxu1 %vm13603_vm1, %v18977_v13  ;;  %v16104_v27 = vpop.eup %13042  ;;  %13056 = vpow2.f32 %v5171_v62  ;;  %v2507_v63 = vpack.c.bf16 %v19381_v57, %v19380_v15 }
 0x565   : > { %v5173_v26 = vmul.f32 1.442695, %v5124_v43  ;;  %12120 = vmatprep.subr.bf16.mxu1 %v18977_v13  ;;  %v5303_v31 = vpack.c.bf16 %v16104_v27, %v13041_v23  ;;  %v5175_v5 = vmul.f32 1.442695, %v5125_v11  ;;  %v16111_v3 = vpop.eup %13044  ;;  %v5230_v62 = vsel %vm3250_vm2, %v16104_v27, 0.0 }
 0x566   : > { %v5070_v47 = vpop.xlane.xlu1 %5069  ;;  %v5073_v36 = vpop.xlane.xlu0 %5072  ;;  %5222 = vadd.xlane.f32.xlu0 %v5221_v17  ;;  %3495 = vadd.xlane.f32.xlu1 %v3494_v4 }
 0x567   : > { %v5126_v10 = vsub.f32 %v15972_v21, %v5070_v47  ;;  %v5127_v40 = vsub.f32 %v15966_v39, %v5073_v36  ;;  %13058 = vpow2.f32 %v5173_v26  ;;  %12105 = vmatmul.mubr.msk.bf16.vlgmr.msra.gmra.mxu0 %vm3250_vm2, %v5303_v31  ;;  %v19378_v21 = vld [vmem:[#allocation280_spill] sm:$0xff]  ;;  %v19379_v39 = vld [vmem:[#allocation281_spill] sm:$0xff] }
 0x568   : > { %v16117_v46 = vpop.eup %13046  ;;  %12115 = vmatpush3.bf16.msra.mxu0 %v2483_v22  ;;  %12116 = vmatprep.mubr.msk.bf16.mxu0 %vm13603_vm1, %v18977_v13  ;;  %v2495_v9 = vpack.c.bf16 %v19379_v39, %v19378_v21  ;;  %13060 = vpow2.f32 %v5175_v5  ;;  %v5233_v5 = vsel %vm3250_vm2, %v16111_v3, 0.0  ;;  %v19384_v22 = vld [vmem:[#allocation286_spill] sm:$0xff] }
 0x569   : > { %v5304_v60 = vpack.c.bf16 %v16117_v46, %v16111_v3  ;;  %v5177_v41 = vmul.f32 1.442695, %v5126_v10  ;;  %v5179_v35 = vmul.f32 1.442695, %v5127_v40  ;;  %12126 = vmatprep.subr.bf16.mxu0 %v18977_v13  ;;  %v16133_v51 = vpop.eup %13048  ;;  %v19385_v10 = vld [vmem:[#allocation288_spill] sm:$0xff]  ;;  %v5236_v21 = vsel %vm3250_vm2, %v16117_v46, 0.0 }
 0x56a   : > { %v5079_v48 = vpop.xlane.xlu0 %5078  ;;  %v5076_v1 = vpop.xlane.xlu1 %5075  ;;  %3498 = vadd.xlane.f32.xlu0 %v3497_v20  ;;  %5225 = vadd.xlane.f32.xlu1 %v5224_v18  ;;  %v2531_v40 = vpack.c.bf16 %v19385_v10, %v19384_v22  ;;  %v3509_v18 = vsel %vm3250_vm2, %v15617_v33, 0.0 }
 0x56b   : > { %13062 = vpow2.f32 %v5177_v41  ;;  %v5129_v50 = vsub.f32 %v15980_v34, %v5079_v48  ;;  %v5128_v6 = vsub.f32 %v15974_v61, %v5076_v1  ;;  %12111 = vmatmul.mubr.msk.bf16.vlgmr.msra.gmra.mxu1 %vm3250_vm2, %v5304_v60  ;;  %v3500_v34 = vsel %vm3250_vm2, %v15591_v56, 0.0 }
 0x56c   : > { %12121 = vmatpush3.bf16.msra.mxu1 %v2495_v9  ;;  %12122 = vmatprep.mubr.msk.bf16.mxu1 %vm13603_vm1, %v18977_v13  ;;  %v16137_v44 = vpop.eup %13050  ;;  %13064 = vpow2.f32 %v5179_v35 }
 0x56d   : > { %v5181_v55 = vmul.f32 1.442695, %v5128_v6  ;;  %12132 = vmatprep.subr.bf16.mxu1 %v18977_v13  ;;  %v5305_v61 = vpack.c.bf16 %v16137_v44, %v16133_v51  ;;  %v5183_v12 = vmul.f32 1.442695, %v5129_v50  ;;  %v16145_v59 = vpop.eup %13052 }
 0x56e   : > { %v5082_v28 = vpop.xlane.xlu1 %5081  ;;  %v5085_v52 = vpop.xlane.xlu0 %5084  ;;  %5228 = vadd.xlane.f32.xlu0 %v5227_v2  ;;  %3501 = vadd.xlane.f32.xlu1 %v3500_v34 }
 0x56f   : > { %v5130_v24 = vsub.f32 %v15988_v25, %v5082_v28  ;;  %v5131_v56 = vsub.f32 %v15982_v8, %v5085_v52  ;;  %13066 = vpow2.f32 %v5181_v55  ;;  %12117 = vmatmul.mubr.msk.bf16.vlgmr.msra.gmra.mxu0 %vm3250_vm2, %v5305_v61  ;;  %v19382_v25 = vld [vmem:[#allocation284_spill] sm:$0xff]  ;;  %v19383_v8 = vld [vmem:[#allocation285_spill] sm:$0xff]  ;;  %v5239_v55 = vsel %vm3250_vm2, %v16133_v51, 0.0 }
 0x570   : > { %v16151_v49 = vpop.eup %13054  ;;  %12127 = vmatpush3.bf16.msra.mxu0 %v2507_v63  ;;  %12128 = vmatprep.mubr.msk.bf16.mxu0 %vm13603_vm1, %v18977_v13  ;;  %v2519_v11 = vpack.c.bf16 %v19383_v8, %v19382_v25  ;;  %13068 = vpow2.f32 %v5183_v12  ;;  %v19388_v12 = vld [vmem:[#allocation291_spill] sm:$0xff]  ;;  %v19389_v28 = vld [vmem:[#allocation292_spill] sm:$0xff]  ;;  %v19390_v63 = vld [vmem:[#allocation305_spill] sm:$0xff] }
 0x571   : > { %v5306_v32 = vpack.c.bf16 %v16151_v49, %v16145_v59  ;;  %v5185_v37 = vmul.f32 1.442695, %v5130_v24  ;;  %v5187_v26 = vmul.f32 1.442695, %v5131_v56  ;;  %12138 = vmatprep.subr.bf16.mxu0 %v18977_v13  ;;  %v16168_v27 = vpop.eup %13056  ;;  %v2555_v52 = vpack.c.bf16 %v19389_v28, %v19388_v12  ;;  %v19393_v25 = vld [vmem:[#allocation309_spill] sm:$0xff] }
 0x572   : > { %v5091_v43 = vpop.xlane.xlu0 %5090  ;;  %v5088_v23 = vpop.xlane.xlu1 %5087  ;;  %3504 = vadd.xlane.f32.xlu0 %v3503_v42  ;;  %5231 = vadd.xlane.f32.xlu1 %v5230_v62  ;;  %v3515_v24 = vsel %vm3250_vm2, %v19390_v63, 0.0  ;;  %v5242_v56 = vsel %vm3250_vm2, %v16137_v44, 0.0  ;;  %v5245_v62 = vsel %vm3250_vm2, %v16145_v59, 0.0  ;;  %v3518_v8 = vsel %vm3250_vm2, %v19393_v25, 0.0  ;;  %v12870_v12 = vld [vmem:[%s18623_s2 + $0x50] ss:$8 sps:$4 sm:$0xff]  }
 0x573   : > { %13070 = vpow2.f32 %v5185_v37  ;;  %v5133_v17 = vsub.f32 %v15996_v30, %v5091_v43  ;;  %v5132_v19 = vsub.f32 %v15990_v45, %v5088_v23  ;;  %12123 = vmatmul.mubr.msk.bf16.vlgmr.msra.gmra.mxu1 %vm3250_vm2, %v5306_v32  ;;  %v3506_v30 = vsel %vm3250_vm2, %v15611_v29, 0.0  ;;  %v19392_v32 = vld [vmem:[#allocation296_spill] sm:$0xff]  ;;  %v19394_v23 = vld [vmem:[#allocation298_spill] sm:$0xff]  ;;  %v19402_v28 = vld [vmem:[#allocation297_spill] sm:$0xff] }
 0x574   : > { %12133 = vmatpush3.bf16.msra.mxu1 %v2519_v11  ;;  %12134 = vmatprep.mubr.msk.bf16.mxu1 %vm13603_vm1, %v18977_v13  ;;  %v16172_v4 = vpop.eup %13058  ;;  %13072 = vpow2.f32 %v5187_v26  ;;  %v19395_v26 = vld [vmem:[#allocation300_spill] sm:$0xff]  ;;  %v12900_v25 = vld [vmem:[%s18623_s2 + $0xb0] ss:$8 sps:$4 sm:$0xff]  }
 0x575   : > { %v5189_v31 = vmul.f32 1.442695, %v5132_v19  ;;  %12144 = vmatprep.subr.bf16.mxu1 %v18977_v13  ;;  %v5307_v45 = vpack.c.bf16 %v16172_v4, %v16168_v27  ;;  %v5191_v47 = vmul.f32 1.442695, %v5133_v17  ;;  %v16181_v0 = vpop.eup %13060  ;;  %v2579_v17 = vpack.c.bf16 %v19395_v26, %v19394_v23  ;;  %v12890_v19 = vld [vmem:[%s18623_s2 + $0xf4] ss:$8 sps:$4 sm:$0xff]  }
 0x576   : > { %v5094_v36 = vpop.xlane.xlu1 %5093  ;;  %5234 = vadd.xlane.f32.xlu0 %v5233_v5  ;;  %v5097_v16 = vpop.xlane.xlu0 %5096  ;;  %3507 = vadd.xlane.f32.xlu1 %v3506_v30  ;;  %v19396_v5 = vld [vmem:[#allocation295_spill] sm:$0xff] }
 0x577   : > { %v5134_v3 = vsub.f32 %v16004_v58, %v5094_v36  ;;  %v5135_v29 = vsub.f32 %v15998_v14, %v5097_v16  ;;  %13074 = vpow2.f32 %v5189_v31  ;;  %12129 = vmatmul.mubr.msk.bf16.vlgmr.msra.gmra.mxu0 %vm3250_vm2, %v5307_v45  ;;  %v19386_v58 = vld [vmem:[#allocation289_spill] sm:$0xff]  ;;  %v19387_v14 = vld [vmem:[#allocation290_spill] sm:$0xff]  ;;  %v3521_v30 = vsel %vm3250_vm2, %v19396_v5, 0.0  ;;  %v19398_v16 = vld [vmem:[#allocation304_spill] sm:$0xff] }
 0x578   : > { %v16187_v60 = vpop.eup %13062  ;;  %12139 = vmatpush3.bf16.msra.mxu0 %v2531_v40  ;;  %12140 = vmatprep.mubr.msk.bf16.mxu0 %vm13603_vm1, %v18977_v13  ;;  %v2543_v39 = vpack.c.bf16 %v19387_v14, %v19386_v58  ;;  %13076 = vpow2.f32 %v5191_v47  ;;  %v5248_v45 = vsel %vm3250_vm2, %v16151_v49, 0.0  ;;  %v12866_v47 = vld [vmem:[%s18623_s2 + $0x74] ss:$8 sps:$4 sm:$0xff]   ;;  %v5251_v40 = vsel %vm3250_vm2, %v16168_v27, 0.0  ;;  %v12864_v58 = vld [vmem:[%s18623_s2 + $0x70] ss:$8 sps:$4 sm:$0xff]  }
 0x579   : > { %v5308_v41 = vpack.c.bf16 %v16187_v60, %v16181_v0  ;;  %v5193_v20 = vmul.f32 1.442695, %v5134_v3  ;;  %v5195_v1 = vmul.f32 1.442695, %v5135_v29  ;;  %12150 = vmatprep.subr.bf16.mxu0 %v18977_v13  ;;  %v16204_v46 = vpop.eup %13064  ;;  %v19397_v36 = vld [vmem:[#allocation302_spill] sm:$0xff]  ;;  %v19399_v3 = vld [vmem:[#allocation293_spill] sm:$0xff] }
 0x57a   : > { %3510 = vadd.xlane.f32.xlu0 %v3509_v18  ;;  %v5103_v9 = vpop.xlane.xlu0 %5102  ;;  %5237 = vadd.xlane.f32.xlu1 %v5236_v21  ;;  %v5100_v48 = vpop.xlane.xlu1 %5099  ;;  %v2591_v22 = vpack.c.bf16 %v19398_v16, %v19397_v36  ;;  %v3524_v29 = vsel %vm3250_vm2, %v19399_v3, 0.0  ;;  %v12893_v21 = vld [vmem:[%s18623_s2 + $0xe4] ss:$8 sps:$4 sm:$0xff]  }
 0x57b   : > { %13078 = vpow2.f32 %v5193_v20  ;;  %v5137_v35 = vsub.f32 %v16012_v54, %v5103_v9  ;;  %v5136_v33 = vsub.f32 %v16006_v38, %v5100_v48  ;;  %12135 = vmatmul.mubr.msk.bf16.vlgmr.msra.gmra.mxu1 %vm3250_vm2, %v5308_v41  ;;  %v3512_v54 = vsel %vm3250_vm2, %v15619_v7, 0.0  ;;  %v12888_v41 = vld [vmem:[%s18623_s2 + $0xf0] ss:$8 sps:$4 sm:$0xff]   ;;  %v12881_v26 = vld [vmem:[%s18623_s2 + $0x24] ss:$8 sps:$4 sm:$0xff]  }
 0x57c   : > { %12145 = vmatpush3.bf16.msra.mxu1 %v2543_v39  ;;  %12146 = vmatprep.mubr.msk.bf16.mxu1 %vm13603_vm1, %v18977_v13  ;;  %v16208_v50 = vpop.eup %13066  ;;  %13080 = vpow2.f32 %v5195_v1  ;;  %v19400_v39 = vld [vmem:[#allocation306_spill] sm:$0xff]  ;;  %v5254_v48 = vsel %vm3250_vm2, %v16172_v4, 0.0  ;;  %v12869_v1 = vld [vmem:[%s18623_s2 + $0x64] ss:$8 sps:$4 sm:$0xff]  }
 0x57d   : > { %v5197_v6 = vmul.f32 1.442695, %v5136_v33  ;;  %12156 = vmatprep.subr.bf16.mxu1 %v18977_v13  ;;  %v5309_v38 = vpack.c.bf16 %v16208_v50, %v16204_v46  ;;  %v5199_v2 = vmul.f32 1.442695, %v5137_v35  ;;  %v16217_v61 = vpop.eup %13068  ;;  %v3527_v9 = vsel %vm3250_vm2, %v19400_v39, 0.0  ;;  %v19405_v39 = vld [vmem:[#allocation178_spill] sm:$0xff] }
 0x57e   : > { %5240 = vadd.xlane.f32.xlu0 %v5239_v55  ;;  %3513 = vadd.xlane.f32.xlu1 %v3512_v54  ;;  %v5106_v34 = vpop.xlane.xlu1 %5105  ;;  %v12891_v35 = vld [vmem:[%s18623_s2 + $0xe0] ss:$8 sps:$4 sm:$0xff]   ;;  %v18853_v33 = vmov 0   ;;  %v12896_v4 = vld [vmem:[%s18623_s2 + $0xd4] ss:$8 sps:$4 sm:$0xff]   ;;  %v5257_v55 = vsel %vm3250_vm2, %v16181_v0, 0.0 }
 0x57f   : > { %v5138_v51 = vsub.f32 %v16018_v53, %v5106_v34  ;;  %13082 = vpow2.f32 %v5197_v6  ;;  %12141 = vmatmul.mubr.msk.bf16.vlgmr.msra.gmra.mxu0 %vm3250_vm2, %v5309_v38  ;;  %v19391_v53 = vld [vmem:[#allocation294_spill] sm:$0xff]  ;;  %v12867_v6 = vld [vmem:[%s18623_s2 + $0x60] ss:$8 sps:$4 sm:$0xff]   ;;  %v12899_v0 = vld [vmem:[%s18623_s2 + $0xc4] ss:$8 sps:$4 sm:$0xff]   ;;  %v5266_v23 = vsel %vm3250_vm2, %v16208_v50, 0.0 }
 0x580   : > { %v16222_v15 = vpop.eup %13070  ;;  %12151 = vmatpush3.bf16.msra.mxu0 %v2555_v52  ;;  %12152 = vmatprep.mubr.msk.bf16.mxu0 %vm13603_vm1, %v18977_v13  ;;  %v2567_v37 = vpack.c.bf16 %v19392_v32, %v19391_v53  ;;  %13084 = vpow2.f32 %v5199_v2  ;;  %v19401_v54 = vld [vmem:[#allocation299_spill] sm:$0xff]  ;;  %v12872_v2 = vld [vmem:[%s18623_s2 + $0x54] ss:$8 sps:$4 sm:$0xff]   ;;  %v12894_v34 = vld [vmem:[%s18623_s2 + $0xd0] ss:$8 sps:$4 sm:$0xff]   ;;  %v3533_v52 = vsel %vm3250_vm2, %v19402_v28, 0.0 }
 0x581   : > { %v5310_v7 = vpack.c.bf16 %v16222_v15, %v16217_v61  ;;  %v5201_v57 = vmul.f32 1.442695, %v5138_v51  ;;  %12162 = vmatprep.subr.bf16.mxu0 %v18977_v13  ;;  %v16237_v42 = vpop.eup %13072  ;;  %v3530_v38 = vsel %vm3250_vm2, %v19401_v54, 0.0  ;;  %v5260_v51 = vsel %vm3250_vm2, %v16187_v60, 0.0  ;;  %v12873_v60 = vld [vmem:[%s18623_s2 + $0x40] ss:$8 sps:$4 sm:$0xff]  }
 0x582   : > { %3516 = vadd.xlane.f32.xlu0 %v3515_v24  ;;  %5243 = vadd.xlane.f32.xlu1 %v5242_v56  ;;  %v3448_v63 = vpop.xlane.xlu1 %3447  ;;  %v12902_v24 = vld [vmem:[%s18623_s2 + $0xb4] ss:$8 sps:$4 sm:$0xff]   ;;  %v3445_v56 = vpop.xlane.xlu0 %3444  ;;  %v5263_v53 = vsel %vm3250_vm2, %v16204_v46, 0.0  ;;  %v19403_v32 = vld [vmem:[#allocation303_spill] sm:$0xff]  ;;  %v5275_v5 = vsel %vm3250_vm2, %v16237_v42, 0.0 }
 0x583   : > { %13086 = vpow2.f32 %v5201_v57  ;;  %12147 = vmatmul.mubr.msk.bf16.vlgmr.msra.gmra.mxu1 %vm3250_vm2, %v5310_v7  ;;  %v12875_v7 = vld [vmem:[%s18623_s2 + $0x44] ss:$8 sps:$4 sm:$0xff]   ;;  %v12897_v57 = vld [vmem:[%s18623_s2 + $0xc0] ss:$8 sps:$4 sm:$0xff]   ;;  %v19407_v54 = vld [vmem:[#allocation69_spill] sm:$0xff] }
 0x584   : > { %12157 = vmatpush3.bf16.msra.mxu1 %v2567_v37  ;;  %12158 = vmatprep.mubr.msk.bf16.mxu1 %vm13603_vm1, %v18977_v13  ;;  %v16241_v44 = vpop.eup %13074  ;;  %13088 = vrcp.f32 %v3448_v63  ;;  %v3536_v37 = vsel %vm3250_vm2, %v19403_v32, 0.0  ;;  %v12905_v46 = vld [vmem:[%s18623_s2 + $0xa4] ss:$8 sps:$4 sm:$0xff]   ;;  %v12879_v50 = vld [vmem:[%s18623_s2 + $0x20] ss:$8 sps:$4 sm:$0xff]  }
 0x585   : > { %12168 = vmatprep.subr.bf16.mxu1 %v18977_v13  ;;  %v5311_v11 = vpack.c.bf16 %v16241_v44, %v16237_v42  ;;  %v16250_v43 = vpop.eup %13076  ;;  %13090 = vrcp.f32 %v3445_v56  ;;  %v12911_v42 = vld [vmem:[%s18623_s2 + $0x84] ss:$8 sps:$4 sm:$0xff]   ;;  %v5278_v16 = vsel %vm3250_vm2, %v16241_v44, 0.0  ;;  %v12885_v44 = vld [vmem:[%s18623_s2] ss:$8 sps:$4 sm:$0xff]  }
 0x586   : > { %5246 = vadd.xlane.f32.xlu0 %v5245_v62  ;;  %3519 = vadd.xlane.f32.xlu1 %v3518_v8  ;;  %v12878_v62 = vld [vmem:[%s18623_s2 + $0x34] ss:$8 sps:$4 sm:$0xff]   ;;  %v12876_v8 = vld [vmem:[%s18623_s2 + $0x30] ss:$8 sps:$4 sm:$0xff]   ;;  %v5281_v36 = vsel %vm3250_vm2, %v16250_v43, 0.0 }
 0x587   : > { %12153 = vmatmul.mubr.msk.bf16.vlgmr.msra.gmra.mxu0 %vm3250_vm2, %v5311_v11  ;;  %v5269_v11 = vsel %vm3250_vm2, %v16217_v61, 0.0  ;;  %v12908_v61 = vld [vmem:[%s18623_s2 + $0x94] ss:$8 sps:$4 sm:$0xff]  }
 0x588   : > { %v16257_v59 = vpop.eup %13078  ;;  %12163 = vmatpush3.bf16.msra.mxu0 %v2579_v17  ;;  %12164 = vmatprep.mubr.msk.bf16.mxu0 %vm13603_vm1, %v18977_v13  ;;  %v12903_v17 = vld [vmem:[%s18623_s2 + $0xa0] ss:$8 sps:$4 sm:$0xff]  }
 0x589   : > { %v5312_v31 = vpack.c.bf16 %v16257_v59, %v16250_v43  ;;  %6196 = vmatprep.subr.bf16.mxu0 %v12890_v19  ;;  %v16274_v10 = vpop.eup %13080  ;;  %v3454_v19 = vpop.xlane.xlu1 %3453 }
 0x58a   : > { %3522 = vadd.xlane.f32.xlu0 %v3521_v30  ;;  %5249 = vadd.xlane.f32.xlu1 %v5248_v45  ;;  %13092 = vrcp.f32 %v3454_v19  ;;  %v5272_v30 = vsel %vm3250_vm2, %v16222_v15, 0.0  ;;  %v12884_v45 = vld [vmem:[%s18623_s2 + $0x14] ss:$8 sps:$4 sm:$0xff]   ;;  %v12882_v15 = vld [vmem:[%s18623_s2 + $0x10] ss:$8 sps:$4 sm:$0xff]  }
 0x58b   : > { %12159 = vmatmul.mubr.msk.bf16.vlgmr.msra.gmra.mxu1 %vm3250_vm2, %v5312_v31  ;;  %v3451_v31 = vpop.xlane.xlu0 %3450 }
 0x58c   : > { %12169 = vmatpush3.bf16.msra.mxu1 %v2591_v22  ;;  %12170 = vmatprep.mubr.msk.bf16.mxu1 %vm13603_vm1, %v18977_v13  ;;  %v16278_v49 = vpop.eup %13082  ;;  %13094 = vrcp.f32 %v3451_v31  ;;  %v12887_v22 = vld [vmem:[%s18623_s2 + $0x4] ss:$8 sps:$4 sm:$0xff]  }
 0x58d   : > { %6469 = vmatprep.subr.bf16.mxu1 %v12866_v47  ;;  %v5313_v20 = vpack.c.bf16 %v16278_v49, %v16274_v10  ;;  %v16289_v18 = vpop.eup %13084  ;;  %v12906_v47 = vld [vmem:[%s18623_s2 + $0x90] ss:$8 sps:$4 sm:$0xff]  }
 0x58e   : > { %5252 = vadd.xlane.f32.xlu0 %v5251_v40  ;;  %3525 = vadd.xlane.f32.xlu1 %v3524_v29  ;;  %v12909_v40 = vld [vmem:[%s18623_s2 + $0x80] ss:$8 sps:$4 sm:$0xff]   ;;  %v3460_v29 = vpop.xlane.xlu1 %3459 }
 0x58f   : > { %12165 = vmatmul.mubr.msk.bf16.vlgmr.msra.gmra.mxu0 %vm3250_vm2, %v5313_v20  ;;  %v3457_v43 = vpop.xlane.xlu0 %3456  ;;  %13096 = vrcp.f32 %v3460_v29  ;;  %v5287_v20 = vsel %vm3250_vm2, %v16274_v10, 0.0  ;;  %v5290_v10 = vsel %vm3250_vm2, %v16278_v49, 0.0 }
 0x590   : > { %v16294_v27 = vpop.eup %13086  ;;  %6197 = vmatpush1.bf16.msra.mxu0 %v12888_v41  ;;  %6228 = vmatprep.mubr.bf16.mxu0 %v18853_v33  ;;  %13098 = vrcp.f32 %v3457_v43 }
 0x591   : > { %v5314_v14 = vpack.c.bf16 %v16294_v27, %v16289_v18  ;;  %6198 = vmatprep.subr.bf16.mxu0 %v12893_v21  ;;  %v13089_v3 = vpop.eup %13088  ;;  %v5284_v21 = vsel %vm3250_vm2, %v16257_v59, 0.0  ;;  %v5296_v49 = vsel %vm3250_vm2, %v16294_v27, 0.0  ;;  %v19412_v27 = vld [vmem:[#allocation11_spill] sm:$0xff] }
 0x592   : > { %3528 = vadd.xlane.f32.xlu0 %v3527_v9  ;;  %5255 = vadd.xlane.f32.xlu1 %v5254_v48  ;;  %v13091_v41 = vpop.eup %13090  ;;  %v5293_v48 = vsel %vm3250_vm2, %v16289_v18, 0.0  ;;  %v19409_v18 = vld [vmem:[#allocation181_spill] sm:$0xff] }
 0x593   : > { %12171 = vmatmul.mubr.msk.bf16.vlgmr.msra.gmra.mxu1 %vm3250_vm2, %v5314_v14  ;;  %v4291_v9 = vmul.f32 %v13091_v41, %v19405_v39 }
 0x594   : > { %6470 = vmatpush1.bf16.msra.mxu1 %v12864_v58  ;;  %6501 = vmatprep.mubr.bf16.mxu1 %v18853_v33  ;;  %v19404_v58 = vld [vmem:[#allocation12_spill] sm:$0xff] }
 0x595   : > { %6471 = vmatprep.subr.bf16.mxu1 %v12869_v1  ;;  %6199 = vmatpush1.bf16.msra.mxu0 %v12891_v35  ;;  %v4292_v14 = vmul.f32 %v13089_v3, %v19404_v58  ;;  %v3466_v35 = vpop.xlane.xlu1 %3465 }
 0x596   : > { %5258 = vadd.xlane.f32.xlu0 %v5257_v55  ;;  %3531 = vadd.xlane.f32.xlu1 %v3530_v38  ;;  %v19406_v55 = vld [vmem:[#allocation73_spill] sm:$0xff]  ;;  %13100 = vrcp.f32 %v3466_v35 }
 0x597   : > { %6200 = vmatprep.subr.bf16.mxu0 %v12896_v4  ;;  %v4323_v1 = vpack.c.bf16 %v4292_v14, %v4291_v9  ;;  %v13093_v59 = vpop.eup %13092  ;;  %v19408_v38 = vpack.c.bf16 %v19406_v55, %v19407_v54 }
 0x598   : > { %6472 = vmatpush1.bf16.msra.mxu1 %v12867_v6  ;;  %v3463_v6 = vpop.xlane.xlu0 %3462 }
 0x599   : > { %6473 = vmatprep.subr.bf16.mxu1 %v12872_v2  ;;  %6201 = vmatpush1.bf16.msra.mxu0 %v12894_v34  ;;  %v13095_v4 = vpop.eup %13094  ;;  %v4294_v2 = vmul.f32 %v13093_v59, %v19409_v18  ;;  %13102 = vrcp.f32 %v3463_v6  ;;  %v19410_v34 = vld [vmem:[#allocation301_spill] sm:$0xff]  ;;  %v19420_v59 = vld [vmem:[#allocation196_spill] sm:$0xff] }
 0x59a   : > { %3534 = vadd.xlane.f32.xlu0 %v3533_v52  ;;  %5261 = vadd.xlane.f32.xlu1 %v5260_v51  ;;  %v3472_v52 = vpop.xlane.xlu1 %3471 }
 0x59b   : > { %6202 = vmatprep.subr.bf16.mxu0 %v12899_v0  ;;  %v4293_v0 = vmul.f32 %v13095_v4, %v19410_v34  ;;  %13104 = vrcp.f32 %v3472_v52 }
 0x59c   : > { %6474 = vmatpush1.bf16.msra.mxu1 %v12870_v12  ;;  %v13097_v28 = vpop.eup %13096 }
 0x59d   : > { %6475 = vmatprep.subr.bf16.mxu1 %v12875_v7  ;;  %6203 = vmatpush1.bf16.msra.mxu0 %v12897_v57  ;;  %v4324_v12 = vpack.c.bf16 %v4294_v2, %v4293_v0  ;;  %v13099_v51 = vpop.eup %13098  ;;  %v3469_v7 = vpop.xlane.xlu0 %3468  ;;  %v19411_v57 = vld [vmem:[#allocation184_spill] sm:$0xff]  ;;  %v19421_v2 = vld [vmem:[#allocation199_spill] sm:$0xff]  ;;  %v19422_v0 = vld [vmem:[#allocation205_spill] sm:$0xff] }
 0x59e   : > { %5264 = vadd.xlane.f32.xlu0 %v5263_v53  ;;  %3537 = vadd.xlane.f32.xlu1 %v3536_v37  ;;  %v4296_v63 = vmul.f32 %v13097_v28, %v19411_v57  ;;  %13106 = vrcp.f32 %v3469_v7  ;;  %v3478_v53 = vpop.xlane.xlu1 %3477 }
 0x59f   : > { %6204 = vmatprep.subr.bf16.mxu0 %v12902_v24  ;;  %v4295_v24 = vmul.f32 %v13099_v51, %v19412_v27  ;;  %13108 = vrcp.f32 %v3478_v53 }
 0x5a0   : > { %6476 = vmatpush1.bf16.msra.mxu1 %v12873_v60 }
 0x5a1   : > { %6477 = vmatprep.subr.bf16.mxu1 %v12878_v62  ;;  %6205 = vmatpush1.bf16.msra.mxu0 %v12900_v25  ;;  %v4325_v56 = vpack.c.bf16 %v4296_v63, %v4295_v24  ;;  %v3475_v37 = vpop.xlane.xlu0 %3474  ;;  %v19413_v62 = vld [vmem:[#allocation193_spill] sm:$0xff]  ;;  %v19423_v24 = vld [vmem:[#allocation202_spill] sm:$0xff] }
 0x5a2   : > { %5270 = vadd.xlane.f32.xlu0 %v5269_v11  ;;  %5267 = vadd.xlane.f32.xlu1 %v5266_v23  ;;  %13110 = vrcp.f32 %v3475_v37 }
 0x5a3   : > { %6206 = vmatprep.subr.bf16.mxu0 %v12905_v46  ;;  %v13101_v60 = vpop.eup %13100  ;;  %v19414_v46 = vld [vmem:[#allocation187_spill] sm:$0xff] }
 0x5a4   : > { %6478 = vmatpush1.bf16.msra.mxu1 %v12876_v8  ;;  %v4298_v25 = vmul.f32 %v13101_v60, %v19413_v62  ;;  %v19424_v60 = vld [vmem:[#allocation17_spill] sm:$0xff] }
 0x5a5   : > { %6479 = vmatprep.subr.bf16.mxu1 %v12881_v26  ;;  %6207 = vmatpush1.bf16.msra.mxu0 %v12903_v17  ;;  %v19415_v17 = vld [vmem:[#allocation13_spill] sm:$0xff] }
 0x5a6   : > { %5276 = vadd.xlane.f32.xlu0 %v5275_v5  ;;  %5273 = vadd.xlane.f32.xlu1 %v5272_v30  ;;  %v13103_v32 = vpop.eup %13102 }
 0x5a7   : > { %6208 = vmatprep.subr.bf16.mxu0 %v12908_v61  ;;  %v4297_v8 = vmul.f32 %v13103_v32, %v19414_v46  ;;  %v19416_v61 = vld [vmem:[#allocation190_spill] sm:$0xff] }
 0x5a8   : > { %6480 = vmatpush1.bf16.msra.mxu1 %v12879_v50  ;;  %v13105_v23 = vpop.eup %13104 }
 0x5a9   : > { %6481 = vmatprep.subr.bf16.mxu1 %v12884_v45  ;;  %6209 = vmatpush1.bf16.msra.mxu0 %v12906_v47  ;;  %v4326_v11 = vpack.c.bf16 %v4298_v25, %v4297_v8  ;;  %v4300_v19 = vmul.f32 %v13105_v23, %v19415_v17  ;;  %v19417_v45 = vld [vmem:[#allocation16_spill] sm:$0xff]  ;;  %v19426_v17 = vld [vmem:[#allocation26_spill] sm:$0xff] }
 0x5aa   : > { %5282 = vadd.xlane.f32.xlu0 %v5281_v36  ;;  %5279 = vadd.xlane.f32.xlu1 %v5278_v16  ;;  %v19425_v23 = vld [vmem:[#allocation20_spill] sm:$0xff] }
 0x5ab   : > { %6210 = vmatprep.subr.bf16.mxu0 %v12911_v42  ;;  %v13107_v26 = vpop.eup %13106 }
 0x5ac   : > { %6482 = vmatpush1.bf16.msra.mxu1 %v12882_v15  ;;  %v4299_v31 = vmul.f32 %v13107_v26, %v19416_v61  ;;  %v13109_v5 = vpop.eup %13108  ;;  %v19418_v15 = vld [vmem:[#allocation14_spill] sm:$0xff] }
 0x5ad   : > { %6483 = vmatprep.subr.bf16.mxu1 %v12887_v22  ;;  %6211 = vmatpush1.bf16.msra.mxu0 %v12909_v40  ;;  %v4302_v47 = vmul.f32 %v13109_v5, %v19417_v45 }
 0x5ae   : > { %5288 = vadd.xlane.f32.xlu0 %v5287_v20  ;;  %5285 = vadd.xlane.f32.xlu1 %v5284_v21  ;;  %v4327_v50 = vpack.c.bf16 %v4300_v19, %v4299_v31 }
 0x5af   : > { %12174 = vmatprep.subr.bf16.mxu0 %v18977_v13  ;;  %v13111_v30 = vpop.eup %13110 }
 0x5b0   : > { %6484 = vmatpush1.bf16.msra.mxu1 %v12885_v44  ;;  %v4301_v36 = vmul.f32 %v13111_v30, %v19418_v15  ;;  %v19427_v15 = vld [vmem:[#allocation23_spill] sm:$0xff] }
 0x5b1   : > { %12180 = vmatprep.subr.bf16.mxu1 %v18977_v13 }
 0x5b2   : > { %5294 = vadd.xlane.f32.xlu0 %v5293_v48  ;;  %5291 = vadd.xlane.f32.xlu1 %v5290_v10  ;;  %v4328_v16 = vpack.c.bf16 %v4302_v47, %v4301_v36  ;;  %v19419_v10 = vld [vmem:[#allocation15_spill] sm:$0xff] }
 0x5b3   : > { %6502 = vmatmul.mubr.bf16.vlgmr.msra.gmra.mxu1 %v4323_v1 }
 0x5b4   : > { %12181 = vmatpush3.bf16.xpose.msra.mxu1 %v19408_v38  ;;  %6511 = vmatprep.mubr.bf16.mxu1 %v18853_v33 }
 0x5b5   : > { %12192 = vmatprep.subr.bf16.mxu1 %v18977_v13 }
 0x5b6   : > { %5297 = vadd.xlane.f32.xlu1 %v5296_v49 }
 0x5bb   : > { %6512 = vmatmul.mubr.bf16.gmra.mxu1 %v4324_v12 }
 0x5bc   : > { %6521 = vmatprep.mubr.bf16.mxu1 %v18853_v33 }
 0x5c3   : > { %6522 = vmatmul.mubr.bf16.gmra.mxu1 %v4325_v56 }
 0x5c4   : > { %6531 = vmatprep.mubr.bf16.mxu1 %v18853_v33 }
 0x5cb   : > { %6532 = vmatmul.mubr.bf16.gmra.mxu1 %v4326_v11 }
 0x5cc   : > { %6541 = vmatprep.mubr.bf16.mxu1 %v18853_v33 }
 0x5d3   : > { %6542 = vmatmul.mubr.bf16.gmra.mxu1 %v4327_v50 }
 0x5d4   : > { %6551 = vmatprep.mubr.bf16.mxu1 %v18853_v33 }
 0x5d7   : > { %v16446_v42 = vpop.xlane.xlu0 %5204 }
 0x5db   : > { %6552 = vmatmul.mubr.bf16.gmra.mxu1 %v4328_v16  ;;  %v3481_v22 = vpop.xlane.xlu0 %3480  ;;  %v5208_v40 = vpop.xlane.xlu1 %5207  ;;  %v19428_v16 = vld [vmem:[#allocation208_spill] sm:$0xff] }
 0x5dc   : > { %6561 = vmatprep.mubr.bf16.mxu1 %v18853_v33  ;;  %13112 = vrcp.f32 %v3481_v22 }
 0x5df   : > { %v16450_v3 = vpop.xlane.xlu0 %5210  ;;  %v3484_v29 = vpop.xlane.xlu1 %3483 }
 0x5e0   : > { %13114 = vrcp.f32 %v3484_v29 }
 0x5e3   : > { %v3487_v41 = vpop.xlane.xlu0 %3486  ;;  %v16452_v43 = vpop.xlane.xlu1 %5213 }
 0x5e4   : > { %13116 = vrcp.f32 %v3487_v41 }
 0x5e7   : > { %v16454_v44 = vpop.xlane.xlu0 %5216  ;;  %v3490_v20 = vpop.xlane.xlu1 %3489 }
 0x5e8   : > { %13118 = vrcp.f32 %v3490_v20 }
 0x5e9   : > { %v13113_v14 = vpop.eup %13112 }
 0x5ea   : > { %v4303_v1 = vmul.f32 %v13113_v14, %v19419_v10 }
 0x5eb   : > { %v3493_v21 = vpop.xlane.xlu0 %3492  ;;  %v16456_v58 = vpop.xlane.xlu1 %5219 }
 0x5ec   : > { %13120 = vrcp.f32 %v3493_v21 }
 0x5ed   : > { %v13115_v39 = vpop.eup %13114 }
 0x5ee   : > { %v4304_v35 = vmul.f32 %v13115_v39, %v19420_v59  ;;  %v19430_v59 = vld [vmem:[#allocation217_spill] sm:$0xff] }
 0x5ef   : > { %v16458_v9 = vpop.xlane.xlu0 %5222  ;;  %v3496_v48 = vpop.xlane.xlu1 %3495 }
 0x5f0   : > { %13122 = vrcp.f32 %v3496_v48  ;;  %v4329_v4 = vpack.c.bf16 %v4304_v35, %v4303_v1 }
 0x5f1   : > { %v13117_v54 = vpop.eup %13116 }
 0x5f2   : > { %6562 = vmatmul.mubr.bf16.gmra.mxu1 %v4329_v4  ;;  %v4305_v34 = vmul.f32 %v13117_v54, %v19421_v2 }
 0x5f3   : > { %v3499_v6 = vpop.xlane.xlu0 %3498  ;;  %v16462_v55 = vpop.xlane.xlu1 %5225  ;;  %6571 = vmatprep.mubr.bf16.mxu1 %v18853_v33 }
 0x5f4   : > { %13124 = vrcp.f32 %v3499_v6 }
 0x5f5   : > { %v13119_v38 = vpop.eup %13118 }
 0x5f6   : > { %v4306_v12 = vmul.f32 %v13119_v38, %v19422_v0 }
 0x5f7   : > { %v16465_v49 = vpop.xlane.xlu0 %5228  ;;  %v3502_v18 = vpop.xlane.xlu1 %3501 }
 0x5f8   : > { %13126 = vrcp.f32 %v3502_v18  ;;  %v4330_v28 = vpack.c.bf16 %v4306_v12, %v4305_v34 }
 0x5f9   : > { %v13121_v7 = vpop.eup %13120 }
 0x5fa   : > { %6572 = vmatmul.mubr.bf16.gmra.mxu1 %v4330_v28  ;;  %v4307_v56 = vmul.f32 %v13121_v7, %v19423_v24 }
 0x5fb   : > { %v3505_v52 = vpop.xlane.xlu0 %3504  ;;  %v16469_v51 = vpop.xlane.xlu1 %5231  ;;  %6581 = vmatprep.mubr.bf16.mxu1 %v18853_v33 }
 0x5fc   : > { %13128 = vrcp.f32 %v3505_v52 }
 0x5fd   : > { %v13123_v57 = vpop.eup %13122 }
 0x5fe   : > { %v4308_v53 = vmul.f32 %v13123_v57, %v19424_v60  ;;  %v19431_v57 = vld [vmem:[#allocation65_spill] sm:$0xff] }
 0x5ff   : > { %v16472_v63 = vpop.xlane.xlu0 %5234  ;;  %v3508_v27 = vpop.xlane.xlu1 %3507 }
 0x600   : > { %13130 = vrcp.f32 %v3508_v27  ;;  %v4331_v32 = vpack.c.bf16 %v4308_v53, %v4307_v56  ;;  %v19432_v27 = vld [vmem:[#allocation61_spill] sm:$0xff]  ;;  %v19434_v53 = vld [vmem:[#allocation214_spill] sm:$0xff] }
 0x601   : > { %v13125_v25 = vpop.eup %13124  ;;  %v19433_v24 = vpack.c.bf16 %v19431_v57, %v19432_v27 }
 0x602   : > { %6582 = vmatmul.mubr.bf16.gmra.mxu1 %v4331_v32  ;;  %v4309_v26 = vmul.f32 %v13125_v25, %v19425_v23 }
 0x603   : > { %v3511_v37 = vpop.xlane.xlu0 %3510  ;;  %v16476_v62 = vpop.xlane.xlu1 %5237  ;;  %6591 = vmatprep.mubr.bf16.mxu1 %v18853_v33 }
 0x604   : > { %13132 = vrcp.f32 %v3511_v37  ;;  %v19435_v37 = vld [vmem:[#allocation32_spill] sm:$0xff] }
 0x605   : > { %v13127_v46 = vpop.eup %13126 }
 0x606   : > { %v4310_v19 = vmul.f32 %v13127_v46, %v19426_v17 }
 0x607   : > { %v16479_v8 = vpop.xlane.xlu0 %5240  ;;  %v3514_v11 = vpop.xlane.xlu1 %3513 }
 0x608   : > { %13134 = vrcp.f32 %v3514_v11  ;;  %v4332_v61 = vpack.c.bf16 %v4310_v19, %v4309_v26 }
 0x609   : > { %13136 = vrcp.f32 %v16446_v42  ;;  %v13129_v5 = vpop.eup %13128 }
 0x60a   : > { %13138 = vrcp.f32 %v5208_v40  ;;  %6592 = vmatmul.mubr.bf16.gmra.mxu1 %v4332_v61  ;;  %v4311_v36 = vmul.f32 %v13129_v5, %v19427_v15 }
 0x60b   : > { %v3517_v31 = vpop.xlane.xlu0 %3516  ;;  %v16484_v50 = vpop.xlane.xlu1 %5243  ;;  %6601 = vmatprep.mubr.bf16.mxu1 %v18853_v33 }
 0x60c   : > { %13140 = vrcp.f32 %v3517_v31 }
 0x60d   : > { %v13131_v30 = vpop.eup %13130  ;;  %13142 = vrcp.f32 %v16450_v3  ;;  %v19429_v3 = vld [vmem:[#allocation211_spill] sm:$0xff] }
 0x60e   : > { %v4312_v22 = vmul.f32 %v13131_v30, %v19428_v16 }
 0x60f   : > { %v16487_v45 = vpop.xlane.xlu0 %5246  ;;  %v3520_v47 = vpop.xlane.xlu1 %3519 }
 0x610   : > { %13144 = vrcp.f32 %v3520_v47  ;;  %v4333_v42 = vpack.c.bf16 %v4312_v22, %v4311_v36 }
 0x611   : > { %13146 = vrcp.f32 %v16452_v43  ;;  %v13133_v41 = vpop.eup %13132 }
 0x612   : > { %6602 = vmatmul.mubr.bf16.gmra.mxu1 %v4333_v42  ;;  %v4313_v1 = vmul.f32 %v13133_v41, %v19429_v3 }
 0x613   : > { %v3523_v40 = vpop.xlane.xlu0 %3522  ;;  %v16493_v29 = vpop.xlane.xlu1 %5249  ;;  %6611 = vmatprep.mubr.bf16.mxu1 %v18853_v33 }
 0x614   : > { %v5352_v20 = vpop.f32.mrf.mxu0  ;;  %13148 = vrcp.f32 %v3523_v40 }
 0x615   : > { %v13135_v21 = vpop.eup %13134  ;;  %13150 = vrcp.f32 %v16456_v58 }
 0x616   : > { %v12082_v14 = vpop.f32.mrf.mxu0  ;;  %v13137_v39 = vpop.eup %13136  ;;  %v4314_v35 = vmul.f32 %v13135_v21, %v19430_v59  ;;  %v19437_v21 = vld [vmem:[#allocation38_spill] sm:$0xff] }
 0x617   : > { %v16496_v48 = vpop.xlane.xlu0 %5252  ;;  %v3526_v10 = vpop.xlane.xlu1 %3525  ;;  %v6051_v6 = vmul.f32 %v13137_v39, %v5352_v20 }
 0x618   : > { %v13139_v43 = vpop.eup %13138  ;;  %v5355_v4 = vpop.f32.mrf.mxu0  ;;  %13152 = vrcp.f32 %v3526_v10  ;;  %v4334_v38 = vpack.c.bf16 %v4314_v35, %v4313_v1 }
 0x619   : > { %v6052_v54 = vmul.f32 %v13139_v43, %v5355_v4  ;;  %13154 = vrcp.f32 %v16454_v44  ;;  %v13141_v12 = vpop.eup %13140 }
 0x61a   : > { %v12083_v18 = vpop.f32.mrf.mxu0  ;;  %6612 = vmatmul.mubr.bf16.gmra.mxu1 %v4334_v38  ;;  %v13143_v52 = vpop.eup %13142  ;;  %v4315_v32 = vmul.f32 %v13141_v12, %v19434_v53 }
 0x61b   : > { %v6083_v2 = vpack.c.bf16 %v6052_v54, %v6051_v6  ;;  %v5396_v34 = vpop.f32.mrf.mxu1  ;;  %v3529_v0 = vpop.xlane.xlu0 %3528  ;;  %6621 = vmatprep.mubr.bf16.mxu1 %v18853_v33 }
 0x61c   : > { %v16502_v28 = vpop.xlane.xlu1 %5255  ;;  %13156 = vrcp.f32 %v3529_v0  ;;  %v6053_v46 = vmul.f32 %v13143_v52, %v5396_v34  ;;  %v19438_v52 = vld [vmem:[#allocation35_spill] sm:$0xff] }
 0x61d   : > { %6229 = vmatmul.mubr.bf16.vlgmr.msra.gmra.mxu0 %v6083_v2  ;;  %v12088_v58 = vpop.f32.mrf.mxu1  ;;  %v13145_v7 = vpop.eup %13144  ;;  %13158 = vrcp.f32 %v16462_v55 }
 0x61e   : > { %12175 = vmatpush3.bf16.xpose.msra.mxu0 %v19433_v24  ;;  %6238 = vmatprep.mubr.bf16.mxu0 %v18853_v33  ;;  %v13147_v44 = vpop.eup %13146  ;;  %v4316_v25 = vmul.f32 %v13145_v7, %v19435_v37  ;;  %v19439_v7 = vld [vmem:[#allocation223_spill] sm:$0xff] }
 0x61f   : > { %v5399_v56 = vpop.f32.mrf.mxu1  ;;  %v16509_v60 = vpop.xlane.xlu0 %5258  ;;  %12186 = vmatprep.subr.bf16.mxu0 %v18977_v13 }
 0x620   : > { %v6054_v11 = vmul.f32 %v13147_v44, %v5399_v56  ;;  %v3532_v23 = vpop.xlane.xlu1 %3531  ;;  %v5440_v26 = vpop.f32.mrf.mxu0  ;;  %v4335_v19 = vpack.c.bf16 %v4316_v25, %v4315_v32 }
 0x621   : > { %13160 = vrcp.f32 %v3532_v23  ;;  %v12089_v17 = vpop.f32.mrf.mxu1  ;;  %v13149_v47 = vpop.eup %13148 }
 0x622   : > { %v6084_v61 = vpack.c.bf16 %v6054_v11, %v6053_v46  ;;  %v12094_v31 = vpop.f32.mrf.mxu0  ;;  %13162 = vrcp.f32 %v16458_v9  ;;  %6622 = vmatmul.mubr.bf16.gmra.mxu1 %v4335_v19  ;;  %v13151_v55 = vpop.eup %13150  ;;  %v19436_v9 = vld [vmem:[#allocation29_spill] sm:$0xff] }
 0x623   : > { %v5484_v5 = vpop.f32.mrf.mxu1  ;;  %v3535_v30 = vpop.xlane.xlu0 %3534  ;;  %6631 = vmatprep.mubr.bf16.mxu1 %v18853_v33  ;;  %v4317_v20 = vmul.f32 %v13149_v47, %v19436_v9  ;;  %v19441_v31 = vld [vmem:[#allocation229_spill] sm:$0xff] }
 0x624   : > { %v16516_v15 = vpop.xlane.xlu1 %5261  ;;  %v5443_v36 = vpop.f32.mrf.mxu0  ;;  %13164 = vrcp.f32 %v3535_v30 }
 0x625   : > { %6239 = vmatmul.mubr.bf16.gmra.mxu0 %v6084_v61  ;;  %v12100_v16 = vpop.f32.mrf.mxu1  ;;  %v13153_v22 = vpop.eup %13152  ;;  %v6056_v40 = vmul.f32 %v13151_v55, %v5443_v36  ;;  %13166 = vrcp.f32 %v16469_v51  ;;  %v19440_v61 = vld [vmem:[#allocation220_spill] sm:$0xff] }
 0x626   : > { %v12095_v42 = vpop.f32.mrf.mxu0  ;;  %6248 = vmatprep.mubr.bf16.mxu0 %v18853_v33  ;;  %v4318_v14 = vmul.f32 %v13153_v22, %v19437_v21  ;;  %v13155_v39 = vpop.eup %13154 }
 0x627   : > { %v5487_v41 = vpop.f32.mrf.mxu1  ;;  %v6055_v1 = vmul.f32 %v13155_v39, %v5440_v26 }
 0x628   : > { %v3538_v10 = vpop.xlane.xlu1 %3537  ;;  %v5528_v3 = vpop.f32.mrf.mxu0  ;;  %v4336_v35 = vpack.c.bf16 %v4318_v14, %v4317_v20 }
 0x629   : > { %13168 = vrcp.f32 %v3538_v10  ;;  %v12101_v59 = vpop.f32.mrf.mxu1  ;;  %v6085_v4 = vpack.c.bf16 %v6056_v40, %v6055_v1  ;;  %v13157_v54 = vpop.eup %13156 }
 0x62a   : > { %v12106_v43 = vpop.f32.mrf.mxu0  ;;  %13170 = vrcp.f32 %v16465_v49  ;;  %6632 = vmatmul.mubr.bf16.gmra.mxu1 %v4336_v35  ;;  %v13159_v18 = vpop.eup %13158  ;;  %v4319_v58 = vmul.f32 %v13157_v54, %v19438_v52  ;;  %v19442_v35 = vld [vmem:[#allocation117_spill] sm:$0xff] }
 0x62b   : > { %v5572_v6 = vpop.f32.mrf.mxu1  ;;  %6641 = vmatprep.mubr.bf16.mxu1 %v18853_v33  ;;  %v6058_v0 = vmul.f32 %v13159_v18, %v5487_v41  ;;  %13172 = vrcp.f32 %v16476_v62  ;;  %v19443_v43 = vld [vmem:[#allocation113_spill] sm:$0xff] }
 0x62c   : > { %v5531_v38 = vpop.f32.mrf.mxu0  ;;  %13174 = vrcp.f32 %v16472_v63  ;;  %v19446_v18 = vld [vmem:[#allocation85_spill] sm:$0xff] }
 0x62d   : > { %6249 = vmatmul.mubr.bf16.gmra.mxu0 %v6085_v4  ;;  %v12112_v2 = vpop.f32.mrf.mxu1  ;;  %13176 = vrcp.f32 %v16484_v50  ;;  %v19444_v4 = vpack.c.bf16 %v19442_v35, %v19443_v43  ;;  %v19460_v35 = vld [vmem:[#allocation165_spill] sm:$0xff] }
 0x62e   : > { %v13161_v51 = vpop.eup %13160  ;;  %v12107_v34 = vpop.f32.mrf.mxu0  ;;  %6258 = vmatprep.mubr.bf16.mxu0 %v18853_v33  ;;  %13178 = vrcp.f32 %v16479_v8  ;;  %v19461_v43 = vld [vmem:[#allocation161_spill] sm:$0xff] }
 0x62f   : > { %v5575_v12 = vpop.f32.mrf.mxu1  ;;  %v4320_v49 = vmul.f32 %v13161_v51, %v19439_v7  ;;  %v13163_v57 = vpop.eup %13162  ;;  %13180 = vrcp.f32 %v16493_v29 }
 0x630   : > { %v16528_v27 = vpop.f32.mrf.mxu0  ;;  %v6057_v24 = vmul.f32 %v13163_v57, %v5484_v5  ;;  %13182 = vrcp.f32 %v16487_v45 }
 0x631   : > { %v12113_v44 = vpop.f32.mrf.mxu1  ;;  %v4337_v56 = vpack.c.bf16 %v4320_v49, %v4319_v58  ;;  %v13165_v25 = vpop.eup %13164  ;;  %13184 = vrcp.f32 %v16502_v28 }
 0x632   : > { %v12118_v53 = vpop.f32.mrf.mxu0  ;;  %v6086_v32 = vpack.c.bf16 %v6058_v0, %v6057_v24  ;;  %v13167_v11 = vpop.eup %13166  ;;  %v4321_v63 = vmul.f32 %v13165_v25, %v19440_v61  ;;  %13186 = vrcp.f32 %v16496_v48  ;;  %v19448_v24 = vld [vmem:[#allocation133_spill] sm:$0xff] }
 0x633   : > { %6642 = vmatmul.mubr.bf16.gmra.mxu1 %v4337_v56  ;;  %v16532_v37 = vpop.f32.mrf.mxu1  ;;  %v6060_v62 = vmul.f32 %v13167_v11, %v5531_v38  ;;  %v19445_v38 = vld [vmem:[#allocation89_spill] sm:$0xff]  ;;  %13188 = vrcp.f32 %v16516_v15 }
 0x634   : > { %v5619_v46 = vpop.f32.mrf.mxu0  ;;  %6651 = vmatprep.mubr.bf16.mxu1 %v18853_v33  ;;  %v19447_v2 = vpack.c.bf16 %v19445_v38, %v19446_v18  ;;  %v19449_v44 = vld [vmem:[#allocation129_spill] sm:$0xff]  ;;  %13190 = vrcp.f32 %v16509_v60  ;;  %v19463_v38 = vld [vmem:[#allocation136_spill] sm:$0xff] }
 0x635   : > { %6259 = vmatmul.mubr.bf16.gmra.mxu0 %v6086_v32  ;;  %v12124_v23 = vpop.f32.mrf.mxu1  ;;  %v19450_v56 = vpack.c.bf16 %v19448_v24, %v19449_v44  ;;  %v19451_v32 = vld [vmem:[#allocation104_spill] sm:$0xff]  ;;  %v19452_v25 = vld [vmem:[#allocation101_spill] sm:$0xff] }
 0x636   : > { %v13169_v26 = vpop.eup %13168  ;;  %v12119_v17 = vpop.f32.mrf.mxu0  ;;  %6268 = vmatprep.mubr.bf16.mxu0 %v18853_v33  ;;  %v19464_v18 = vld [vmem:[#allocation132_spill] sm:$0xff] }
 0x637   : > { %v16536_v19 = vpop.f32.mrf.mxu1  ;;  %v4322_v5 = vmul.f32 %v13169_v26, %v19441_v31  ;;  %v13171_v30 = vpop.eup %13170  ;;  %v19470_v24 = vld [vmem:[#allocation148_spill] sm:$0xff] }
 0x638   : > { %v16540_v47 = vpop.f32.mrf.mxu0  ;;  %v6059_v36 = vmul.f32 %v13171_v30, %v5528_v3  ;;  %v13173_v20 = vpop.eup %13172  ;;  %v19454_v30 = vld [vmem:[#allocation149_spill] sm:$0xff] }
 0x639   : > { %v12125_v55 = vpop.f32.mrf.mxu1  ;;  %v4338_v16 = vpack.c.bf16 %v4322_v5, %v4321_v63  ;;  %v6062_v50 = vmul.f32 %v13173_v20, %v5575_v12  ;;  %v13175_v39 = vpop.eup %13174 }
 0x63a   : > { %v12130_v22 = vpop.f32.mrf.mxu0  ;;  %v6087_v42 = vpack.c.bf16 %v6060_v62, %v6059_v36  ;;  %v6061_v10 = vmul.f32 %v13175_v39, %v5572_v6  ;;  %v13177_v45 = vpop.eup %13176  ;;  %v19455_v36 = vld [vmem:[#allocation145_spill] sm:$0xff] }
 0x63b   : > { %6652 = vmatmul.mubr.bf16.gmra.mxu1 %v4338_v16  ;;  %v16544_v40 = vpop.f32.mrf.mxu1  ;;  %v6064_v34 = vmul.f32 %v13177_v45, %v5619_v46  ;;  %v13179_v12 = vpop.eup %13178  ;;  %v19453_v46 = vpack.c.bf16 %v19451_v32, %v19452_v25  ;;  %v19456_v55 = vpack.c.bf16 %v19454_v30, %v19455_v36  ;;  %v19458_v22 = vld [vmem:[#allocation116_spill] sm:$0xff] }
 0x63c   : > { %v16546_v41 = vpop.f32.mrf.mxu0  ;;  %12182 = vmatprep.mubr.msk.bf16.mxu1 %vm13603_vm1, %v18977_v13  ;;  %v6088_v59 = vpack.c.bf16 %v6062_v50, %v6061_v10  ;;  %v6063_v58 = vmul.f32 %v13179_v12, %v16528_v27  ;;  %v13181_v48 = vpop.eup %13180 }
 0x63d   : > { %6269 = vmatmul.mubr.bf16.gmra.mxu0 %v6087_v42  ;;  %v12136_v9 = vpop.f32.mrf.mxu1  ;;  %v6066_v23 = vmul.f32 %v13181_v48, %v16536_v19  ;;  %v13183_v17 = vpop.eup %13182  ;;  %v19457_v19 = vld [vmem:[#allocation120_spill] sm:$0xff]  ;;  %v19472_v48 = vld [vmem:[#allocation33_spill] sm:$0xff] }
 0x63e   : > { %v12131_v21 = vpop.f32.mrf.mxu0  ;;  %6278 = vmatprep.mubr.bf16.mxu0 %v18853_v33  ;;  %v6089_v57 = vpack.c.bf16 %v6064_v34, %v6063_v58  ;;  %v6065_v61 = vmul.f32 %v13183_v17, %v16532_v37  ;;  %v19459_v42 = vpack.c.bf16 %v19457_v19, %v19458_v22  ;;  %v13185_v60 = vpop.eup %13184  ;;  %v19466_v58 = vld [vmem:[#allocation21_spill] sm:$0xff]  ;;  %v19475_v17 = vld [vmem:[#allocation168_spill] sm:$0xff] }
 0x63f   : > { %v16551_v14 = vpop.f32.mrf.mxu1  ;;  %v5268_v37 = vpop.xlane.xlu1 %5267  ;;  %v6068_v21 = vmul.f32 %v13185_v60, %v16546_v41  ;;  %v19478_v22 = vld [vmem:[#allocation45_spill] sm:$0xff]  ;;  %v19481_v60 = vld [vmem:[#allocation182_spill] sm:$0xff] }
 0x640   : > { %v16553_v8 = vpop.f32.mrf.mxu0  ;;  %v6090_v5 = vpack.c.bf16 %v6066_v23, %v6065_v61  ;;  %v13187_v39 = vpop.eup %13186  ;;  %13192 = vrcp.f32 %v5268_v37  ;;  %v19476_v61 = vld [vmem:[#allocation164_spill] sm:$0xff]  ;;  %v19482_v37 = vld [vmem:[#allocation179_spill] sm:$0xff] }
 0x641   : > { %v12137_v3 = vpop.f32.mrf.mxu1  ;;  %v5265_v10 = vpop.xlane.xlu0 %5264 }
 0x642   : > { %v12142_v1 = vpop.f32.mrf.mxu0  ;;  %v6067_v3 = vmul.f32 %v13187_v39, %v16540_v47  ;;  %13194 = vrcp.f32 %v5265_v10  ;;  %v13189_v41 = vpop.eup %13188 }
 0x643   : > { %12183 = vmatmul.mubr.bf16.vlgmr.msra.gmra.mxu1 %v19444_v4  ;;  %v16560_v54 = vpop.f32.mrf.mxu1  ;;  %v19462_v4 = vpack.c.bf16 %v19460_v35, %v19461_v43  ;;  %v6070_v47 = vmul.f32 %v13189_v41, %v16551_v14  ;;  %v13191_v45 = vpop.eup %13190  ;;  %v19488_v41 = vld [vmem:[#allocation194_spill] sm:$0xff] }
 0x644   : > { %12193 = vmatpush3.bf16.xpose.msra.mxu1 %v19447_v2  ;;  %v16565_v51 = vpop.f32.mrf.mxu0  ;;  %12194 = vmatprep.mubr.msk.bf16.mxu1 %vm13603_vm1, %v18977_v13  ;;  %v19465_v2 = vpack.c.bf16 %v19463_v38, %v19464_v18  ;;  %v6069_v34 = vmul.f32 %v13191_v45, %v16544_v40  ;;  %v19485_v38 = vld [vmem:[#allocation57_spill] sm:$0xff]  ;;  %v19486_v18 = vld [vmem:[#allocation54_spill] sm:$0xff] }
 0x645   : > { %6279 = vmatmul.mubr.bf16.gmra.mxu0 %v6088_v59  ;;  %v12148_v29 = vpop.f32.mrf.mxu1  ;;  %12204 = vmatprep.subr.bf16.mxu1 %v18977_v13  ;;  %v6091_v59 = vpack.c.bf16 %v6068_v21, %v6067_v3 }
 0x646   : > { %v12143_v6 = vpop.f32.mrf.mxu0  ;;  %6288 = vmatprep.mubr.bf16.mxu0 %v18853_v33  ;;  %v5274_v29 = vpop.xlane.xlu1 %5273  ;;  %v6092_v12 = vpack.c.bf16 %v6070_v47, %v6069_v34 }
 0x647   : > { %v16571_v0 = vpop.f32.mrf.mxu1  ;;  %v5271_v6 = vpop.xlane.xlu0 %5270  ;;  %13196 = vrcp.f32 %v5274_v29  ;;  %v19489_v29 = vld [vmem:[#allocation191_spill] sm:$0xff] }
 0x648   : > { %v16573_v52 = vpop.f32.mrf.mxu0  ;;  %13198 = vrcp.f32 %v5271_v6 }
 0x649   : > { %v12149_v7 = vpop.f32.mrf.mxu1 }
 0x64a   : > { %v12154_v49 = vpop.f32.mrf.mxu0  ;;  %v19467_v7 = vld [vmem:[#allocation18_spill] sm:$0xff] }
 0x64b   : > { %12195 = vmatmul.mubr.bf16.vlgmr.msra.gmra.mxu1 %v19450_v56  ;;  %v16581_v53 = vpop.f32.mrf.mxu1  ;;  %v19468_v49 = vpack.c.bf16 %v19466_v58, %v19467_v7  ;;  %v5280_v56 = vpop.xlane.xlu1 %5279 }
 0x64c   : > { %12205 = vmatpush3.bf16.xpose.msra.mxu1 %v19453_v46  ;;  %v16586_v11 = vpop.f32.mrf.mxu0  ;;  %12206 = vmatprep.mubr.msk.bf16.mxu1 %vm13603_vm1, %v18977_v13  ;;  %v5277_v25 = vpop.xlane.xlu0 %5276  ;;  %13200 = vrcp.f32 %v5280_v56 }
 0x64d   : > { %6289 = vmatmul.mubr.bf16.gmra.mxu0 %v6089_v57  ;;  %v12160_v28 = vpop.f32.mrf.mxu1  ;;  %12216 = vmatprep.subr.bf16.mxu1 %v18977_v13  ;;  %v19469_v57 = vld [vmem:[#allocation152_spill] sm:$0xff]  ;;  %v13193_v14 = vpop.eup %13192  ;;  %13202 = vrcp.f32 %v5277_v25 }
 0x64e   : > { %v12155_v27 = vpop.f32.mrf.mxu0  ;;  %6298 = vmatprep.mubr.bf16.mxu0 %v18853_v33  ;;  %v19471_v44 = vpack.c.bf16 %v19469_v57, %v19470_v24  ;;  %v6072_v40 = vmul.f32 %v13193_v14, %v16565_v51 }
 0x64f   : > { %v16593_v26 = vpop.f32.mrf.mxu1  ;;  %v13195_v32 = vpop.eup %13194  ;;  %v19473_v27 = vld [vmem:[#allocation30_spill] sm:$0xff] }
 0x650   : > { %v16595_v62 = vpop.f32.mrf.mxu0  ;;  %v6071_v46 = vmul.f32 %v13195_v32, %v16553_v8  ;;  %v19474_v23 = vpack.c.bf16 %v19472_v48, %v19473_v27  ;;  %v5283_v30 = vpop.xlane.xlu0 %5282 }
 0x651   : > { %v12161_v63 = vpop.f32.mrf.mxu1 }
 0x652   : > { %v12166_v31 = vpop.f32.mrf.mxu0  ;;  %v6093_v28 = vpack.c.bf16 %v6072_v40, %v6071_v46  ;;  %v19477_v63 = vpack.c.bf16 %v19475_v17, %v19476_v61 }
 0x653   : > { %12207 = vmatmul.mubr.bf16.vlgmr.msra.gmra.mxu1 %v19456_v55  ;;  %v16603_v16 = vpop.f32.mrf.mxu1  ;;  %v5286_v31 = vpop.xlane.xlu1 %5285 }
 0x654   : > { %12217 = vmatpush3.bf16.xpose.msra.mxu1 %v19459_v42  ;;  %v16608_v9 = vpop.f32.mrf.mxu0  ;;  %12218 = vmatprep.mubr.msk.bf16.mxu1 %vm13603_vm1, %v18977_v13  ;;  %v13197_v51 = vpop.eup %13196  ;;  %13204 = vrcp.f32 %v5286_v31  ;;  %v19479_v42 = vld [vmem:[#allocation42_spill] sm:$0xff] }
 0x655   : > { %6299 = vmatmul.mubr.bf16.gmra.mxu0 %v6090_v5  ;;  %v12172_v15 = vpop.f32.mrf.mxu1  ;;  %12228 = vmatprep.subr.bf16.mxu1 %v18977_v13  ;;  %v6074_v8 = vmul.f32 %v13197_v51, %v16571_v0  ;;  %v13199_v5 = vpop.eup %13198  ;;  %13206 = vrcp.f32 %v5283_v30  ;;  %v19504_v30 = vld [vmem:[#allocation81_spill] sm:$0xff] }
 0x656   : > { %v12167_v20 = vpop.f32.mrf.mxu0  ;;  %6308 = vmatprep.mubr.bf16.mxu0 %v18853_v33  ;;  %v6073_v36 = vmul.f32 %v13199_v5, %v16560_v54  ;;  %v19480_v15 = vpack.c.bf16 %v19478_v22, %v19479_v42  ;;  %v19509_v42 = vld [vmem:[#allocation125_spill] sm:$0xff] }
 0x657   : > { %v16615_v50 = vpop.f32.mrf.mxu1  ;;  %v19483_v20 = vpack.c.bf16 %v19481_v60, %v19482_v37  ;;  %v5292_v21 = vpop.xlane.xlu1 %5291  ;;  %v19512_v37 = vld [vmem:[#allocation97_spill] sm:$0xff] }
 0x658   : > { %v6094_v55 = vpack.c.bf16 %v6074_v8, %v6073_v36  ;;  %13208 = vrcp.f32 %v5292_v21  ;;  %v19501_v8 = vld [vmem:[#allocation109_spill] sm:$0xff] }
 0x659   : > { %v12173_v1 = vpop.f32.mrf.mxu1  ;;  %v13201_v54 = vpop.eup %13200  ;;  %v19505_v36 = vld [vmem:[#allocation77_spill] sm:$0xff] }
 0x65a   : > { %v6076_v39 = vmul.f32 %v13201_v54, %v16586_v11  ;;  %v13203_v3 = vpop.eup %13202  ;;  %v5289_v1 = vpop.xlane.xlu0 %5288  ;;  %v19490_v11 = vpack.c.bf16 %v19488_v41, %v19489_v29 }
 0x65b   : > { %12219 = vmatmul.mubr.bf16.vlgmr.msra.gmra.mxu1 %v19462_v4  ;;  %13210 = vrcp.f32 %v5289_v1  ;;  %v5298_v45 = vpop.xlane.xlu1 %5297  ;;  %v19518_v1 = vld [vmem:[#allocation137_spill] sm:$0xff] }
 0x65c   : > { %12229 = vmatpush3.bf16.xpose.msra.mxu1 %v19465_v2  ;;  %12230 = vmatprep.mubr.msk.bf16.mxu1 %vm13603_vm1, %v18977_v13  ;;  %v19487_v2 = vpack.c.bf16 %v19485_v38, %v19486_v18  ;;  %13212 = vrcp.f32 %v5298_v45  ;;  %v19521_v38 = vld [vmem:[#allocation108_spill] sm:$0xff] }
 0x65d   : > { %6309 = vmatmul.mubr.bf16.gmra.mxu0 %v6091_v59  ;;  %12240 = vmatprep.subr.bf16.mxu1 %v18977_v13  ;;  %v6075_v59 = vmul.f32 %v13203_v3, %v16573_v52  ;;  %v19517_v3 = vld [vmem:[#allocation141_spill] sm:$0xff] }
 0x65e   : > { %6318 = vmatprep.mubr.bf16.mxu0 %v18853_v33  ;;  %v5295_v58 = vpop.xlane.xlu0 %5294 }
 0x65f   : > { %v6095_v43 = vpack.c.bf16 %v6076_v39, %v6075_v59  ;;  %13214 = vrcp.f32 %v5295_v58  ;;  %v19519_v59 = vpack.c.bf16 %v19517_v3, %v19518_v1  ;;  %v19556_v3 = vld [vmem:[#allocation39_spill] sm:$0xff]  ;;  %v19557_v1 = vld [vmem:[#allocation36_spill] sm:$0xff] }
 0x661   : > { %v13205_v52 = vpop.eup %13204 }
 0x662   : > { %v6078_v6 = vmul.f32 %v13205_v52, %v16593_v26  ;;  %v19527_v52 = vld [vmem:[#allocation153_spill] sm:$0xff] }
 0x663   : > { %12231 = vmatmul.mubr.bf16.vlgmr.msra.gmra.mxu1 %v19468_v49 }
 0x664   : > { %12241 = vmatpush3.bf16.xpose.msra.mxu1 %v19471_v44  ;;  %12242 = vmatprep.mubr.msk.bf16.mxu1 %vm13603_vm1, %v18977_v13 }
 0x665   : > { %6319 = vmatmul.mubr.bf16.gmra.mxu0 %v6092_v12  ;;  %12252 = vmatprep.subr.bf16.mxu1 %v18977_v13  ;;  %v13207_v12 = vpop.eup %13206 }
 0x666   : > { %6328 = vmatprep.mubr.bf16.mxu0 %v18853_v33  ;;  %v6077_v7 = vmul.f32 %v13207_v12, %v16581_v53  ;;  %v13209_v14 = vpop.eup %13208  ;;  %v19530_v12 = vld [vmem:[#allocation124_spill] sm:$0xff] }
 0x667   : > { %v6080_v26 = vmul.f32 %v13209_v14, %v16608_v9 }
 0x668   : > { %v6096_v57 = vpack.c.bf16 %v6078_v6, %v6077_v7  ;;  %v13211_v40 = vpop.eup %13210  ;;  %v19529_v6 = vld [vmem:[#allocation128_spill] sm:$0xff] }
 0x669   : > { %v6079_v32 = vmul.f32 %v13211_v40, %v16595_v62  ;;  %v13213_v48 = vpop.eup %13212  ;;  %v19531_v58 = vpack.c.bf16 %v19529_v6, %v19530_v12  ;;  %v19536_v40 = vld [vmem:[#allocation173_spill] sm:$0xff]  ;;  %v19566_v12 = vld [vmem:[#allocation51_spill] sm:$0xff] }
 0x66a   : > { %v6082_v27 = vmul.f32 %v13213_v48, %v16615_v50  ;;  %v19502_v50 = vld [vmem:[#allocation105_spill] sm:$0xff]  ;;  %v19539_v48 = vld [vmem:[#allocation144_spill] sm:$0xff] }
 0x66b   : > { %12243 = vmatmul.mubr.bf16.vlgmr.msra.gmra.mxu1 %v19474_v23  ;;  %v6097_v25 = vpack.c.bf16 %v6080_v26, %v6079_v32  ;;  %v19503_v5 = vpack.c.bf16 %v19501_v8, %v19502_v50  ;;  %v19537_v32 = vld [vmem:[#allocation169_spill] sm:$0xff] }
 0x66c   : > { %12253 = vmatpush3.bf16.xpose.msra.mxu1 %v19477_v63  ;;  %12254 = vmatprep.mubr.msk.bf16.mxu1 %vm13603_vm1, %v18977_v13  ;;  %v13215_v9 = vpop.eup %13214 }
 0x66d   : > { %6329 = vmatmul.mubr.bf16.gmra.mxu0 %v6093_v28  ;;  %12264 = vmatprep.subr.bf16.mxu1 %v18977_v13  ;;  %v6081_v17 = vmul.f32 %v13215_v9, %v16603_v16  ;;  %v19506_v16 = vpack.c.bf16 %v19504_v30, %v19505_v36  ;;  %v19547_v30 = vld [vmem:[#allocation24_spill] sm:$0xff] }
 0x66e   : > { %6338 = vmatprep.mubr.bf16.mxu0 %v18853_v33 }
 0x66f   : > { %v6098_v62 = vpack.c.bf16 %v6082_v27, %v6081_v17  ;;  %v19540_v27 = vld [vmem:[#allocation140_spill] sm:$0xff] }
 0x670   : > { %v19541_v9 = vpack.c.bf16 %v19539_v48, %v19540_v27 }
 0x673   : > { %v16654_v19 = vpop.f32.mrf.mxu1  ;;  %12255 = vmatmul.mubr.bf16.vlgmr.msra.gmra.mxu1 %v19480_v15  ;;  %v19510_v15 = vld [vmem:[#allocation121_spill] sm:$0xff] }
 0x674   : > { %12265 = vmatpush3.bf16.xpose.msra.mxu1 %v19483_v20  ;;  %12266 = vmatprep.mubr.msk.bf16.mxu1 %vm13603_vm1, %v18977_v13  ;;  %v19511_v60 = vpack.c.bf16 %v19509_v42, %v19510_v15  ;;  %v19513_v20 = vld [vmem:[#allocation93_spill] sm:$0xff]  ;;  %v19550_v42 = vld [vmem:[#allocation156_spill] sm:$0xff] }
 0x675   : > { %6339 = vmatmul.mubr.bf16.gmra.mxu0 %v6094_v55  ;;  %v16664_v0 = vpop.f32.mrf.mxu1  ;;  %12276 = vmatprep.subr.bf16.mxu1 %v18977_v13  ;;  %v19514_v54 = vpack.c.bf16 %v19512_v37, %v19513_v20 }
 0x676   : > { %6348 = vmatprep.mubr.bf16.mxu0 %v18853_v33 }
 0x677   : > { %v16669_v10 = vpop.f32.mrf.mxu1 }
 0x679   : > { %v16672_v35 = vpop.f32.mrf.mxu1 }
 0x67a   : > { %19484 = vst [vmem:[#allocation226_spill] sm:$0xff] %v16672_v35 }
 0x67b   : > { %v16674_v4 = vpop.f32.mrf.mxu1  ;;  %12267 = vmatmul.mubr.bf16.vlgmr.msra.gmra.mxu1 %v19487_v2 }
 0x67c   : > { %12277 = vmatpush3.bf16.msra.mxu1 %v19490_v11  ;;  %12278 = vmatprep.mubr.msk.bf16.mxu1 %vm13603_vm1, %v18977_v13  ;;  %v19526_v11 = vld [vmem:[#allocation157_spill] sm:$0xff] }
 0x67d   : > { %6349 = vmatmul.mubr.bf16.gmra.mxu0 %v6095_v43  ;;  %v16684_v47 = vpop.f32.mrf.mxu1  ;;  %12288 = vmatprep.subr.bf16.mxu1 %v18977_v13  ;;  %v19520_v43 = vld [vmem:[#allocation112_spill] sm:$0xff]  ;;  %v19528_v45 = vpack.c.bf16 %v19526_v11, %v19527_v52 }
 0x67e   : > { %6358 = vmatprep.mubr.bf16.mxu0 %v18853_v33  ;;  %v19522_v18 = vpack.c.bf16 %v19520_v43, %v19521_v38  ;;  %v19559_v43 = vld [vmem:[#allocation176_spill] sm:$0xff] }
 0x67f   : > { %v16689_v34 = vpop.f32.mrf.mxu1  ;;  %v19560_v38 = vld [vmem:[#allocation172_spill] sm:$0xff] }
 0x681   : > { %v16692_v49 = vpop.f32.mrf.mxu1 }
 0x682   : > { %19491 = vst [vmem:[#allocation44_spill] sm:$0xff] %v16692_v49 }
 0x683   : > { %v16694_v24 = vpop.f32.mrf.mxu1 }
 0x685   : > { %6359 = vmatmul.mubr.bf16.gmra.mxu0 %v6096_v57  ;;  %v16696_v44 = vpop.f32.mrf.mxu1 }
 0x686   : > { %6368 = vmatprep.mubr.bf16.mxu0 %v18853_v33 }
 0x687   : > { %v16700_v56 = vpop.f32.mrf.mxu1 }
 0x688   : > { %19492 = vst [vmem:[#allocation41_spill] sm:$0xff] %v16700_v56 }
 0x689   : > { %v16703_v53 = vpop.f32.mrf.mxu1 }
 0x68a   : > { %19493 = vst [vmem:[#allocation50_spill] sm:$0xff] %v16703_v53 }
 0x68b   : > { %v16705_v46 = vpop.f32.mrf.mxu1 }
 0x68c   : > { %19494 = vst [vmem:[#allocation47_spill] sm:$0xff] %v16705_v46 }
 0x68d   : > { %6369 = vmatmul.mubr.bf16.gmra.mxu0 %v6097_v25  ;;  %v16707_v28 = vpop.f32.mrf.mxu1  ;;  %v19538_v25 = vpack.c.bf16 %v19536_v40, %v19537_v32  ;;  %v19569_v32 = vld [vmem:[#allocation188_spill] sm:$0xff] }
 0x68e   : > { %19495 = vst [vmem:[#allocation235_spill] sm:$0xff] %v16707_v28  ;;  %6378 = vmatprep.mubr.bf16.mxu0 %v18853_v33 }
 0x68f   : > { %v16711_v23 = vpop.f32.mrf.mxu1 }
 0x690   : > { %19496 = vst [vmem:[#allocation232_spill] sm:$0xff] %v16711_v23 }
 0x691   : > { %v16714_v61 = vpop.f32.mrf.mxu1 }
 0x692   : > { %19497 = vst [vmem:[#allocation241_spill] sm:$0xff] %v16714_v61 }
 0x693   : > { %v16716_v63 = vpop.f32.mrf.mxu1 }
 0x694   : > { %19498 = vst [vmem:[#allocation238_spill] sm:$0xff] %v16716_v63 }
 0x695   : > { %6379 = vmatmul.mubr.bf16.gmra.mxu0 %v6098_v62  ;;  %v16720_v51 = vpop.f32.mrf.mxu1 }
 0x696   : > { %12176 = vmatprep.mubr.msk.bf16.mxu0 %vm13603_vm1, %v18977_v13  ;;  %19499 = vst [vmem:[#allocation250_spill] sm:$0xff] %v16720_v51 }
 0x697   : > { %v16722_v31 = vpop.f32.mrf.mxu1 }
 0x698   : > { %19500 = vst [vmem:[#allocation253_spill] sm:$0xff] %v16722_v31 }
 0x699   : > { %v16733_v55 = vpop.f32.mrf.mxu1 }
 0x69a   : > { %19507 = vst [vmem:[#allocation56_spill] sm:$0xff] %v16733_v55 }
 0x69b   : > { %v16735_v22 = vpop.f32.mrf.mxu1 }
 0x69c   : > { %19508 = vst [vmem:[#allocation53_spill] sm:$0xff] %v16735_v22 }
 0x69d   : > { %12177 = vmatmul.mubr.bf16.vlgmr.msra.gmra.mxu0 %v19503_v5  ;;  %v16746_v21 = vpop.f32.mrf.mxu1  ;;  %v19546_v5 = vld [vmem:[#allocation27_spill] sm:$0xff] }
 0x69e   : > { %12187 = vmatpush3.bf16.xpose.msra.mxu0 %v19506_v16  ;;  %12188 = vmatprep.mubr.msk.bf16.mxu0 %vm13603_vm1, %v18977_v13  ;;  %19515 = vst [vmem:[#allocation64_spill] sm:$0xff] %v16746_v21  ;;  %v19548_v36 = vpack.c.bf16 %v19546_v5, %v19547_v30  ;;  %v19549_v16 = vld [vmem:[#allocation160_spill] sm:$0xff] }
 0x69f   : > { %12198 = vmatprep.subr.bf16.mxu0 %v18977_v13  ;;  %v16748_v39 = vpop.f32.mrf.mxu1  ;;  %v19551_v15 = vpack.c.bf16 %v19549_v16, %v19550_v42 }
 0x6a0   : > { %19516 = vst [vmem:[#allocation60_spill] sm:$0xff] %v16748_v39 }
 0x6a1   : > { %v16759_v2 = vpop.f32.mrf.mxu1 }
 0x6a2   : > { %19523 = vst [vmem:[#allocation247_spill] sm:$0xff] %v16759_v2 }
 0x6a5   : > { %12189 = vmatmul.mubr.bf16.vlgmr.msra.gmra.mxu0 %v19511_v60 }
 0x6a6   : > { %12199 = vmatpush3.bf16.xpose.msra.mxu0 %v19514_v54  ;;  %12200 = vmatprep.mubr.msk.bf16.mxu0 %vm13603_vm1, %v18977_v13 }
 0x6a7   : > { %12210 = vmatprep.subr.bf16.mxu0 %v18977_v13 }
 0x6ad   : > { %12201 = vmatmul.mubr.bf16.vlgmr.msra.gmra.mxu0 %v19519_v59  ;;  %v19558_v59 = vpack.c.bf16 %v19556_v3, %v19557_v1 }
 0x6ae   : > { %12211 = vmatpush3.bf16.xpose.msra.mxu0 %v19522_v18  ;;  %12212 = vmatprep.mubr.msk.bf16.mxu0 %vm13603_vm1, %v18977_v13  ;;  %v19561_v18 = vpack.c.bf16 %v19559_v43, %v19560_v38 }
 0x6af   : > { %12222 = vmatprep.subr.bf16.mxu0 %v18977_v13 }
 0x6b2   : > { %v16761_v41 = vpop.f32.mrf.mxu1 }
 0x6b3   : > { %19524 = vst [vmem:[#allocation244_spill] sm:$0xff] %v16761_v41 }
 0x6b4   : > { %v16763_v29 = vpop.f32.mrf.mxu1 }
 0x6b5   : > { %19525 = vst [vmem:[#allocation62_spill] sm:$0xff] %v16763_v29  ;;  %12213 = vmatmul.mubr.bf16.vlgmr.msra.gmra.mxu0 %v19528_v45 }
 0x6b6   : > { %12223 = vmatpush3.bf16.xpose.msra.mxu0 %v19531_v58  ;;  %12224 = vmatprep.mubr.msk.bf16.mxu0 %vm13603_vm1, %v18977_v13  ;;  %v16773_v7 = vpop.f32.mrf.mxu1  ;;  %v19567_v58 = vld [vmem:[#allocation48_spill] sm:$0xff] }
 0x6b7   : > { %19532 = vst [vmem:[#allocation255_spill] sm:$0xff] %v16773_v7  ;;  %12234 = vmatprep.subr.bf16.mxu0 %v18977_v13  ;;  %v19568_v40 = vpack.c.bf16 %v19566_v12, %v19567_v58 }
 0x6b8   : > { %v16776_v57 = vpop.f32.mrf.mxu1 }
 0x6b9   : > { %19533 = vst [vmem:[#allocation74_spill] sm:$0xff] %v16776_v57 }
 0x6ba   : > { %v16778_v14 = vpop.f32.mrf.mxu1 }
 0x6bb   : > { %19534 = vst [vmem:[#allocation259_spill] sm:$0xff] %v16778_v14 }
 0x6bc   : > { %v16780_v26 = vpop.f32.mrf.mxu1 }
 0x6bd   : > { %19535 = vst [vmem:[#allocation72_spill] sm:$0xff] %v16780_v26  ;;  %12225 = vmatmul.mubr.bf16.vlgmr.msra.gmra.mxu0 %v19538_v25  ;;  %v19570_v25 = vld [vmem:[#allocation185_spill] sm:$0xff] }
 0x6be   : > { %12235 = vmatpush3.bf16.xpose.msra.mxu0 %v19541_v9  ;;  %12236 = vmatprep.mubr.msk.bf16.mxu0 %vm13603_vm1, %v18977_v13  ;;  %v16790_v17 = vpop.f32.mrf.mxu1  ;;  %v19571_v48 = vpack.c.bf16 %v19569_v32, %v19570_v25 }
 0x6bf   : > { %19542 = vst [vmem:[#allocation68_spill] sm:$0xff] %v16790_v17  ;;  %12246 = vmatprep.subr.bf16.mxu0 %v18977_v13 }
 0x6c0   : > { %v16793_v62 = vpop.f32.mrf.mxu1 }
 0x6c1   : > { %19543 = vst [vmem:[#allocation80_spill] sm:$0xff] %v16793_v62 }
 0x6c2   : > { %v16795_v8 = vpop.f32.mrf.mxu1 }
 0x6c3   : > { %19544 = vst [vmem:[#allocation76_spill] sm:$0xff] %v16795_v8 }
 0x6c4   : > { %v16797_v50 = vpop.f32.mrf.mxu1 }
 0x6c5   : > { %19545 = vst [vmem:[#allocation260_spill] sm:$0xff] %v16797_v50  ;;  %12237 = vmatmul.mubr.bf16.vlgmr.msra.gmra.mxu0 %v19548_v36 }
 0x6c6   : > { %12247 = vmatpush3.bf16.xpose.msra.mxu0 %v19551_v15  ;;  %12248 = vmatprep.mubr.msk.bf16.mxu0 %vm13603_vm1, %v18977_v13  ;;  %v16807_v60 = vpop.f32.mrf.mxu1 }
 0x6c7   : > { %19552 = vst [vmem:[#allocation263_spill] sm:$0xff] %v16807_v60  ;;  %12258 = vmatprep.subr.bf16.mxu0 %v18977_v13 }
 0x6c8   : > { %v16810_v37 = vpop.f32.mrf.mxu1 }
 0x6c9   : > { %19553 = vst [vmem:[#allocation264_spill] sm:$0xff] %v16810_v37 }
 0x6ca   : > { %v16812_v20 = vpop.f32.mrf.mxu1 }
 0x6cb   : > { %19554 = vst [vmem:[#allocation267_spill] sm:$0xff] %v16812_v20 }
 0x6cc   : > { %v16814_v54 = vpop.f32.mrf.mxu1 }
 0x6cd   : > { %19555 = vst [vmem:[#allocation88_spill] sm:$0xff] %v16814_v54  ;;  %12249 = vmatmul.mubr.bf16.vlgmr.msra.gmra.mxu0 %v19558_v59 }
 0x6ce   : > { %12259 = vmatpush3.bf16.xpose.msra.mxu0 %v19561_v18  ;;  %12260 = vmatprep.mubr.msk.bf16.mxu0 %vm13603_vm1, %v18977_v13  ;;  %v16824_v11 = vpop.f32.mrf.mxu1 }
 0x6cf   : > { %19562 = vst [vmem:[#allocation84_spill] sm:$0xff] %v16824_v11  ;;  %12270 = vmatprep.subr.bf16.mxu0 %v18977_v13 }
 0x6d0   : > { %v16827_v52 = vpop.f32.mrf.mxu1 }
 0x6d1   : > { %19563 = vst [vmem:[#allocation96_spill] sm:$0xff] %v16827_v52 }
 0x6d2   : > { %v16829_v45 = vpop.f32.mrf.mxu1 }
 0x6d3   : > { %19564 = vst [vmem:[#allocation92_spill] sm:$0xff] %v16829_v45 }
 0x6d4   : > { %v16831_v6 = vpop.f32.mrf.mxu1 }
 0x6d5   : > { %19565 = vst [vmem:[#allocation268_spill] sm:$0xff] %v16831_v6  ;;  %12261 = vmatmul.mubr.bf16.vlgmr.msra.gmra.mxu0 %v19568_v40 }
 0x6d6   : > { %12271 = vmatpush3.bf16.msra.mxu0 %v19571_v48  ;;  %12272 = vmatprep.mubr.msk.bf16.mxu0 %vm13603_vm1, %v18977_v13  ;;  %v16841_v27 = vpop.f32.mrf.mxu1 }
 0x6d7   : > { %19572 = vst [vmem:[#allocation269_spill] sm:$0xff] %v16841_v27  ;;  %12282 = vmatprep.subr.bf16.mxu0 %v18977_v13 }
 0x6d8   : > { %v16844_v9 = vpop.f32.mrf.mxu1 }
 0x6d9   : > { %19573 = vst [vmem:[#allocation103_spill] sm:$0xff] %v16844_v9 }
 0x6da   : > { %v16846_v5 = vpop.f32.mrf.mxu1 }
 0x6db   : > { %19574 = vst [vmem:[#allocation100_spill] sm:$0xff] %v16846_v5 }
 0x6dc   : > { %v16850_v36 = vpop.f32.mrf.mxu1 }
 0x6dd   : > { %v16848_v30 = vpop.f32.mrf.mxu0  ;;  %19575 = vst [vmem:[#allocation307_spill] sm:$0xff] %v16850_v36 }
 0x6de   : > { %v16854_v42 = vpop.f32.mrf.mxu1 }
 0x6df   : > { %v16852_v16 = vpop.f32.mrf.mxu0  ;;  %19576 = vst [vmem:[#allocation308_spill] sm:$0xff] %v16854_v42 }
 0x6e0   : > { %v16858_v3 = vpop.f32.mrf.mxu1 }
 0x6e1   : > { %v16856_v15 = vpop.f32.mrf.mxu0  ;;  %19577 = vst [vmem:[#allocation270_spill] sm:$0xff] %v16858_v3 }
 0x6e2   : > { %v16862_v59 = vpop.f32.mrf.mxu1 }
 0x6e3   : > { %v16860_v1 = vpop.f32.mrf.mxu0  ;;  %19579 = vst [vmem:[#allocation272_spill] sm:$0xff] %v16862_v59 }
 0x6e4   : > { %19578 = vst [vmem:[#allocation271_spill] sm:$0xff] %v16860_v1  ;;  %v16866_v38 = vpop.f32.mrf.mxu1 }
 0x6e5   : > { %v16864_v43 = vpop.f32.mrf.mxu0  ;;  %19580 = vst [vmem:[#allocation273_spill] sm:$0xff] %v16866_v38 }
 0x6e6   : > { %v16870_v12 = vpop.f32.mrf.mxu1 }
 0x6e7   : > { %v16868_v18 = vpop.f32.mrf.mxu0  ;;  %19581 = vst [vmem:[#allocation274_spill] sm:$0xff] %v16870_v12 }
 0x6e8   : > { %v16874_v40 = vpop.f32.mrf.mxu1 }
 0x6e9   : > { %v16872_v58 = vpop.f32.mrf.mxu0  ;;  %19582 = vst [vmem:[#allocation275_spill] sm:$0xff] %v16874_v40 }
 0x6ea   : > { %v16878_v25 = vpop.f32.mrf.mxu1 }
 0x6eb   : > { %v16876_v32 = vpop.f32.mrf.mxu0  ;;  %19584 = vst [vmem:[#allocation277_spill] sm:$0xff] %v16878_v25 }
 0x6ec   : > { %19583 = vst [vmem:[#allocation276_spill] sm:$0xff] %v16876_v32  ;;  %v16882_v33 = vpop.f32.mrf.mxu1 }
 0x6ed   : > { %v16880_v48 = vpop.f32.mrf.mxu0  ;;  %19585 = vst [vmem:[#allocation278_spill] sm:$0xff] %v16882_v33 }
 0x6ee   : > { %v16886_v9 = vpop.f32.mrf.mxu1 }
 0x6ef   : > { %v16884_v3 = vpop.f32.mrf.mxu0  ;;  %19586 = vst [vmem:[#allocation279_spill] sm:$0xff] %v16886_v9 }
 0x6f0   : > { %v16890_v37 = vpop.f32.mrf.mxu1 }
 0x6f1   : > { %v16888_v52 = vpop.f32.mrf.mxu0  ;;  %19588 = vst [vmem:[#allocation281_spill] sm:$0xff] %v16890_v37 }
 0x6f2   : > { %19587 = vst [vmem:[#allocation280_spill] sm:$0xff] %v16888_v52 }
 0x6f3   : > { %v16892_v62 = vpop.f32.mrf.mxu0  ;;  %v16894_v57 = vpop.f32.mrf.mxu1 }
 0x6f4   : > { %19589 = vst [vmem:[#allocation282_spill] sm:$0xff] %v16892_v62  ;;  %19590 = vst [vmem:[#allocation283_spill] sm:$0xff] %v16894_v57 }
 0x6f5   : > { %v16896_v40 = vpop.f32.mrf.mxu0  ;;  %v16898_v2 = vpop.f32.mrf.mxu1 }
 0x6f6   : > { %19591 = vst [vmem:[#allocation284_spill] sm:$0xff] %v16896_v40  ;;  %19592 = vst [vmem:[#allocation285_spill] sm:$0xff] %v16898_v2 }
 0x6f7   : > { %v16900_v55 = vpop.f32.mrf.mxu0  ;;  %v16902_v61 = vpop.f32.mrf.mxu1 }
 0x6f8   : > { %19593 = vst [vmem:[#allocation286_spill] sm:$0xff] %v16900_v55  ;;  %19594 = vst [vmem:[#allocation288_spill] sm:$0xff] %v16902_v61 }
 0x6f9   : > { %v16904_v53 = vpop.f32.mrf.mxu0  ;;  %v16906_v49 = vpop.f32.mrf.mxu1 }
 0x6fa   : > { %19595 = vst [vmem:[#allocation289_spill] sm:$0xff] %v16904_v53  ;;  %19596 = vst [vmem:[#allocation290_spill] sm:$0xff] %v16906_v49 }
 0x6fb   : > { %v16908_v32 = vpop.f32.mrf.mxu0  ;;  %v16910_v35 = vpop.f32.mrf.mxu1 }
 0x6fc   : > { %19597 = vst [vmem:[#allocation291_spill] sm:$0xff] %v16908_v32  ;;  %19598 = vst [vmem:[#allocation292_spill] sm:$0xff] %v16910_v35 }
 0x6fd   : > { %v16912_v37 = vpop.f32.mrf.mxu0  ;;  %v16914_v62 = vpop.f32.mrf.mxu1 }
 0x6fe   : > { %19599 = vst [vmem:[#allocation305_spill] sm:$0xff] %v16912_v37  ;;  %19600 = vst [vmem:[#allocation294_spill] sm:$0xff] %v16914_v62 }
 0x6ff   : > { %v16916_v1 = vpop.f32.mrf.mxu0  ;;  %v16918_v57 = vpop.f32.mrf.mxu1 }
 0x700   : > { %19601 = vst [vmem:[#allocation296_spill] sm:$0xff] %v16916_v1  ;;  %19602 = vst [vmem:[#allocation309_spill] sm:$0xff] %v16918_v57 }
 0x701   : > { %v16920_v2 = vpop.f32.mrf.mxu0  ;;  %v16922_v9 = vpop.f32.mrf.mxu1 }
 0x702   : > { %19603 = vst [vmem:[#allocation298_spill] sm:$0xff] %v16920_v2  ;;  %19604 = vst [vmem:[#allocation300_spill] sm:$0xff] %v16922_v9 }
 0x703   : > { %v16924_v61 = vpop.f32.mrf.mxu0  ;;  %v16926_v33 = vpop.f32.mrf.mxu1 }
 0x704   : > { %19605 = vst [vmem:[#allocation295_spill] sm:$0xff] %v16924_v61  ;;  %v7324_v49 = vsel %vm3250_vm2, %v16926_v33, -inf }
 0x705   : > { %v16930_v32 = vpop.f32.mrf.mxu0  ;;  %7325 = vmax.xlane.f32.xlu0 %v7324_v49  ;;  %v12184_v35 = vpop.f32.mrf.mxu1 }
 0x706   : > { %19606 = vst [vmem:[#allocation302_spill] sm:$0xff] %v16930_v32 }
 0x707   : > { %v16932_v62 = vpop.f32.mrf.mxu0  ;;  %v16934_v25 = vpop.f32.mrf.mxu1 }
 0x708   : > { %19607 = vst [vmem:[#allocation304_spill] sm:$0xff] %v16932_v62  ;;  %v7327_v57 = vsel %vm3250_vm2, %v16934_v25, -inf }
 0x709   : > { %v16938_v12 = vpop.f32.mrf.mxu0  ;;  %7328 = vmax.xlane.f32.xlu1 %v7327_v57  ;;  %v12185_v9 = vpop.f32.mrf.mxu1 }
 0x70a   : > { %19608 = vst [vmem:[#allocation293_spill] sm:$0xff] %v16938_v12 }
 0x70b   : > { %v16940_v61 = vpop.f32.mrf.mxu0  ;;  %v16942_v38 = vpop.f32.mrf.mxu1 }
 0x70c   : > { %19609 = vst [vmem:[#allocation306_spill] sm:$0xff] %v16940_v61  ;;  %v7336_v59 = vsel %vm3250_vm2, %v16942_v38, -inf }
 0x70d   : > { %v16946_v49 = vpop.f32.mrf.mxu0  ;;  %7337 = vmax.xlane.f32.xlu0 %v7336_v59  ;;  %v12196_v35 = vpop.f32.mrf.mxu1 }
 0x70e   : > { %19610 = vst [vmem:[#allocation299_spill] sm:$0xff] %v16946_v49 }
 0x70f   : > { %v16948_v42 = vpop.f32.mrf.mxu0  ;;  %v16950_v36 = vpop.f32.mrf.mxu1 }
 0x710   : > { %19611 = vst [vmem:[#allocation297_spill] sm:$0xff] %v16948_v42  ;;  %v7339_v5 = vsel %vm3250_vm2, %v16950_v36, -inf }
 0x711   : > { %v16954_v57 = vpop.f32.mrf.mxu0  ;;  %7340 = vmax.xlane.f32.xlu1 %v7339_v5  ;;  %v12197_v9 = vpop.f32.mrf.mxu1 }
 0x712   : > { %19612 = vst [vmem:[#allocation303_spill] sm:$0xff] %v16954_v57 }
 0x713   : > { %v16956_v61 = vpop.f32.mrf.mxu0  ;;  %v16958_v27 = vpop.f32.mrf.mxu1 }
 0x714   : > { %19613 = vst [vmem:[#allocation12_spill] sm:$0xff] %v16956_v61  ;;  %v7348_v6 = vsel %vm3250_vm2, %v16958_v27, -inf }
 0x715   : > { %v16962_v59 = vpop.f32.mrf.mxu0  ;;  %7349 = vmax.xlane.f32.xlu0 %v7348_v6  ;;  %v12208_v35 = vpop.f32.mrf.mxu1 }
 0x716   : > { %19614 = vst [vmem:[#allocation178_spill] sm:$0xff] %v16962_v59 }
 0x717   : > { %v16964_v45 = vpop.f32.mrf.mxu0  ;;  %v16966_v11 = vpop.f32.mrf.mxu1 }
 0x718   : > { %19615 = vst [vmem:[#allocation73_spill] sm:$0xff] %v16964_v45  ;;  %v7351_v54 = vsel %vm3250_vm2, %v16966_v11, -inf }
 0x719   : > { %v16970_v5 = vpop.f32.mrf.mxu0  ;;  %7352 = vmax.xlane.f32.xlu1 %v7351_v54  ;;  %v12209_v9 = vpop.f32.mrf.mxu1 }
 0x71a   : > { %19616 = vst [vmem:[#allocation69_spill] sm:$0xff] %v16970_v5 }
 0x71b   : > { %v16972_v61 = vpop.f32.mrf.mxu0  ;;  %v16974_v20 = vpop.f32.mrf.mxu1 }
 0x71c   : > { %19617 = vst [vmem:[#allocation181_spill] sm:$0xff] %v16972_v61  ;;  %v7360_v60 = vsel %vm3250_vm2, %v16974_v20, -inf }
 0x71d   : > { %v16978_v6 = vpop.f32.mrf.mxu0  ;;  %7361 = vmax.xlane.f32.xlu0 %v7360_v60  ;;  %v12220_v35 = vpop.f32.mrf.mxu1 }
 0x71e   : > { %19618 = vst [vmem:[#allocation301_spill] sm:$0xff] %v16978_v6 }
 0x71f   : > { %v16980_v50 = vpop.f32.mrf.mxu0  ;;  %v16982_v8 = vpop.f32.mrf.mxu1 }
 0x720   : > { %19619 = vst [vmem:[#allocation184_spill] sm:$0xff] %v16980_v50  ;;  %v7363_v17 = vsel %vm3250_vm2, %v16982_v8, -inf }
 0x721   : > { %v16986_v54 = vpop.f32.mrf.mxu0  ;;  %7364 = vmax.xlane.f32.xlu1 %v7363_v17  ;;  %v12221_v9 = vpop.f32.mrf.mxu1 }
 0x722   : > { %19620 = vst [vmem:[#allocation11_spill] sm:$0xff] %v16986_v54 }
 0x723   : > { %v16988_v61 = vpop.f32.mrf.mxu0  ;;  %v16990_v5 = vpop.f32.mrf.mxu1 }
 0x724   : > { %19621 = vst [vmem:[#allocation193_spill] sm:$0xff] %v16988_v61  ;;  %v7372_v6 = vsel %vm3250_vm2, %v16990_v5, -inf }
 0x725   : > { %v16994_v60 = vpop.f32.mrf.mxu0  ;;  %7373 = vmax.xlane.f32.xlu0 %v7372_v6  ;;  %v12232_v35 = vpop.f32.mrf.mxu1 }
 0x726   : > { %19622 = vst [vmem:[#allocation187_spill] sm:$0xff] %v16994_v60 }
 0x727   : > { %v16996_v50 = vpop.f32.mrf.mxu0  ;;  %v16998_v26 = vpop.f32.mrf.mxu1 }
 0x728   : > { %19623 = vst [vmem:[#allocation13_spill] sm:$0xff] %v16996_v50  ;;  %v7375_v54 = vsel %vm3250_vm2, %v16998_v26, -inf }
 0x729   : > { %v17002_v17 = vpop.f32.mrf.mxu0  ;;  %7376 = vmax.xlane.f32.xlu1 %v7375_v54  ;;  %v12233_v9 = vpop.f32.mrf.mxu1 }
 0x72a   : > { %19624 = vst [vmem:[#allocation190_spill] sm:$0xff] %v17002_v17 }
 0x72b   : > { %v17004_v61 = vpop.f32.mrf.mxu0  ;;  %v17006_v45 = vpop.f32.mrf.mxu1 }
 0x72c   : > { %19625 = vst [vmem:[#allocation16_spill] sm:$0xff] %v17004_v61  ;;  %v7384_v60 = vsel %vm3250_vm2, %v17006_v45, -inf }
 0x72d   : > { %v17010_v6 = vpop.f32.mrf.mxu0  ;;  %7385 = vmax.xlane.f32.xlu0 %v7384_v60  ;;  %v12244_v35 = vpop.f32.mrf.mxu1 }
 0x72e   : > { %19626 = vst [vmem:[#allocation14_spill] sm:$0xff] %v17010_v6 }
 0x72f   : > { %v17012_v50 = vpop.f32.mrf.mxu0  ;;  %v17014_v14 = vpop.f32.mrf.mxu1 }
 0x730   : > { %19627 = vst [vmem:[#allocation15_spill] sm:$0xff] %v17012_v50  ;;  %v7387_v17 = vsel %vm3250_vm2, %v17014_v14, -inf }
 0x731   : > { %v17018_v54 = vpop.f32.mrf.mxu0  ;;  %7388 = vmax.xlane.f32.xlu1 %v7387_v17  ;;  %v12245_v9 = vpop.f32.mrf.mxu1 }
 0x732   : > { %19628 = vst [vmem:[#allocation196_spill] sm:$0xff] %v17018_v54 }
 0x733   : > { %v17020_v61 = vpop.f32.mrf.mxu0  ;;  %v17022_v59 = vpop.f32.mrf.mxu1 }
 0x734   : > { %19629 = vst [vmem:[#allocation199_spill] sm:$0xff] %v17020_v61 }
 0x735   : > { %v17024_v7 = vpop.f32.mrf.mxu0  ;;  %v12256_v6 = vpop.f32.mrf.mxu1 }
 0x736   : > { %19630 = vst [vmem:[#allocation205_spill] sm:$0xff] %v17024_v7 }
 0x737   : > { %v17026_v60 = vpop.f32.mrf.mxu0  ;;  %v17028_v35 = vpop.f32.mrf.mxu1 }
 0x738   : > { %19631 = vst [vmem:[#allocation202_spill] sm:$0xff] %v17026_v60 }
 0x739   : > { %v17030_v50 = vpop.f32.mrf.mxu0  ;;  %v12257_v57 = vpop.f32.mrf.mxu1 }
 0x73a   : > { %19632 = vst [vmem:[#allocation17_spill] sm:$0xff] %v17030_v50 }
 0x73b   : > { %v17032_v29 = vpop.f32.mrf.mxu0  ;;  %v17034_v42 = vpop.f32.mrf.mxu1 }
 0x73c   : > { %19633 = vst [vmem:[#allocation20_spill] sm:$0xff] %v17032_v29 }
 0x73d   : > { %v17036_v17 = vpop.f32.mrf.mxu0  ;;  %v12268_v9 = vpop.f32.mrf.mxu1 }
 0x73e   : > { %19634 = vst [vmem:[#allocation26_spill] sm:$0xff] %v17036_v17 }
 0x73f   : > { %v17038_v61 = vpop.f32.mrf.mxu0  ;;  %v17040_v54 = vpop.f32.mrf.mxu1 }
 0x740   : > { %19635 = vst [vmem:[#allocation23_spill] sm:$0xff] %v17038_v61 }
 0x741   : > { %v17042_v7 = vpop.f32.mrf.mxu0  ;;  %v12269_v6 = vpop.f32.mrf.mxu1 }
 0x742   : > { %19636 = vst [vmem:[#allocation208_spill] sm:$0xff] %v17042_v7 }
 0x743   : > { %v17044_v60 = vpop.f32.mrf.mxu0 }
 0x744   : > { %19637 = vst [vmem:[#allocation211_spill] sm:$0xff] %v17044_v60 }
 0x745   : > { %v17046_v41 = vpop.f32.mrf.mxu0 }
 0x746   : > { %19638 = vst [vmem:[#allocation217_spill] sm:$0xff] %v17046_v41 }
 0x747   : > { %v17048_v50 = vpop.f32.mrf.mxu0 }
 0x748   : > { %19639 = vst [vmem:[#allocation65_spill] sm:$0xff] %v17048_v50 }
 0x749   : > { %v17050_v57 = vpop.f32.mrf.mxu0 }
 0x74a   : > { %19640 = vst [vmem:[#allocation61_spill] sm:$0xff] %v17050_v57 }
 0x74b   : > { %v17052_v29 = vpop.f32.mrf.mxu0 }
 0x74c   : > { %19641 = vst [vmem:[#allocation214_spill] sm:$0xff] %v17052_v29 }
 0x74d   : > { %v17054_v49 = vpop.f32.mrf.mxu0 }
 0x74e   : > { %19642 = vst [vmem:[#allocation32_spill] sm:$0xff] %v17054_v49 }
 0x74f   : > { %v17056_v9 = vpop.f32.mrf.mxu0 }
 0x750   : > { %19643 = vst [vmem:[#allocation29_spill] sm:$0xff] %v17056_v9 }
 0x751   : > { %v17058_v61 = vpop.f32.mrf.mxu0 }
 0x752   : > { %19644 = vst [vmem:[#allocation38_spill] sm:$0xff] %v17058_v61 }
 0x753   : > { %v17060_v17 = vpop.f32.mrf.mxu0 }
 0x754   : > { %19645 = vst [vmem:[#allocation35_spill] sm:$0xff] %v17060_v17 }
 0x755   : > { %v17062_v7 = vpop.f32.mrf.mxu0 }
 0x756   : > { %19646 = vst [vmem:[#allocation223_spill] sm:$0xff] %v17062_v7  ;;  %v7396_v7 = vsel %vm3250_vm2, %v17022_v59, -inf }
 0x757   : > { %v17064_v6 = vpop.f32.mrf.mxu0 }
 0x758   : > { %19647 = vst [vmem:[#allocation220_spill] sm:$0xff] %v17064_v6 }
 0x759   : > { %v17066_v60 = vpop.f32.mrf.mxu0 }
 0x75a   : > { %19648 = vst [vmem:[#allocation229_spill] sm:$0xff] %v17066_v60 }
 0x75b   : > { %v17068_v41 = vpop.f32.mrf.mxu0 }
 0x75c   : > { %19649 = vst [vmem:[#allocation117_spill] sm:$0xff] %v17068_v41  ;;  %v7399_v41 = vsel %vm3250_vm2, %v17028_v35, -inf }
 0x75d   : > { %v17070_v50 = vpop.f32.mrf.mxu0 }
 0x75e   : > { %v7318_v29 = vsel %vm3250_vm2, %v17070_v50, -inf }
 0x75f   : > { %v12178_v49 = vpop.f32.mrf.mxu0  ;;  %7319 = vmax.xlane.f32.xlu0 %v7318_v29 }
 0x760   : > { %v7408_v49 = vsel %vm3250_vm2, %v17034_v42, -inf }
 0x761   : > { %v17074_v9 = vpop.f32.mrf.mxu0 }
 0x762   : > { %v7321_v17 = vsel %vm3250_vm2, %v17074_v9, -inf }
 0x763   : > { %v12179_v6 = vpop.f32.mrf.mxu0  ;;  %7322 = vmax.xlane.f32.xlu1 %v7321_v17  ;;  %7397 = vmax.xlane.f32.xlu0 %v7396_v7  ;;  %v7411_v17 = vsel %vm3250_vm2, %v17040_v54, -inf }
 0x765   : > { %v17080_v60 = vpop.f32.mrf.mxu0 }
 0x766   : > { %v7330_v57 = vsel %vm3250_vm2, %v17080_v60, -inf }
 0x767   : > { %v12190_v29 = vpop.f32.mrf.mxu0  ;;  %7400 = vmax.xlane.f32.xlu1 %v7399_v41  ;;  %7409 = vmax.xlane.f32.xlu0 %v7408_v49 }
 0x769   : > { %v17086_v61 = vpop.f32.mrf.mxu0 }
 0x76a   : > { %v7333_v41 = vsel %vm3250_vm2, %v17086_v61, -inf }
 0x76b   : > { %v12191_v7 = vpop.f32.mrf.mxu0  ;;  %7331 = vmax.xlane.f32.xlu0 %v7330_v57  ;;  %7412 = vmax.xlane.f32.xlu1 %v7411_v17 }
 0x76d   : > { %v17092_v6 = vpop.f32.mrf.mxu0 }
 0x76e   : > { %v7342_v39 = vsel %vm3250_vm2, %v17092_v6, -inf }
 0x76f   : > { %v12202_v49 = vpop.f32.mrf.mxu0  ;;  %7343 = vmax.xlane.f32.xlu0 %v7342_v39  ;;  %7334 = vmax.xlane.f32.xlu1 %v7333_v41 }
 0x771   : > { %v17098_v29 = vpop.f32.mrf.mxu0 }
 0x772   : > { %v7345_v12 = vsel %vm3250_vm2, %v17098_v29, -inf }
 0x773   : > { %v12203_v21 = vpop.f32.mrf.mxu0  ;;  %7346 = vmax.xlane.f32.xlu1 %v7345_v12 }
 0x775   : > { %v17102_v57 = vpop.f32.mrf.mxu0 }
 0x776   : > { %v7354_v17 = vsel %vm3250_vm2, %v17102_v57, -inf }
 0x777   : > { %v12214_v7 = vpop.f32.mrf.mxu0  ;;  %7355 = vmax.xlane.f32.xlu0 %v7354_v17 }
 0x779   : > { %v17106_v62 = vpop.f32.mrf.mxu0 }
 0x77a   : > { %v7357_v39 = vsel %vm3250_vm2, %v17106_v62, -inf }
 0x77b   : > { %v12215_v41 = vpop.f32.mrf.mxu0  ;;  %7358 = vmax.xlane.f32.xlu1 %v7357_v39 }
 0x77d   : > { %v17110_v49 = vpop.f32.mrf.mxu0 }
 0x77e   : > { %v7366_v21 = vsel %vm3250_vm2, %v17110_v49, -inf }
 0x77f   : > { %v12226_v12 = vpop.f32.mrf.mxu0  ;;  %7367 = vmax.xlane.f32.xlu0 %v7366_v21 }
 0x781   : > { %v17114_v22 = vpop.f32.mrf.mxu0 }
 0x782   : > { %v7369_v7 = vsel %vm3250_vm2, %v17114_v22, -inf }
 0x783   : > { %v12227_v17 = vpop.f32.mrf.mxu0  ;;  %7370 = vmax.xlane.f32.xlu1 %v7369_v7 }
 0x785   : > { %v17118_v32 = vpop.f32.mrf.mxu0 }
 0x786   : > { %v7378_v41 = vsel %vm3250_vm2, %v17118_v32, -inf }
 0x787   : > { %v12238_v39 = vpop.f32.mrf.mxu0  ;;  %7379 = vmax.xlane.f32.xlu0 %v7378_v41 }
 0x789   : > { %v17122_v31 = vpop.f32.mrf.mxu0 }
 0x78a   : > { %v7381_v12 = vsel %vm3250_vm2, %v17122_v31, -inf }
 0x78b   : > { %v12239_v21 = vpop.f32.mrf.mxu0  ;;  %7382 = vmax.xlane.f32.xlu1 %v7381_v12 }
 0x78d   : > { %v17126_v2 = vpop.f32.mrf.mxu0 }
 0x78e   : > { %v7326_v51 = vpop.xlane.xlu0 %7325  ;;  %v7390_v7 = vsel %vm3250_vm2, %v17126_v2, -inf }
 0x78f   : > { %v7416_v17 = vsub.f32 %v16926_v33, %v7326_v51  ;;  %v12250_v1 = vpop.f32.mrf.mxu0  ;;  %7391 = vmax.xlane.f32.xlu0 %v7390_v7 }
 0x791   : > { %v17131_v63 = vpop.f32.mrf.mxu0  ;;  %v7450_v41 = vmul.f32 1.442695, %v7416_v17 }
 0x792   : > { %v7329_v39 = vpop.xlane.xlu1 %7328  ;;  %v7393_v37 = vsel %vm3250_vm2, %v17131_v63, -inf }
 0x793   : > { %v7417_v21 = vsub.f32 %v16934_v25, %v7329_v39  ;;  %v12251_v12 = vpop.f32.mrf.mxu0  ;;  %7394 = vmax.xlane.f32.xlu1 %v7393_v37  ;;  %13216 = vpow2.f32 %v7450_v41 }
 0x795   : > { %v7452_v23 = vmul.f32 1.442695, %v7417_v21  ;;  %v17136_v53 = vpop.f32.mrf.mxu0 }
 0x796   : > { %v7338_v28 = vpop.xlane.xlu0 %7337  ;;  %v7402_v33 = vsel %vm3250_vm2, %v17136_v53, -inf }
 0x797   : > { %13218 = vpow2.f32 %v7452_v23  ;;  %v7420_v51 = vsub.f32 %v16942_v38, %v7338_v28  ;;  %v12262_v1 = vpop.f32.mrf.mxu0  ;;  %7403 = vmax.xlane.f32.xlu0 %v7402_v33 }
 0x799   : > { %v17141_v7 = vpop.f32.mrf.mxu0  ;;  %v7458_v17 = vmul.f32 1.442695, %v7420_v51 }
 0x79a   : > { %v7341_v55 = vpop.xlane.xlu1 %7340  ;;  %v7405_v37 = vsel %vm3250_vm2, %v17141_v7, -inf }
 0x79b   : > { %v7421_v25 = vsub.f32 %v16950_v36, %v7341_v55  ;;  %v12263_v39 = vpop.f32.mrf.mxu0  ;;  %7406 = vmax.xlane.f32.xlu1 %v7405_v37  ;;  %13220 = vpow2.f32 %v7458_v17  ;;  %v19651_v37 = vld [vmem:[#allocation203_spill] sm:$0xff] }
 0x79d   : > { %v7460_v41 = vmul.f32 1.442695, %v7421_v25 }
 0x79e   : > { %v7350_v21 = vpop.xlane.xlu0 %7349 }
 0x79f   : > { %13222 = vpow2.f32 %v7460_v41  ;;  %v7424_v23 = vsub.f32 %v16958_v27, %v7350_v21  ;;  %v19650_v27 = vld [vmem:[#allocation206_spill] sm:$0xff] }
 0x7a0   : > { %v17147_v12 = vpop.eup %13216  ;;  %v19652_v25 = vpack.c.bf16 %v19650_v27, %v19651_v37 }
 0x7a1   : > { %v7466_v28 = vmul.f32 1.442695, %v7424_v23 }
 0x7a2   : > { %v7353_v38 = vpop.xlane.xlu1 %7352 }
 0x7a3   : > { %v7425_v33 = vsub.f32 %v16966_v11, %v7353_v38  ;;  %13224 = vpow2.f32 %v7466_v28 }
 0x7a4   : > { %v17150_v51 = vpop.eup %13218 }
 0x7a5   : > { %v7607_v1 = vpack.c.bf16 %v17150_v51, %v17147_v12  ;;  %v7468_v55 = vmul.f32 1.442695, %v7425_v33 }
 0x7a6   : > { %v7362_v36 = vpop.xlane.xlu0 %7361 }
 0x7a7   : > { %13226 = vpow2.f32 %v7468_v55  ;;  %v7428_v17 = vsub.f32 %v16974_v20, %v7362_v36  ;;  %12279 = vmatmul.mubr.msk.bf16.vlgmr.msra.gmra.mxu1 %vm3250_vm2, %v7607_v1  ;;  %v19653_v1 = vld [vmem:[#allocation218_spill] sm:$0xff]  ;;  %v19654_v55 = vld [vmem:[#allocation215_spill] sm:$0xff] }
 0x7a8   : > { %12289 = vmatpush3.bf16.msra.mxu1 %v19652_v25  ;;  %12290 = vmatprep.mubr.msk.bf16.mxu1 %vm13603_vm1, %v18977_v13  ;;  %v17162_v41 = vpop.eup %13220  ;;  %v19655_v36 = vpack.c.bf16 %v19653_v1, %v19654_v55 }
 0x7a9   : > { %12300 = vmatprep.subr.bf16.mxu1 %v18977_v13  ;;  %v7474_v11 = vmul.f32 1.442695, %v7428_v17 }
 0x7aa   : > { %v7365_v39 = vpop.xlane.xlu1 %7364 }
 0x7ab   : > { %v7429_v21 = vsub.f32 %v16982_v8, %v7365_v39  ;;  %13228 = vpow2.f32 %v7474_v11 }
 0x7ac   : > { %v17165_v23 = vpop.eup %13222 }
 0x7ad   : > { %v7609_v20 = vpack.c.bf16 %v17165_v23, %v17162_v41  ;;  %v7476_v28 = vmul.f32 1.442695, %v7429_v21 }
 0x7ae   : > { %v7374_v38 = vpop.xlane.xlu0 %7373 }
 0x7af   : > { %13230 = vpow2.f32 %v7476_v28  ;;  %v7432_v33 = vsub.f32 %v16990_v5, %v7374_v38  ;;  %12291 = vmatmul.mubr.msk.bf16.vlgmr.msra.gmra.mxu1 %vm3250_vm2, %v7609_v20  ;;  %v19656_v20 = vld [vmem:[#allocation230_spill] sm:$0xff]  ;;  %v19657_v28 = vld [vmem:[#allocation227_spill] sm:$0xff] }
 0x7b0   : > { %12301 = vmatpush3.bf16.msra.mxu1 %v19655_v36  ;;  %12302 = vmatprep.mubr.msk.bf16.mxu1 %vm13603_vm1, %v18977_v13  ;;  %v17177_v27 = vpop.eup %13224  ;;  %v19658_v38 = vpack.c.bf16 %v19656_v20, %v19657_v28  ;;  %v19663_v20 = vld [vmem:[#allocation251_spill] sm:$0xff] }
 0x7b1   : > { %12312 = vmatprep.subr.bf16.mxu1 %v18977_v13  ;;  %v7482_v8 = vmul.f32 1.442695, %v7432_v33 }
 0x7b2   : > { %v7377_v17 = vpop.xlane.xlu1 %7376 }
 0x7b3   : > { %v7433_v37 = vsub.f32 %v16998_v26, %v7377_v17  ;;  %13232 = vpow2.f32 %v7482_v8  ;;  %v19659_v17 = vld [vmem:[#allocation242_spill] sm:$0xff] }
 0x7b4   : > { %v17180_v25 = vpop.eup %13226 }
 0x7b5   : > { %v7611_v5 = vpack.c.bf16 %v17180_v25, %v17177_v27  ;;  %v7484_v11 = vmul.f32 1.442695, %v7433_v37  ;;  %v19660_v37 = vld [vmem:[#allocation239_spill] sm:$0xff] }
 0x7b6   : > { %v7386_v39 = vpop.xlane.xlu0 %7385 }
 0x7b7   : > { %13234 = vpow2.f32 %v7484_v11  ;;  %v7436_v21 = vsub.f32 %v17006_v45, %v7386_v39  ;;  %12303 = vmatmul.mubr.msk.bf16.vlgmr.msra.gmra.mxu1 %vm3250_vm2, %v7611_v5  ;;  %v19661_v5 = vpack.c.bf16 %v19659_v17, %v19660_v37 }
 0x7b8   : > { %12313 = vmatpush3.bf16.msra.mxu1 %v19658_v38  ;;  %12314 = vmatprep.mubr.msk.bf16.mxu1 %vm13603_vm1, %v18977_v13  ;;  %v17192_v1 = vpop.eup %13228 }
 0x7b9   : > { %12324 = vmatprep.subr.bf16.mxu1 %v18977_v13  ;;  %v7490_v26 = vmul.f32 1.442695, %v7436_v21  ;;  %v19662_v21 = vld [vmem:[#allocation70_spill] sm:$0xff] }
 0x7ba   : > { %v7389_v33 = vpop.xlane.xlu1 %7388  ;;  %v19664_v28 = vpack.c.bf16 %v19662_v21, %v19663_v20 }
 0x7bb   : > { %v7437_v55 = vsub.f32 %v17014_v14, %v7389_v33  ;;  %13236 = vpow2.f32 %v7490_v26 }
 0x7bc   : > { %v17195_v36 = vpop.eup %13230 }
 0x7bd   : > { %v7613_v45 = vpack.c.bf16 %v17195_v36, %v17192_v1  ;;  %v7492_v8 = vmul.f32 1.442695, %v7437_v55  ;;  %v19665_v55 = vld [vmem:[#allocation86_spill] sm:$0xff] }
 0x7bf   : > { %13238 = vpow2.f32 %v7492_v8  ;;  %12315 = vmatmul.mubr.msk.bf16.vlgmr.msra.gmra.mxu1 %vm3250_vm2, %v7613_v45  ;;  %v19666_v45 = vld [vmem:[#allocation257_spill] sm:$0xff] }
 0x7c0   : > { %12325 = vmatpush3.bf16.msra.mxu1 %v19661_v5  ;;  %12326 = vmatprep.mubr.msk.bf16.mxu1 %vm13603_vm1, %v18977_v13  ;;  %v17206_v14 = vpop.eup %13232  ;;  %v19667_v8 = vpack.c.bf16 %v19665_v55, %v19666_v45 }
 0x7c1   : > { %12336 = vmatprep.subr.bf16.mxu1 %v18977_v13 }
 0x7c4   : > { %v17208_v11 = vpop.eup %13234 }
 0x7c5   : > { %v7615_v39 = vpack.c.bf16 %v17208_v11, %v17206_v14 }
 0x7c7   : > { %12327 = vmatmul.mubr.msk.bf16.vlgmr.msra.gmra.mxu1 %vm3250_vm2, %v7615_v39 }
 0x7c8   : > { %12337 = vmatpush3.bf16.msra.mxu1 %v19664_v28  ;;  %12338 = vmatprep.mubr.msk.bf16.mxu1 %vm13603_vm1, %v18977_v13  ;;  %v17219_v38 = vpop.eup %13236 }
 0x7c9   : > { %12348 = vmatprep.subr.bf16.mxu1 %v18977_v13 }
 0x7cc   : > { %v17221_v26 = vpop.eup %13238 }
 0x7cd   : > { %v7617_v33 = vpack.c.bf16 %v17221_v26, %v17219_v38 }
 0x7cf   : > { %12339 = vmatmul.mubr.msk.bf16.vlgmr.msra.gmra.mxu1 %vm3250_vm2, %v7617_v33 }
 0x7d0   : > { %12349 = vmatpush3.bf16.msra.mxu1 %v19667_v8  ;;  %12350 = vmatprep.mubr.msk.bf16.mxu1 %vm13603_vm1, %v18977_v13 }
 0x7d1   : > { %12360 = vmatprep.subr.bf16.mxu1 %v18977_v13 }
 0x7e8   : > { %v7320_v17 = vpop.xlane.xlu0 %7319 }
 0x7e9   : > { %v7414_v37 = vsub.f32 %v17070_v50, %v7320_v17 }
 0x7eb   : > { %v7446_v5 = vmul.f32 1.442695, %v7414_v37 }
 0x7ec   : > { %v7323_v39 = vpop.xlane.xlu1 %7322  ;;  %v7398_v21 = vpop.xlane.xlu0 %7397 }
 0x7ed   : > { %13240 = vpow2.f32 %v7446_v5  ;;  %v7415_v20 = vsub.f32 %v17074_v9, %v7323_v39  ;;  %v7440_v28 = vsub.f32 %v17022_v59, %v7398_v21 }
 0x7ef   : > { %v7448_v33 = vmul.f32 1.442695, %v7415_v20  ;;  %v7498_v46 = vmul.f32 1.442695, %v7440_v28 }
 0x7f0   : > { %v7401_v55 = vpop.xlane.xlu1 %7400  ;;  %v7410_v45 = vpop.xlane.xlu0 %7409 }
 0x7f1   : > { %13242 = vpow2.f32 %v7448_v33  ;;  %v7441_v8 = vsub.f32 %v17028_v35, %v7401_v55  ;;  %v7444_v50 = vsub.f32 %v17034_v42, %v7410_v45 }
 0x7f2   : > { %13244 = vpow2.f32 %v7498_v46 }
 0x7f3   : > { %v7500_v40 = vmul.f32 1.442695, %v7441_v8  ;;  %v7506_v21 = vmul.f32 1.442695, %v7444_v50  ;;  %v19668_v50 = vld [vmem:[#allocation200_spill] sm:$0xff] }
 0x7f4   : > { %v7332_v56 = vpop.xlane.xlu0 %7331  ;;  %v7413_v52 = vpop.xlane.xlu1 %7412 }
 0x7f5   : > { %13246 = vpow2.f32 %v7500_v40  ;;  %v7418_v17 = vsub.f32 %v17080_v60, %v7332_v56  ;;  %v7445_v9 = vsub.f32 %v17040_v54, %v7413_v52 }
 0x7f7   : > { %v7454_v37 = vmul.f32 1.442695, %v7418_v17  ;;  %v7508_v59 = vmul.f32 1.442695, %v7445_v9  ;;  %v19669_v17 = vld [vmem:[#allocation197_spill] sm:$0xff] }
 0x7f8   : > { %v7344_v5 = vpop.xlane.xlu0 %7343  ;;  %v7335_v39 = vpop.xlane.xlu1 %7334  ;;  %v19670_v9 = vpack.c.bf16 %v19668_v50, %v19669_v17  ;;  %v19675_v50 = vld [vmem:[#allocation63_spill] sm:$0xff] }
 0x7f9   : > { %13248 = vpow2.f32 %v7454_v37  ;;  %v7422_v20 = vsub.f32 %v17092_v6, %v7344_v5  ;;  %v7419_v35 = vsub.f32 %v17086_v61, %v7335_v39  ;;  %v7516_v6 = vsel %vm3250_vm2, %v17147_v12, 0.0 }
 0x7fa   : > { %v13241_v46 = vpop.eup %13240  ;;  %13250 = vpow2.f32 %v7508_v59  ;;  %v7519_v59 = vsel %vm3250_vm2, %v17150_v51, 0.0 }
 0x7fb   : > { %v7462_v28 = vmul.f32 1.442695, %v7422_v20  ;;  %v7456_v40 = vmul.f32 1.442695, %v7419_v35  ;;  %v7510_v42 = vsel %vm3250_vm2, %v13241_v46, 0.0  ;;  %13252 = vpow2.f32 %v7506_v21  ;;  %v19671_v21 = vld [vmem:[#allocation98_spill] sm:$0xff] }
 0x7fc   : > { %7511 = vadd.xlane.f32.xlu0 %v7510_v42  ;;  %v7347_v56 = vpop.xlane.xlu1 %7346  ;;  %v19672_v20 = vld [vmem:[#allocation265_spill] sm:$0xff] }
 0x7fd   : > { %v7423_v52 = vsub.f32 %v17098_v29, %v7347_v56  ;;  %13254 = vpow2.f32 %v7456_v40  ;;  %v19673_v35 = vpack.c.bf16 %v19671_v21, %v19672_v20  ;;  %v7540_v20 = vsel %vm3250_vm2, %v17177_v27, 0.0  ;;  %v19686_v27 = vld [vmem:[#allocation224_spill] sm:$0xff] }
 0x7fe   : > { %v13243_v54 = vpop.eup %13242  ;;  %13256 = vpow2.f32 %v7462_v28 }
 0x7ff   : > { %v7606_v60 = vpack.c.bf16 %v13243_v54, %v13241_v46  ;;  %v7513_v61 = vsel %vm3250_vm2, %v13243_v54, 0.0  ;;  %v7464_v33 = vmul.f32 1.442695, %v7423_v52  ;;  %v17246_v45 = vpop.eup %13244 }
 0x800   : > { %7517 = vadd.xlane.f32.xlu0 %v7516_v6  ;;  %v7356_v55 = vpop.xlane.xlu0 %7355  ;;  %7514 = vadd.xlane.f32.xlu1 %v7513_v61 }
 0x801   : > { %v7426_v8 = vsub.f32 %v17102_v57, %v7356_v55  ;;  %12273 = vmatmul.mubr.msk.bf16.vlgmr.msra.gmra.mxu0 %vm3250_vm2, %v7606_v60  ;;  %13258 = vpow2.f32 %v7464_v33  ;;  %v7528_v60 = vsel %vm3250_vm2, %v17162_v41, 0.0  ;;  %v19677_v41 = vld [vmem:[#allocation212_spill] sm:$0xff] }
 0x802   : > { %v17250_v29 = vpop.eup %13246  ;;  %12283 = vmatpush3.bf16.msra.mxu0 %v19670_v9  ;;  %12284 = vmatprep.mubr.msk.bf16.mxu0 %vm13603_vm1, %v18977_v13  ;;  %v19678_v9 = vld [vmem:[#allocation209_spill] sm:$0xff] }
 0x803   : > { %v7619_v12 = vpack.c.bf16 %v17250_v29, %v17246_v45  ;;  %v7470_v37 = vmul.f32 1.442695, %v7426_v8  ;;  %12294 = vmatprep.subr.bf16.mxu0 %v18977_v13  ;;  %v19674_v8 = vld [vmem:[#allocation67_spill] sm:$0xff] }
 0x804   : > { %7520 = vadd.xlane.f32.xlu1 %v7519_v59  ;;  %v7359_v57 = vpop.xlane.xlu1 %7358  ;;  %v19676_v17 = vpack.c.bf16 %v19674_v8, %v19675_v50 }
 0x805   : > { %v7427_v5 = vsub.f32 %v17106_v62, %v7359_v57  ;;  %12351 = vmatmul.mubr.msk.bf16.vlgmr.msra.gmra.mxu1 %vm3250_vm2, %v7619_v12  ;;  %13260 = vpow2.f32 %v7470_v37  ;;  %v19679_v12 = vpack.c.bf16 %v19677_v41, %v19678_v9  ;;  %v7531_v57 = vsel %vm3250_vm2, %v17165_v23, 0.0 }
 0x806   : > { %v13249_v39 = vpop.eup %13248  ;;  %12361 = vmatpush3.bf16.msra.mxu1 %v19673_v35  ;;  %12362 = vmatprep.mubr.msk.bf16.mxu1 %vm13603_vm1, %v18977_v13  ;;  %v7552_v41 = vsel %vm3250_vm2, %v17192_v1, 0.0  ;;  %v19695_v1 = vld [vmem:[#allocation236_spill] sm:$0xff] }
 0x807   : > { %v7522_v51 = vsel %vm3250_vm2, %v13249_v39, 0.0  ;;  %12366 = vmatprep.subr.bf16.mxu1 %v18977_v13  ;;  %v17271_v46 = vpop.eup %13250  ;;  %v7472_v28 = vmul.f32 1.442695, %v7427_v5 }
 0x808   : > { %7523 = vadd.xlane.f32.xlu0 %v7522_v51  ;;  %v7368_v62 = vpop.xlane.xlu0 %7367  ;;  %v17274_v42 = vpop.eup %13252 }
 0x809   : > { %v7430_v40 = vsub.f32 %v17110_v49, %v7368_v62  ;;  %v7621_v52 = vpack.c.bf16 %v17271_v46, %v17274_v42  ;;  %13262 = vpow2.f32 %v7472_v28  ;;  %v19680_v62 = vld [vmem:[#allocation111_spill] sm:$0xff] }
 0x80a   : > { %v13255_v56 = vpop.eup %13254 }
 0x80b   : > { %v7478_v54 = vmul.f32 1.442695, %v7430_v40  ;;  %v13257_v6 = vpop.eup %13256  ;;  %v7608_v61 = vpack.c.bf16 %v13255_v56, %v13249_v39  ;;  %v7525_v33 = vsel %vm3250_vm2, %v13255_v56, 0.0  ;;  %v19681_v40 = vld [vmem:[#allocation107_spill] sm:$0xff] }
 0x80c   : > { %7529 = vadd.xlane.f32.xlu0 %v7528_v60  ;;  %v7371_v55 = vpop.xlane.xlu1 %7370  ;;  %7526 = vadd.xlane.f32.xlu1 %v7525_v33  ;;  %v7534_v37 = vsel %vm3250_vm2, %v13257_v6, 0.0  ;;  %v19682_v56 = vpack.c.bf16 %v19680_v62, %v19681_v40  ;;  %v7564_v62 = vsel %vm3250_vm2, %v17206_v14, 0.0  ;;  %v19702_v14 = vld [vmem:[#allocation87_spill] sm:$0xff] }
 0x80d   : > { %v7431_v49 = vsub.f32 %v17114_v22, %v7371_v55  ;;  %12363 = vmatmul.mubr.msk.bf16.vlgmr.msra.gmra.mxu1 %vm3250_vm2, %v7621_v52  ;;  %12285 = vmatmul.mubr.msk.bf16.vlgmr.msra.gmra.mxu0 %vm3250_vm2, %v7608_v61  ;;  %13264 = vpow2.f32 %v7478_v54  ;;  %v19683_v52 = vld [vmem:[#allocation75_spill] sm:$0xff] }
 0x80e   : > { %12367 = vmatpush3.bf16.xpose.msra.mxu1 %v19676_v17  ;;  %12295 = vmatpush3.bf16.msra.mxu0 %v19679_v12  ;;  %v13259_v5 = vpop.eup %13258  ;;  %v19684_v54 = vld [vmem:[#allocation71_spill] sm:$0xff] }
 0x80f   : > { %12296 = vmatprep.mubr.msk.bf16.mxu0 %vm13603_vm1, %v18977_v13  ;;  %v7480_v59 = vmul.f32 1.442695, %v7431_v49  ;;  %12306 = vmatprep.subr.bf16.mxu0 %v18977_v13  ;;  %v7610_v51 = vpack.c.bf16 %v13259_v5, %v13257_v6  ;;  %v7537_v23 = vsel %vm3250_vm2, %v13259_v5, 0.0  ;;  %v19685_v60 = vpack.c.bf16 %v19683_v52, %v19684_v54  ;;  %v19687_v6 = vld [vmem:[#allocation221_spill] sm:$0xff]  ;;  %v19692_v5 = vld [vmem:[#allocation83_spill] sm:$0xff] }
 0x810   : > { %7535 = vadd.xlane.f32.xlu0 %v7534_v37  ;;  %v7380_v22 = vpop.xlane.xlu0 %7379  ;;  %7532 = vadd.xlane.f32.xlu1 %v7531_v57  ;;  %v19688_v61 = vpack.c.bf16 %v19686_v27, %v19687_v6  ;;  %v7543_v49 = vsel %vm3250_vm2, %v17180_v25, 0.0  ;;  %v19699_v27 = vld [vmem:[#allocation123_spill] sm:$0xff] }
 0x811   : > { %v7434_v39 = vsub.f32 %v17118_v32, %v7380_v22  ;;  %12368 = vmatprep.mubr.msk.bf16.mxu1 %vm13603_vm1, %v18977_v13  ;;  %12372 = vmatprep.subr.bf16.mxu1 %v18977_v13  ;;  %13266 = vpow2.f32 %v7480_v59  ;;  %v19689_v59 = vld [vmem:[#allocation119_spill] sm:$0xff] }
 0x812   : > { %v13261_v35 = vpop.eup %13260  ;;  %v19690_v22 = vld [vmem:[#allocation115_spill] sm:$0xff] }
 0x813   : > { %v7486_v21 = vmul.f32 1.442695, %v7434_v39  ;;  %v7546_v33 = vsel %vm3250_vm2, %v13261_v35, 0.0  ;;  %v19691_v57 = vpack.c.bf16 %v19689_v59, %v19690_v22  ;;  %v19693_v39 = vld [vmem:[#allocation79_spill] sm:$0xff] }
 0x814   : > { %7541 = vadd.xlane.f32.xlu0 %v7540_v20  ;;  %v7383_v28 = vpop.xlane.xlu1 %7382  ;;  %7538 = vadd.xlane.f32.xlu1 %v7537_v23  ;;  %v19696_v20 = vld [vmem:[#allocation233_spill] sm:$0xff]  ;;  %v7555_v23 = vsel %vm3250_vm2, %v17195_v36, 0.0  ;;  %v19709_v22 = vld [vmem:[#allocation135_spill] sm:$0xff] }
 0x815   : > { %v7435_v32 = vsub.f32 %v17122_v31, %v7383_v28  ;;  %12369 = vmatmul.mubr.bf16.vlgmr.msra.gmra.mxu1 %v19682_v56  ;;  %12297 = vmatmul.mubr.msk.bf16.vlgmr.msra.gmra.mxu0 %vm3250_vm2, %v7610_v51  ;;  %13268 = vpow2.f32 %v7486_v21  ;;  %v19694_v21 = vpack.c.bf16 %v19692_v5, %v19693_v39  ;;  %v19712_v39 = vld [vmem:[#allocation256_spill] sm:$0xff] }
 0x816   : > { %12373 = vmatpush3.bf16.xpose.msra.mxu1 %v19685_v60  ;;  %12307 = vmatpush3.bf16.msra.mxu0 %v19688_v61  ;;  %v13263_v8 = vpop.eup %13262  ;;  %v19698_v60 = vld [vmem:[#allocation127_spill] sm:$0xff] }
 0x817   : > { %12308 = vmatprep.mubr.msk.bf16.mxu0 %vm13603_vm1, %v18977_v13  ;;  %v7488_v31 = vmul.f32 1.442695, %v7435_v32  ;;  %12318 = vmatprep.subr.bf16.mxu0 %v18977_v13  ;;  %v7612_v12 = vpack.c.bf16 %v13263_v8, %v13261_v35  ;;  %v7549_v25 = vsel %vm3250_vm2, %v13263_v8, 0.0  ;;  %v19697_v35 = vpack.c.bf16 %v19695_v1, %v19696_v20 }
 0x818   : > { %7547 = vadd.xlane.f32.xlu0 %v7546_v33  ;;  %v7392_v55 = vpop.xlane.xlu0 %7391  ;;  %7544 = vadd.xlane.f32.xlu1 %v7543_v49  ;;  %v19700_v6 = vpack.c.bf16 %v19698_v60, %v19699_v27  ;;  %v19701_v33 = vld [vmem:[#allocation91_spill] sm:$0xff]  ;;  %v19705_v49 = vld [vmem:[#allocation245_spill] sm:$0xff]  ;;  %v7579_v20 = vsel %vm3250_vm2, %v17221_v26, 0.0 }
 0x819   : > { %v7438_v50 = vsub.f32 %v17126_v2, %v7392_v55  ;;  %12374 = vmatprep.mubr.msk.bf16.mxu1 %vm13603_vm1, %v18977_v13  ;;  %12378 = vmatprep.subr.bf16.mxu1 %v18977_v13  ;;  %13270 = vpow2.f32 %v7488_v31  ;;  %v19703_v31 = vpack.c.bf16 %v19701_v33, %v19702_v14  ;;  %v19704_v55 = vld [vmem:[#allocation248_spill] sm:$0xff]  ;;  %v12914_v26 = vld [vmem:[%s18623_s2 + $0x174] ss:$8 sps:$4 sm:$0xff]  }
 0x81a   : > { %v13265_v9 = vpop.eup %13264  ;;  %v19706_v8 = vpack.c.bf16 %v19704_v55, %v19705_v49  ;;  %v19725_v55 = vld [vmem:[#allocation151_spill] sm:$0xff] }
 0x81b   : > { %v7494_v17 = vmul.f32 1.442695, %v7438_v50  ;;  %v7558_v51 = vsel %vm3250_vm2, %v13265_v9, 0.0  ;;  %v19726_v49 = vld [vmem:[#allocation147_spill] sm:$0xff] }
 0x81c   : > { %7553 = vadd.xlane.f32.xlu0 %v7552_v41  ;;  %v7395_v37 = vpop.xlane.xlu1 %7394  ;;  %7550 = vadd.xlane.f32.xlu1 %v7549_v25  ;;  %v19707_v25 = vld [vmem:[#allocation95_spill] sm:$0xff] }
 0x81d   : > { %v7439_v2 = vsub.f32 %v17131_v63, %v7395_v37  ;;  %12375 = vmatmul.mubr.bf16.vlgmr.msra.gmra.mxu1 %v19691_v57  ;;  %12309 = vmatmul.mubr.msk.bf16.vlgmr.msra.gmra.mxu0 %vm3250_vm2, %v7612_v12  ;;  %13272 = vpow2.f32 %v7494_v17  ;;  %v19708_v37 = vld [vmem:[#allocation99_spill] sm:$0xff] }
 0x81e   : > { %12379 = vmatpush3.bf16.xpose.msra.mxu1 %v19694_v21  ;;  %12319 = vmatpush3.bf16.msra.mxu0 %v19697_v35  ;;  %v13267_v28 = vpop.eup %13266  ;;  %v19710_v57 = vld [vmem:[#allocation131_spill] sm:$0xff] }
 0x81f   : > { %12320 = vmatprep.mubr.msk.bf16.mxu0 %vm13603_vm1, %v18977_v13  ;;  %v7496_v63 = vmul.f32 1.442695, %v7439_v2  ;;  %12330 = vmatprep.subr.bf16.mxu0 %v18977_v13  ;;  %v7614_v56 = vpack.c.bf16 %v13267_v28, %v13265_v9  ;;  %v7561_v52 = vsel %vm3250_vm2, %v13267_v28, 0.0  ;;  %v7576_v9 = vsel %vm3250_vm2, %v17219_v38, 0.0  ;;  %v19713_v38 = vld [vmem:[#allocation58_spill] sm:$0xff] }
 0x820   : > { %7559 = vadd.xlane.f32.xlu0 %v7558_v51  ;;  %7556 = vadd.xlane.f32.xlu1 %v7555_v23  ;;  %v7404_v32 = vpop.xlane.xlu0 %7403  ;;  %v2457_v2 = vpack.c.bf16 %v19708_v37, %v19707_v25  ;;  %v19711_v5 = vpack.c.bf16 %v19709_v22, %v19710_v57  ;;  %v19714_v21 = vpack.c.bf16 %v19712_v39, %v19713_v38  ;;  %v19715_v51 = vld [vmem:[#allocation102_spill] sm:$0xff]  ;;  %v19731_v37 = vld [vmem:[#allocation159_spill] sm:$0xff] }
 0x821   : > { %12380 = vmatprep.mubr.msk.bf16.mxu1 %vm13603_vm1, %v18977_v13  ;;  %12384 = vmatprep.subr.bf16.mxu1 %v18977_v13  ;;  %13274 = vpow2.f32 %v7496_v63  ;;  %v7442_v61 = vsub.f32 %v17136_v53, %v7404_v32  ;;  %v7567_v53 = vsel %vm3250_vm2, %v17208_v11, 0.0  ;;  %v19716_v63 = vld [vmem:[#allocation106_spill] sm:$0xff]  ;;  %v12921_v22 = vld [vmem:[%s18623_s2 + $0x140] ss:$8 sps:$4 sm:$0xff]  }
 0x822   : > { %v13269_v40 = vpop.eup %13268  ;;  %v2469_v23 = vpack.c.bf16 %v19716_v63, %v19715_v51  ;;  %v12918_v25 = vld [vmem:[%s18623_s2 + $0x150] ss:$8 sps:$4 sm:$0xff]   ;;  %v12926_v57 = vld [vmem:[%s18623_s2 + $0x134] ss:$8 sps:$4 sm:$0xff]   ;;  %v12929_v51 = vld [vmem:[%s18623_s2 + $0x124] ss:$8 sps:$4 sm:$0xff]  }
 0x823   : > { %v7570_v50 = vsel %vm3250_vm2, %v13269_v40, 0.0  ;;  %v7502_v41 = vmul.f32 1.442695, %v7442_v61  ;;  %v19724_v61 = vld [vmem:[#allocation114_spill] sm:$0xff]  ;;  %v12927_v63 = vld [vmem:[%s18623_s2 + $0x120] ss:$8 sps:$4 sm:$0xff]  }
 0x824   : > { %7565 = vadd.xlane.f32.xlu0 %v7564_v62  ;;  %v7407_v36 = vpop.xlane.xlu1 %7406  ;;  %7562 = vadd.xlane.f32.xlu1 %v7561_v52  ;;  %v19717_v62 = vld [vmem:[#allocation143_spill] sm:$0xff]  ;;  %v19720_v52 = vld [vmem:[#allocation94_spill] sm:$0xff] }
 0x825   : > { %v7443_v54 = vsub.f32 %v17141_v7, %v7407_v36  ;;  %12381 = vmatmul.mubr.bf16.vlgmr.msra.gmra.mxu1 %v19700_v6  ;;  %12321 = vmatmul.mubr.msk.bf16.vlgmr.msra.gmra.mxu0 %vm3250_vm2, %v7614_v56  ;;  %v19721_v36 = vld [vmem:[#allocation261_spill] sm:$0xff]  ;;  %v19723_v6 = vld [vmem:[#allocation110_spill] sm:$0xff] }
 0x826   : > { %12385 = vmatpush3.bf16.xpose.msra.mxu1 %v19703_v31  ;;  %12331 = vmatpush3.bf16.msra.mxu0 %v19706_v8  ;;  %v13271_v17 = vpop.eup %13270  ;;  %v2481_v33 = vpack.c.bf16 %v19724_v61, %v19723_v6  ;;  %v12912_v31 = vld [vmem:[%s18623_s2 + $0x170] ss:$8 sps:$4 sm:$0xff]   ;;  %v19727_v8 = vpack.c.bf16 %v19725_v55, %v19726_v49 }
 0x827   : > { %12332 = vmatprep.mubr.msk.bf16.mxu0 %vm13603_vm1, %v18977_v13  ;;  %v7504_v7 = vmul.f32 1.442695, %v7443_v54  ;;  %12342 = vmatprep.subr.bf16.mxu0 %v18977_v13  ;;  %v7616_v59 = vpack.c.bf16 %v13271_v17, %v13269_v40  ;;  %v7573_v11 = vsel %vm3250_vm2, %v13271_v17, 0.0  ;;  %v19718_v40 = vld [vmem:[#allocation139_spill] sm:$0xff]  ;;  %v19722_v54 = vpack.c.bf16 %v19720_v52, %v19721_v36  ;;  %v12920_v17 = vld [vmem:[%s18623_s2 + $0x154] ss:$8 sps:$4 sm:$0xff]  }
 0x828   : > { %7571 = vadd.xlane.f32.xlu0 %v7570_v50  ;;  %7568 = vadd.xlane.f32.xlu1 %v7567_v53  ;;  %v19719_v56 = vpack.c.bf16 %v19717_v62, %v19718_v40  ;;  %v12917_v50 = vld [vmem:[%s18623_s2 + $0x164] ss:$8 sps:$4 sm:$0xff]   ;;  %v19728_v53 = vmov 0   ;;  %v19735_v39 = vld [vmem:[#allocation130_spill] sm:$0xff] }
 0x829   : > { %12386 = vmatprep.mubr.msk.bf16.mxu1 %vm13603_vm1, %v18977_v13  ;;  %12390 = vmatprep.subr.bf16.mxu1 %v18977_v13  ;;  %13276 = vpow2.f32 %v7504_v7  ;;  %v12915_v7 = vld [vmem:[%s18623_s2 + $0x160] ss:$8 sps:$4 sm:$0xff]   ;;  %v12930_v40 = vld [vmem:[%s18623_s2 + $0x110] ss:$8 sps:$4 sm:$0xff]   ;;  %v12935_v36 = vld [vmem:[%s18623_s2 + $0x104] ss:$8 sps:$4 sm:$0xff]  }
 0x82a   : > { %v13273_v12 = vpop.eup %13272  ;;  %13278 = vpow2.f32 %v7502_v41  ;;  %v19729_v41 = vld [vmem:[#allocation118_spill] sm:$0xff] }
 0x82b   : > { %v7582_v1 = vsel %vm3250_vm2, %v13273_v12, 0.0  ;;  %v19744_v6 = vld [vmem:[#allocation142_spill] sm:$0xff] }
 0x82c   : > { %7577 = vadd.xlane.f32.xlu0 %v7576_v9  ;;  %7574 = vadd.xlane.f32.xlu1 %v7573_v11  ;;  %v19730_v9 = vld [vmem:[#allocation122_spill] sm:$0xff]  ;;  %v12923_v11 = vld [vmem:[%s18623_s2 + $0x144] ss:$8 sps:$4 sm:$0xff]  }
 0x82d   : > { %12387 = vmatmul.mubr.bf16.vlgmr.msra.gmra.mxu1 %v19711_v5  ;;  %12333 = vmatmul.mubr.msk.bf16.vlgmr.msra.gmra.mxu0 %vm3250_vm2, %v7616_v59  ;;  %v19734_v5 = vld [vmem:[#allocation126_spill] sm:$0xff] }
 0x82e   : > { %12391 = vmatpush3.bf16.xpose.msra.mxu1 %v2457_v2  ;;  %12343 = vmatpush3.bf16.msra.mxu0 %v19714_v21  ;;  %v13275_v35 = vpop.eup %13274  ;;  %v19732_v2 = vld [vmem:[#allocation155_spill] sm:$0xff]  ;;  %v2505_v38 = vpack.c.bf16 %v19735_v39, %v19734_v5  ;;  %v12924_v21 = vld [vmem:[%s18623_s2 + $0x130] ss:$8 sps:$4 sm:$0xff]  }
 0x82f   : > { %12344 = vmatprep.mubr.msk.bf16.mxu0 %vm13603_vm1, %v18977_v13  ;;  %12354 = vmatprep.subr.bf16.mxu0 %v18977_v13  ;;  %v7618_v28 = vpack.c.bf16 %v13275_v35, %v13273_v12  ;;  %v7585_v32 = vsel %vm3250_vm2, %v13275_v35, 0.0  ;;  %v2493_v12 = vpack.c.bf16 %v19730_v9, %v19729_v41  ;;  %v19733_v59 = vpack.c.bf16 %v19731_v37, %v19732_v2  ;;  %v19745_v61 = vld [vmem:[#allocation146_spill] sm:$0xff] }
 0x830   : > { %7583 = vadd.xlane.f32.xlu0 %v7582_v1  ;;  %7580 = vadd.xlane.f32.xlu1 %v7579_v20  ;;  %v19736_v1 = vld [vmem:[#allocation167_spill] sm:$0xff]  ;;  %v19749_v49 = vld [vmem:[#allocation150_spill] sm:$0xff] }
 0x831   : > { %12392 = vmatprep.mubr.msk.bf16.mxu1 %vm13603_vm1, %v18977_v13  ;;  %12396 = vmatprep.subr.bf16.mxu1 %v18977_v13  ;;  %v19737_v20 = vld [vmem:[#allocation163_spill] sm:$0xff]  ;;  %v19754_v37 = vld [vmem:[#allocation158_spill] sm:$0xff] }
 0x832   : > { %v19738_v35 = vpack.c.bf16 %v19736_v1, %v19737_v20  ;;  %v19755_v2 = vld [vmem:[#allocation162_spill] sm:$0xff] }
 0x833   : > { %v19759_v1 = vld [vmem:[#allocation166_spill] sm:$0xff] }
 0x834   : > { %7586 = vadd.xlane.f32.xlu1 %v7585_v32  ;;  %v19740_v32 = vld [vmem:[#allocation138_spill] sm:$0xff] }
 0x835   : > { %12393 = vmatmul.mubr.bf16.vlgmr.msra.gmra.mxu1 %v19719_v56  ;;  %12345 = vmatmul.mubr.msk.bf16.vlgmr.msra.gmra.mxu0 %vm3250_vm2, %v7618_v28  ;;  %v19739_v28 = vld [vmem:[#allocation134_spill] sm:$0xff]  ;;  %v19741_v56 = vld [vmem:[#allocation175_spill] sm:$0xff] }
 0x836   : > { %12397 = vmatpush3.bf16.xpose.msra.mxu1 %v2469_v23  ;;  %12355 = vmatpush3.bf16.msra.mxu0 %v19722_v54  ;;  %v17410_v60 = vpop.eup %13276  ;;  %v12932_v23 = vld [vmem:[%s18623_s2 + $0x114] ss:$8 sps:$4 sm:$0xff]   ;;  %v2517_v62 = vpack.c.bf16 %v19740_v32, %v19739_v28  ;;  %v12933_v54 = vld [vmem:[%s18623_s2 + $0x100] ss:$8 sps:$4 sm:$0xff]  }
 0x837   : > { %12356 = vmatprep.mubr.msk.bf16.mxu0 %vm13603_vm1, %v18977_v13  ;;  %12398 = vmatprep.mubr.msk.bf16.mxu1 %vm13603_vm1, %v18977_v13  ;;  %v17412_v27 = vpop.eup %13278  ;;  %v19760_v20 = vld [vmem:[#allocation170_spill] sm:$0xff] }
 0x838   : > { %12402 = vmatprep.subr.bf16.mxu1 %v18977_v13  ;;  %8503 = vmatprep.subr.bf16.mxu0 %v12914_v26  ;;  %v7620_v14 = vpack.c.bf16 %v17410_v60, %v17412_v27  ;;  %v19742_v26 = vld [vmem:[#allocation171_spill] sm:$0xff] }
 0x839   : > { %v19743_v52 = vpack.c.bf16 %v19741_v56, %v19742_v26  ;;  %v19764_v56 = vld [vmem:[#allocation174_spill] sm:$0xff]  ;;  %v19765_v26 = vld [vmem:[#allocation177_spill] sm:$0xff] }
 0x83d   : > { %12399 = vmatmul.mubr.bf16.vlgmr.msra.gmra.mxu1 %v19727_v8  ;;  %12357 = vmatmul.mubr.msk.bf16.vlgmr.msra.gmra.mxu0 %vm3250_vm2, %v7620_v14  ;;  %v19746_v14 = vld [vmem:[#allocation22_spill] sm:$0xff] }
 0x83e   : > { %12403 = vmatpush3.bf16.xpose.msra.mxu1 %v2481_v33  ;;  %12404 = vmatprep.mubr.msk.bf16.mxu1 %vm13603_vm1, %v18977_v13  ;;  %v2529_v33 = vpack.c.bf16 %v19745_v61, %v19744_v6  ;;  %v19750_v8 = vld [vmem:[#allocation154_spill] sm:$0xff]  ;;  %v19767_v6 = vld [vmem:[#allocation43_spill] sm:$0xff] }
 0x83f   : > { %12408 = vmatprep.subr.bf16.mxu1 %v18977_v13  ;;  %8504 = vmatpush1.bf16.msra.mxu0 %v12912_v31  ;;  %v19747_v31 = vld [vmem:[#allocation19_spill] sm:$0xff] }
 0x840   : > { %8535 = vmatprep.mubr.bf16.mxu0 %v19728_v53  ;;  %8505 = vmatprep.subr.bf16.mxu0 %v12917_v50  ;;  %v19748_v55 = vpack.c.bf16 %v19746_v14, %v19747_v31  ;;  %v2541_v50 = vpack.c.bf16 %v19750_v8, %v19749_v49  ;;  %v19770_v49 = vld [vmem:[#allocation183_spill] sm:$0xff] }
 0x843   : > { %8506 = vmatpush1.bf16.msra.mxu0 %v12915_v7  ;;  %v19751_v7 = vld [vmem:[#allocation28_spill] sm:$0xff] }
 0x844   : > { %8507 = vmatprep.subr.bf16.mxu0 %v12920_v17  ;;  %v19752_v17 = vld [vmem:[#allocation25_spill] sm:$0xff] }
 0x845   : > { %12405 = vmatmul.mubr.bf16.vlgmr.msra.gmra.mxu1 %v19733_v59  ;;  %v19753_v41 = vpack.c.bf16 %v19751_v7, %v19752_v17  ;;  %v2553_v59 = vpack.c.bf16 %v19755_v2, %v19754_v37  ;;  %v19771_v17 = vld [vmem:[#allocation52_spill] sm:$0xff] }
 0x846   : > { %12409 = vmatpush3.bf16.xpose.msra.mxu1 %v2493_v12  ;;  %12410 = vmatprep.mubr.msk.bf16.mxu1 %vm13603_vm1, %v18977_v13 }
 0x847   : > { %12414 = vmatprep.subr.bf16.mxu1 %v18977_v13  ;;  %8508 = vmatpush1.bf16.msra.mxu0 %v12918_v25 }
 0x848   : > { %8509 = vmatprep.subr.bf16.mxu0 %v12923_v11 }
 0x84b   : > { %8510 = vmatpush1.bf16.msra.mxu0 %v12921_v22  ;;  %v19756_v22 = vld [vmem:[#allocation34_spill] sm:$0xff] }
 0x84c   : > { %8511 = vmatprep.subr.bf16.mxu0 %v12926_v57  ;;  %v19757_v57 = vld [vmem:[#allocation31_spill] sm:$0xff] }
 0x84d   : > { %12411 = vmatmul.mubr.bf16.vlgmr.msra.gmra.mxu1 %v19738_v35  ;;  %v19758_v5 = vpack.c.bf16 %v19756_v22, %v19757_v57  ;;  %v2565_v35 = vpack.c.bf16 %v19760_v20, %v19759_v1  ;;  %v19774_v22 = vld [vmem:[#allocation186_spill] sm:$0xff]  ;;  %v19775_v57 = vld [vmem:[#allocation189_spill] sm:$0xff]  ;;  %v19776_v1 = vld [vmem:[#allocation59_spill] sm:$0xff] }
 0x84e   : > { %12415 = vmatpush3.bf16.xpose.msra.mxu1 %v2505_v38  ;;  %12416 = vmatprep.mubr.msk.bf16.mxu1 %vm13603_vm1, %v18977_v13  ;;  %v19777_v20 = vld [vmem:[#allocation55_spill] sm:$0xff] }
 0x84f   : > { %12420 = vmatprep.subr.bf16.mxu1 %v18977_v13  ;;  %8512 = vmatpush1.bf16.msra.mxu0 %v12924_v21 }
 0x850   : > { %8513 = vmatprep.subr.bf16.mxu0 %v12929_v51 }
 0x853   : > { %8514 = vmatpush1.bf16.msra.mxu0 %v12927_v63  ;;  %v19761_v63 = vld [vmem:[#allocation40_spill] sm:$0xff] }
 0x854   : > { %8515 = vmatprep.subr.bf16.mxu0 %v12932_v23  ;;  %v19762_v23 = vld [vmem:[#allocation37_spill] sm:$0xff] }
 0x855   : > { %12417 = vmatmul.mubr.bf16.vlgmr.msra.gmra.mxu1 %v19743_v52  ;;  %v19763_v28 = vpack.c.bf16 %v19761_v63, %v19762_v23  ;;  %v2577_v52 = vpack.c.bf16 %v19765_v26, %v19764_v56 }
 0x856   : > { %12421 = vmatpush3.bf16.xpose.msra.mxu1 %v2517_v62  ;;  %12422 = vmatprep.mubr.msk.bf16.mxu1 %vm13603_vm1, %v18977_v13 }
 0x857   : > { %12426 = vmatprep.subr.bf16.mxu1 %v18977_v13  ;;  %8516 = vmatpush1.bf16.msra.mxu0 %v12930_v40 }
 0x858   : > { %8517 = vmatprep.subr.bf16.mxu0 %v12935_v36 }
 0x85b   : > { %8518 = vmatpush1.bf16.msra.mxu0 %v12933_v54  ;;  %v19766_v54 = vld [vmem:[#allocation46_spill] sm:$0xff] }
 0x85c   : > { %12480 = vmatprep.subr.bf16.mxu0 %v18977_v13  ;;  %v19768_v61 = vpack.c.bf16 %v19766_v54, %v19767_v6 }
 0x85d   : > { %12423 = vmatmul.mubr.bf16.vlgmr.msra.gmra.mxu1 %v19748_v55  ;;  %v19769_v55 = vld [vmem:[#allocation180_spill] sm:$0xff] }
 0x85e   : > { %12427 = vmatpush3.bf16.xpose.msra.mxu1 %v2529_v33  ;;  %12428 = vmatprep.mubr.msk.bf16.mxu1 %vm13603_vm1, %v18977_v13  ;;  %v2589_v8 = vpack.c.bf16 %v19770_v49, %v19769_v55 }
 0x85f   : > { %12432 = vmatprep.subr.bf16.mxu1 %v18977_v13 }
 0x865   : > { %12429 = vmatmul.mubr.bf16.vlgmr.msra.gmra.mxu1 %v19753_v41  ;;  %v19772_v41 = vld [vmem:[#allocation49_spill] sm:$0xff] }
 0x866   : > { %12433 = vmatpush3.bf16.xpose.msra.mxu1 %v2541_v50  ;;  %12434 = vmatprep.mubr.msk.bf16.mxu1 %vm13603_vm1, %v18977_v13 }
 0x867   : > { %v17511_v9 = vpop.f32.mrf.mxu1  ;;  %12438 = vmatprep.subr.bf16.mxu1 %v18977_v13 }
 0x869   : > { %v12280_v12 = vpop.f32.mrf.mxu1 }
 0x86a   : > { %v19773_v12 = vpack.c.bf16 %v19771_v17, %v19772_v41 }
 0x86b   : > { %v17514_v25 = vpop.f32.mrf.mxu1 }
 0x86d   : > { %v12281_v11 = vpop.f32.mrf.mxu1  ;;  %12435 = vmatmul.mubr.bf16.vlgmr.msra.gmra.mxu1 %v19758_v5  ;;  %v2413_v5 = vpack.c.bf16 %v19775_v57, %v19774_v22 }
 0x86e   : > { %12439 = vmatpush3.bf16.xpose.msra.mxu1 %v2553_v59  ;;  %12440 = vmatprep.mubr.msk.bf16.mxu1 %vm13603_vm1, %v18977_v13 }
 0x86f   : > { %v17523_v39 = vpop.f32.mrf.mxu1  ;;  %12444 = vmatprep.subr.bf16.mxu1 %v18977_v13 }
 0x871   : > { %v12292_v38 = vpop.f32.mrf.mxu1 }
 0x873   : > { %v17526_v21 = vpop.f32.mrf.mxu1 }
 0x875   : > { %v12293_v51 = vpop.f32.mrf.mxu1  ;;  %12441 = vmatmul.mubr.bf16.vlgmr.msra.gmra.mxu1 %v19763_v28 }
 0x876   : > { %12445 = vmatpush3.bf16.xpose.msra.mxu1 %v2565_v35  ;;  %12446 = vmatprep.mubr.msk.bf16.mxu1 %vm13603_vm1, %v18977_v13  ;;  %v19778_v35 = vpack.c.bf16 %v19776_v1, %v19777_v20 }
 0x877   : > { %v17535_v32 = vpop.f32.mrf.mxu1  ;;  %12450 = vmatprep.subr.bf16.mxu1 %v18977_v13 }
 0x879   : > { %v12304_v62 = vpop.f32.mrf.mxu1 }
 0x87b   : > { %v17538_v40 = vpop.f32.mrf.mxu1 }
 0x87d   : > { %v12305_v36 = vpop.f32.mrf.mxu1  ;;  %12447 = vmatmul.mubr.bf16.vlgmr.msra.gmra.mxu1 %v19768_v61 }
 0x87e   : > { %12451 = vmatpush3.bf16.xpose.msra.mxu1 %v2577_v52  ;;  %12452 = vmatprep.mubr.msk.bf16.mxu1 %vm13603_vm1, %v18977_v13 }
 0x87f   : > { %v17547_v33 = vpop.f32.mrf.mxu1  ;;  %12456 = vmatprep.subr.bf16.mxu1 %v18977_v13 }
 0x881   : > { %v12316_v14 = vpop.f32.mrf.mxu1 }
 0x883   : > { %v17550_v31 = vpop.f32.mrf.mxu1 }
 0x885   : > { %v17554_v50 = vpop.xlane.xlu0 %7511  ;;  %v12317_v7 = vpop.f32.mrf.mxu1  ;;  %12453 = vmatmul.mubr.bf16.vlgmr.msra.gmra.mxu1 %v19773_v12 }
 0x886   : > { %12457 = vmatpush3.bf16.xpose.msra.mxu1 %v2589_v8  ;;  %12458 = vmatprep.mubr.msk.bf16.mxu1 %vm13603_vm1, %v18977_v13 }
 0x887   : > { %v17561_v37 = vpop.f32.mrf.mxu1  ;;  %12462 = vmatprep.subr.bf16.mxu1 %v18977_v13 }
 0x889   : > { %v7518_v2 = vpop.xlane.xlu0 %7517  ;;  %v7515_v59 = vpop.xlane.xlu1 %7514 }
 0x88a   : > { %v12328_v11 = vpop.f32.mrf.mxu1  ;;  %13280 = vrcp.f32 %v7518_v2 }
 0x88c   : > { %v17566_v38 = vpop.f32.mrf.mxu1 }
 0x88d   : > { %12459 = vmatmul.mubr.bf16.vlgmr.msra.gmra.mxu1 %v19778_v35  ;;  %v7521_v51 = vpop.xlane.xlu1 %7520 }
 0x88e   : > { %12463 = vmatpush3.bf16.msra.mxu1 %v2413_v5  ;;  %13282 = vrcp.f32 %v7521_v51  ;;  %v12329_v63 = vpop.f32.mrf.mxu1  ;;  %12464 = vmatprep.mubr.msk.bf16.mxu1 %vm13603_vm1, %v18977_v13 }
 0x88f   : > { %12468 = vmatprep.subr.bf16.mxu1 %v18977_v13 }
 0x890   : > { %v17574_v23 = vpop.f32.mrf.mxu1 }
 0x891   : > { %v17576_v28 = vpop.xlane.xlu0 %7523 }
 0x892   : > { %v12340_v62 = vpop.f32.mrf.mxu1 }
 0x894   : > { %v17578_v56 = vpop.f32.mrf.mxu1 }
 0x895   : > { %v7530_v26 = vpop.xlane.xlu0 %7529  ;;  %v7527_v52 = vpop.xlane.xlu1 %7526 }
 0x896   : > { %v12341_v36 = vpop.f32.mrf.mxu1  ;;  %13284 = vrcp.f32 %v7530_v26 }
 0x897   : > { %v13281_v54 = vpop.eup %13280 }
 0x898   : > { %v17583_v55 = vmul.f32 %v13281_v54, %v17511_v9 }
 0x899   : > { %v17580_v6 = vpop.xlane.xlu0 %7535  ;;  %v7533_v61 = vpop.xlane.xlu1 %7532 }
 0x89a   : > { %13286 = vrcp.f32 %v7533_v61 }
 0x89b   : > { %v13283_v14 = vpop.eup %13282 }
 0x89c   : > { %v17586_v49 = vmul.f32 %v13283_v14, %v17514_v25 }
 0x89d   : > { %v7542_v8 = vpop.xlane.xlu0 %7541  ;;  %v17588_v7 = vpop.xlane.xlu1 %7538 }
 0x89e   : > { %13288 = vrcp.f32 %v7542_v8 }
 0x8a1   : > { %v17592_v41 = vpop.xlane.xlu0 %7547  ;;  %v7545_v12 = vpop.xlane.xlu1 %7544 }
 0x8a2   : > { %13290 = vrcp.f32 %v7545_v12 }
 0x8a3   : > { %v13285_v11 = vpop.eup %13284 }
 0x8a4   : > { %v17599_v25 = vmul.f32 %v13285_v11, %v17523_v39 }
 0x8a5   : > { %v7554_v2 = vpop.xlane.xlu0 %7553  ;;  %v17594_v22 = vpop.xlane.xlu1 %7550 }
 0x8a6   : > { %13292 = vrcp.f32 %v7554_v2 }
 0x8a7   : > { %v13287_v9 = vpop.eup %13286 }
 0x8a8   : > { %v17602_v5 = vmul.f32 %v13287_v9, %v17526_v21 }
 0x8a9   : > { %v17596_v57 = vpop.xlane.xlu0 %7559  ;;  %v7557_v1 = vpop.xlane.xlu1 %7556 }
 0x8aa   : > { %13294 = vrcp.f32 %v7557_v1 }
 0x8ab   : > { %v13289_v51 = vpop.eup %13288 }
 0x8ac   : > { %v17611_v36 = vmul.f32 %v13289_v51, %v17535_v32 }
 0x8ad   : > { %v7566_v35 = vpop.xlane.xlu0 %7565  ;;  %v17606_v63 = vpop.xlane.xlu1 %7562 }
 0x8ae   : > { %13296 = vrcp.f32 %v7566_v35 }
 0x8af   : > { %v13291_v62 = vpop.eup %13290 }
 0x8b0   : > { %v17614_v39 = vmul.f32 %v13291_v62, %v17538_v40 }
 0x8b1   : > { %v17608_v26 = vpop.xlane.xlu0 %7571  ;;  %v7569_v21 = vpop.xlane.xlu1 %7568 }
 0x8b2   : > { %13298 = vrcp.f32 %v7569_v21 }
 0x8b3   : > { %v13293_v61 = vpop.eup %13292  ;;  %13300 = vrcp.f32 %v17554_v50 }
 0x8b4   : > { %13302 = vrcp.f32 %v7515_v59  ;;  %v17622_v32 = vmul.f32 %v13293_v61, %v17547_v33 }
 0x8b5   : > { %v7578_v14 = vpop.xlane.xlu0 %7577  ;;  %v17618_v8 = vpop.xlane.xlu1 %7574 }
 0x8b6   : > { %13304 = vrcp.f32 %v7578_v14 }
 0x8b7   : > { %v13295_v12 = vpop.eup %13294 }
 0x8b8   : > { %v17625_v40 = vmul.f32 %v13295_v12, %v17550_v31 }
 0x8b9   : > { %v7581_v2 = vpop.xlane.xlu1 %7580 }
 0x8ba   : > { %13306 = vrcp.f32 %v7581_v2 }
 0x8bb   : > { %v13297_v9 = vpop.eup %13296  ;;  %13308 = vrcp.f32 %v7527_v52 }
 0x8bc   : > { %v17630_v51 = vmul.f32 %v13297_v9, %v17561_v37  ;;  %13310 = vrcp.f32 %v17576_v28  ;;  %v19779_v9 = vld [vmem:[#allocation204_spill] sm:$0xff] }
 0x8bd   : > { %13312 = vrcp.f32 %v17588_v7 }
 0x8be   : > { %13314 = vrcp.f32 %v17580_v6 }
 0x8bf   : > { %v13299_v1 = vpop.eup %13298  ;;  %13316 = vrcp.f32 %v17594_v22  ;;  %v7600_v22 = vsel %vm3250_vm2, %v17274_v42, 0.0 }
 0x8c0   : > { %v17633_v50 = vmul.f32 %v13299_v1, %v17566_v38  ;;  %v13301_v31 = vpop.eup %13300  ;;  %v19780_v1 = vld [vmem:[#allocation207_spill] sm:$0xff]  ;;  %13318 = vrcp.f32 %v17592_v41 }
 0x8c1   : > { %v7659_v35 = vpop.f32.mrf.mxu0  ;;  %v13303_v62 = vpop.eup %13302  ;;  %13320 = vrcp.f32 %v17606_v63 }
 0x8c2   : > { %v8358_v12 = vmul.f32 %v13301_v31, %v7659_v35  ;;  %13322 = vrcp.f32 %v17596_v57 }
 0x8c3   : > { %v12274_v59 = vpop.f32.mrf.mxu0  ;;  %v13305_v14 = vpop.eup %13304  ;;  %13324 = vrcp.f32 %v17618_v8 }
 0x8c4   : > { %v2449_v59 = vpack.c.bf16 %v19780_v1, %v19779_v9  ;;  %v17645_v33 = vmul.f32 %v13305_v14, %v17574_v23  ;;  %13326 = vrcp.f32 %v17608_v26  ;;  %v19785_v26 = vpack.c.bf16 %v17633_v50, %v17630_v51 }
 0x8c5   : > { %v7662_v21 = vpop.f32.mrf.mxu0  ;;  %v17637_v61 = vpop.f32.mrf.mxu1 }
 0x8c6   : > { %v8359_v2 = vmul.f32 %v13303_v62, %v7662_v21 }
 0x8c7   : > { %v12275_v11 = vpop.f32.mrf.mxu0  ;;  %v12352_v54 = vpop.f32.mrf.mxu1 }
 0x8c8   : > { %v13307_v37 = vpop.eup %13306  ;;  %v8390_v38 = vpack.c.bf16 %v8359_v2, %v8358_v12 }
 0x8c9   : > { %v17642_v20 = vpop.f32.mrf.mxu1  ;;  %v17648_v17 = vmul.f32 %v13307_v37, %v17578_v56  ;;  %v19781_v56 = vpack.c.bf16 %v17586_v49, %v17583_v55  ;;  %v13309_v21 = vpop.eup %13308 }
 0x8ca   : > { %8536 = vmatmul.mubr.bf16.vlgmr.msra.gmra.mxu0 %v8390_v38  ;;  %v13311_v37 = vpop.eup %13310 }
 0x8cb   : > { %12481 = vmatpush3.bf16.msra.mxu0 %v2449_v59  ;;  %v12353_v52 = vpop.f32.mrf.mxu1  ;;  %8545 = vmatprep.mubr.bf16.mxu0 %v19728_v53  ;;  %v8401_v28 = vpack.c.bf16 %v17648_v17, %v17645_v33 }
 0x8cc   : > { %12492 = vmatprep.subr.bf16.mxu0 %v18977_v13 }
 0x8cd   : > { %v17654_v54 = vpop.f32.mrf.mxu1  ;;  %v7747_v11 = vpop.f32.mrf.mxu0 }
 0x8ce   : > { %v8362_v9 = vmul.f32 %v13311_v37, %v7747_v11 }
 0x8cf   : > { %v12364_v35 = vpop.f32.mrf.mxu1  ;;  %v12286_v31 = vpop.f32.mrf.mxu0 }
 0x8d1   : > { %v17656_v23 = vpop.f32.mrf.mxu1  ;;  %v7750_v62 = vpop.f32.mrf.mxu0 }
 0x8d2   : > { %8546 = vmatmul.mubr.bf16.gmra.mxu0 %v19781_v56  ;;  %v8363_v12 = vmul.f32 %v13309_v21, %v7750_v62  ;;  %v7588_v62 = vsel %vm3250_vm2, %v17246_v45, 0.0 }
 0x8d3   : > { %v12365_v14 = vpop.f32.mrf.mxu1  ;;  %8555 = vmatprep.mubr.bf16.mxu0 %v19728_v53  ;;  %v12287_v2 = vpop.f32.mrf.mxu0 }
 0x8d4   : > { %v8392_v55 = vpack.c.bf16 %v8363_v12, %v8362_v9  ;;  %v7591_v14 = vsel %vm3250_vm2, %v17250_v29, 0.0 }
 0x8d5   : > { %v17662_v38 = vpop.f32.mrf.mxu1  ;;  %v7835_v1 = vpop.f32.mrf.mxu0 }
 0x8d6   : > { %v9416_v59 = vsel %vm3250_vm2, %v17662_v38, -inf }
 0x8d7   : > { %9417 = vmax.xlane.f32.xlu0 %v9416_v59  ;;  %v12370_v52 = vpop.f32.mrf.mxu1  ;;  %v12298_v49 = vpop.f32.mrf.mxu0  ;;  %v19782_v59 = vpack.c.bf16 %v17602_v5, %v17599_v25 }
 0x8d8   : > { %v7594_v52 = vsel %vm3250_vm2, %v17412_v27, 0.0  ;;  %v7597_v27 = vsel %vm3250_vm2, %v17410_v60, 0.0 }
 0x8d9   : > { %v17668_v35 = vpop.f32.mrf.mxu1  ;;  %v7838_v31 = vpop.f32.mrf.mxu0 }
 0x8da   : > { %8556 = vmatmul.mubr.bf16.gmra.mxu0 %v8392_v55  ;;  %v9419_v7 = vsel %vm3250_vm2, %v17668_v35, -inf  ;;  %v13313_v55 = vpop.eup %13312 }
 0x8db   : > { %7589 = vadd.xlane.f32.xlu0 %v7588_v62  ;;  %9420 = vmax.xlane.f32.xlu1 %v9419_v7  ;;  %v12371_v11 = vpop.f32.mrf.mxu1  ;;  %v12299_v56 = vpop.f32.mrf.mxu0  ;;  %v8367_v62 = vmul.f32 %v13313_v55, %v7838_v31  ;;  %v7603_v55 = vsel %vm3250_vm2, %v17271_v46, 0.0 }
 0x8dc   : > { %8565 = vmatprep.mubr.bf16.mxu0 %v19728_v53  ;;  %v13315_v11 = vpop.eup %13314 }
 0x8dd   : > { %v17675_v21 = vpop.f32.mrf.mxu1  ;;  %v17677_v6 = vpop.f32.mrf.mxu0  ;;  %v8366_v25 = vmul.f32 %v13315_v11, %v7835_v1 }
 0x8de   : > { %v9422_v12 = vsel %vm3250_vm2, %v17675_v21, -inf }
 0x8df   : > { %7592 = vadd.xlane.f32.xlu1 %v7591_v14  ;;  %9423 = vmax.xlane.f32.xlu0 %v9422_v12  ;;  %v12376_v45 = vpop.f32.mrf.mxu1  ;;  %v12310_v2 = vpop.f32.mrf.mxu0  ;;  %v8394_v12 = vpack.c.bf16 %v8367_v62, %v8366_v25  ;;  %v19783_v25 = vpack.c.bf16 %v17614_v39, %v17611_v36 }
 0x8e1   : > { %v17683_v37 = vpop.f32.mrf.mxu1  ;;  %v7926_v9 = vpop.f32.mrf.mxu0 }
 0x8e2   : > { %8566 = vmatmul.mubr.bf16.gmra.mxu0 %v19782_v59  ;;  %v9425_v29 = vsel %vm3250_vm2, %v17683_v37, -inf }
 0x8e3   : > { %7595 = vadd.xlane.f32.xlu0 %v7594_v52  ;;  %9426 = vmax.xlane.f32.xlu1 %v9425_v29  ;;  %v12377_v49 = vpop.f32.mrf.mxu1  ;;  %v12311_v7 = vpop.f32.mrf.mxu0 }
 0x8e4   : > { %8575 = vmatprep.mubr.bf16.mxu0 %v19728_v53 }
 0x8e5   : > { %v17693_v56 = vpop.f32.mrf.mxu1  ;;  %v17696_v5 = vpop.f32.mrf.mxu0 }
 0x8e6   : > { %v9428_v14 = vsel %vm3250_vm2, %v17693_v56, -inf }
 0x8e7   : > { %7598 = vadd.xlane.f32.xlu1 %v7597_v27  ;;  %9429 = vmax.xlane.f32.xlu0 %v9428_v14  ;;  %v12382_v31 = vpop.f32.mrf.mxu1  ;;  %v12322_v45 = vpop.f32.mrf.mxu0 }
 0x8e8   : > { %v13317_v14 = vpop.eup %13316 }
 0x8e9   : > { %v17703_v2 = vpop.f32.mrf.mxu1  ;;  %v8014_v59 = vpop.f32.mrf.mxu0  ;;  %v8371_v31 = vmul.f32 %v13317_v14, %v7926_v9 }
 0x8ea   : > { %8576 = vmatmul.mubr.bf16.gmra.mxu0 %v8394_v12  ;;  %v9431_v60 = vsel %vm3250_vm2, %v17703_v2, -inf  ;;  %v13319_v45 = vpop.eup %13318 }
 0x8eb   : > { %7601 = vadd.xlane.f32.xlu0 %v7600_v22  ;;  %9432 = vmax.xlane.f32.xlu1 %v9431_v60  ;;  %v12383_v1 = vpop.f32.mrf.mxu1  ;;  %v12323_v52 = vpop.f32.mrf.mxu0  ;;  %v8370_v60 = vmul.f32 %v13319_v45, %v17677_v6 }
 0x8ec   : > { %8585 = vmatprep.mubr.bf16.mxu0 %v19728_v53 }
 0x8ed   : > { %v17710_v29 = vpop.f32.mrf.mxu1  ;;  %v17712_v41 = vpop.f32.mrf.mxu0  ;;  %v8396_v52 = vpack.c.bf16 %v8371_v31, %v8370_v60 }
 0x8ee   : > { %v9434_v49 = vsel %vm3250_vm2, %v17710_v29, -inf  ;;  %v13321_v60 = vpop.eup %13320 }
 0x8ef   : > { %7604 = vadd.xlane.f32.xlu1 %v7603_v55  ;;  %9435 = vmax.xlane.f32.xlu0 %v9434_v49  ;;  %v12388_v42 = vpop.f32.mrf.mxu1  ;;  %v12334_v62 = vpop.f32.mrf.mxu0 }
 0x8f1   : > { %v17718_v7 = vpop.f32.mrf.mxu1  ;;  %v17720_v11 = vpop.f32.mrf.mxu0 }
 0x8f2   : > { %8586 = vmatmul.mubr.bf16.gmra.mxu0 %v19783_v25  ;;  %v9437_v27 = vsel %vm3250_vm2, %v17718_v7, -inf }
 0x8f3   : > { %9438 = vmax.xlane.f32.xlu1 %v9437_v27  ;;  %v12389_v46 = vpop.f32.mrf.mxu1  ;;  %8595 = vmatprep.mubr.bf16.mxu0 %v19728_v53  ;;  %v12335_v12 = vpop.f32.mrf.mxu0 }
 0x8f4   : > { %v19784_v12 = vpack.c.bf16 %v17625_v40, %v17622_v32 }
 0x8f5   : > { %v17728_v22 = vpop.f32.mrf.mxu1  ;;  %v17732_v1 = vpop.f32.mrf.mxu0 }
 0x8f6   : > { %v9440_v36 = vsel %vm3250_vm2, %v17728_v22, -inf }
 0x8f7   : > { %9441 = vmax.xlane.f32.xlu0 %v9440_v36  ;;  %v12394_v39 = vpop.f32.mrf.mxu1  ;;  %v12346_v55 = vpop.f32.mrf.mxu0 }
 0x8f8   : > { %v8375_v39 = vmul.f32 %v13321_v60, %v8014_v59  ;;  %v13323_v55 = vpop.eup %13322 }
 0x8f9   : > { %v17737_v9 = vpop.f32.mrf.mxu1  ;;  %v17739_v49 = vpop.f32.mrf.mxu0 }
 0x8fa   : > { %8596 = vmatmul.mubr.bf16.gmra.mxu0 %v8396_v52  ;;  %v9443_v63 = vsel %vm3250_vm2, %v17737_v9, -inf  ;;  %v13325_v60 = vpop.eup %13324 }
 0x8fb   : > { %9444 = vmax.xlane.f32.xlu1 %v9443_v63  ;;  %v12395_v6 = vpop.f32.mrf.mxu1  ;;  %8605 = vmatprep.mubr.bf16.mxu0 %v19728_v53  ;;  %v12347_v42 = vpop.f32.mrf.mxu0 }
 0x8fc   : > { %v8374_v6 = vmul.f32 %v13323_v55, %v17696_v5  ;;  %v13327_v55 = vpop.eup %13326 }
 0x8fd   : > { %v17744_v62 = vpop.f32.mrf.mxu1  ;;  %v17746_v25 = vpop.f32.mrf.mxu0 }
 0x8fe   : > { %v9446_v57 = vsel %vm3250_vm2, %v17744_v62, -inf  ;;  %v8398_v42 = vpack.c.bf16 %v8375_v39, %v8374_v6  ;;  %v7584_v6 = vpop.xlane.xlu0 %7583 }
 0x8ff   : > { %9447 = vmax.xlane.f32.xlu0 %v9446_v57  ;;  %v12400_v27 = vpop.f32.mrf.mxu1  ;;  %v12358_v14 = vpop.f32.mrf.mxu0 }
 0x901   : > { %v17750_v46 = vpop.f32.mrf.mxu1  ;;  %v17752_v31 = vpop.f32.mrf.mxu0 }
 0x902   : > { %8606 = vmatmul.mubr.bf16.gmra.mxu0 %v19784_v12  ;;  %v9449_v45 = vsel %vm3250_vm2, %v17750_v46, -inf }
 0x903   : > { %9450 = vmax.xlane.f32.xlu1 %v9449_v45  ;;  %v12401_v36 = vpop.f32.mrf.mxu1  ;;  %8615 = vmatprep.mubr.bf16.mxu0 %v19728_v53  ;;  %v12359_v52 = vpop.f32.mrf.mxu0 }
 0x904   : > { %v7587_v36 = vpop.xlane.xlu1 %7586  ;;  %v8379_v52 = vmul.f32 %v13325_v60, %v17720_v11 }
 0x905   : > { %v17760_v63 = vpop.f32.mrf.mxu1  ;;  %13328 = vrcp.f32 %v7587_v36 }
 0x906   : > { %v9452_v32 = vsel %vm3250_vm2, %v17760_v63, -inf  ;;  %13330 = vrcp.f32 %v7584_v6 }
 0x907   : > { %9453 = vmax.xlane.f32.xlu0 %v9452_v32  ;;  %v12406_v40 = vpop.f32.mrf.mxu1 }
 0x908   : > { %v8378_v40 = vmul.f32 %v13327_v55, %v17712_v41 }
 0x909   : > { %v17767_v57 = vpop.f32.mrf.mxu1 }
 0x90a   : > { %8616 = vmatmul.mubr.bf16.gmra.mxu0 %v8398_v42  ;;  %v9455_v59 = vsel %vm3250_vm2, %v17767_v57, -inf  ;;  %v8400_v42 = vpack.c.bf16 %v8379_v52, %v8378_v40 }
 0x90b   : > { %9456 = vmax.xlane.f32.xlu1 %v9455_v59  ;;  %v12407_v27 = vpop.f32.mrf.mxu1  ;;  %8625 = vmatprep.mubr.bf16.mxu0 %v19728_v53 }
 0x90d   : > { %v17772_v8 = vpop.f32.mrf.mxu1 }
 0x90e   : > { %v9458_v5 = vsel %vm3250_vm2, %v17772_v8, -inf }
 0x90f   : > { %9459 = vmax.xlane.f32.xlu0 %v9458_v5  ;;  %v12412_v14 = vpop.f32.mrf.mxu1 }
 0x911   : > { %v17776_v12 = vpop.f32.mrf.mxu1 }
 0x912   : > { %8626 = vmatmul.mubr.bf16.gmra.mxu0 %v19785_v26  ;;  %v9461_v45 = vsel %vm3250_vm2, %v17776_v12, -inf  ;;  %v13329_v60 = vpop.eup %13328 }
 0x913   : > { %9462 = vmax.xlane.f32.xlu1 %v9461_v45  ;;  %v12413_v39 = vpop.f32.mrf.mxu1  ;;  %8635 = vmatprep.mubr.bf16.mxu0 %v19728_v53  ;;  %v13331_v52 = vpop.eup %13330 }
 0x914   : > { %v8383_v39 = vmul.f32 %v13329_v60, %v17739_v49  ;;  %v8382_v6 = vmul.f32 %v13331_v52, %v17732_v1 }
 0x915   : > { %v17785_v32 = vpop.f32.mrf.mxu1 }
 0x916   : > { %v9464_v51 = vsel %vm3250_vm2, %v17785_v32, -inf  ;;  %v8402_v33 = vpack.c.bf16 %v8383_v39, %v8382_v6 }
 0x917   : > { %9465 = vmax.xlane.f32.xlu0 %v9464_v51  ;;  %v12418_v50 = vpop.f32.mrf.mxu1 }
 0x919   : > { %v17790_v59 = vpop.f32.mrf.mxu1 }
 0x91a   : > { %8636 = vmatmul.mubr.bf16.gmra.mxu0 %v8400_v42  ;;  %v9467_v11 = vsel %vm3250_vm2, %v17790_v59, -inf }
 0x91b   : > { %9468 = vmax.xlane.f32.xlu1 %v9467_v11  ;;  %v12419_v27 = vpop.f32.mrf.mxu1  ;;  %8645 = vmatprep.mubr.bf16.mxu0 %v19728_v53 }
 0x91d   : > { %v17795_v5 = vpop.f32.mrf.mxu1 }
 0x91e   : > { %v9470_v41 = vsel %vm3250_vm2, %v17795_v5, -inf }
 0x91f   : > { %9471 = vmax.xlane.f32.xlu0 %v9470_v41  ;;  %v12424_v14 = vpop.f32.mrf.mxu1 }
 0x921   : > { %v17799_v26 = vpop.f32.mrf.mxu1 }
 0x922   : > { %8646 = vmatmul.mubr.bf16.gmra.mxu0 %v8401_v28  ;;  %v9473_v45 = vsel %vm3250_vm2, %v17799_v26, -inf }
 0x923   : > { %9474 = vmax.xlane.f32.xlu1 %v9473_v45  ;;  %v12425_v36 = vpop.f32.mrf.mxu1  ;;  %8655 = vmatprep.mubr.bf16.mxu0 %v19728_v53 }
 0x925   : > { %v17808_v55 = vpop.f32.mrf.mxu1 }
 0x926   : > { %v9476_v40 = vsel %vm3250_vm2, %v17808_v55, -inf }
 0x927   : > { %9477 = vmax.xlane.f32.xlu0 %v9476_v40  ;;  %v12430_v17 = vpop.f32.mrf.mxu1 }
 0x929   : > { %v17813_v28 = vpop.f32.mrf.mxu1 }
 0x92a   : > { %8656 = vmatmul.mubr.bf16.gmra.mxu0 %v8402_v33  ;;  %v9479_v51 = vsel %vm3250_vm2, %v17813_v28, -inf }
 0x92b   : > { %9480 = vmax.xlane.f32.xlu1 %v9479_v51  ;;  %v12431_v50 = vpop.f32.mrf.mxu1  ;;  %8665 = vmatprep.mubr.bf16.mxu0 %v19728_v53 }
 0x92d   : > { %v17818_v49 = vpop.f32.mrf.mxu1 }
 0x92e   : > { %v9482_v1 = vsel %vm3250_vm2, %v17818_v49, -inf }
 0x92f   : > { %9483 = vmax.xlane.f32.xlu0 %v9482_v1  ;;  %v12436_v42 = vpop.f32.mrf.mxu1 }
 0x931   : > { %v17822_v11 = vpop.f32.mrf.mxu1 }
 0x932   : > { %v9485_v27 = vsel %vm3250_vm2, %v17822_v11, -inf }
 0x933   : > { %9486 = vmax.xlane.f32.xlu1 %v9485_v27  ;;  %v12437_v41 = vpop.f32.mrf.mxu1 }
 0x935   : > { %v17826_v14 = vpop.f32.mrf.mxu1 }
 0x936   : > { %v9488_v45 = vsel %vm3250_vm2, %v17826_v14, -inf }
 0x937   : > { %9489 = vmax.xlane.f32.xlu0 %v9488_v45  ;;  %v12442_v60 = vpop.f32.mrf.mxu1 }
 0x939   : > { %v17830_v36 = vpop.f32.mrf.mxu1 }
 0x93a   : > { %v9491_v39 = vsel %vm3250_vm2, %v17830_v36, -inf }
 0x93b   : > { %9492 = vmax.xlane.f32.xlu1 %v9491_v39  ;;  %v12443_v52 = vpop.f32.mrf.mxu1 }
 0x93d   : > { %v17834_v6 = vpop.f32.mrf.mxu1 }
 0x93e   : > { %v9494_v40 = vsel %vm3250_vm2, %v17834_v6, -inf }
 0x93f   : > { %9495 = vmax.xlane.f32.xlu0 %v9494_v40  ;;  %v12448_v17 = vpop.f32.mrf.mxu1 }
 0x941   : > { %v17838_v33 = vpop.f32.mrf.mxu1 }
 0x942   : > { %19786 = vst [vmem:[#allocation113_spill] sm:$0xff] %v17838_v33  ;;  %v9497_v51 = vsel %vm3250_vm2, %v17838_v33, -inf }
 0x943   : > { %9498 = vmax.xlane.f32.xlu1 %v9497_v51  ;;  %v12449_v50 = vpop.f32.mrf.mxu1 }
 0x945   : > { %v17842_v1 = vpop.f32.mrf.mxu1 }
 0x946   : > { %19787 = vst [vmem:[#allocation89_spill] sm:$0xff] %v17842_v1  ;;  %v9500_v42 = vsel %vm3250_vm2, %v17842_v1, -inf }
 0x947   : > { %9501 = vmax.xlane.f32.xlu0 %v9500_v42  ;;  %v12454_v27 = vpop.f32.mrf.mxu1 }
 0x949   : > { %v17846_v41 = vpop.f32.mrf.mxu1 }
 0x94a   : > { %19788 = vst [vmem:[#allocation85_spill] sm:$0xff] %v17846_v41  ;;  %v9503_v45 = vsel %vm3250_vm2, %v17846_v41, -inf }
 0x94b   : > { %9504 = vmax.xlane.f32.xlu1 %v9503_v45  ;;  %v12455_v60 = vpop.f32.mrf.mxu1 }
 0x94d   : > { %v17850_v39 = vpop.f32.mrf.mxu1 }
 0x94e   : > { %19789 = vst [vmem:[#allocation133_spill] sm:$0xff] %v17850_v39  ;;  %v9506_v52 = vsel %vm3250_vm2, %v17850_v39, -inf }
 0x94f   : > { %9507 = vmax.xlane.f32.xlu0 %v9506_v52  ;;  %v12460_v40 = vpop.f32.mrf.mxu1 }
 0x951   : > { %v17854_v17 = vpop.f32.mrf.mxu1 }
 0x952   : > { %19790 = vst [vmem:[#allocation129_spill] sm:$0xff] %v17854_v17  ;;  %v9509_v51 = vsel %vm3250_vm2, %v17854_v17, -inf }
 0x953   : > { %9510 = vmax.xlane.f32.xlu1 %v9509_v51  ;;  %v12461_v50 = vpop.f32.mrf.mxu1 }
 0x960   : > { %v9418_v42 = vpop.xlane.xlu0 %9417 }
 0x961   : > { %v9512_v27 = vsub.f32 %v17662_v38, %v9418_v42 }
 0x963   : > { %v9544_v41 = vmul.f32 1.442695, %v9512_v27 }
 0x964   : > { %v7590_v45 = vpop.xlane.xlu0 %7589  ;;  %v9421_v60 = vpop.xlane.xlu1 %9420 }
 0x965   : > { %13332 = vpow2.f32 %v9544_v41  ;;  %v9513_v1 = vsub.f32 %v17668_v35, %v9421_v60 }
 0x966   : > { %13334 = vrcp.f32 %v7590_v45 }
 0x967   : > { %v9546_v33 = vmul.f32 1.442695, %v9513_v1 }
 0x968   : > { %v7593_v52 = vpop.xlane.xlu1 %7592  ;;  %v9424_v40 = vpop.xlane.xlu0 %9423 }
 0x969   : > { %13336 = vpow2.f32 %v9546_v33  ;;  %v9514_v39 = vsub.f32 %v17675_v21, %v9424_v40 }
 0x96a   : > { %13338 = vrcp.f32 %v7593_v52 }
 0x96b   : > { %v9548_v17 = vmul.f32 1.442695, %v9514_v39 }
 0x96c   : > { %v7596_v51 = vpop.xlane.xlu0 %7595  ;;  %v9427_v50 = vpop.xlane.xlu1 %9426 }
 0x96d   : > { %13340 = vpow2.f32 %v9548_v17  ;;  %v9515_v38 = vsub.f32 %v17683_v37, %v9427_v50 }
 0x96e   : > { %13342 = vrcp.f32 %v7596_v51 }
 0x96f   : > { %v9550_v42 = vmul.f32 1.442695, %v9515_v38  ;;  %v19791_v38 = vld [vmem:[#allocation192_spill] sm:$0xff] }
 0x970   : > { %v7599_v27 = vpop.xlane.xlu1 %7598  ;;  %v9430_v41 = vpop.xlane.xlu0 %9429 }
 0x971   : > { %13344 = vpow2.f32 %v9550_v42  ;;  %v9516_v35 = vsub.f32 %v17693_v56, %v9430_v41  ;;  %v19792_v56 = vld [vmem:[#allocation195_spill] sm:$0xff] }
 0x972   : > { %v13333_v1 = vpop.eup %13332  ;;  %13346 = vrcp.f32 %v7599_v27  ;;  %v2425_v42 = vpack.c.bf16 %v19792_v56, %v19791_v38 }
 0x973   : > { %v9552_v45 = vmul.f32 1.442695, %v9516_v35  ;;  %v9608_v33 = vsel %vm3250_vm2, %v13333_v1, 0.0  ;;  %v13335_v39 = vpop.eup %13334 }
 0x974   : > { %v7602_v21 = vpop.xlane.xlu0 %7601  ;;  %v9433_v60 = vpop.xlane.xlu1 %9432  ;;  %9609 = vadd.xlane.f32.xlu0 %v9608_v33  ;;  %v8384_v35 = vmul.f32 %v13335_v39, %v17637_v61 }
 0x975   : > { %13348 = vpow2.f32 %v9552_v45  ;;  %v9517_v17 = vsub.f32 %v17703_v2, %v9433_v60 }
 0x976   : > { %v13337_v37 = vpop.eup %13336  ;;  %13350 = vrcp.f32 %v7602_v21 }
 0x977   : > { %v13339_v52 = vpop.eup %13338  ;;  %v9704_v40 = vpack.c.bf16 %v13337_v37, %v13333_v1  ;;  %v9554_v51 = vmul.f32 1.442695, %v9517_v17  ;;  %v9611_v50 = vsel %vm3250_vm2, %v13337_v37, 0.0 }
 0x978   : > { %v7605_v27 = vpop.xlane.xlu1 %7604  ;;  %v9436_v41 = vpop.xlane.xlu0 %9435  ;;  %9612 = vadd.xlane.f32.xlu1 %v9611_v50  ;;  %v8385_v33 = vmul.f32 %v13339_v52, %v17642_v20  ;;  %v19794_v50 = vld [vmem:[#allocation201_spill] sm:$0xff] }
 0x979   : > { %13352 = vpow2.f32 %v9554_v51  ;;  %v9518_v2 = vsub.f32 %v17710_v29, %v9436_v41  ;;  %12465 = vmatmul.mubr.msk.bf16.vlgmr.msra.gmra.mxu1 %vm3250_vm2, %v9704_v40  ;;  %v19793_v51 = vld [vmem:[#allocation198_spill] sm:$0xff] }
 0x97a   : > { %v13341_v1 = vpop.eup %13340  ;;  %13354 = vrcp.f32 %v7605_v27  ;;  %12469 = vmatpush3.bf16.msra.mxu1 %v2425_v42  ;;  %v8403_v45 = vpack.c.bf16 %v8385_v33, %v8384_v35  ;;  %12470 = vmatprep.mubr.msk.bf16.mxu1 %vm13603_vm1, %v18977_v13  ;;  %v2437_v38 = vpack.c.bf16 %v19794_v50, %v19793_v51 }
 0x97b   : > { %v9556_v21 = vmul.f32 1.442695, %v9518_v2  ;;  %v9614_v60 = vsel %vm3250_vm2, %v13341_v1, 0.0  ;;  %12474 = vmatprep.subr.bf16.mxu1 %v18977_v13  ;;  %v13343_v20 = vpop.eup %13342 }
 0x97c   : > { %8666 = vmatmul.mubr.bf16.gmra.mxu0 %v8403_v45  ;;  %v9439_v61 = vpop.xlane.xlu1 %9438  ;;  %9615 = vadd.xlane.f32.xlu0 %v9614_v60  ;;  %v8386_v42 = vmul.f32 %v13343_v20, %v17746_v25  ;;  %v19795_v20 = vld [vmem:[#allocation210_spill] sm:$0xff] }
 0x97d   : > { %13356 = vpow2.f32 %v9556_v21  ;;  %v9519_v29 = vsub.f32 %v17718_v7, %v9439_v61  ;;  %8675 = vmatprep.mubr.bf16.mxu0 %v19728_v53 }
 0x97e   : > { %v13345_v39 = vpop.eup %13344 }
 0x97f   : > { %v13347_v17 = vpop.eup %13346  ;;  %v9705_v37 = vpack.c.bf16 %v13345_v39, %v13341_v1  ;;  %v9558_v52 = vmul.f32 1.442695, %v9519_v29  ;;  %v9617_v40 = vsel %vm3250_vm2, %v13345_v39, 0.0  ;;  %v19796_v29 = vld [vmem:[#allocation213_spill] sm:$0xff] }
 0x980   : > { %v9442_v56 = vpop.xlane.xlu0 %9441  ;;  %9618 = vadd.xlane.f32.xlu1 %v9617_v40  ;;  %v8387_v27 = vmul.f32 %v13347_v17, %v17752_v31  ;;  %v2461_v39 = vpack.c.bf16 %v19796_v29, %v19795_v20 }
 0x981   : > { %13358 = vpow2.f32 %v9558_v52  ;;  %v9520_v7 = vsub.f32 %v17728_v22, %v9442_v56  ;;  %12471 = vmatmul.mubr.msk.bf16.vlgmr.msra.gmra.mxu1 %vm3250_vm2, %v9705_v37 }
 0x982   : > { %v13349_v41 = vpop.eup %13348  ;;  %12475 = vmatpush3.bf16.msra.mxu1 %v2437_v38  ;;  %v8404_v35 = vpack.c.bf16 %v8387_v27, %v8386_v42  ;;  %12476 = vmatprep.mubr.msk.bf16.mxu1 %vm13603_vm1, %v18977_v13  ;;  %v6508_v42 = vadd.f32 %v16669_v10, %v16856_v15  ;;  %v6514_v10 = vadd.f32 %v16674_v4, %v16864_v43 }
 0x983   : > { %v9560_v33 = vmul.f32 1.442695, %v9520_v7  ;;  %v9620_v2 = vsel %vm3250_vm2, %v13349_v41, 0.0  ;;  %12486 = vmatprep.subr.bf16.mxu1 %v18977_v13  ;;  %v13351_v31 = vpop.eup %13350 }
 0x984   : > { %8676 = vmatmul.mubr.bf16.gmra.mxu0 %v8404_v35  ;;  %v9445_v25 = vpop.xlane.xlu1 %9444  ;;  %9621 = vadd.xlane.f32.xlu0 %v9620_v2  ;;  %v8388_v37 = vmul.f32 %v13351_v31, %v17654_v54  ;;  %v6506_v54 = vadd.f32 %v16664_v0, %v16852_v16  ;;  %v19797_v31 = vld [vmem:[#allocation216_spill] sm:$0xff] }
 0x985   : > { %13360 = vpow2.f32 %v9560_v33  ;;  %v9521_v22 = vsub.f32 %v17737_v9, %v9445_v25  ;;  %8685 = vmatprep.mubr.bf16.mxu0 %v19728_v53  ;;  %v6504_v9 = vadd.f32 %v16654_v19, %v16848_v30 }
 0x986   : > { %v13353_v1 = vpop.eup %13352 }
 0x987   : > { %v13355_v45 = vpop.eup %13354  ;;  %v9706_v21 = vpack.c.bf16 %v13353_v1, %v13349_v41  ;;  %v9562_v60 = vmul.f32 1.442695, %v9521_v22  ;;  %v9623_v61 = vsel %vm3250_vm2, %v13353_v1, 0.0  ;;  %v19798_v22 = vld [vmem:[#allocation219_spill] sm:$0xff] }
 0x988   : > { %v9448_v17 = vpop.xlane.xlu0 %9447  ;;  %9624 = vadd.xlane.f32.xlu1 %v9623_v61  ;;  %v8389_v52 = vmul.f32 %v13355_v45, %v17656_v23  ;;  %v2473_v1 = vpack.c.bf16 %v19798_v22, %v19797_v31  ;;  %v19803_v31 = vld [vmem:[#allocation228_spill] sm:$0xff]  ;;  %v19804_v22 = vld [vmem:[#allocation231_spill] sm:$0xff] }
 0x989   : > { %13362 = vpow2.f32 %v9562_v60  ;;  %v9522_v40 = vsub.f32 %v17744_v62, %v9448_v17  ;;  %12477 = vmatmul.mubr.msk.bf16.vlgmr.msra.gmra.mxu1 %vm3250_vm2, %v9706_v21  ;;  %v6516_v60 = vadd.f32 %v16684_v47, %v16868_v18 }
 0x98a   : > { %v13357_v51 = vpop.eup %13356  ;;  %12487 = vmatpush3.bf16.msra.mxu1 %v2461_v39  ;;  %v8537_v50 = vpop.f32.mrf.mxu0  ;;  %v8405_v38 = vpack.c.bf16 %v8389_v52, %v8388_v37  ;;  %12488 = vmatprep.mubr.msk.bf16.mxu1 %vm13603_vm1, %v18977_v13 }
 0x98b   : > { %v9564_v56 = vmul.f32 1.442695, %v9522_v40  ;;  %v17904_v23 = vadd.f32 %v8537_v50, %v6504_v9  ;;  %v9626_v19 = vsel %vm3250_vm2, %v13357_v51, 0.0  ;;  %12498 = vmatprep.subr.bf16.mxu1 %v18977_v13 }
 0x98c   : > { %8686 = vmatmul.mubr.bf16.gmra.mxu0 %v8405_v38  ;;  %v8539_v30 = vpop.f32.mrf.mxu0  ;;  %v9451_v62 = vpop.xlane.xlu1 %9450  ;;  %9627 = vadd.xlane.f32.xlu0 %v9626_v19 }
 0x98d   : > { %13364 = vpow2.f32 %v9564_v56  ;;  %v17910_v27 = vadd.f32 %v8539_v30, %v6506_v54  ;;  %v9523_v7 = vsub.f32 %v17750_v46, %v9451_v62  ;;  %12482 = vmatprep.mubr.msk.bf16.mxu0 %vm13603_vm1, %v18977_v13  ;;  %v6526_v30 = vadd.f32 %v16696_v44, %v16884_v3 }
 0x98e   : > { %v13359_v0 = vpop.eup %13358  ;;  %v8541_v16 = vpop.f32.mrf.mxu0 }
 0x98f   : > { %v9566_v41 = vmul.f32 1.442695, %v9523_v7  ;;  %v17915_v35 = vadd.f32 %v8541_v16, %v6508_v42  ;;  %v9629_v33 = vsel %vm3250_vm2, %v13359_v0, 0.0  ;;  %v9707_v45 = vpack.c.bf16 %v13359_v0, %v13357_v51  ;;  %v19802_v0 = vld [vmem:[#allocation41_spill] sm:$0xff] }
 0x990   : > { %v17918_v2 = vpop.f32.mrf.mxu0  ;;  %v9454_v25 = vpop.xlane.xlu0 %9453  ;;  %9630 = vadd.xlane.f32.xlu1 %v9629_v33 }
 0x991   : > { %13366 = vpow2.f32 %v9566_v41  ;;  %v9524_v15 = vsub.f32 %v17760_v63, %v9454_v25  ;;  %v6518_v63 = vadd.f32 %v16689_v34, %v16872_v58  ;;  %v19799_v34 = vld [vmem:[#allocation222_spill] sm:$0xff]  ;;  %v19800_v58 = vld [vmem:[#allocation225_spill] sm:$0xff] }
 0x992   : > { %v13361_v46 = vpop.eup %13360  ;;  %v8547_v21 = vpop.f32.mrf.mxu0  ;;  %v2485_v51 = vpack.c.bf16 %v19800_v58, %v19799_v34  ;;  %v19809_v34 = vld [vmem:[#allocation289_spill] sm:$0xff]  ;;  %v19810_v58 = vld [vmem:[#allocation232_spill] sm:$0xff] }
 0x993   : > { %v9568_v61 = vmul.f32 1.442695, %v9524_v15  ;;  %v17927_v20 = vadd.f32 %v8547_v21, %v6514_v10  ;;  %v9632_v29 = vsel %vm3250_vm2, %v13361_v46, 0.0 }
 0x994   : > { %12483 = vmatmul.mubr.msk.bf16.vlgmr.msra.gmra.mxu0 %vm3250_vm2, %v9707_v45  ;;  %v8549_v4 = vpop.f32.mrf.mxu0  ;;  %v9457_v43 = vpop.xlane.xlu1 %9456  ;;  %9633 = vadd.xlane.f32.xlu0 %v9632_v29 }
 0x995   : > { %13368 = vpow2.f32 %v9568_v61  ;;  %12493 = vmatpush3.bf16.msra.mxu0 %v2473_v1  ;;  %v17933_v39 = vadd.f32 %v8549_v4, %v6516_v60  ;;  %v9525_v17 = vsub.f32 %v17767_v57, %v9457_v43  ;;  %12494 = vmatprep.mubr.msk.bf16.mxu0 %vm13603_vm1, %v18977_v13  ;;  %v6524_v57 = vadd.f32 %v16694_v24, %v16880_v48  ;;  %v19805_v60 = vld [vmem:[#allocation284_spill] sm:$0xff]  ;;  %v19806_v61 = vld [vmem:[#allocation47_spill] sm:$0xff] }
 0x996   : > { %v13363_v47 = vpop.eup %13362  ;;  %v8551_v18 = vpop.f32.mrf.mxu0  ;;  %12504 = vmatprep.subr.bf16.mxu0 %v18977_v13  ;;  %v2497_v1 = vpack.c.bf16 %v19804_v22, %v19803_v31  ;;  %v6534_v29 = vadd.f32 %v19806_v61, %v19805_v60  ;;  %v19816_v31 = vld [vmem:[#allocation250_spill] sm:$0xff] }
 0x997   : > { %v9708_v37 = vpack.c.bf16 %v13363_v47, %v13361_v46  ;;  %v9570_v52 = vmul.f32 1.442695, %v9525_v17  ;;  %v17939_v9 = vadd.f32 %v8551_v18, %v6518_v63  ;;  %v9635_v40 = vsel %vm3250_vm2, %v13363_v47, 0.0  ;;  %v19807_v63 = vld [vmem:[#allocation286_spill] sm:$0xff]  ;;  %v19808_v17 = vld [vmem:[#allocation235_spill] sm:$0xff] }
 0x998   : > { %v17944_v50 = vpop.f32.mrf.mxu0  ;;  %v9460_v38 = vpop.xlane.xlu0 %9459  ;;  %9636 = vadd.xlane.f32.xlu1 %v9635_v40  ;;  %v6536_v47 = vadd.f32 %v19808_v17, %v19807_v63 }
 0x999   : > { %13370 = vpow2.f32 %v9570_v52  ;;  %v9526_v54 = vsub.f32 %v17772_v8, %v9460_v38  ;;  %12489 = vmatmul.mubr.msk.bf16.vlgmr.msra.gmra.mxu1 %vm3250_vm2, %v9708_v37  ;;  %v19801_v8 = vld [vmem:[#allocation280_spill] sm:$0xff] }
 0x99a   : > { %v13365_v56 = vpop.eup %13364  ;;  %12499 = vmatpush3.bf16.msra.mxu1 %v2485_v51  ;;  %v8557_v19 = vpop.f32.mrf.mxu0  ;;  %12500 = vmatprep.mubr.msk.bf16.mxu1 %vm13603_vm1, %v18977_v13  ;;  %v6528_v16 = vadd.f32 %v19802_v0, %v19801_v8  ;;  %v6538_v51 = vadd.f32 %v19810_v58, %v19809_v34  ;;  %v19819_v34 = vld [vmem:[#allocation240_spill] sm:$0xff]  ;;  %v19820_v58 = vld [vmem:[#allocation243_spill] sm:$0xff] }
 0x99b   : > { %v9572_v62 = vmul.f32 1.442695, %v9526_v54  ;;  %v17954_v42 = vadd.f32 %v8557_v19, %v6524_v57  ;;  %v9638_v7 = vsel %vm3250_vm2, %v13365_v56, 0.0  ;;  %12510 = vmatprep.subr.bf16.mxu1 %v18977_v13 }
 0x99c   : > { %v8559_v24 = vpop.f32.mrf.mxu0  ;;  %v9463_v48 = vpop.xlane.xlu1 %9462  ;;  %9639 = vadd.xlane.f32.xlu0 %v9638_v7 }
 0x99d   : > { %13372 = vpow2.f32 %v9572_v62  ;;  %v17960_v41 = vadd.f32 %v8559_v24, %v6526_v30  ;;  %v9527_v33 = vsub.f32 %v17776_v12, %v9463_v48  ;;  %v19811_v24 = vld [vmem:[#allocation234_spill] sm:$0xff]  ;;  %v19812_v48 = vld [vmem:[#allocation237_spill] sm:$0xff] }
 0x99e   : > { %v13367_v25 = vpop.eup %13366  ;;  %v8561_v44 = vpop.f32.mrf.mxu0  ;;  %v2509_v8 = vpack.c.bf16 %v19812_v48, %v19811_v24  ;;  %v19823_v48 = vld [vmem:[#allocation304_spill] sm:$0xff] }
 0x99f   : > { %v9709_v3 = vpack.c.bf16 %v13367_v25, %v13365_v56  ;;  %v9574_v10 = vmul.f32 1.442695, %v9527_v33  ;;  %v17963_v15 = vadd.f32 %v8561_v44, %v6528_v16  ;;  %v9641_v46 = vsel %vm3250_vm2, %v13367_v25, 0.0  ;;  %v19813_v33 = vld [vmem:[#allocation305_spill] sm:$0xff]  ;;  %v19814_v25 = vld [vmem:[#allocation238_spill] sm:$0xff] }
 0x9a0   : > { %v17968_v45 = vpop.f32.mrf.mxu0  ;;  %v9466_v21 = vpop.xlane.xlu0 %9465  ;;  %9642 = vadd.xlane.f32.xlu1 %v9641_v46  ;;  %v6544_v44 = vadd.f32 %v19814_v25, %v19813_v33  ;;  %v19815_v46 = vld [vmem:[#allocation296_spill] sm:$0xff] }
 0x9a1   : > { %13374 = vpow2.f32 %v9574_v10  ;;  %v9528_v12 = vsub.f32 %v17785_v32, %v9466_v21  ;;  %12495 = vmatmul.mubr.msk.bf16.vlgmr.msra.gmra.mxu0 %vm3250_vm2, %v9709_v3  ;;  %v6546_v22 = vadd.f32 %v19816_v31, %v19815_v46 }
 0x9a2   : > { %v13369_v4 = vpop.eup %13368  ;;  %12505 = vmatpush3.bf16.msra.mxu0 %v2497_v1  ;;  %v8567_v43 = vpop.f32.mrf.mxu0  ;;  %12506 = vmatprep.mubr.msk.bf16.mxu0 %vm13603_vm1, %v18977_v13 }
 0x9a3   : > { %v9576_v18 = vmul.f32 1.442695, %v9528_v12  ;;  %v17978_v37 = vadd.f32 %v8567_v43, %v6534_v29  ;;  %v9644_v52 = vsel %vm3250_vm2, %v13369_v4, 0.0  ;;  %12516 = vmatprep.subr.bf16.mxu0 %v18977_v13  ;;  %v19817_v29 = vld [vmem:[#allocation298_spill] sm:$0xff]  ;;  %v19818_v12 = vld [vmem:[#allocation253_spill] sm:$0xff] }
 0x9a4   : > { %v8569_v40 = vpop.f32.mrf.mxu0  ;;  %v9469_v32 = vpop.xlane.xlu1 %9468  ;;  %9645 = vadd.xlane.f32.xlu0 %v9644_v52 }
 0x9a5   : > { %13376 = vpow2.f32 %v9576_v18  ;;  %v17984_v38 = vadd.f32 %v8569_v40, %v6536_v47  ;;  %v9529_v57 = vsub.f32 %v17790_v59, %v9469_v32 }
 0x9a6   : > { %v13371_v54 = vpop.eup %13370  ;;  %v8571_v56 = vpop.f32.mrf.mxu0 }
 0x9a7   : > { %v9710_v19 = vpack.c.bf16 %v13371_v54, %v13369_v4  ;;  %v9578_v30 = vmul.f32 1.442695, %v9529_v57  ;;  %v17987_v62 = vadd.f32 %v8571_v56, %v6538_v51  ;;  %v9647_v7 = vsel %vm3250_vm2, %v13371_v54, 0.0  ;;  %v19821_v56 = vld [vmem:[#allocation302_spill] sm:$0xff] }
 0x9a8   : > { %v17992_v0 = vpop.f32.mrf.mxu0  ;;  %v9472_v16 = vpop.xlane.xlu0 %9471  ;;  %9648 = vadd.xlane.f32.xlu1 %v9647_v7  ;;  %v6548_v4 = vadd.f32 %v19818_v12, %v19817_v29  ;;  %v2521_v51 = vpack.c.bf16 %v19820_v58, %v19819_v34 }
 0x9a9   : > { %13378 = vpow2.f32 %v9578_v30  ;;  %v9530_v59 = vsub.f32 %v17795_v5, %v9472_v16  ;;  %12501 = vmatmul.mubr.msk.bf16.vlgmr.msra.gmra.mxu1 %vm3250_vm2, %v9710_v19  ;;  %v19822_v19 = vld [vmem:[#allocation53_spill] sm:$0xff] }
 0x9aa   : > { %v13373_v3 = vpop.eup %13372  ;;  %12511 = vmatpush3.bf16.msra.mxu1 %v2509_v8  ;;  %v8577_v10 = vpop.f32.mrf.mxu0  ;;  %12512 = vmatprep.mubr.msk.bf16.mxu1 %vm13603_vm1, %v18977_v13  ;;  %v6554_v30 = vadd.f32 %v19822_v19, %v19821_v56  ;;  %v19824_v8 = vld [vmem:[#allocation64_spill] sm:$0xff]  ;;  %v19832_v56 = vld [vmem:[#allocation62_spill] sm:$0xff] }
 0x9ab   : > { %v9580_v1 = vmul.f32 1.442695, %v9530_v59  ;;  %v18002_v21 = vadd.f32 %v8577_v10, %v6544_v44  ;;  %v9650_v60 = vsel %vm3250_vm2, %v13373_v3, 0.0  ;;  %12522 = vmatprep.subr.bf16.mxu1 %v18977_v13  ;;  %v6556_v16 = vadd.f32 %v19824_v8, %v19823_v48  ;;  %v19826_v10 = vld [vmem:[#allocation60_spill] sm:$0xff]  ;;  %v19833_v48 = vld [vmem:[#allocation303_spill] sm:$0xff] }
 0x9ac   : > { %v8579_v61 = vpop.f32.mrf.mxu0  ;;  %v9475_v5 = vpop.xlane.xlu1 %9474  ;;  %9651 = vadd.xlane.f32.xlu0 %v9650_v60  ;;  %v19834_v8 = vld [vmem:[#allocation255_spill] sm:$0xff] }
 0x9ad   : > { %13380 = vpow2.f32 %v9580_v1  ;;  %v18008_v43 = vadd.f32 %v8579_v61, %v6546_v22  ;;  %v9531_v63 = vsub.f32 %v17799_v26, %v9475_v5 }
 0x9ae   : > { %v13375_v17 = vpop.eup %13374  ;;  %v8581_v47 = vpop.f32.mrf.mxu0 }
 0x9af   : > { %v9711_v18 = vpack.c.bf16 %v13375_v17, %v13373_v3  ;;  %v9582_v52 = vmul.f32 1.442695, %v9531_v63  ;;  %v18011_v40 = vadd.f32 %v8581_v47, %v6548_v4  ;;  %v9653_v32 = vsel %vm3250_vm2, %v13375_v17, 0.0  ;;  %v19825_v3 = vld [vmem:[#allocation293_spill] sm:$0xff]  ;;  %v19827_v4 = vld [vmem:[#allocation246_spill] sm:$0xff] }
 0x9b0   : > { %v18016_v57 = vpop.f32.mrf.mxu0  ;;  %v9478_v54 = vpop.xlane.xlu0 %9477  ;;  %9654 = vadd.xlane.f32.xlu1 %v9653_v32  ;;  %v6558_v46 = vadd.f32 %v19826_v10, %v19825_v3  ;;  %v19828_v63 = vld [vmem:[#allocation249_spill] sm:$0xff]  ;;  %v19830_v32 = vld [vmem:[#allocation244_spill] sm:$0xff] }
 0x9b1   : > { %13382 = vpow2.f32 %v9582_v52  ;;  %v9532_v26 = vsub.f32 %v17808_v55, %v9478_v54  ;;  %12507 = vmatmul.mubr.msk.bf16.vlgmr.msra.gmra.mxu0 %vm3250_vm2, %v9711_v18  ;;  %v2533_v17 = vpack.c.bf16 %v19828_v63, %v19827_v4  ;;  %v19829_v52 = vld [vmem:[#allocation299_spill] sm:$0xff]  ;;  %v19831_v54 = vld [vmem:[#allocation297_spill] sm:$0xff]  ;;  %v19837_v4 = vld [vmem:[#allocation178_spill] sm:$0xff] }
 0x9b2   : > { %v13377_v7 = vpop.eup %13376  ;;  %12517 = vmatpush3.bf16.msra.mxu0 %v2521_v51  ;;  %v8587_v24 = vpop.f32.mrf.mxu0  ;;  %12518 = vmatprep.mubr.msk.bf16.mxu0 %vm13603_vm1, %v18977_v13  ;;  %v6564_v34 = vadd.f32 %v19830_v32, %v19829_v52  ;;  %v6566_v19 = vadd.f32 %v19832_v56, %v19831_v54  ;;  %v19838_v63 = vld [vmem:[#allocation259_spill] sm:$0xff]  ;;  %v19839_v32 = vld [vmem:[#allocation73_spill] sm:$0xff] }
 0x9b3   : > { %v9584_v33 = vmul.f32 1.442695, %v9532_v26  ;;  %v18026_v25 = vadd.f32 %v8587_v24, %v6554_v30  ;;  %v9656_v44 = vsel %vm3250_vm2, %v13377_v7, 0.0  ;;  %12528 = vmatprep.subr.bf16.mxu0 %v18977_v13 }
 0x9b4   : > { %v8589_v59 = vpop.f32.mrf.mxu0  ;;  %v9481_v55 = vpop.xlane.xlu1 %9480  ;;  %9657 = vadd.xlane.f32.xlu0 %v9656_v44 }
 0x9b5   : > { %13384 = vpow2.f32 %v9584_v33  ;;  %v18032_v31 = vadd.f32 %v8589_v59, %v6556_v16  ;;  %v9533_v22 = vsub.f32 %v17813_v28, %v9481_v55  ;;  %v6568_v16 = vadd.f32 %v19834_v8, %v19833_v48 }
 0x9b6   : > { %v13379_v1 = vpop.eup %13378  ;;  %v8591_v60 = vpop.f32.mrf.mxu0 }
 0x9b7   : > { %v9712_v61 = vpack.c.bf16 %v13379_v1, %v13377_v7  ;;  %v9586_v5 = vmul.f32 1.442695, %v9533_v22  ;;  %v18035_v29 = vadd.f32 %v8591_v60, %v6558_v46  ;;  %v9659_v12 = vsel %vm3250_vm2, %v13379_v1, 0.0  ;;  %v19835_v1 = vld [vmem:[#allocation252_spill] sm:$0xff]  ;;  %v19836_v60 = vld [vmem:[#allocation66_spill] sm:$0xff] }
 0x9b8   : > { %v18040_v47 = vpop.f32.mrf.mxu0  ;;  %v9484_v18 = vpop.xlane.xlu0 %9483  ;;  %9660 = vadd.xlane.f32.xlu1 %v9659_v12 }
 0x9b9   : > { %13386 = vpow2.f32 %v9586_v5  ;;  %v9534_v28 = vsub.f32 %v17818_v49, %v9484_v18  ;;  %12513 = vmatmul.mubr.msk.bf16.vlgmr.msra.gmra.mxu1 %vm3250_vm2, %v9712_v61  ;;  %v2545_v61 = vpack.c.bf16 %v19836_v60, %v19835_v1 }
 0x9ba   : > { %v13381_v58 = vpop.eup %13380  ;;  %12523 = vmatpush3.bf16.msra.mxu1 %v2533_v17  ;;  %v8597_v51 = vpop.f32.mrf.mxu0  ;;  %12524 = vmatprep.mubr.msk.bf16.mxu1 %vm13603_vm1, %v18977_v13  ;;  %v6574_v17 = vadd.f32 %v19838_v63, %v19837_v4 }
 0x9bb   : > { %v9588_v30 = vmul.f32 1.442695, %v9534_v28  ;;  %v18050_v26 = vadd.f32 %v8597_v51, %v6564_v34  ;;  %v9662_v7 = vsel %vm3250_vm2, %v13381_v58, 0.0  ;;  %12534 = vmatprep.subr.bf16.mxu1 %v18977_v13  ;;  %v19840_v34 = vld [vmem:[#allocation72_spill] sm:$0xff] }
 0x9bc   : > { %v8599_v24 = vpop.f32.mrf.mxu0  ;;  %v9487_v49 = vpop.xlane.xlu1 %9486  ;;  %9663 = vadd.xlane.f32.xlu0 %v9662_v7  ;;  %v6576_v28 = vadd.f32 %v19840_v34, %v19839_v32 }
 0x9bd   : > { %13388 = vpow2.f32 %v9588_v30  ;;  %v18056_v33 = vadd.f32 %v8599_v24, %v6566_v19  ;;  %v9535_v44 = vsub.f32 %v17822_v11, %v9487_v49  ;;  %v19841_v19 = vld [vmem:[#allocation69_spill] sm:$0xff]  ;;  %v19842_v30 = vld [vmem:[#allocation68_spill] sm:$0xff] }
 0x9be   : > { %v13383_v59 = vpop.eup %13382  ;;  %v8601_v55 = vpop.f32.mrf.mxu0  ;;  %v6578_v7 = vadd.f32 %v19842_v30, %v19841_v19  ;;  %v19851_v30 = vld [vmem:[#allocation113_spill] sm:$0xff] }
 0x9bf   : > { %v9713_v3 = vpack.c.bf16 %v13383_v59, %v13381_v58  ;;  %v9590_v10 = vmul.f32 1.442695, %v9535_v44  ;;  %v18059_v46 = vadd.f32 %v8601_v55, %v6568_v16  ;;  %v9665_v22 = vsel %vm3250_vm2, %v13383_v59, 0.0 }
 0x9c0   : > { %v18064_v5 = vpop.f32.mrf.mxu0  ;;  %v9490_v12 = vpop.xlane.xlu0 %9489  ;;  %9666 = vadd.xlane.f32.xlu1 %v9665_v22 }
 0x9c1   : > { %13390 = vpow2.f32 %v9590_v10  ;;  %v9536_v11 = vsub.f32 %v17826_v14, %v9490_v12  ;;  %12519 = vmatmul.mubr.msk.bf16.vlgmr.msra.gmra.mxu0 %vm3250_vm2, %v9713_v3  ;;  %v19843_v3 = vld [vmem:[#allocation254_spill] sm:$0xff]  ;;  %v19846_v12 = vld [vmem:[#allocation76_spill] sm:$0xff] }
 0x9c2   : > { %v13385_v18 = vpop.eup %13384  ;;  %12529 = vmatpush3.bf16.msra.mxu0 %v2545_v61  ;;  %v8607_v52 = vpop.f32.mrf.mxu0  ;;  %12530 = vmatprep.mubr.msk.bf16.mxu0 %vm13603_vm1, %v18977_v13  ;;  %v19844_v10 = vld [vmem:[#allocation78_spill] sm:$0xff]  ;;  %v19845_v61 = vld [vmem:[#allocation301_spill] sm:$0xff] }
 0x9c3   : > { %v9592_v58 = vmul.f32 1.442695, %v9536_v11  ;;  %v18074_v51 = vadd.f32 %v8607_v52, %v6574_v17  ;;  %v9668_v54 = vsel %vm3250_vm2, %v13385_v18, 0.0  ;;  %12540 = vmatprep.subr.bf16.mxu0 %v18977_v13  ;;  %v2557_v22 = vpack.c.bf16 %v19844_v10, %v19843_v3  ;;  %v19847_v11 = vld [vmem:[#allocation184_spill] sm:$0xff]  ;;  %v19852_v3 = vld [vmem:[#allocation258_spill] sm:$0xff] }
 0x9c4   : > { %v8609_v56 = vpop.f32.mrf.mxu0  ;;  %v9493_v14 = vpop.xlane.xlu1 %9492  ;;  %9669 = vadd.xlane.f32.xlu0 %v9668_v54  ;;  %v6584_v4 = vadd.f32 %v19846_v12, %v19845_v61  ;;  %v19849_v54 = vld [vmem:[#allocation11_spill] sm:$0xff]  ;;  %v19853_v10 = vld [vmem:[#allocation82_spill] sm:$0xff] }
 0x9c5   : > { %13392 = vpow2.f32 %v9592_v58  ;;  %v18080_v24 = vadd.f32 %v8609_v56, %v6576_v28  ;;  %v9537_v49 = vsub.f32 %v17830_v36, %v9493_v14  ;;  %v19850_v56 = vld [vmem:[#allocation263_spill] sm:$0xff] }
 0x9c6   : > { %v13387_v48 = vpop.eup %13386  ;;  %v8611_v8 = vpop.f32.mrf.mxu0  ;;  %v6588_v14 = vadd.f32 %v19850_v56, %v19849_v54  ;;  %v19854_v12 = vld [vmem:[#allocation187_spill] sm:$0xff] }
 0x9c7   : > { %v9714_v16 = vpack.c.bf16 %v13387_v48, %v13385_v18  ;;  %v9594_v44 = vmul.f32 1.442695, %v9537_v49  ;;  %v18083_v59 = vadd.f32 %v8611_v8, %v6578_v7  ;;  %v9671_v55 = vsel %vm3250_vm2, %v13387_v48, 0.0  ;;  %v19848_v18 = vld [vmem:[#allocation260_spill] sm:$0xff] }
 0x9c8   : > { %v18088_v1 = vpop.f32.mrf.mxu0  ;;  %v9496_v60 = vpop.xlane.xlu0 %9495  ;;  %9672 = vadd.xlane.f32.xlu1 %v9671_v55  ;;  %v6586_v52 = vadd.f32 %v19848_v18, %v19847_v11 }
 0x9c9   : > { %13394 = vpow2.f32 %v9594_v44  ;;  %v9538_v36 = vsub.f32 %v17834_v6, %v9496_v60  ;;  %12525 = vmatmul.mubr.msk.bf16.vlgmr.msra.gmra.mxu1 %vm3250_vm2, %v9714_v16 }
 0x9ca   : > { %v13389_v63 = vpop.eup %13388  ;;  %12535 = vmatpush3.bf16.msra.mxu1 %v2557_v22  ;;  %v8617_v17 = vpop.f32.mrf.mxu0  ;;  %12536 = vmatprep.mubr.msk.bf16.mxu1 %vm13603_vm1, %v18977_v13  ;;  %v2569_v22 = vpack.c.bf16 %v19853_v10, %v19852_v3 }
 0x9cb   : > { %v9596_v32 = vmul.f32 1.442695, %v9538_v36  ;;  %v18098_v34 = vadd.f32 %v8617_v17, %v6584_v4  ;;  %v9674_v28 = vsel %vm3250_vm2, %v13389_v63, 0.0  ;;  %12546 = vmatprep.subr.bf16.mxu1 %v18977_v13  ;;  %v19855_v4 = vld [vmem:[#allocation267_spill] sm:$0xff]  ;;  %v19856_v17 = vld [vmem:[#allocation89_spill] sm:$0xff] }
 0x9cc   : > { %v8619_v58 = vpop.f32.mrf.mxu0  ;;  %v9499_v6 = vpop.xlane.xlu1 %9498  ;;  %9675 = vadd.xlane.f32.xlu0 %v9674_v28  ;;  %v6594_v36 = vadd.f32 %v19855_v4, %v19854_v12  ;;  %v12938_v4 = vld [vmem:[%s18623_s2 + $0x1f4] ss:$8 sps:$4 sm:$0xff]  }
 0x9cd   : > { %13396 = vpow2.f32 %v9596_v32  ;;  %v18104_v19 = vadd.f32 %v8619_v58, %v6586_v52  ;;  %v9539_v7 = vsub.f32 %v19851_v30, %v9499_v6  ;;  %v19857_v52 = vld [vmem:[#allocation13_spill] sm:$0xff]  ;;  %v19858_v32 = vld [vmem:[#allocation88_spill] sm:$0xff]  ;;  %v19859_v30 = vld [vmem:[#allocation190_spill] sm:$0xff] }
 0x9ce   : > { %v13391_v49 = vpop.eup %13390  ;;  %v8621_v48 = vpop.f32.mrf.mxu0  ;;  %v6596_v28 = vadd.f32 %v19858_v32, %v19857_v52  ;;  %v19865_v32 = vld [vmem:[#allocation14_spill] sm:$0xff] }
 0x9cf   : > { %v9715_v8 = vpack.c.bf16 %v13391_v49, %v13389_v63  ;;  %v9598_v16 = vmul.f32 1.442695, %v9539_v7  ;;  %v18107_v44 = vadd.f32 %v8621_v48, %v6588_v14  ;;  %v9677_v55 = vsel %vm3250_vm2, %v13391_v49, 0.0  ;;  %v19860_v7 = vld [vmem:[#allocation84_spill] sm:$0xff] }
 0x9d0   : > { %v18112_v60 = vpop.f32.mrf.mxu0  ;;  %v9502_v61 = vpop.xlane.xlu0 %9501  ;;  %9678 = vadd.xlane.f32.xlu1 %v9677_v55  ;;  %v6598_v49 = vadd.f32 %v19860_v7, %v19859_v30  ;;  %v19868_v30 = vld [vmem:[#allocation15_spill] sm:$0xff]  ;;  %v19869_v7 = vld [vmem:[#allocation268_spill] sm:$0xff] }
 0x9d1   : > { %13398 = vpow2.f32 %v9598_v16  ;;  %v9540_v11 = vsub.f32 %v19856_v17, %v9502_v61  ;;  %12531 = vmatmul.mubr.msk.bf16.vlgmr.msra.gmra.mxu0 %vm3250_vm2, %v9715_v8  ;;  %v19861_v8 = vld [vmem:[#allocation85_spill] sm:$0xff]  ;;  %v19864_v17 = vld [vmem:[#allocation90_spill] sm:$0xff] }
 0x9d2   : > { %v13393_v63 = vpop.eup %13392  ;;  %12541 = vmatpush3.bf16.msra.mxu0 %v2569_v22  ;;  %v8627_v18 = vpop.f32.mrf.mxu0  ;;  %12542 = vmatprep.mubr.msk.bf16.mxu0 %vm13603_vm1, %v18977_v13 }
 0x9d3   : > { %v9600_v58 = vmul.f32 1.442695, %v9540_v11  ;;  %v18122_v6 = vadd.f32 %v8627_v18, %v6594_v36  ;;  %v9680_v54 = vsel %vm3250_vm2, %v13393_v63, 0.0  ;;  %12552 = vmatprep.subr.bf16.mxu0 %v18977_v13  ;;  %v19863_v36 = vld [vmem:[#allocation262_spill] sm:$0xff] }
 0x9d4   : > { %v8629_v56 = vpop.f32.mrf.mxu0  ;;  %v9505_v14 = vpop.xlane.xlu1 %9504  ;;  %9681 = vadd.xlane.f32.xlu0 %v9680_v54  ;;  %v2581_v11 = vpack.c.bf16 %v19864_v17, %v19863_v36 }
 0x9d5   : > { %13400 = vpow2.f32 %v9600_v58  ;;  %v18128_v48 = vadd.f32 %v8629_v56, %v6596_v28  ;;  %v9541_v16 = vsub.f32 %v19861_v8, %v9505_v14  ;;  %v19866_v28 = vld [vmem:[#allocation92_spill] sm:$0xff] }
 0x9d6   : > { %v13395_v55 = vpop.eup %13394  ;;  %v8631_v3 = vpop.f32.mrf.mxu0  ;;  %v6604_v58 = vadd.f32 %v19866_v28, %v19865_v32 }
 0x9d7   : > { %v9716_v10 = vpack.c.bf16 %v13395_v55, %v13393_v63  ;;  %v9602_v22 = vmul.f32 1.442695, %v9541_v16  ;;  %v18131_v61 = vadd.f32 %v8631_v3, %v6598_v49  ;;  %v9683_v12 = vsel %vm3250_vm2, %v13395_v55, 0.0  ;;  %v19867_v63 = vld [vmem:[#allocation133_spill] sm:$0xff] }
 0x9d8   : > { %v18139_v18 = vpop.f32.mrf.mxu0  ;;  %v9508_v52 = vpop.xlane.xlu0 %9507  ;;  %9684 = vadd.xlane.f32.xlu1 %v9683_v12  ;;  %v6606_v49 = vadd.f32 %v19869_v7, %v19868_v30  ;;  %v19871_v12 = vld [vmem:[#allocation196_spill] sm:$0xff]  ;;  %v19877_v30 = vld [vmem:[#allocation287_spill] sm:$0xff] }
 0x9d9   : > { %19862 = vst [vmem:[#allocation104_spill] sm:$0xff] %v18131_v61  ;;  %13402 = vpow2.f32 %v9602_v22  ;;  %v9542_v54 = vsub.f32 %v19867_v63, %v9508_v52  ;;  %12537 = vmatmul.mubr.msk.bf16.vlgmr.msra.gmra.mxu1 %vm3250_vm2, %v9716_v10  ;;  %v19872_v10 = vld [vmem:[#allocation269_spill] sm:$0xff] }
 0x9da   : > { %v13397_v56 = vpop.eup %13396  ;;  %12547 = vmatpush3.bf16.msra.mxu1 %v2581_v11  ;;  %v8637_v14 = vpop.f32.mrf.mxu0  ;;  %12548 = vmatprep.mubr.msk.bf16.mxu1 %vm13603_vm1, %v18977_v13  ;;  %v6608_v36 = vadd.f32 %v19872_v10, %v19871_v12  ;;  %v19874_v11 = vld [vmem:[#allocation129_spill] sm:$0xff]  ;;  %v19882_v10 = vld [vmem:[#allocation307_spill] sm:$0xff] }
 0x9db   : > { %v9604_v8 = vmul.f32 1.442695, %v9542_v54  ;;  %v18149_v16 = vadd.f32 %v8637_v14, %v6604_v58  ;;  %v9686_v55 = vsel %vm3250_vm2, %v13397_v56, 0.0  ;;  %10601 = vmatprep.subr.bf16.mxu1 %v12938_v4  ;;  %v19876_v4 = vld [vmem:[#allocation266_spill] sm:$0xff]  ;;  %v19879_v12 = vld [vmem:[#allocation205_spill] sm:$0xff] }
 0x9dc   : > { %v8639_v3 = vpop.f32.mrf.mxu0  ;;  %9687 = vadd.xlane.f32.xlu0 %v9686_v55  ;;  %v9511_v22 = vpop.xlane.xlu1 %9510  ;;  %v2593_v7 = vpack.c.bf16 %v19877_v30, %v19876_v4 }
 0x9dd   : > { %19870 = vst [vmem:[#allocation101_spill] sm:$0xff] %v18149_v16  ;;  %13404 = vpow2.f32 %v9604_v8  ;;  %v18154_v17 = vadd.f32 %v8639_v3, %v6606_v49  ;;  %v9543_v52 = vsub.f32 %v19874_v11, %v9511_v22  ;;  %v19880_v8 = vld [vmem:[#allocation100_spill] sm:$0xff]  ;;  %v19881_v22 = vld [vmem:[#allocation202_spill] sm:$0xff] }
 0x9de   : > { %v13399_v32 = vpop.eup %13398  ;;  %v8641_v28 = vpop.f32.mrf.mxu0  ;;  %v6614_v49 = vadd.f32 %v19880_v8, %v19879_v12 }
 0x9df   : > { %19873 = vst [vmem:[#allocation149_spill] sm:$0xff] %v18154_v17  ;;  %v9717_v63 = vpack.c.bf16 %v13399_v32, %v13397_v56  ;;  %v9606_v54 = vmul.f32 1.442695, %v9543_v52  ;;  %v18157_v58 = vadd.f32 %v8641_v28, %v6608_v36  ;;  %v9689_v14 = vsel %vm3250_vm2, %v13399_v32, 0.0  ;;  %v19884_v28 = vld [vmem:[#allocation17_spill] sm:$0xff] }
 0x9e0   : > { %v18162_v55 = vpop.f32.mrf.mxu0  ;;  %9690 = vadd.xlane.f32.xlu1 %v9689_v14  ;;  %v6616_v36 = vadd.f32 %v19882_v10, %v19881_v22  ;;  %v19885_v14 = vld [vmem:[#allocation308_spill] sm:$0xff]  ;;  %v19889_v22 = vld [vmem:[#allocation26_spill] sm:$0xff] }
 0x9e1   : > { %19875 = vst [vmem:[#allocation145_spill] sm:$0xff] %v18157_v58  ;;  %19878 = vst [vmem:[#allocation120_spill] sm:$0xff] %v18162_v55  ;;  %13406 = vpow2.f32 %v9606_v54  ;;  %12543 = vmatmul.mubr.msk.bf16.vlgmr.msra.gmra.mxu0 %vm3250_vm2, %v9717_v63  ;;  %v6618_v54 = vadd.f32 %v19885_v14, %v19884_v28  ;;  %v19890_v10 = vld [vmem:[#allocation272_spill] sm:$0xff]  ;;  %v19891_v28 = vld [vmem:[#allocation23_spill] sm:$0xff] }
 0x9e2   : > { %v13401_v3 = vpop.eup %13400  ;;  %12553 = vmatpush3.bf16.msra.mxu0 %v2593_v7  ;;  %v8647_v56 = vpop.f32.mrf.mxu0  ;;  %12554 = vmatprep.mubr.msk.bf16.mxu0 %vm13603_vm1, %v18977_v13  ;;  %v12936_v13 = vld [vmem:[%s18623_s2 + $0x1f0] ss:$8 sps:$4 sm:$0xff]  }
 0x9e3   : > { %v18171_v11 = vadd.f32 %v8647_v56, %v6614_v49  ;;  %v9692_v52 = vsel %vm3250_vm2, %v13401_v3, 0.0  ;;  %v12941_v49 = vld [vmem:[%s18623_s2 + $0x1e4] ss:$8 sps:$4 sm:$0xff]   ;;  %v19892_v14 = vld [vmem:[#allocation273_spill] sm:$0xff] }
 0x9e4   : > { %v8649_v32 = vpop.f32.mrf.mxu0  ;;  %9693 = vadd.xlane.f32.xlu0 %v9692_v52  ;;  %v19904_v58 = vld [vmem:[#allocation61_spill] sm:$0xff] }
 0x9e5   : > { %19883 = vst [vmem:[#allocation116_spill] sm:$0xff] %v18171_v11  ;;  %v18176_v4 = vadd.f32 %v8649_v32, %v6616_v36  ;;  %v6624_v36 = vadd.f32 %v19890_v10, %v19889_v22  ;;  %v19895_v22 = vld [vmem:[#allocation274_spill] sm:$0xff] }
 0x9e6   : > { %v13403_v63 = vpop.eup %13402  ;;  %v8651_v30 = vpop.f32.mrf.mxu0 }
 0x9e7   : > { %19886 = vst [vmem:[#allocation165_spill] sm:$0xff] %v18176_v4  ;;  %v9718_v7 = vpack.c.bf16 %v13403_v63, %v13401_v3  ;;  %v18181_v12 = vadd.f32 %v8651_v30, %v6618_v54  ;;  %v9695_v8 = vsel %vm3250_vm2, %v13403_v63, 0.0  ;;  %v12939_v3 = vld [vmem:[%s18623_s2 + $0x1e0] ss:$8 sps:$4 sm:$0xff]   ;;  %v6626_v54 = vadd.f32 %v19892_v14, %v19891_v28  ;;  %v12947_v14 = vld [vmem:[%s18623_s2 + $0x1c4] ss:$8 sps:$4 sm:$0xff]  }
 0x9e8   : > { %v18187_v56 = vpop.f32.mrf.mxu0  ;;  %9696 = vadd.xlane.f32.xlu1 %v9695_v8 }
 0x9e9   : > { %19887 = vst [vmem:[#allocation161_spill] sm:$0xff] %v18181_v12  ;;  %19888 = vst [vmem:[#allocation136_spill] sm:$0xff] %v18187_v56  ;;  %12549 = vmatmul.mubr.msk.bf16.vlgmr.msra.gmra.mxu1 %vm3250_vm2, %v9718_v7  ;;  %v12944_v7 = vld [vmem:[%s18623_s2 + $0x1d4] ss:$8 sps:$4 sm:$0xff]  }
 0x9ea   : > { %v13405_v52 = vpop.eup %13404  ;;  %v8657_v32 = vpop.f32.mrf.mxu0  ;;  %10602 = vmatpush1.bf16.msra.mxu1 %v12936_v13  ;;  %10633 = vmatprep.mubr.bf16.mxu1 %v19728_v53  ;;  %v19894_v13 = vld [vmem:[#allocation208_spill] sm:$0xff] }
 0x9eb   : > { %v18198_v63 = vadd.f32 %v8657_v32, %v6624_v36  ;;  %v9698_v30 = vsel %vm3250_vm2, %v13405_v52, 0.0  ;;  %10603 = vmatprep.subr.bf16.mxu1 %v12941_v49  ;;  %v6628_v10 = vadd.f32 %v19895_v22, %v19894_v13  ;;  %v12942_v36 = vld [vmem:[%s18623_s2 + $0x1d0] ss:$8 sps:$4 sm:$0xff]   ;;  %v12957_v13 = vld [vmem:[%s18623_s2 + $0x180] ss:$8 sps:$4 sm:$0xff]  }
 0x9ec   : > { %v8659_v8 = vpop.f32.mrf.mxu0  ;;  %9699 = vadd.xlane.f32.xlu0 %v9698_v30  ;;  %v12956_v30 = vld [vmem:[%s18623_s2 + $0x194] ss:$8 sps:$4 sm:$0xff]  }
 0x9ed   : > { %19893 = vst [vmem:[#allocation132_spill] sm:$0xff] %v18198_v63  ;;  %v18206_v12 = vadd.f32 %v8659_v8, %v6626_v54  ;;  %v12951_v54 = vld [vmem:[%s18623_s2 + $0x1a0] ss:$8 sps:$4 sm:$0xff]   ;;  %v12959_v8 = vld [vmem:[%s18623_s2 + $0x184] ss:$8 sps:$4 sm:$0xff]  }
 0x9ee   : > { %v13407_v56 = vpop.eup %13406  ;;  %v8661_v4 = vpop.f32.mrf.mxu0  ;;  %10604 = vmatpush1.bf16.msra.mxu1 %v12939_v3  ;;  %v12945_v3 = vld [vmem:[%s18623_s2 + $0x1c0] ss:$8 sps:$4 sm:$0xff]  }
 0x9ef   : > { %19896 = vst [vmem:[#allocation21_spill] sm:$0xff] %v18206_v12  ;;  %v9719_v32 = vpack.c.bf16 %v13407_v56, %v13405_v52  ;;  %v18211_v49 = vadd.f32 %v8661_v4, %v6628_v10  ;;  %v9701_v28 = vsel %vm3250_vm2, %v13407_v56, 0.0  ;;  %10605 = vmatprep.subr.bf16.mxu1 %v12944_v7  ;;  %v12950_v4 = vld [vmem:[%s18623_s2 + $0x1b4] ss:$8 sps:$4 sm:$0xff]   ;;  %v12948_v56 = vld [vmem:[%s18623_s2 + $0x1b0] ss:$8 sps:$4 sm:$0xff]  }
 0x9f0   : > { %9702 = vadd.xlane.f32.xlu1 %v9701_v28  ;;  %v12953_v52 = vld [vmem:[%s18623_s2 + $0x1a4] ss:$8 sps:$4 sm:$0xff]   ;;  %v12954_v7 = vld [vmem:[%s18623_s2 + $0x190] ss:$8 sps:$4 sm:$0xff]  }
 0x9f1   : > { %19897 = vst [vmem:[#allocation18_spill] sm:$0xff] %v18211_v49  ;;  %12555 = vmatmul.mubr.msk.bf16.vlgmr.msra.gmra.mxu0 %vm3250_vm2, %v9719_v32  ;;  %v19902_v49 = vld [vmem:[#allocation278_spill] sm:$0xff] }
 0x9f2   : > { %10606 = vmatpush1.bf16.msra.mxu1 %v12942_v36 }
 0x9f3   : > { %10607 = vmatprep.subr.bf16.mxu1 %v12947_v14  ;;  %v18245_v14 = vpop.f32.mrf.mxu0 }
 0x9f4   : > { %19898 = vst [vmem:[#allocation152_spill] sm:$0xff] %v18245_v14  ;;  %v19905_v14 = vld [vmem:[#allocation279_spill] sm:$0xff] }
 0x9f5   : > { %v6638_v55 = vadd.f32 %v19905_v14, %v19904_v58 }
 0x9f6   : > { %10608 = vmatpush1.bf16.msra.mxu1 %v12945_v3  ;;  %v19899_v3 = vld [vmem:[#allocation217_spill] sm:$0xff] }
 0x9f7   : > { %10609 = vmatprep.subr.bf16.mxu1 %v12950_v4  ;;  %v19900_v4 = vld [vmem:[#allocation277_spill] sm:$0xff] }
 0x9fa   : > { %10610 = vmatpush1.bf16.msra.mxu1 %v12948_v56  ;;  %v6634_v56 = vadd.f32 %v19900_v4, %v19899_v3 }
 0x9fb   : > { %10611 = vmatprep.subr.bf16.mxu1 %v12953_v52 }
 0x9fd   : > { %v9610_v22 = vpop.xlane.xlu0 %9609 }
 0x9fe   : > { %10612 = vmatpush1.bf16.msra.mxu1 %v12951_v54  ;;  %13408 = vrcp.f32 %v9610_v22 }
 0x9ff   : > { %10613 = vmatprep.subr.bf16.mxu1 %v12956_v30 }
 0xa01   : > { %v9613_v10 = vpop.xlane.xlu1 %9612 }
 0xa02   : > { %10614 = vmatpush1.bf16.msra.mxu1 %v12954_v7  ;;  %13410 = vrcp.f32 %v9613_v10 }
 0xa03   : > { %10615 = vmatprep.subr.bf16.mxu1 %v12959_v8 }
 0xa05   : > { %v9616_v36 = vpop.xlane.xlu0 %9615 }
 0xa06   : > { %10616 = vmatpush1.bf16.msra.mxu1 %v12957_v13  ;;  %13412 = vrcp.f32 %v9616_v36  ;;  %v19901_v13 = vld [vmem:[#allocation65_spill] sm:$0xff] }
 0xa07   : > { %v6636_v12 = vadd.f32 %v19902_v49, %v19901_v13 }
 0xa09   : > { %v9619_v32 = vpop.xlane.xlu1 %9618 }
 0xa0a   : > { %13414 = vrcp.f32 %v9619_v32 }
 0xa0b   : > { %v13409_v54 = vpop.eup %13408 }
 0xa0d   : > { %v9622_v30 = vpop.xlane.xlu0 %9621 }
 0xa0e   : > { %13416 = vrcp.f32 %v9622_v30  ;;  %v19911_v30 = vld [vmem:[#allocation29_spill] sm:$0xff] }
 0xa0f   : > { %v13411_v8 = vpop.eup %13410 }
 0xa11   : > { %v9625_v22 = vpop.xlane.xlu1 %9624 }
 0xa12   : > { %13418 = vrcp.f32 %v9625_v22 }
 0xa13   : > { %v13413_v58 = vpop.eup %13412 }
 0xa39   : > { %v9757_v28 = vpop.f32.mrf.mxu1 }
 0xa3a   : > { %v10456_v36 = vmul.f32 %v13409_v54, %v9757_v28  ;;  %v19910_v28 = vld [vmem:[#allocation283_spill] sm:$0xff] }
 0xa3b   : > { %v12466_v52 = vpop.f32.mrf.mxu1 }
 0xa3c   : > { %v8667_v7 = vpop.f32.mrf.mxu0 }
 0xa3d   : > { %v18251_v10 = vadd.f32 %v8667_v7, %v6634_v56  ;;  %v9760_v63 = vpop.f32.mrf.mxu1  ;;  %v19909_v56 = vld [vmem:[#allocation32_spill] sm:$0xff]  ;;  %v19912_v7 = vld [vmem:[#allocation285_spill] sm:$0xff] }
 0xa3e   : > { %v8669_v32 = vpop.f32.mrf.mxu0  ;;  %v10457_v11 = vmul.f32 %v13411_v8, %v9760_v63  ;;  %v6644_v54 = vadd.f32 %v19910_v28, %v19909_v56  ;;  %v6646_v8 = vadd.f32 %v19912_v7, %v19911_v30 }
 0xa3f   : > { %19903 = vst [vmem:[#allocation148_spill] sm:$0xff] %v18251_v10  ;;  %v18255_v3 = vadd.f32 %v8669_v32, %v6636_v12  ;;  %v12467_v4 = vpop.f32.mrf.mxu1  ;;  %v13415_v12 = vpop.eup %13414  ;;  %v19913_v32 = vld [vmem:[#allocation38_spill] sm:$0xff] }
 0xa40   : > { %v10488_v52 = vpack.c.bf16 %v10457_v11, %v10456_v36  ;;  %v8671_v17 = vpop.f32.mrf.mxu0  ;;  %v19914_v4 = vld [vmem:[#allocation288_spill] sm:$0xff]  ;;  %v13417_v30 = vpop.eup %13416 }
 0xa41   : > { %19906 = vst [vmem:[#allocation33_spill] sm:$0xff] %v18255_v3  ;;  %v18257_v16 = vadd.f32 %v8671_v17, %v6638_v55  ;;  %v9801_v49 = vpop.f32.mrf.mxu1 }
 0xa42   : > { %v18259_v13 = vpop.f32.mrf.mxu0  ;;  %10634 = vmatmul.mubr.bf16.vlgmr.msra.gmra.mxu1 %v10488_v52  ;;  %v10458_v55 = vmul.f32 %v13413_v58, %v9801_v49  ;;  %v6648_v52 = vadd.f32 %v19914_v4, %v19913_v32  ;;  %v19918_v49 = vld [vmem:[#allocation223_spill] sm:$0xff]  ;;  %v19919_v58 = vld [vmem:[#allocation292_spill] sm:$0xff] }
 0xa43   : > { %19907 = vst [vmem:[#allocation30_spill] sm:$0xff] %v18257_v16  ;;  %19908 = vst [vmem:[#allocation168_spill] sm:$0xff] %v18259_v13  ;;  %v12472_v63 = vpop.f32.mrf.mxu1  ;;  %10643 = vmatprep.mubr.bf16.mxu1 %v19728_v53  ;;  %v9628_v16 = vpop.xlane.xlu0 %9627 }
 0xa44   : > { %v8677_v14 = vpop.f32.mrf.mxu0  ;;  %v9631_v63 = vpop.xlane.xlu1 %9630  ;;  %13420 = vrcp.f32 %v9628_v16 }
 0xa45   : > { %v18266_v11 = vadd.f32 %v8677_v14, %v6644_v54  ;;  %v9804_v17 = vpop.f32.mrf.mxu1  ;;  %v6654_v14 = vadd.f32 %v19919_v58, %v19918_v49  ;;  %13422 = vrcp.f32 %v9631_v63 }
 0xa46   : > { %v8679_v22 = vpop.f32.mrf.mxu0  ;;  %v10459_v36 = vmul.f32 %v13415_v12, %v9804_v17  ;;  %v19920_v17 = vld [vmem:[#allocation220_spill] sm:$0xff] }
 0xa47   : > { %v18270_v56 = vadd.f32 %v8679_v22, %v6646_v8  ;;  %v12473_v28 = vpop.f32.mrf.mxu1  ;;  %v13419_v8 = vpop.eup %13418 }
 0xa48   : > { %v10489_v13 = vpack.c.bf16 %v10459_v36, %v10458_v55  ;;  %v8681_v3 = vpop.f32.mrf.mxu0  ;;  %v19921_v55 = vld [vmem:[#allocation294_spill] sm:$0xff]  ;;  %v9637_v16 = vpop.xlane.xlu1 %9636  ;;  %v19923_v28 = vld [vmem:[#allocation309_spill] sm:$0xff] }
 0xa49   : > { %19915 = vst [vmem:[#allocation164_spill] sm:$0xff] %v18270_v56  ;;  %v18272_v10 = vadd.f32 %v8681_v3, %v6648_v52  ;;  %v9845_v61 = vpop.f32.mrf.mxu1  ;;  %v6656_v22 = vadd.f32 %v19921_v55, %v19920_v17  ;;  %v19922_v52 = vld [vmem:[#allocation229_spill] sm:$0xff]  ;;  %13424 = vrcp.f32 %v9637_v16 }
 0xa4a   : > { %v18274_v54 = vpop.f32.mrf.mxu0  ;;  %10644 = vmatmul.mubr.bf16.gmra.mxu1 %v10489_v13  ;;  %v10460_v32 = vmul.f32 %v13417_v30, %v9845_v61  ;;  %v6658_v49 = vadd.f32 %v19923_v28, %v19922_v52 }
 0xa4b   : > { %19916 = vst [vmem:[#allocation45_spill] sm:$0xff] %v18272_v10  ;;  %19917 = vst [vmem:[#allocation42_spill] sm:$0xff] %v18274_v54  ;;  %v12478_v12 = vpop.f32.mrf.mxu1  ;;  %10653 = vmatprep.mubr.bf16.mxu1 %v19728_v53 }
 0xa4c   : > { %v8687_v7 = vpop.f32.mrf.mxu0  ;;  %v9634_v12 = vpop.xlane.xlu0 %9633 }
 0xa4d   : > { %v18281_v3 = vadd.f32 %v8687_v7, %v6654_v14  ;;  %v9848_v36 = vpop.f32.mrf.mxu1  ;;  %13426 = vrcp.f32 %v9634_v12  ;;  %v9643_v14 = vpop.xlane.xlu1 %9642 }
 0xa4e   : > { %v8689_v4 = vpop.f32.mrf.mxu0  ;;  %v10461_v13 = vmul.f32 %v13419_v8, %v9848_v36  ;;  %13428 = vrcp.f32 %v9643_v14 }
 0xa4f   : > { %v18285_v63 = vadd.f32 %v8689_v4, %v6656_v22  ;;  %v12479_v58 = vpop.f32.mrf.mxu1 }
 0xa50   : > { %v10490_v10 = vpack.c.bf16 %v10461_v13, %v10460_v32  ;;  %v8691_v54 = vpop.f32.mrf.mxu0  ;;  %v9640_v55 = vpop.xlane.xlu0 %9639 }
 0xa51   : > { %v18287_v56 = vadd.f32 %v8691_v54, %v6658_v49  ;;  %v13421_v7 = vpop.eup %13420  ;;  %13430 = vrcp.f32 %v9640_v55  ;;  %v9649_v28 = vpop.xlane.xlu1 %9648 }
 0xa52   : > { %v18289_v17 = vpop.f32.mrf.mxu0  ;;  %10654 = vmatmul.mubr.bf16.gmra.mxu1 %v10490_v10  ;;  %v13423_v8 = vpop.eup %13422  ;;  %13432 = vrcp.f32 %v9649_v28 }
 0xa53   : > { %19924 = vst [vmem:[#allocation182_spill] sm:$0xff] %v18287_v56  ;;  %10663 = vmatprep.mubr.bf16.mxu1 %v19728_v53 }
 0xa54   : > { %v9889_v61 = vpop.f32.mrf.mxu0 }
 0xa55   : > { %v10462_v36 = vmul.f32 %v13421_v7, %v9889_v61 }
 0xa56   : > { %v12484_v30 = vpop.f32.mrf.mxu0  ;;  %v13425_v52 = vpop.eup %13424 }
 0xa57   : > { %v9646_v30 = vpop.xlane.xlu0 %9645 }
 0xa58   : > { %v9892_v22 = vpop.f32.mrf.mxu0  ;;  %13434 = vrcp.f32 %v9646_v30 }
 0xa59   : > { %v10463_v32 = vmul.f32 %v13423_v8, %v9892_v22  ;;  %v9933_v4 = vpop.f32.mrf.mxu1  ;;  %v9655_v22 = vpop.xlane.xlu1 %9654 }
 0xa5a   : > { %v12485_v16 = vpop.f32.mrf.mxu0  ;;  %v13427_v12 = vpop.eup %13426  ;;  %13436 = vrcp.f32 %v9655_v22 }
 0xa5b   : > { %v10491_v54 = vpack.c.bf16 %v10463_v32, %v10462_v36  ;;  %v12490_v13 = vpop.f32.mrf.mxu1  ;;  %v10464_v56 = vmul.f32 %v13427_v12, %v9933_v4  ;;  %v13429_v55 = vpop.eup %13428 }
 0xa5d   : > { %10664 = vmatmul.mubr.bf16.gmra.mxu1 %v10491_v54  ;;  %v9936_v10 = vpop.f32.mrf.mxu1  ;;  %v9652_v54 = vpop.xlane.xlu0 %9651 }
 0xa5e   : > { %10673 = vmatprep.mubr.bf16.mxu1 %v19728_v53  ;;  %v10465_v49 = vmul.f32 %v13425_v52, %v9936_v10  ;;  %v13431_v16 = vpop.eup %13430  ;;  %13438 = vrcp.f32 %v9652_v54 }
 0xa5f   : > { %v12491_v58 = vpop.f32.mrf.mxu1 }
 0xa60   : > { %v10492_v61 = vpack.c.bf16 %v10465_v49, %v10464_v56  ;;  %v13433_v56 = vpop.eup %13432  ;;  %v9661_v49 = vpop.xlane.xlu1 %9660 }
 0xa61   : > { %v9977_v14 = vpop.f32.mrf.mxu0  ;;  %13440 = vrcp.f32 %v9661_v49 }
 0xa62   : > { %v10466_v13 = vmul.f32 %v13431_v16, %v9977_v14 }
 0xa63   : > { %v12496_v7 = vpop.f32.mrf.mxu0 }
 0xa65   : > { %10674 = vmatmul.mubr.bf16.gmra.mxu1 %v10492_v61  ;;  %v9980_v8 = vpop.f32.mrf.mxu0  ;;  %v13435_v30 = vpop.eup %13434 }
 0xa66   : > { %10683 = vmatprep.mubr.bf16.mxu1 %v19728_v53  ;;  %v10467_v36 = vmul.f32 %v13429_v55, %v9980_v8  ;;  %v9658_v61 = vpop.xlane.xlu0 %9657 }
 0xa67   : > { %v12497_v32 = vpop.f32.mrf.mxu0  ;;  %13442 = vrcp.f32 %v9658_v61 }
 0xa68   : > { %v10493_v52 = vpack.c.bf16 %v10467_v36, %v10466_v13  ;;  %v13437_v36 = vpop.eup %13436  ;;  %v9667_v32 = vpop.xlane.xlu1 %9666 }
 0xa69   : > { %v10021_v10 = vpop.f32.mrf.mxu1  ;;  %13444 = vrcp.f32 %v9667_v32 }
 0xa6a   : > { %v10468_v7 = vmul.f32 %v13435_v30, %v10021_v10 }
 0xa6b   : > { %v12502_v4 = vpop.f32.mrf.mxu1  ;;  %v13439_v13 = vpop.eup %13438 }
 0xa6d   : > { %10684 = vmatmul.mubr.bf16.gmra.mxu1 %v10493_v52  ;;  %v10024_v28 = vpop.f32.mrf.mxu1  ;;  %v9664_v52 = vpop.xlane.xlu0 %9663 }
 0xa6e   : > { %10693 = vmatprep.mubr.bf16.mxu1 %v19728_v53  ;;  %v10469_v58 = vmul.f32 %v13433_v56, %v10024_v28  ;;  %13446 = vrcp.f32 %v9664_v52 }
 0xa6f   : > { %v12503_v12 = vpop.f32.mrf.mxu1 }
 0xa70   : > { %v10494_v55 = vpack.c.bf16 %v10469_v58, %v10468_v7  ;;  %v13441_v58 = vpop.eup %13440  ;;  %v9673_v12 = vpop.xlane.xlu1 %9672 }
 0xa71   : > { %v10065_v8 = vpop.f32.mrf.mxu0  ;;  %13448 = vrcp.f32 %v9673_v12 }
 0xa72   : > { %v10470_v4 = vmul.f32 %v13439_v13, %v10065_v8 }
 0xa73   : > { %v12508_v14 = vpop.f32.mrf.mxu0 }
 0xa74   : > { %v13443_v7 = vpop.eup %13442 }
 0xa75   : > { %10694 = vmatmul.mubr.bf16.gmra.mxu1 %v10494_v55  ;;  %v10068_v22 = vpop.f32.mrf.mxu0  ;;  %v9670_v55 = vpop.xlane.xlu0 %9669 }
 0xa76   : > { %10703 = vmatprep.mubr.bf16.mxu1 %v19728_v53  ;;  %v10471_v16 = vmul.f32 %v13437_v36, %v10068_v22  ;;  %13450 = vrcp.f32 %v9670_v55 }
 0xa77   : > { %v12509_v54 = vpop.f32.mrf.mxu0 }
 0xa78   : > { %v10495_v56 = vpack.c.bf16 %v10471_v16, %v10470_v4  ;;  %v13445_v16 = vpop.eup %13444  ;;  %v9679_v54 = vpop.xlane.xlu1 %9678 }
 0xa79   : > { %v10109_v28 = vpop.f32.mrf.mxu1  ;;  %13452 = vrcp.f32 %v9679_v54 }
 0xa7a   : > { %v10472_v14 = vmul.f32 %v13443_v7, %v10109_v28 }
 0xa7b   : > { %v12514_v10 = vpop.f32.mrf.mxu1  ;;  %v13447_v4 = vpop.eup %13446 }
 0xa7d   : > { %10704 = vmatmul.mubr.bf16.gmra.mxu1 %v10495_v56  ;;  %v10112_v49 = vpop.f32.mrf.mxu1  ;;  %v9676_v56 = vpop.xlane.xlu0 %9675 }
 0xa7e   : > { %10713 = vmatprep.mubr.bf16.mxu1 %v19728_v53  ;;  %v10473_v30 = vmul.f32 %v13441_v58, %v10112_v49  ;;  %13454 = vrcp.f32 %v9676_v56 }
 0xa7f   : > { %v12515_v61 = vpop.f32.mrf.mxu1 }
 0xa80   : > { %v10496_v36 = vpack.c.bf16 %v10473_v30, %v10472_v14  ;;  %v13449_v30 = vpop.eup %13448  ;;  %v9685_v61 = vpop.xlane.xlu1 %9684 }
 0xa81   : > { %v10153_v22 = vpop.f32.mrf.mxu0  ;;  %13456 = vrcp.f32 %v9685_v61 }
 0xa82   : > { %v10474_v10 = vmul.f32 %v13447_v4, %v10153_v22 }
 0xa83   : > { %v12520_v8 = vpop.f32.mrf.mxu0  ;;  %v13451_v14 = vpop.eup %13450 }
 0xa85   : > { %10714 = vmatmul.mubr.bf16.gmra.mxu1 %v10496_v36  ;;  %v10156_v32 = vpop.f32.mrf.mxu0  ;;  %v9682_v36 = vpop.xlane.xlu0 %9681 }
 0xa86   : > { %10723 = vmatprep.mubr.bf16.mxu1 %v19728_v53  ;;  %v10475_v13 = vmul.f32 %v13445_v16, %v10156_v32  ;;  %13458 = vrcp.f32 %v9682_v36 }
 0xa87   : > { %v12521_v52 = vpop.f32.mrf.mxu0 }
 0xa88   : > { %v10497_v58 = vpack.c.bf16 %v10475_v13, %v10474_v10  ;;  %v13453_v13 = vpop.eup %13452  ;;  %v9691_v52 = vpop.xlane.xlu1 %9690 }
 0xa89   : > { %v10197_v49 = vpop.f32.mrf.mxu1  ;;  %13460 = vrcp.f32 %v9691_v52 }
 0xa8a   : > { %v10476_v8 = vmul.f32 %v13451_v14, %v10197_v49 }
 0xa8b   : > { %v12526_v28 = vpop.f32.mrf.mxu1  ;;  %v13455_v10 = vpop.eup %13454 }
 0xa8d   : > { %10724 = vmatmul.mubr.bf16.gmra.mxu1 %v10497_v58  ;;  %v10200_v12 = vpop.f32.mrf.mxu1  ;;  %v9688_v58 = vpop.xlane.xlu0 %9687 }
 0xa8e   : > { %10733 = vmatprep.mubr.bf16.mxu1 %v19728_v53  ;;  %v10477_v7 = vmul.f32 %v13449_v30, %v10200_v12  ;;  %13462 = vrcp.f32 %v9688_v58 }
 0xa8f   : > { %v12527_v55 = vpop.f32.mrf.mxu1 }
 0xa90   : > { %v10498_v16 = vpack.c.bf16 %v10477_v7, %v10476_v8  ;;  %v13457_v7 = vpop.eup %13456  ;;  %v9697_v55 = vpop.xlane.xlu1 %9696 }
 0xa91   : > { %v10241_v32 = vpop.f32.mrf.mxu0  ;;  %13464 = vrcp.f32 %v9697_v55 }
 0xa92   : > { %v10478_v28 = vmul.f32 %v13455_v10, %v10241_v32 }
 0xa93   : > { %v12532_v22 = vpop.f32.mrf.mxu0  ;;  %v13459_v8 = vpop.eup %13458 }
 0xa95   : > { %10734 = vmatmul.mubr.bf16.gmra.mxu1 %v10498_v16  ;;  %v10244_v54 = vpop.f32.mrf.mxu0  ;;  %v9694_v16 = vpop.xlane.xlu0 %9693 }
 0xa96   : > { %10743 = vmatprep.mubr.bf16.mxu1 %v19728_v53  ;;  %v10479_v4 = vmul.f32 %v13453_v13, %v10244_v54  ;;  %13466 = vrcp.f32 %v9694_v16 }
 0xa97   : > { %v12533_v56 = vpop.f32.mrf.mxu0 }
 0xa98   : > { %v10499_v30 = vpack.c.bf16 %v10479_v4, %v10478_v28  ;;  %v13461_v4 = vpop.eup %13460  ;;  %v9703_v56 = vpop.xlane.xlu1 %9702 }
 0xa99   : > { %v10285_v12 = vpop.f32.mrf.mxu1  ;;  %13468 = vrcp.f32 %v9703_v56 }
 0xa9a   : > { %v10480_v22 = vmul.f32 %v13459_v8, %v10285_v12 }
 0xa9b   : > { %v12538_v49 = vpop.f32.mrf.mxu1  ;;  %v13463_v28 = vpop.eup %13462 }
 0xa9d   : > { %10744 = vmatmul.mubr.bf16.gmra.mxu1 %v10499_v30  ;;  %v10288_v61 = vpop.f32.mrf.mxu1  ;;  %v9700_v30 = vpop.xlane.xlu0 %9699 }
 0xa9e   : > { %10753 = vmatprep.mubr.bf16.mxu1 %v19728_v53  ;;  %v10481_v14 = vmul.f32 %v13457_v7, %v10288_v61  ;;  %13470 = vrcp.f32 %v9700_v30 }
 0xa9f   : > { %v12539_v36 = vpop.f32.mrf.mxu1 }
 0xaa0   : > { %v10500_v13 = vpack.c.bf16 %v10481_v14, %v10480_v22  ;;  %v13465_v14 = vpop.eup %13464 }
 0xaa1   : > { %v10329_v54 = vpop.f32.mrf.mxu0 }
 0xaa2   : > { %v10482_v49 = vmul.f32 %v13463_v28, %v10329_v54 }
 0xaa3   : > { %v12544_v32 = vpop.f32.mrf.mxu0  ;;  %v13467_v16 = vpop.eup %13466 }
 0xaa5   : > { %10754 = vmatmul.mubr.bf16.gmra.mxu1 %v10500_v13  ;;  %v10332_v52 = vpop.f32.mrf.mxu0 }
 0xaa6   : > { %10763 = vmatprep.mubr.bf16.mxu1 %v19728_v53  ;;  %v10483_v10 = vmul.f32 %v13461_v4, %v10332_v52  ;;  %v13469_v56 = vpop.eup %13468 }
 0xaa7   : > { %v12545_v58 = vpop.f32.mrf.mxu0 }
 0xaa8   : > { %v10501_v7 = vpack.c.bf16 %v10483_v10, %v10482_v49  ;;  %v10860_v49 = vlaneseq }
 0xaa9   : > { %v10373_v61 = vpop.f32.mrf.mxu1 }
 0xaaa   : > { %v10484_v22 = vmul.f32 %v13467_v16, %v10373_v61  ;;  %v10858_v61 = vld [vmem:[%s18624_s3] sm:$0x3] }
 0xaab   : > { %v12550_v12 = vpop.f32.mrf.mxu1  ;;  %v13471_v58 = vpop.eup %13470 }
 0xaad   : > { %10764 = vmatmul.mubr.bf16.gmra.mxu1 %v10501_v7  ;;  %v10376_v55 = vpop.f32.mrf.mxu1  ;;  %v10861_v7 = vshrl.u32 %v10860_v49, 7 }
 0xaae   : > { %10773 = vmatprep.mubr.bf16.mxu1 %v19728_v53  ;;  %v10485_v36 = vmul.f32 %v13465_v14, %v10376_v55 }
 0xaaf   : > { %v12551_v8 = vpop.f32.mrf.mxu1  ;;  %v10862_v12 = vsub.s32 0, %v10861_v7  ;;  %v10866_v55 = vsub.s32 1, %v10861_v7 }
 0xab0   : > { %v10502_v32 = vpack.c.bf16 %v10485_v36, %v10484_v22  ;;  %v19925_v22 = vld [vmem:[#allocation271_spill] sm:$0xff] }
 0xab1   : > { %v10417_v13 = vpop.f32.mrf.mxu0  ;;  %v18307_v14 = vrot.slane %v10858_v61, %v10862_v12  ;;  %v18310_v8 = vrot.slane %v10858_v61, %v10866_v55  ;;  %v19927_v12 = vld [vmem:[#allocation276_spill] sm:$0xff] }
 0xab2   : > { %v10486_v28 = vmul.f32 %v13471_v58, %v10417_v13  ;;  %v19926_v13 = vld [vmem:[#allocation226_spill] sm:$0xff]  ;;  %v19928_v61 = vld [vmem:[#allocation44_spill] sm:$0xff] }
 0xab3   : > { %v12556_v52 = vpop.f32.mrf.mxu0  ;;  %v6520_v55 = vadd.f32 %v19928_v61, %v19927_v12 }
 0xab5   : > { %10774 = vmatmul.mubr.bf16.gmra.mxu1 %v10502_v32  ;;  %v10420_v4 = vpop.f32.mrf.mxu0  ;;  %v6510_v32 = vadd.f32 %v19926_v13, %v19925_v22 }
 0xab6   : > { %10783 = vmatprep.mubr.bf16.mxu1 %v19728_v53  ;;  %v10487_v54 = vmul.f32 %v13469_v56, %v10420_v4 }
 0xab7   : > { %v12557_v10 = vpop.f32.mrf.mxu0 }
 0xab8   : > { %v10503_v30 = vpack.c.bf16 %v10487_v54, %v10486_v28  ;;  %v8699_v54 = vadd.f32 %v17918_v2, %v6510_v32 }
 0xabd   : > { %10784 = vmatmul.mubr.bf16.gmra.mxu1 %v10503_v30 }
 0xb02   : > { %v10635_v36 = vpop.f32.mrf.mxu1 }
 0xb03   : > { %v10794_v53 = vadd.f32 %v10635_v36, %v17904_v23 }
 0xb04   : > { %v10637_v16 = vpop.f32.mrf.mxu1 }
 0xb05   : > { %v10870_v52 = vadd.f32 %v18307_v14, %v10794_v53  ;;  %v10795_v4 = vadd.f32 %v10637_v16, %v17910_v27  ;;  %v8703_v16 = vadd.f32 %v17944_v50, %v6520_v55  ;;  %v19931_v55 = vld [vmem:[#allocation291_spill] sm:$0xff] }
 0xb06   : > { %v10639_v56 = vpop.f32.mrf.mxu1 }
 0xb07   : > { %10934 = vst [vmem:[%s18319_s20] sm:$0xff] %v10870_v52  ;;  %v10871_v23 = vadd.f32 %v18310_v8, %v10795_v4  ;;  %v10796_v10 = vadd.f32 %v10639_v56, %v17915_v35 }
 0xb08   : > { %v10641_v58 = vpop.f32.mrf.mxu1 }
 0xb09   : > { %10935 = vst.msk [vmem:[%s18319_s20 + $0x8] sm:$0xff] %vm1195_vm0, %v10871_v23  ;;  %v10872_v27 = vadd.f32 %v18307_v14, %v10796_v10  ;;  %v10797_v28 = vadd.f32 %v10641_v58, %v8699_v54  ;;  %v19929_v54 = vld [vmem:[#allocation282_spill] sm:$0xff] }
 0xb0a   : > { %v10645_v2 = vpop.f32.mrf.mxu1  ;;  %v19930_v23 = vld [vmem:[#allocation50_spill] sm:$0xff] }
 0xb0b   : > { %10936 = vst [vmem:[%s18319_s20 + $0x10] sm:$0xff] %v10872_v27  ;;  %v10873_v30 = vadd.f32 %v18310_v8, %v10797_v28  ;;  %v10798_v49 = vadd.f32 %v10645_v2, %v17927_v20 }
 0xb0c   : > { %v10647_v7 = vpop.f32.mrf.mxu1 }
 0xb0d   : > { %10937 = vst.msk [vmem:[%s18319_s20 + $0x18] sm:$0xff] %vm1195_vm0, %v10873_v30  ;;  %v10874_v35 = vadd.f32 %v18307_v14, %v10798_v49  ;;  %v10799_v36 = vadd.f32 %v10647_v7, %v17933_v39 }
 0xb0e   : > { %v10649_v53 = vpop.f32.mrf.mxu1 }
 0xb0f   : > { %10938 = vst [vmem:[%s18319_s20 + $0x20] sm:$0xff] %v10874_v35  ;;  %v10875_v22 = vadd.f32 %v18310_v8, %v10799_v36  ;;  %v10800_v20 = vadd.f32 %v10649_v53, %v17939_v9  ;;  %v6530_v9 = vadd.f32 %v19930_v23, %v19929_v54 }
 0xb10   : > { %v10651_v13 = vpop.f32.mrf.mxu1 }
 0xb11   : > { %10939 = vst.msk [vmem:[%s18319_s20 + $0x28] sm:$0xff] %vm1195_vm0, %v10875_v22  ;;  %v10876_v32 = vadd.f32 %v18307_v14, %v10800_v20  ;;  %v10801_v52 = vadd.f32 %v10651_v13, %v8703_v16  ;;  %v8707_v28 = vadd.f32 %v17968_v45, %v6530_v9 }
 0xb12   : > { %v10655_v4 = vpop.f32.mrf.mxu1 }
 0xb13   : > { %10940 = vst [vmem:[%s18319_s20 + $0x30] sm:$0xff] %v10876_v32  ;;  %v10877_v39 = vadd.f32 %v18310_v8, %v10801_v52  ;;  %v10802_v50 = vadd.f32 %v10655_v4, %v17954_v42 }
 0xb14   : > { %v10657_v56 = vpop.f32.mrf.mxu1 }
 0xb15   : > { %10941 = vst.msk [vmem:[%s18319_s20 + $0x38] sm:$0xff] %vm1195_vm0, %v10877_v39  ;;  %v10878_v10 = vadd.f32 %v18307_v14, %v10802_v50  ;;  %v10803_v58 = vadd.f32 %v10657_v56, %v17960_v41  ;;  %v19933_v50 = vld [vmem:[#allocation295_spill] sm:$0xff]  ;;  %v19934_v56 = vld [vmem:[#allocation56_spill] sm:$0xff] }
 0xb16   : > { %v10659_v27 = vpop.f32.mrf.mxu1  ;;  %v6550_v54 = vadd.f32 %v19934_v56, %v19933_v50 }
 0xb17   : > { %10942 = vst [vmem:[%s18319_s20 + $0x40] sm:$0xff] %v10878_v10  ;;  %v10879_v2 = vadd.f32 %v18310_v8, %v10803_v58  ;;  %v10804_v30 = vadd.f32 %v10659_v27, %v17963_v15  ;;  %v19932_v15 = vld [vmem:[#allocation241_spill] sm:$0xff] }
 0xb18   : > { %v10661_v42 = vpop.f32.mrf.mxu1  ;;  %v6540_v35 = vadd.f32 %v19932_v15, %v19931_v55  ;;  %v8715_v10 = vadd.f32 %v18016_v57, %v6550_v54  ;;  %v19939_v54 = vld [vmem:[#allocation181_spill] sm:$0xff] }
 0xb19   : > { %10943 = vst.msk [vmem:[%s18319_s20 + $0x48] sm:$0xff] %vm1195_vm0, %v10879_v2  ;;  %v10880_v49 = vadd.f32 %v18307_v14, %v10804_v30  ;;  %v10805_v7 = vadd.f32 %v10661_v42, %v8707_v28 }
 0xb1a   : > { %v8711_v22 = vadd.f32 %v17992_v0, %v6540_v35 }
 0xb1b   : > { %10944 = vst [vmem:[%s18319_s20 + $0x50] sm:$0xff] %v10880_v49  ;;  %v10881_v12 = vadd.f32 %v18310_v8, %v10805_v7  ;;  %v19935_v49 = vld [vmem:[#allocation306_spill] sm:$0xff]  ;;  %v19936_v7 = vld [vmem:[#allocation247_spill] sm:$0xff] }
 0xb1d   : > { %10945 = vst.msk [vmem:[%s18319_s20 + $0x58] sm:$0xff] %vm1195_vm0, %v10881_v12  ;;  %v10665_v41 = vpop.f32.mrf.mxu1  ;;  %v6560_v12 = vadd.f32 %v19936_v7, %v19935_v49 }
 0xb1e   : > { %v10806_v45 = vadd.f32 %v10665_v41, %v17978_v37 }
 0xb1f   : > { %v10667_v61 = vpop.f32.mrf.mxu1 }
 0xb20   : > { %v10882_v36 = vadd.f32 %v18307_v14, %v10806_v45  ;;  %v10807_v53 = vadd.f32 %v10667_v61, %v17984_v38  ;;  %v8719_v61 = vadd.f32 %v18040_v47, %v6560_v12 }
 0xb21   : > { %v10669_v16 = vpop.f32.mrf.mxu1 }
 0xb22   : > { %10946 = vst [vmem:[%s18319_s20 + $0x60] sm:$0xff] %v10882_v36  ;;  %v10883_v20 = vadd.f32 %v18310_v8, %v10807_v53  ;;  %v10808_v13 = vadd.f32 %v10669_v16, %v17987_v62 }
 0xb23   : > { %v10671_v32 = vpop.f32.mrf.mxu1 }
 0xb24   : > { %10947 = vst.msk [vmem:[%s18319_s20 + $0x68] sm:$0xff] %vm1195_vm0, %v10883_v20  ;;  %v10884_v37 = vadd.f32 %v18307_v14, %v10808_v13  ;;  %v10809_v52 = vadd.f32 %v10671_v32, %v8711_v22  ;;  %v19937_v22 = vld [vmem:[#allocation12_spill] sm:$0xff]  ;;  %v19938_v20 = vld [vmem:[#allocation74_spill] sm:$0xff] }
 0xb25   : > { %v10675_v4 = vpop.f32.mrf.mxu1  ;;  %v6570_v13 = vadd.f32 %v19938_v20, %v19937_v22  ;;  %v19945_v20 = vld [vmem:[#allocation104_spill] sm:$0xff] }
 0xb26   : > { %10948 = vst [vmem:[%s18319_s20 + $0x70] sm:$0xff] %v10884_v37  ;;  %v10885_v38 = vadd.f32 %v18310_v8, %v10809_v52  ;;  %v10810_v39 = vadd.f32 %v10675_v4, %v18002_v21 }
 0xb27   : > { %v10677_v0 = vpop.f32.mrf.mxu1  ;;  %v8723_v52 = vadd.f32 %v18064_v5, %v6570_v13 }
 0xb28   : > { %10949 = vst.msk [vmem:[%s18319_s20 + $0x78] sm:$0xff] %vm1195_vm0, %v10885_v38  ;;  %v10886_v62 = vadd.f32 %v18307_v14, %v10810_v39  ;;  %v10811_v23 = vadd.f32 %v10677_v0, %v18008_v43 }
 0xb29   : > { %v10679_v9 = vpop.f32.mrf.mxu1 }
 0xb2a   : > { %10950 = vst [vmem:[%s18319_s20 + $0x80] sm:$0xff] %v10886_v62  ;;  %v10887_v58 = vadd.f32 %v18310_v8, %v10811_v23  ;;  %v10812_v21 = vadd.f32 %v10679_v9, %v18011_v40  ;;  %v19940_v62 = vld [vmem:[#allocation80_spill] sm:$0xff] }
 0xb2b   : > { %v10681_v27 = vpop.f32.mrf.mxu1  ;;  %v6580_v23 = vadd.f32 %v19940_v62, %v19939_v54 }
 0xb2c   : > { %10951 = vst.msk [vmem:[%s18319_s20 + $0x88] sm:$0xff] %vm1195_vm0, %v10887_v58  ;;  %v10888_v28 = vadd.f32 %v18307_v14, %v10812_v21  ;;  %v10813_v2 = vadd.f32 %v10681_v27, %v8715_v10 }
 0xb2d   : > { %v10685_v30 = vpop.f32.mrf.mxu1  ;;  %v8727_v58 = vadd.f32 %v18088_v1, %v6580_v23  ;;  %v19951_v23 = vld [vmem:[#allocation145_spill] sm:$0xff] }
 0xb2e   : > { %10952 = vst [vmem:[%s18319_s20 + $0x90] sm:$0xff] %v10888_v28  ;;  %v10889_v43 = vadd.f32 %v18310_v8, %v10813_v2  ;;  %v10814_v42 = vadd.f32 %v10685_v30, %v18026_v25 }
 0xb2f   : > { %v10687_v57 = vpop.f32.mrf.mxu1 }
 0xb30   : > { %10953 = vst.msk [vmem:[%s18319_s20 + $0x98] sm:$0xff] %vm1195_vm0, %v10889_v43  ;;  %v10890_v40 = vadd.f32 %v18307_v14, %v10814_v42  ;;  %v10815_v41 = vadd.f32 %v10687_v57, %v18032_v31  ;;  %v19941_v42 = vld [vmem:[#allocation193_spill] sm:$0xff]  ;;  %v19942_v57 = vld [vmem:[#allocation264_spill] sm:$0xff] }
 0xb31   : > { %v10689_v45 = vpop.f32.mrf.mxu1  ;;  %v6590_v49 = vadd.f32 %v19942_v57, %v19941_v42  ;;  %v19955_v42 = vld [vmem:[#allocation165_spill] sm:$0xff] }
 0xb32   : > { %10954 = vst [vmem:[%s18319_s20 + $0xa0] sm:$0xff] %v10890_v40  ;;  %v10891_v55 = vadd.f32 %v18310_v8, %v10815_v41  ;;  %v10816_v25 = vadd.f32 %v10689_v45, %v18035_v29 }
 0xb33   : > { %v10691_v15 = vpop.f32.mrf.mxu1  ;;  %v8731_v40 = vadd.f32 %v18112_v60, %v6590_v49 }
 0xb34   : > { %10955 = vst.msk [vmem:[%s18319_s20 + $0xa8] sm:$0xff] %vm1195_vm0, %v10891_v55  ;;  %v10892_v35 = vadd.f32 %v18307_v14, %v10816_v25  ;;  %v10817_v36 = vadd.f32 %v10691_v15, %v8719_v61 }
 0xb35   : > { %v10695_v53 = vpop.f32.mrf.mxu1 }
 0xb36   : > { %10956 = vst [vmem:[%s18319_s20 + $0xb0] sm:$0xff] %v10892_v35  ;;  %v10893_v31 = vadd.f32 %v18310_v8, %v10817_v36  ;;  %v10818_v16 = vadd.f32 %v10695_v53, %v18050_v26  ;;  %v19943_v35 = vld [vmem:[#allocation16_spill] sm:$0xff] }
 0xb37   : > { %v10697_v47 = vpop.f32.mrf.mxu1  ;;  %v19944_v36 = vld [vmem:[#allocation96_spill] sm:$0xff] }
 0xb38   : > { %10957 = vst.msk [vmem:[%s18319_s20 + $0xb8] sm:$0xff] %vm1195_vm0, %v10893_v31  ;;  %v10894_v29 = vadd.f32 %v18307_v14, %v10818_v16  ;;  %v10819_v32 = vadd.f32 %v10697_v47, %v18056_v33  ;;  %v6600_v53 = vadd.f32 %v19944_v36, %v19943_v35  ;;  %v19959_v35 = vld [vmem:[#allocation211_spill] sm:$0xff] }
 0xb39   : > { %v10699_v37 = vpop.f32.mrf.mxu1  ;;  %v19960_v36 = vld [vmem:[#allocation275_spill] sm:$0xff] }
 0xb3a   : > { %10958 = vst [vmem:[%s18319_s20 + $0xc0] sm:$0xff] %v10894_v29  ;;  %v10895_v4 = vadd.f32 %v18310_v8, %v10819_v32  ;;  %v10820_v26 = vadd.f32 %v10699_v37, %v18059_v46  ;;  %v8735_v47 = vadd.f32 %v18139_v18, %v6600_v53  ;;  %v6630_v53 = vadd.f32 %v19960_v36, %v19959_v35  ;;  %v19976_v35 = vld [vmem:[#allocation300_spill] sm:$0xff] }
 0xb3b   : > { %v10701_v38 = vpop.f32.mrf.mxu1 }
 0xb3c   : > { %10959 = vst.msk [vmem:[%s18319_s20 + $0xc8] sm:$0xff] %vm1195_vm0, %v10895_v4  ;;  %v10896_v39 = vadd.f32 %v18307_v14, %v10820_v26  ;;  %v10821_v0 = vadd.f32 %v10701_v38, %v8723_v52  ;;  %v19946_v52 = vld [vmem:[#allocation101_spill] sm:$0xff]  ;;  %v19947_v26 = vld [vmem:[#allocation199_spill] sm:$0xff] }
 0xb3d   : > { %v10705_v50 = vpop.f32.mrf.mxu1  ;;  %v19948_v38 = vld [vmem:[#allocation103_spill] sm:$0xff] }
 0xb3e   : > { %10960 = vst [vmem:[%s18319_s20 + $0xd0] sm:$0xff] %v10896_v39  ;;  %v10897_v33 = vadd.f32 %v18310_v8, %v10821_v0  ;;  %v10822_v56 = vadd.f32 %v10705_v50, %v18074_v51  ;;  %v6610_v39 = vadd.f32 %v19948_v38, %v19947_v26  ;;  %v19949_v50 = vld [vmem:[#allocation149_spill] sm:$0xff] }
 0xb3f   : > { %v10707_v5 = vpop.f32.mrf.mxu1 }
 0xb40   : > { %10961 = vst.msk [vmem:[%s18319_s20 + $0xd8] sm:$0xff] %vm1195_vm0, %v10897_v33  ;;  %v10898_v46 = vadd.f32 %v18307_v14, %v10822_v56  ;;  %v10823_v9 = vadd.f32 %v10707_v5, %v18080_v24  ;;  %v19950_v5 = vld [vmem:[#allocation120_spill] sm:$0xff] }
 0xb41   : > { %v10709_v10 = vpop.f32.mrf.mxu1  ;;  %v8739_v54 = vadd.f32 %v19950_v5, %v6610_v39  ;;  %v19965_v39 = vld [vmem:[#allocation214_spill] sm:$0xff] }
 0xb42   : > { %10962 = vst [vmem:[%s18319_s20 + $0xe0] sm:$0xff] %v10898_v46  ;;  %v10899_v21 = vadd.f32 %v18310_v8, %v10823_v9  ;;  %v10824_v51 = vadd.f32 %v10709_v10, %v18083_v59 }
 0xb43   : > { %v10711_v27 = vpop.f32.mrf.mxu1 }
 0xb44   : > { %10963 = vst.msk [vmem:[%s18319_s20 + $0xe8] sm:$0xff] %vm1195_vm0, %v10899_v21  ;;  %v10900_v28 = vadd.f32 %v18307_v14, %v10824_v51  ;;  %v10825_v2 = vadd.f32 %v10711_v27, %v8727_v58  ;;  %v19952_v27 = vld [vmem:[#allocation116_spill] sm:$0xff] }
 0xb45   : > { %v10715_v30 = vpop.f32.mrf.mxu1 }
 0xb46   : > { %10964 = vst [vmem:[%s18319_s20 + $0xf0] sm:$0xff] %v10900_v28  ;;  %v10901_v24 = vadd.f32 %v18310_v8, %v10825_v2  ;;  %v10826_v43 = vadd.f32 %v10715_v30, %v18098_v34  ;;  %v19953_v30 = vld [vmem:[#allocation20_spill] sm:$0xff] }
 0xb47   : > { %v10717_v1 = vpop.f32.mrf.mxu1 }
 0xb48   : > { %10965 = vst.msk [vmem:[%s18319_s20 + $0xf8] sm:$0xff] %vm1195_vm0, %v10901_v24  ;;  %v10902_v59 = vadd.f32 %v18307_v14, %v10826_v43  ;;  %v10827_v7 = vadd.f32 %v10717_v1, %v18104_v19  ;;  %v19954_v24 = vld [vmem:[#allocation270_spill] sm:$0xff] }
 0xb49   : > { %v10719_v12 = vpop.f32.mrf.mxu1  ;;  %v6620_v43 = vadd.f32 %v19954_v24, %v19953_v30  ;;  %v19970_v24 = vld [vmem:[#allocation35_spill] sm:$0xff] }
 0xb4a   : > { %10966 = vst [vmem:[%s18319_s20 + $0x100] sm:$0xff] %v10902_v59  ;;  %v10903_v41 = vadd.f32 %v18310_v8, %v10827_v7  ;;  %v10828_v34 = vadd.f32 %v10719_v12, %v18107_v44  ;;  %v19956_v59 = vld [vmem:[#allocation136_spill] sm:$0xff] }
 0xb4b   : > { %v10721_v45 = vpop.f32.mrf.mxu1  ;;  %v8743_v7 = vadd.f32 %v19956_v59, %v6620_v43  ;;  %v19971_v43 = vld [vmem:[#allocation290_spill] sm:$0xff] }
 0xb4c   : > { %10967 = vst.msk [vmem:[%s18319_s20 + $0x108] sm:$0xff] %vm1195_vm0, %v10903_v41  ;;  %v10904_v61 = vadd.f32 %v18307_v14, %v10828_v34  ;;  %v10829_v55 = vadd.f32 %v10721_v45, %v8731_v40  ;;  %v19957_v40 = vld [vmem:[#allocation161_spill] sm:$0xff] }
 0xb4d   : > { %v10725_v25 = vpop.f32.mrf.mxu1 }
 0xb4e   : > { %10968 = vst [vmem:[%s18319_s20 + $0x110] sm:$0xff] %v10904_v61  ;;  %v10905_v19 = vadd.f32 %v18310_v8, %v10829_v55  ;;  %v10830_v15 = vadd.f32 %v10725_v25, %v18122_v6 }
 0xb4f   : > { %v10727_v60 = vpop.f32.mrf.mxu1 }
 0xb50   : > { %10969 = vst.msk [vmem:[%s18319_s20 + $0x118] sm:$0xff] %vm1195_vm0, %v10905_v19  ;;  %v10906_v44 = vadd.f32 %v18307_v14, %v10830_v15  ;;  %v10831_v31 = vadd.f32 %v10727_v60, %v18128_v48  ;;  %v19958_v19 = vld [vmem:[#allocation132_spill] sm:$0xff] }
 0xb51   : > { %v10729_v16 = vpop.f32.mrf.mxu1 }
 0xb52   : > { %10970 = vst [vmem:[%s18319_s20 + $0x120] sm:$0xff] %v10906_v44  ;;  %v10907_v22 = vadd.f32 %v18310_v8, %v10831_v31  ;;  %v10832_v6 = vadd.f32 %v10729_v16, %v19945_v20  ;;  %v19961_v31 = vld [vmem:[#allocation21_spill] sm:$0xff] }
 0xb53   : > { %v10731_v13 = vpop.f32.mrf.mxu1 }
 0xb54   : > { %10971 = vst.msk [vmem:[%s18319_s20 + $0x128] sm:$0xff] %vm1195_vm0, %v10907_v22  ;;  %v10908_v29 = vadd.f32 %v18307_v14, %v10832_v6  ;;  %v10833_v32 = vadd.f32 %v10731_v13, %v8735_v47  ;;  %v19962_v22 = vld [vmem:[#allocation152_spill] sm:$0xff]  ;;  %v19963_v13 = vld [vmem:[#allocation18_spill] sm:$0xff] }
 0xb55   : > { %v10735_v37 = vpop.f32.mrf.mxu1  ;;  %v8747_v20 = vadd.f32 %v19962_v22, %v6630_v53 }
 0xb56   : > { %10972 = vst [vmem:[%s18319_s20 + $0x130] sm:$0xff] %v10908_v29  ;;  %v10909_v48 = vadd.f32 %v18310_v8, %v10833_v32  ;;  %v10834_v4 = vadd.f32 %v10735_v37, %v19946_v52 }
 0xb57   : > { %v10737_v18 = vpop.f32.mrf.mxu1 }
 0xb58   : > { %10973 = vst.msk [vmem:[%s18319_s20 + $0x138] sm:$0xff] %vm1195_vm0, %v10909_v48  ;;  %v10910_v0 = vadd.f32 %v18307_v14, %v10834_v4  ;;  %v10835_v33 = vadd.f32 %v10737_v18, %v19949_v50  ;;  %v19964_v18 = vld [vmem:[#allocation148_spill] sm:$0xff] }
 0xb59   : > { %v10739_v56 = vpop.f32.mrf.mxu1 }
 0xb5a   : > { %10974 = vst [vmem:[%s18319_s20 + $0x140] sm:$0xff] %v10910_v0  ;;  %v10911_v62 = vadd.f32 %v18310_v8, %v10835_v33  ;;  %v10836_v46 = vadd.f32 %v10739_v56, %v19951_v23  ;;  %v19966_v0 = vld [vmem:[#allocation281_spill] sm:$0xff] }
 0xb5b   : > { %v10741_v9 = vpop.f32.mrf.mxu1  ;;  %v6640_v50 = vadd.f32 %v19966_v0, %v19965_v39  ;;  %v19967_v56 = vld [vmem:[#allocation33_spill] sm:$0xff] }
 0xb5c   : > { %10975 = vst.msk [vmem:[%s18319_s20 + $0x148] sm:$0xff] %vm1195_vm0, %v10911_v62  ;;  %v10912_v10 = vadd.f32 %v18307_v14, %v10836_v46  ;;  %v10837_v58 = vadd.f32 %v10741_v9, %v8739_v54  ;;  %v19968_v62 = vld [vmem:[#allocation168_spill] sm:$0xff]  ;;  %v19969_v9 = vld [vmem:[#allocation30_spill] sm:$0xff] }
 0xb5d   : > { %v10745_v21 = vpop.f32.mrf.mxu1  ;;  %v8751_v23 = vadd.f32 %v19968_v62, %v6640_v50 }
 0xb5e   : > { %10976 = vst [vmem:[%s18319_s20 + $0x150] sm:$0xff] %v10912_v10  ;;  %v10913_v51 = vadd.f32 %v18310_v8, %v10837_v58  ;;  %v10838_v28 = vadd.f32 %v10745_v21, %v19952_v27 }
 0xb5f   : > { %v10747_v2 = vpop.f32.mrf.mxu1 }
 0xb60   : > { %10977 = vst.msk [vmem:[%s18319_s20 + $0x158] sm:$0xff] %vm1195_vm0, %v10913_v51  ;;  %v10914_v1 = vadd.f32 %v18307_v14, %v10838_v28  ;;  %v10839_v57 = vadd.f32 %v10747_v2, %v19955_v42 }
 0xb61   : > { %v10749_v49 = vpop.f32.mrf.mxu1 }
 0xb62   : > { %10978 = vst [vmem:[%s18319_s20 + $0x160] sm:$0xff] %v10914_v1  ;;  %v10915_v12 = vadd.f32 %v18310_v8, %v10839_v57  ;;  %v10840_v41 = vadd.f32 %v10749_v49, %v19957_v40  ;;  %v6650_v1 = vadd.f32 %v19971_v43, %v19970_v24  ;;  %v19972_v57 = vld [vmem:[#allocation164_spill] sm:$0xff] }
 0xb63   : > { %v10751_v34 = vpop.f32.mrf.mxu1 }
 0xb64   : > { %10979 = vst.msk [vmem:[%s18319_s20 + $0x168] sm:$0xff] %vm1195_vm0, %v10915_v12  ;;  %v10916_v45 = vadd.f32 %v18307_v14, %v10840_v41  ;;  %v10841_v61 = vadd.f32 %v10751_v34, %v8743_v7  ;;  %v19973_v7 = vld [vmem:[#allocation42_spill] sm:$0xff]  ;;  %v19974_v41 = vld [vmem:[#allocation45_spill] sm:$0xff] }
 0xb65   : > { %v10755_v55 = vpop.f32.mrf.mxu1  ;;  %v8755_v12 = vadd.f32 %v19973_v7, %v6650_v1 }
 0xb66   : > { %10980 = vst [vmem:[%s18319_s20 + $0x170] sm:$0xff] %v10916_v45  ;;  %v10917_v25 = vadd.f32 %v18310_v8, %v10841_v61  ;;  %v10842_v15 = vadd.f32 %v10755_v55, %v19958_v19 }
 0xb67   : > { %v10757_v60 = vpop.f32.mrf.mxu1 }
 0xb68   : > { %10981 = vst.msk [vmem:[%s18319_s20 + $0x178] sm:$0xff] %vm1195_vm0, %v10917_v25  ;;  %v10918_v44 = vadd.f32 %v18307_v14, %v10842_v15  ;;  %v10843_v16 = vadd.f32 %v10757_v60, %v19961_v31  ;;  %v19975_v60 = vld [vmem:[#allocation117_spill] sm:$0xff] }
 0xb69   : > { %v10759_v47 = vpop.f32.mrf.mxu1  ;;  %v6660_v36 = vadd.f32 %v19976_v35, %v19975_v60 }
 0xb6a   : > { %10982 = vst [vmem:[%s18319_s20 + $0x180] sm:$0xff] %v10918_v44  ;;  %v10919_v6 = vadd.f32 %v18310_v8, %v10843_v16  ;;  %v10844_v29 = vadd.f32 %v10759_v47, %v19963_v13 }
 0xb6b   : > { %v10761_v32 = vpop.f32.mrf.mxu1  ;;  %v8759_v16 = vadd.f32 %v18289_v17, %v6660_v36 }
 0xb6c   : > { %10983 = vst.msk [vmem:[%s18319_s20 + $0x188] sm:$0xff] %vm1195_vm0, %v10919_v6  ;;  %v10920_v37 = vadd.f32 %v18307_v14, %v10844_v29  ;;  %v10845_v48 = vadd.f32 %v10761_v32, %v8747_v20 }
 0xb6d   : > { %v10765_v52 = vpop.f32.mrf.mxu1 }
 0xb6e   : > { %10984 = vst [vmem:[%s18319_s20 + $0x190] sm:$0xff] %v10920_v37  ;;  %v10921_v4 = vadd.f32 %v18310_v8, %v10845_v48  ;;  %v10846_v26 = vadd.f32 %v10765_v52, %v19964_v18 }
 0xb6f   : > { %v10767_v38 = vpop.f32.mrf.mxu1 }
 0xb70   : > { %10985 = vst.msk [vmem:[%s18319_s20 + $0x198] sm:$0xff] %vm1195_vm0, %v10921_v4  ;;  %v10922_v33 = vadd.f32 %v18307_v14, %v10846_v26  ;;  %v10847_v5 = vadd.f32 %v10767_v38, %v19967_v56 }
 0xb71   : > { %v10769_v54 = vpop.f32.mrf.mxu1 }
 0xb72   : > { %10986 = vst [vmem:[%s18319_s20 + $0x1a0] sm:$0xff] %v10922_v33  ;;  %v10923_v46 = vadd.f32 %v18310_v8, %v10847_v5  ;;  %v10848_v10 = vadd.f32 %v10769_v54, %v19969_v9 }
 0xb73   : > { %v10771_v58 = vpop.f32.mrf.mxu1 }
 0xb74   : > { %10987 = vst.msk [vmem:[%s18319_s20 + $0x1a8] sm:$0xff] %vm1195_vm0, %v10923_v46  ;;  %v10924_v21 = vadd.f32 %v18307_v14, %v10848_v10  ;;  %v10849_v51 = vadd.f32 %v10771_v58, %v8751_v23 }
 0xb75   : > { %v10775_v27 = vpop.f32.mrf.mxu1 }
 0xb76   : > { %10988 = vst [vmem:[%s18319_s20 + $0x1b0] sm:$0xff] %v10924_v21  ;;  %v10925_v28 = vadd.f32 %v18310_v8, %v10849_v51  ;;  %v10850_v2 = vadd.f32 %v10775_v27, %v18266_v11 }
 0xb77   : > { %v10777_v30 = vpop.f32.mrf.mxu1 }
 0xb78   : > { %10989 = vst.msk [vmem:[%s18319_s20 + $0x1b8] sm:$0xff] %vm1195_vm0, %v10925_v28  ;;  %v10926_v42 = vadd.f32 %v18307_v14, %v10850_v2  ;;  %v10851_v49 = vadd.f32 %v10777_v30, %v19972_v57 }
 0xb79   : > { %v10779_v59 = vpop.f32.mrf.mxu1 }
 0xb7a   : > { %10990 = vst [vmem:[%s18319_s20 + $0x1c0] sm:$0xff] %v10926_v42  ;;  %v10927_v40 = vadd.f32 %v18310_v8, %v10851_v49  ;;  %v10852_v11 = vadd.f32 %v10779_v59, %v19974_v41 }
 0xb7b   : > { %v10781_v34 = vpop.f32.mrf.mxu1 }
 0xb7c   : > { %10991 = vst.msk [vmem:[%s18319_s20 + $0x1c8] sm:$0xff] %vm1195_vm0, %v10927_v40  ;;  %v10928_v45 = vadd.f32 %v18307_v14, %v10852_v11  ;;  %v10853_v61 = vadd.f32 %v10781_v34, %v8755_v12 }
 0xb7d   : > { %v10785_v55 = vpop.f32.mrf.mxu1 }
 0xb7e   : > { %10992 = vst [vmem:[%s18319_s20 + $0x1d0] sm:$0xff] %v10928_v45  ;;  %v10929_v25 = vadd.f32 %v18310_v8, %v10853_v61  ;;  %v10854_v19 = vadd.f32 %v10785_v55, %v18281_v3  ;;  %v19977_v3 = vld [vmem:[#allocation182_spill] sm:$0xff] }
 0xb7f   : > { %v10787_v15 = vpop.f32.mrf.mxu1 }
 0xb80   : > { %10993 = vst.msk [vmem:[%s18319_s20 + $0x1d8] sm:$0xff] %vm1195_vm0, %v10929_v25  ;;  %v10930_v53 = vadd.f32 %v18307_v14, %v10854_v19  ;;  %v10855_v44 = vadd.f32 %v10787_v15, %v18285_v63 }
 0xb81   : > { %v10789_v31 = vpop.f32.mrf.mxu1 }
 0xb82   : > { %10994 = vst [vmem:[%s18319_s20 + $0x1e0] sm:$0xff] %v10930_v53  ;;  %v10931_v47 = vadd.f32 %v18310_v8, %v10855_v44  ;;  %v10856_v22 = vadd.f32 %v10789_v31, %v19977_v3 }
 0xb83   : > { %v10791_v20 = vpop.f32.mrf.mxu1 }
 0xb84   : > { %10995 = vst.msk [vmem:[%s18319_s20 + $0x1e8] sm:$0xff] %vm1195_vm0, %v10931_v47  ;;  %v10932_v6 = vadd.f32 %v18307_v14, %v10856_v22  ;;  %v10857_v13 = vadd.f32 %v10791_v20, %v8759_v16 }
 0xb86   : > { %10996 = vst [vmem:[%s18319_s20 + $0x1f0] sm:$0xff] %v10932_v6  ;;  %v10933_v63 = vadd.f32 %v18310_v8, %v10857_v13 }
 0xb88   : > { %10997 = vst.msk [vmem:[%s18319_s20 + $0x1f8] sm:$0xff] %vm1195_vm0, %v10933_v63 }
 0xb89   : > { %13539 = shalt.err (!%p13536_p0)
}
 0xb8a   : > { %s13540_s28 = scalar_lea.hbm %s18572_s8, 8192  ;;  %s13544_s11 = scalar_lea.hbm %s18625_s4, 16384 }
 0xb8b   : > { %p13541_p5 = scmp.ne.s32.totalorder %s18572_s8, %s13540_s28  ;;  %p13545_p4 = scmp.lt.s32.totalorder %s18572_s8, %s18625_s4 }
 0xb8c   : > { %p13546_p6 = scmp.lt.s32.totalorder %s13544_s11, %s13540_s28 }
 0xb8d   : > { %p13542_p9 = pnand %p13541_p5, %p19978_p11 }
 0xb8e   : > { %p13547_p8 = por %p13546_p6, %p13545_p4 }
 0xb8f   : > { %p13543_p1 = pneg %p13542_p9 }
 0xb91   : > { %p13548_p3 = pnand %p13547_p8, %p13543_p1 }
 0xb93   : > { %13551 = shalt.err (!%p13548_p3)
}
 0xb94   : > { %s13606_s20 = smov 256   ;;  %s13607_s6 = smov 16  }
 0xb95   : > { %12588 = dma.vmem_to_hbm [thread:$0]  (%p19978_p11), %s18574_s25, 8192, %s18572_s8, %s10999_s19, %s13606_s20, %s13606_s20, %s13607_s6  }
 0xb96 PF: > { %s11028_s30 = sand.u32 1, %s13582_s15   ;;  %p19979_p7 = scmp.ne.s32.totalorder %s18861_s22, 0 }
 0xb97   : > { %p19980_p12 = scmp.ge.s32.totalorder %s13594_s18, 2  ;;  %s11029_s7 = scalar_lea.sflag [#allocation4], %s11028_s30 }
 0xb99   : > { %p12599_p10 = pnand %p19980_p12, %p19979_p7 }
 0xb9b   : > { %p12600_p2 = pneg %p12599_p10 }
 0xb9d   : > { %13577 = dma.done.wait (%p12600_p2), %s11029_s7, 8192  }
 0xb9e   : > { %13579 = vsyncadd (%p12600_p2), %s11029_s7, 4294959104  ;;  %p18_p13 = scmp.ge.s32.totalorder %s13687_s27, 4   ;;  %s19981_s15 = smov %s13586_s16 }
 0xb9f   : > { %s19982_s16 = smov %s13590_s17  ;;  %s19983_s17 = smov %s13704_s9 }
 0xba0   : > { %s19984_s18 = smov %s13687_s27  ;;  %20 = sbr.rel (!%p18_p13) target bundleno = 6 (0x6), region = 88 }
 0xba5   :  { %11034 = vsyncpa [#allocation3], 1 }
 0xba6   :  { %11036 = vsyncpa [#allocation3 + $0x1], 1 }
 0xba7   :  { %11037 = vsyncpa [#allocation6], 1 }
 0xba8   :  { %11038 = vsyncpa [#allocation4], 1 }
 0xba9   :  { %11040 = vsyncpa [#allocation4 + $0x1], 1 }

</bundles_post_ra>
